<compile_context>
chip_gen: v7x
topology: tpu7x:2x2x1
jax: 0.10.0
libtpu: 0.0.40
codegen_flags: <defaults>
</compile_context>

<pallas_src>
import functools

import jax
import jax.numpy as jnp
import numpy as np
from jax import lax
from jax.experimental import pallas as pl
from jax.experimental.pallas import tpu as pltpu


# ----------------------------- in-kernel helpers --------------------------- #

def _layer_norm(x, w, b, eps=1e-5):
    # x: (N, C) f32; w, b: (1, C) f32
    mu = jnp.mean(x, axis=-1, keepdims=True)
    var = jnp.mean((x - mu) ** 2, axis=-1, keepdims=True)
    return (x - mu) * lax.rsqrt(var + eps) * w + b


def _erf_poly(x):
    # Abramowitz & Stegun 7.1.26, |error| <= 1.5e-7.  Uses only exp + VALU ops
    # so it lowers on any Mosaic build (no dependence on an erf primitive).
    a1, a2, a3, a4, a5 = (0.254829592, -0.284496736, 1.421413741,
                          -1.453152027, 1.061405429)
    p = 0.3275911
    sign = jnp.where(x >= 0.0, 1.0, -1.0)
    ax = jnp.abs(x)
    t = 1.0 / (1.0 + p * ax)
    poly = ((((a5 * t + a4) * t + a3) * t + a2) * t + a1) * t
    return sign * (1.0 - poly * jnp.exp(-ax * ax))


def _gelu(x, approximate):
    if approximate:
        return jax.nn.gelu(x, approximate=True)        # tanh form (EUP)
    return 0.5 * x * (1.0 + _erf_poly(x * 0.7071067811865476))  # exact nn.GELU


# ----------------------------- kernel -------------------------------------- #

def transformer_kernel(
    x_ref,                       # (1, N, C)  input tokens
    ln1w_ref, ln1b_ref,          # (1, C)
    wq_ref, wk_ref, wv_ref,      # (C, C); 1/sqrt(head_dim) folded into wq
    projw_ref, projb_ref,        # (C, C), (1, C)
    ln2w_ref, ln2b_ref,          # (1, C)
    fc1w_ref, fc1b_ref,          # (C, Dh), (1, Dh)
    fc2w_ref, fc2b_ref,          # (Dh, C), (1, C)
    out_ref,                     # (1, N, C)
    *, num_heads: int, matmul_dtype, approx_recip: bool, approx_gelu: bool,
    mlp_chunk: int,
):
    x = x_ref[0].astype(jnp.float32)                    # (N, C) residual, f32
    N, C = x.shape
    hd = C // num_heads

    # ---------------- attention branch ----------------
    h = _layer_norm(x, ln1w_ref[...], ln1b_ref[...])
    hm = h.astype(matmul_dtype)

    # Lane-dense full-C projections; outputs stay in the matmul dtype
    # (MXU accumulates in f32 internally).
    q = jnp.dot(hm, wq_ref[...], preferred_element_type=matmul_dtype)   # (N, C)
    k = jnp.dot(hm, wk_ref[...], preferred_element_type=matmul_dtype)   # (N, C)
    v = jnp.dot(hm, wv_ref[...], preferred_element_type=matmul_dtype)   # (N, C)

    qh = q.reshape(N, num_heads, hd)
    kh = k.reshape(N, num_heads, hd)
    vh = v.reshape(N, num_heads, hd)

    # scores: per-head (nh, N, N), f32 accumulation (scale already in wq)
    s = jnp.einsum('qhd,khd->hqk', qh, kh, preferred_element_type=jnp.float32)

    # hand-rolled softmax over keys, f32
    s_max = jnp.max(s, axis=-1, keepdims=True)
    p = jnp.exp(s - s_max)
    denom = jnp.sum(p, axis=-1, keepdims=True)
    if approx_recip:
        p = p * pl.reciprocal(denom, approx=True)        # EUP slot
    else:
        p = p / denom                                    # exact path

    # PV -> (N, nh, hd), merged head-major to (N, C) (matches torch reshape)
    o = jnp.einsum('hqk,khd->qhd', p.astype(matmul_dtype), vh,
                   preferred_element_type=matmul_dtype)
    om = o.reshape(N, C)

    # single full-C projection matmul + residual 1
    y = jnp.dot(om, projw_ref[...], preferred_element_type=jnp.float32)
    x = x + y + projb_ref[...]

    # ---------------- MLP branch ----------------
    h2 = _layer_norm(x, ln2w_ref[...], ln2b_ref[...])
    h2m = h2.astype(matmul_dtype)
    Dh = fc1w_ref.shape[1]

    a2 = jnp.zeros((N, C), jnp.float32)
    for j in range(Dh // mlp_chunk):                     # static chunk loop
        lo = j * mlp_chunk
        a1 = jnp.dot(h2m, fc1w_ref[:, lo:lo + mlp_chunk],
                     preferred_element_type=jnp.float32)
        a1 = a1 + fc1b_ref[:, lo:lo + mlp_chunk]
        a1 = _gelu(a1, approx_gelu)
        a2 = a2 + jnp.dot(a1.astype(matmul_dtype), fc2w_ref[lo:lo + mlp_chunk, :],
                          preferred_element_type=jnp.float32)

    out_ref[0] = (x + a2 + fc2b_ref[...]).astype(out_ref.dtype)   # residual 2


# ----------------------------- param prep ---------------------------------- #

def prepare_params(params, *, num_heads, matmul_dtype=jnp.bfloat16):
    """One-time host-side weight transform: split qkv into wq/wk/wv (columns are
    already head-major in the PyTorch layout), fold the attention scale into
    wq, cast matmul weights to `matmul_dtype`; LN params / biases stay f32."""
    C, C3 = params["qkv_w"].shape
    assert C3 == 3 * C and C % num_heads == 0
    hd = C // num_heads
    scale = hd ** -0.5

    row = lambda v: jnp.asarray(v, jnp.float32).reshape(1, -1)
    qkv_w = jnp.asarray(params["qkv_w"], jnp.float32)

    return dict(
        ln1_w=row(params["ln1_w"]), ln1_b=row(params["ln1_b"]),
        wq=(qkv_w[:, 0:C] * scale).astype(matmul_dtype),
        wk=qkv_w[:, C:2 * C].astype(matmul_dtype),
        wv=qkv_w[:, 2 * C:3 * C].astype(matmul_dtype),
        proj_w=jnp.asarray(params["proj_w"]).astype(matmul_dtype),
        proj_b=row(params["proj_b"]),
        ln2_w=row(params["ln2_w"]), ln2_b=row(params["ln2_b"]),
        fc1_w=jnp.asarray(params["fc1_w"]).astype(matmul_dtype),
        fc1_b=row(params["fc1_b"]),
        fc2_w=jnp.asarray(params["fc2_w"]).astype(matmul_dtype),
        fc2_b=row(params["fc2_b"]),
    )


# ----------------------------- wrapper ------------------------------------- #

def _vmem_limit_bytes(N, C, Dh, num_heads, mm_bytes, mlp_chunk, buf):
    weights = (4 * C * C + 2 * C * Dh) * mm_bytes * buf
    small = (6 * C + Dh) * 4 * buf
    io = 2 * 2 * N * C * 4                          # x/out blocks, double-buffered
    inter = (2 * num_heads * N * N * 4              # scores + softmax (f32)
             + 4 * N * C * mm_bytes                 # q, k, v, merged o
             + 2 * N * mlp_chunk * 4                # fc1 activation chunk
             + 6 * N * C * 4)                       # x, h, proj-out, h2, a2, slack
    est = weights + small + io + inter
    # Headroom; cap at 100 MiB (TODO(synk): cap near 56 MiB on v7x once the
    # query/MLP grid tiling lands for real VOLO widths).
    return int(min(max(int(1.5 * est) + (4 << 20), 32 << 20), 100 << 20))


def transformer_block(x, prep, *, num_heads, approx_recip=True, approx_gelu=False):
    """x: (B, H, W, C) float32.  prep: output of prepare_params.  Returns (B,H,W,C)."""
    B, H, W, C = x.shape
    N = H * W
    Dh = prep["fc1_w"].shape[1]
    matmul_dtype = prep["fc1_w"].dtype
    mm_bytes = prep["fc1_w"].dtype.itemsize
    mlp_chunk = 512 if (Dh > 512 and Dh % 512 == 0) else Dh

    x_flat = x.reshape(B, N, C)

    kernel = functools.partial(
        transformer_kernel,
        num_heads=num_heads,
        matmul_dtype=matmul_dtype,
        approx_recip=approx_recip,
        approx_gelu=approx_gelu,
        mlp_chunk=mlp_chunk,
    )

    def run(single_buffer_weights):
        buf = 1 if single_buffer_weights else 2
        vmem_limit = _vmem_limit_bytes(N, C, Dh, num_heads, mm_bytes, mlp_chunk, buf)

        def const_spec(shape):
            idx = lambda b, _s=shape: (0,) * len(_s)
            if single_buffer_weights:
                return pl.BlockSpec(shape, idx, pipeline_mode=pl.Buffered(1))
            return pl.BlockSpec(shape, idx)

        return pl.pallas_call(
            kernel,
            out_shape=jax.ShapeDtypeStruct((B, N, C), x.dtype),
            grid=(B,),
            in_specs=[
                pl.BlockSpec((1, N, C), lambda b: (b, 0, 0)),          # x
                const_spec((1, C)), const_spec((1, C)),                # ln1 w, b
                const_spec((C, C)),                                    # wq (scaled)
                const_spec((C, C)),                                    # wk
                const_spec((C, C)),                                    # wv
                const_spec((C, C)), const_spec((1, C)),                # proj w, b
                const_spec((1, C)), const_spec((1, C)),                # ln2 w, b
                const_spec((C, Dh)), const_spec((1, Dh)),              # fc1 w, b
                const_spec((Dh, C)), const_spec((1, C)),               # fc2 w, b
            ],
            out_specs=pl.BlockSpec((1, N, C), lambda b: (b, 0, 0)),
            compiler_params=pltpu.CompilerParams(
                dimension_semantics=("parallel",),
                vmem_limit_bytes=vmem_limit),
        )(
            x_flat,
            prep["ln1_w"], prep["ln1_b"],
            prep["wq"], prep["wk"], prep["wv"],
            prep["proj_w"], prep["proj_b"],
            prep["ln2_w"], prep["ln2_b"],
            prep["fc1_w"], prep["fc1_b"],
            prep["fc2_w"], prep["fc2_b"],
        )

    try:
        out = run(True)
    except Exception:
        # pl.Buffered(1) single-buffering not supported on this jax build:
        # fall back to default double-buffered constant weight blocks.
        out = run(False)
    return out.reshape(B, H, W, C)


# ----------------------------- reference ----------------------------------- #

def transformer_ref(x, params, *, num_heads):
    """Pure-JAX (f32) reference mirroring the PyTorch forward exactly."""
    B, H, W, C = x.shape
    N = H * W
    hd = C // num_heads
    scale = hd ** -0.5

    def ln(v, w, b):
        mu = v.mean(-1, keepdims=True)
        var = ((v - mu) ** 2).mean(-1, keepdims=True)
        return (v - mu) / jnp.sqrt(var + 1e-5) * w + b

    xf = x.reshape(B, N, C)
    h = ln(xf, params["ln1_w"], params["ln1_b"])
    qkv = h @ params["qkv_w"]                                   # (B, N, 3C)
    qkv = qkv.reshape(B, N, 3, num_heads, hd).transpose(2, 0, 3, 1, 4)
    q, k, v = qkv[0], qkv[1], qkv[2]                            # (B, nh, N, hd)
    att = jax.nn.softmax((q * scale) @ jnp.swapaxes(k, -2, -1), axis=-1)
    a = (att @ v).transpose(0, 2, 1, 3).reshape(B, N, C)
    a = a @ params["proj_w"] + params["proj_b"]
    xf = xf + a
    h2 = ln(xf, params["ln2_w"], params["ln2_b"])
    h2 = jax.nn.gelu(h2 @ params["fc1_w"] + params["fc1_b"], approximate=False)
    h2 = h2 @ params["fc2_w"] + params["fc2_b"]
    xf = xf + h2
    return xf.reshape(B, H, W, C)


# ----------------------------- main ----------------------------------------- #

if __name__ == "__main__":
    # Small VOLO-like shapes: dim=32, heads=8 (head_dim=4), mlp_ratio=4.
    B, H, W, C = 2, 8, 8, 32
    num_heads = 8
    Dh = int(C * 4.0)

    key = jax.random.PRNGKey(0)
    ks = jax.random.split(key, 8)

    # Deterministic synthetic parameters (nn.Linear weights stored as (in, out)).
    params = {
        "ln1_w": jnp.ones((C,), jnp.float32),
        "ln1_b": jnp.zeros((C,), jnp.float32),
        "qkv_w": jax.random.normal(ks[0], (C, 3 * C), jnp.float32) * 0.05,
        "proj_w": jax.random.normal(ks[1], (C, C), jnp.float32) * 0.05,
        "proj_b": jax.random.normal(ks[2], (C,), jnp.float32) * 0.01,
        "ln2_w": jnp.ones((C,), jnp.float32),
        "ln2_b": jnp.zeros((C,), jnp.float32),
        "fc1_w": jax.random.normal(ks[3], (C, Dh), jnp.float32) * 0.05,
        "fc1_b": jax.random.normal(ks[4], (Dh,), jnp.float32) * 0.01,
        "fc2_w": jax.random.normal(ks[5], (Dh, C), jnp.float32) * 0.05,
        "fc2_b": jax.random.normal(ks[6], (C,), jnp.float32) * 0.01,
    }
    x = jax.random.normal(ks[7], (B, H, W, C), jnp.float32)

    ref = transformer_ref(x, params, num_heads=num_heads)

    # 1) f32-matmul / exact-softmax / exact-GELU variant: tight check vs reference.
    prep_f32 = prepare_params(params, num_heads=num_heads, matmul_dtype=jnp.float32)
    out_f32 = jax.block_until_ready(
        transformer_block(x, prep_f32, num_heads=num_heads,
                          approx_recip=False, approx_gelu=False))
    np.testing.assert_allclose(np.asarray(out_f32), np.asarray(ref),
                               rtol=1e-4, atol=1e-4)

    # 2) bf16-MXU variant (f32 accumulation, EUP approx reciprocal in softmax):
    #    loosened tolerance accounts for bf16 matmul inputs/outputs.
    prep_bf16 = prepare_params(params, num_heads=num_heads, matmul_dtype=jnp.bfloat16)
    out_bf16 = jax.block_until_ready(
        transformer_block(x, prep_bf16, num_heads=num_heads,
                          approx_recip=True, approx_gelu=False))
    np.testing.assert_allclose(np.asarray(out_bf16), np.asarray(ref),
                               rtol=2e-2, atol=2e-2)

    print("KERNEL_OK")
</pallas_src>

<mosaic_0001>
module attributes {stable_mosaic.version = 11 : i64} {
  func.func @transformer_kernel(%arg0: i32, %arg1: memref<1x64x32xf32, #tpu.memory_space<vmem>>, %arg2: memref<1x32xf32, #tpu.memory_space<vmem>>, %arg3: memref<1x32xf32, #tpu.memory_space<vmem>>, %arg4: memref<32x32xf32, #tpu.memory_space<vmem>>, %arg5: memref<32x32xf32, #tpu.memory_space<vmem>>, %arg6: memref<32x32xf32, #tpu.memory_space<vmem>>, %arg7: memref<32x32xf32, #tpu.memory_space<vmem>>, %arg8: memref<1x32xf32, #tpu.memory_space<vmem>>, %arg9: memref<1x32xf32, #tpu.memory_space<vmem>>, %arg10: memref<1x32xf32, #tpu.memory_space<vmem>>, %arg11: memref<32x128xf32, #tpu.memory_space<vmem>>, %arg12: memref<1x128xf32, #tpu.memory_space<vmem>>, %arg13: memref<128x32xf32, #tpu.memory_space<vmem>>, %arg14: memref<1x32xf32, #tpu.memory_space<vmem>>, %arg15: memref<1x64x32xf32, #tpu.memory_space<vmem>>) attributes {dimension_semantics = [#tpu.dimension_semantics<parallel>], iteration_bounds = array<i64: 2>, scalar_prefetch = 0 : i64, scratch_operands = 0 : i64, tpu.core_type = #tpu.core_type<tc>, window_params = [{transform_indices = @transform_0, window_bounds = array<i64: 1, 64, 32>}, {pipeline_mode = #tpu.pipeline_mode<synchronous>, transform_indices = @transform_1, window_bounds = array<i64: 1, 32>}, {pipeline_mode = #tpu.pipeline_mode<synchronous>, transform_indices = @transform_2, window_bounds = array<i64: 1, 32>}, {pipeline_mode = #tpu.pipeline_mode<synchronous>, transform_indices = @transform_3, window_bounds = array<i64: 32, 32>}, {pipeline_mode = #tpu.pipeline_mode<synchronous>, transform_indices = @transform_4, window_bounds = array<i64: 32, 32>}, {pipeline_mode = #tpu.pipeline_mode<synchronous>, transform_indices = @transform_5, window_bounds = array<i64: 32, 32>}, {pipeline_mode = #tpu.pipeline_mode<synchronous>, transform_indices = @transform_6, window_bounds = array<i64: 32, 32>}, {pipeline_mode = #tpu.pipeline_mode<synchronous>, transform_indices = @transform_7, window_bounds = array<i64: 1, 32>}, {pipeline_mode = #tpu.pipeline_mode<synchronous>, transform_indices = @transform_8, window_bounds = array<i64: 1, 32>}, {pipeline_mode = #tpu.pipeline_mode<synchronous>, transform_indices = @transform_9, window_bounds = array<i64: 1, 32>}, {pipeline_mode = #tpu.pipeline_mode<synchronous>, transform_indices = @transform_10, window_bounds = array<i64: 32, 128>}, {pipeline_mode = #tpu.pipeline_mode<synchronous>, transform_indices = @transform_11, window_bounds = array<i64: 1, 128>}, {pipeline_mode = #tpu.pipeline_mode<synchronous>, transform_indices = @transform_12, window_bounds = array<i64: 128, 32>}, {pipeline_mode = #tpu.pipeline_mode<synchronous>, transform_indices = @transform_13, window_bounds = array<i64: 1, 32>}, {transform_indices = @transform_14, window_bounds = array<i64: 1, 64, 32>}]} {
    %c0 = arith.constant 0 : index
    %c0_0 = arith.constant 0 : index
    %c0_1 = arith.constant 0 : index
    %0 = vector.load %arg1[%c0, %c0_0, %c0_1] : memref<1x64x32xf32, #tpu.memory_space<vmem>>, vector<1x64x32xf32>
    %1 = vector.shape_cast %0 : vector<1x64x32xf32> to vector<64x32xf32>
    %c0_2 = arith.constant 0 : index
    %c0_3 = arith.constant 0 : index
    %2 = vector.load %arg2[%c0_2, %c0_3] : memref<1x32xf32, #tpu.memory_space<vmem>>, vector<1x32xf32>
    %c0_4 = arith.constant 0 : index
    %c0_5 = arith.constant 0 : index
    %3 = vector.load %arg3[%c0_4, %c0_5] : memref<1x32xf32, #tpu.memory_space<vmem>>, vector<1x32xf32>
    %cst = arith.constant dense<0.000000e+00> : vector<64xf32>
    %4 = vector.multi_reduction <add>, %1, %cst [1] : vector<64x32xf32> to vector<64xf32>
    %5 = vector.shape_cast %4 : vector<64xf32> to vector<64x1xf32>
    %cst_6 = arith.constant 3.200000e+01 : f32
    %6 = vector.broadcast %cst_6 : f32 to vector<64x1xf32>
    %7 = arith.divf %5, %6 : vector<64x1xf32>
    %8 = vector.broadcast %7 : vector<64x1xf32> to vector<64x32xf32>
    %9 = arith.subf %1, %8 : vector<64x32xf32>
    %10 = arith.mulf %9, %9 : vector<64x32xf32>
    %cst_7 = arith.constant dense<0.000000e+00> : vector<64xf32>
    %11 = vector.multi_reduction <add>, %10, %cst_7 [1] : vector<64x32xf32> to vector<64xf32>
    %12 = vector.shape_cast %11 : vector<64xf32> to vector<64x1xf32>
    %cst_8 = arith.constant 3.200000e+01 : f32
    %13 = vector.broadcast %cst_8 : f32 to vector<64x1xf32>
    %14 = arith.divf %12, %13 : vector<64x1xf32>
    %15 = vector.broadcast %7 : vector<64x1xf32> to vector<64x32xf32>
    %16 = arith.subf %1, %15 : vector<64x32xf32>
    %cst_9 = arith.constant 9.99999974E-6 : f32
    %17 = vector.broadcast %cst_9 : f32 to vector<64x1xf32>
    %18 = arith.addf %14, %17 : vector<64x1xf32>
    %19 = math.rsqrt %18 : vector<64x1xf32>
    %20 = vector.broadcast %19 : vector<64x1xf32> to vector<64x32xf32>
    %21 = arith.mulf %16, %20 : vector<64x32xf32>
    %22 = vector.broadcast %2 : vector<1x32xf32> to vector<64x32xf32>
    %23 = arith.mulf %21, %22 : vector<64x32xf32>
    %24 = vector.broadcast %3 : vector<1x32xf32> to vector<64x32xf32>
    %25 = arith.addf %23, %24 : vector<64x32xf32>
    %c0_10 = arith.constant 0 : index
    %c0_11 = arith.constant 0 : index
    %26 = vector.load %arg4[%c0_10, %c0_11] : memref<32x32xf32, #tpu.memory_space<vmem>>, vector<32x32xf32>
    %cst_12 = arith.constant dense<0.000000e+00> : vector<64x32xf32>
    %27 = tpu.matmul %25, %26, %cst_12 {dimension_numbers = #tpu.dot_dimension_numbers<[1], [0], [0], [1], [0, 0, 1, 1], [], []>} : vector<64x32xf32>, vector<32x32xf32>, vector<64x32xf32> -> vector<64x32xf32>
    %c0_13 = arith.constant 0 : index
    %c0_14 = arith.constant 0 : index
    %28 = vector.load %arg5[%c0_13, %c0_14] : memref<32x32xf32, #tpu.memory_space<vmem>>, vector<32x32xf32>
    %cst_15 = arith.constant dense<0.000000e+00> : vector<64x32xf32>
    %29 = tpu.matmul %25, %28, %cst_15 {dimension_numbers = #tpu.dot_dimension_numbers<[1], [0], [0], [1], [0, 0, 1, 1], [], []>} : vector<64x32xf32>, vector<32x32xf32>, vector<64x32xf32> -> vector<64x32xf32>
    %c0_16 = arith.constant 0 : index
    %c0_17 = arith.constant 0 : index
    %30 = vector.load %arg6[%c0_16, %c0_17] : memref<32x32xf32, #tpu.memory_space<vmem>>, vector<32x32xf32>
    %cst_18 = arith.constant dense<0.000000e+00> : vector<64x32xf32>
    %31 = tpu.matmul %25, %30, %cst_18 {dimension_numbers = #tpu.dot_dimension_numbers<[1], [0], [0], [1], [0, 0, 1, 1], [], []>} : vector<64x32xf32>, vector<32x32xf32>, vector<64x32xf32> -> vector<64x32xf32>
    %32 = vector.shape_cast %27 : vector<64x32xf32> to vector<64x8x4xf32>
    %33 = vector.shape_cast %29 : vector<64x32xf32> to vector<64x8x4xf32>
    %34 = vector.shape_cast %31 : vector<64x32xf32> to vector<64x8x4xf32>
    "tpu.trace_start"() <{level = 10 : i32, message = "qhd,khd->hqk"}> : () -> ()
    %cst_19 = arith.constant dense<0.000000e+00> : vector<8x64x64xf32>
    %35 = tpu.matmul %32, %33, %cst_19 {dimension_numbers = #tpu.dot_dimension_numbers<[2], [2], [0], [0], [0, 1, 0, 0, 1, 0], [1], [1]>} : vector<64x8x4xf32>, vector<64x8x4xf32>, vector<8x64x64xf32> -> vector<8x64x64xf32>
    "tpu.trace_stop"() : () -> ()
    %cst_20 = arith.constant dense<0xFF800000> : vector<8x64xf32>
    %36 = vector.multi_reduction <maximumf>, %35, %cst_20 [2] : vector<8x64x64xf32> to vector<8x64xf32>
    %37 = vector.shape_cast %36 : vector<8x64xf32> to vector<8x64x1xf32>
    %38 = vector.broadcast %37 : vector<8x64x1xf32> to vector<8x64x64xf32>
    %39 = arith.subf %35, %38 : vector<8x64x64xf32>
    %40 = math.exp %39 : vector<8x64x64xf32>
    %cst_21 = arith.constant dense<0.000000e+00> : vector<8x64xf32>
    %41 = vector.multi_reduction <add>, %40, %cst_21 [2] : vector<8x64x64xf32> to vector<8x64xf32>
    %42 = vector.shape_cast %41 : vector<8x64xf32> to vector<8x64x1xf32>
    %43 = vector.broadcast %42 : vector<8x64x1xf32> to vector<8x64x64xf32>
    %44 = arith.divf %40, %43 : vector<8x64x64xf32>
    "tpu.trace_start"() <{level = 10 : i32, message = "hqk,khd->qhd"}> : () -> ()
    %cst_22 = arith.constant dense<0.000000e+00> : vector<8x4x64xf32>
    %45 = tpu.matmul %34, %44, %cst_22 {dimension_numbers = #tpu.dot_dimension_numbers<[0], [2], [2], [1], [0, 1, 0, 2, 1, 1], [1], [0]>} : vector<64x8x4xf32>, vector<8x64x64xf32>, vector<8x4x64xf32> -> vector<8x4x64xf32>
    %46 = tpu.transpose %45, [2, 0, 1] : vector<8x4x64xf32> -> vector<64x8x4xf32>
    "tpu.trace_stop"() : () -> ()
    %47 = vector.shape_cast %46 : vector<64x8x4xf32> to vector<64x32xf32>
    %c0_23 = arith.constant 0 : index
    %c0_24 = arith.constant 0 : index
    %48 = vector.load %arg7[%c0_23, %c0_24] : memref<32x32xf32, #tpu.memory_space<vmem>>, vector<32x32xf32>
    %cst_25 = arith.constant dense<0.000000e+00> : vector<64x32xf32>
    %49 = tpu.matmul %47, %48, %cst_25 {dimension_numbers = #tpu.dot_dimension_numbers<[1], [0], [0], [1], [0, 0, 1, 1], [], []>} : vector<64x32xf32>, vector<32x32xf32>, vector<64x32xf32> -> vector<64x32xf32>
    %50 = arith.addf %1, %49 : vector<64x32xf32>
    %c0_26 = arith.constant 0 : index
    %c0_27 = arith.constant 0 : index
    %51 = vector.load %arg8[%c0_26, %c0_27] : memref<1x32xf32, #tpu.memory_space<vmem>>, vector<1x32xf32>
    %52 = vector.broadcast %51 : vector<1x32xf32> to vector<64x32xf32>
    %53 = arith.addf %50, %52 : vector<64x32xf32>
    %c0_28 = arith.constant 0 : index
    %c0_29 = arith.constant 0 : index
    %54 = vector.load %arg9[%c0_28, %c0_29] : memref<1x32xf32, #tpu.memory_space<vmem>>, vector<1x32xf32>
    %c0_30 = arith.constant 0 : index
    %c0_31 = arith.constant 0 : index
    %55 = vector.load %arg10[%c0_30, %c0_31] : memref<1x32xf32, #tpu.memory_space<vmem>>, vector<1x32xf32>
    %cst_32 = arith.constant dense<0.000000e+00> : vector<64xf32>
    %56 = vector.multi_reduction <add>, %53, %cst_32 [1] : vector<64x32xf32> to vector<64xf32>
    %57 = vector.shape_cast %56 : vector<64xf32> to vector<64x1xf32>
    %cst_33 = arith.constant 3.200000e+01 : f32
    %58 = vector.broadcast %cst_33 : f32 to vector<64x1xf32>
    %59 = arith.divf %57, %58 : vector<64x1xf32>
    %60 = vector.broadcast %59 : vector<64x1xf32> to vector<64x32xf32>
    %61 = arith.subf %53, %60 : vector<64x32xf32>
    %62 = arith.mulf %61, %61 : vector<64x32xf32>
    %cst_34 = arith.constant dense<0.000000e+00> : vector<64xf32>
    %63 = vector.multi_reduction <add>, %62, %cst_34 [1] : vector<64x32xf32> to vector<64xf32>
    %64 = vector.shape_cast %63 : vector<64xf32> to vector<64x1xf32>
    %cst_35 = arith.constant 3.200000e+01 : f32
    %65 = vector.broadcast %cst_35 : f32 to vector<64x1xf32>
    %66 = arith.divf %64, %65 : vector<64x1xf32>
    %67 = vector.broadcast %59 : vector<64x1xf32> to vector<64x32xf32>
    %68 = arith.subf %53, %67 : vector<64x32xf32>
    %cst_36 = arith.constant 9.99999974E-6 : f32
    %69 = vector.broadcast %cst_36 : f32 to vector<64x1xf32>
    %70 = arith.addf %66, %69 : vector<64x1xf32>
    %71 = math.rsqrt %70 : vector<64x1xf32>
    %72 = vector.broadcast %71 : vector<64x1xf32> to vector<64x32xf32>
    %73 = arith.mulf %68, %72 : vector<64x32xf32>
    %74 = vector.broadcast %54 : vector<1x32xf32> to vector<64x32xf32>
    %75 = arith.mulf %73, %74 : vector<64x32xf32>
    %76 = vector.broadcast %55 : vector<1x32xf32> to vector<64x32xf32>
    %77 = arith.addf %75, %76 : vector<64x32xf32>
    %cst_37 = arith.constant 0.000000e+00 : f32
    %78 = vector.broadcast %cst_37 : f32 to vector<64x32xf32>
    %c0_38 = arith.constant 0 : index
    %c0_39 = arith.constant 0 : index
    %79 = vector.load %arg11[%c0_38, %c0_39] : memref<32x128xf32, #tpu.memory_space<vmem>>, vector<32x128xf32>
    %cst_40 = arith.constant dense<0.000000e+00> : vector<64x128xf32>
    %80 = tpu.matmul %77, %79, %cst_40 {dimension_numbers = #tpu.dot_dimension_numbers<[1], [0], [0], [1], [0, 0, 1, 1], [], []>} : vector<64x32xf32>, vector<32x128xf32>, vector<64x128xf32> -> vector<64x128xf32>
    %c0_41 = arith.constant 0 : index
    %c0_42 = arith.constant 0 : index
    %81 = vector.load %arg12[%c0_41, %c0_42] : memref<1x128xf32, #tpu.memory_space<vmem>>, vector<1x128xf32>
    %82 = vector.broadcast %81 : vector<1x128xf32> to vector<64x128xf32>
    %83 = arith.addf %80, %82 : vector<64x128xf32>
    %cst_43 = arith.constant 5.000000e-01 : f32
    %84 = vector.broadcast %cst_43 : f32 to vector<64x128xf32>
    %85 = arith.mulf %84, %83 : vector<64x128xf32>
    %cst_44 = arith.constant 0.707106769 : f32
    %86 = vector.broadcast %cst_44 : f32 to vector<64x128xf32>
    %87 = arith.mulf %83, %86 : vector<64x128xf32>
    %cst_45 = arith.constant 0.000000e+00 : f32
    %88 = vector.broadcast %cst_45 : f32 to vector<64x128xf32>
    %89 = arith.cmpf oge, %87, %88 : vector<64x128xf32>
    %cst_46 = arith.constant 1.000000e+00 : f32
    %cst_47 = arith.constant -1.000000e+00 : f32
    %90 = vector.broadcast %cst_46 : f32 to vector<64x128xf32>
    %91 = vector.broadcast %cst_47 : f32 to vector<64x128xf32>
    %92 = arith.select %89, %90, %91 : vector<64x128xi1>, vector<64x128xf32>
    %93 = math.absf %87 : vector<64x128xf32>
    %cst_48 = arith.constant 0.327591091 : f32
    %94 = vector.broadcast %cst_48 : f32 to vector<64x128xf32>
    %95 = arith.mulf %94, %93 : vector<64x128xf32>
    %cst_49 = arith.constant 1.000000e+00 : f32
    %96 = vector.broadcast %cst_49 : f32 to vector<64x128xf32>
    %97 = arith.addf %96, %95 : vector<64x128xf32>
    %cst_50 = arith.constant 1.000000e+00 : f32
    %98 = vector.broadcast %cst_50 : f32 to vector<64x128xf32>
    %99 = arith.divf %98, %97 : vector<64x128xf32>
    %cst_51 = arith.constant 1.06140542 : f32
    %100 = vector.broadcast %cst_51 : f32 to vector<64x128xf32>
    %101 = arith.mulf %100, %99 : vector<64x128xf32>
    %cst_52 = arith.constant -1.45315206 : f32
    %102 = vector.broadcast %cst_52 : f32 to vector<64x128xf32>
    %103 = arith.addf %101, %102 : vector<64x128xf32>
    %104 = arith.mulf %103, %99 : vector<64x128xf32>
    %cst_53 = arith.constant 1.42141378 : f32
    %105 = vector.broadcast %cst_53 : f32 to vector<64x128xf32>
    %106 = arith.addf %104, %105 : vector<64x128xf32>
    %107 = arith.mulf %106, %99 : vector<64x128xf32>
    %cst_54 = arith.constant -0.284496725 : f32
    %108 = vector.broadcast %cst_54 : f32 to vector<64x128xf32>
    %109 = arith.addf %107, %108 : vector<64x128xf32>
    %110 = arith.mulf %109, %99 : vector<64x128xf32>
    %cst_55 = arith.constant 0.254829586 : f32
    %111 = vector.broadcast %cst_55 : f32 to vector<64x128xf32>
    %112 = arith.addf %110, %111 : vector<64x128xf32>
    %113 = arith.mulf %112, %99 : vector<64x128xf32>
    %cst_56 = arith.constant 0.000000e+00 : f32
    %114 = vector.broadcast %cst_56 : f32 to vector<64x128xf32>
    %115 = arith.subf %114, %93 : vector<64x128xf32>
    %116 = arith.mulf %115, %93 : vector<64x128xf32>
    %117 = math.exp %116 : vector<64x128xf32>
    %118 = arith.mulf %113, %117 : vector<64x128xf32>
    %cst_57 = arith.constant 1.000000e+00 : f32
    %119 = vector.broadcast %cst_57 : f32 to vector<64x128xf32>
    %120 = arith.subf %119, %118 : vector<64x128xf32>
    %121 = arith.mulf %92, %120 : vector<64x128xf32>
    %cst_58 = arith.constant 1.000000e+00 : f32
    %122 = vector.broadcast %cst_58 : f32 to vector<64x128xf32>
    %123 = arith.addf %122, %121 : vector<64x128xf32>
    %124 = arith.mulf %85, %123 : vector<64x128xf32>
    %c0_59 = arith.constant 0 : index
    %c0_60 = arith.constant 0 : index
    %125 = vector.load %arg13[%c0_59, %c0_60] : memref<128x32xf32, #tpu.memory_space<vmem>>, vector<128x32xf32>
    %cst_61 = arith.constant dense<0.000000e+00> : vector<64x32xf32>
    %126 = tpu.matmul %124, %125, %cst_61 {dimension_numbers = #tpu.dot_dimension_numbers<[1], [0], [0], [1], [0, 0, 1, 1], [], []>} : vector<64x128xf32>, vector<128x32xf32>, vector<64x32xf32> -> vector<64x32xf32>
    %127 = arith.addf %78, %126 : vector<64x32xf32>
    %128 = arith.addf %53, %127 : vector<64x32xf32>
    %c0_62 = arith.constant 0 : index
    %c0_63 = arith.constant 0 : index
    %129 = vector.load %arg14[%c0_62, %c0_63] : memref<1x32xf32, #tpu.memory_space<vmem>>, vector<1x32xf32>
    %130 = vector.broadcast %129 : vector<1x32xf32> to vector<64x32xf32>
    %131 = arith.addf %128, %130 : vector<64x32xf32>
    %c0_64 = arith.constant 0 : index
    %c0_65 = arith.constant 0 : index
    %c0_66 = arith.constant 0 : index
    %132 = vector.load %arg15[%c0_64, %c0_65, %c0_66] : memref<1x64x32xf32, #tpu.memory_space<vmem>>, vector<1x64x32xf32>
    %133 = vector.shape_cast %132 : vector<1x64x32xf32> to vector<64x32xf32>
    %134 = vector.shape_cast %131 : vector<64x32xf32> to vector<1x64x32xf32>
    tpu.vector_store %arg15[%c0_64, %c0_65, %c0_66], %134 {strides = array<i32>} : memref<1x64x32xf32, #tpu.memory_space<vmem>>, vector<1x64x32xf32>,
    return
  }
  func.func @transform_0(%arg0: i32) -> (i32, i32, i32) {
    %c0_i32 = arith.constant 0 : i32
    %c0_i32_0 = arith.constant 0 : i32
    %c0_i32_1 = arith.constant 0 : i32
    return %arg0, %c0_i32, %c0_i32_0 : i32, i32, i32
  }
  func.func @transform_1(%arg0: i32) -> (i32, i32) {
    %c0_i32 = arith.constant 0 : i32
    %c0_i32_0 = arith.constant 0 : i32
    %c0_i32_1 = arith.constant 0 : i32
    return %c0_i32, %c0_i32_0 : i32, i32
  }
  func.func @transform_2(%arg0: i32) -> (i32, i32) {
    %c0_i32 = arith.constant 0 : i32
    %c0_i32_0 = arith.constant 0 : i32
    %c0_i32_1 = arith.constant 0 : i32
    return %c0_i32, %c0_i32_0 : i32, i32
  }
  func.func @transform_3(%arg0: i32) -> (i32, i32) {
    %c0_i32 = arith.constant 0 : i32
    %c0_i32_0 = arith.constant 0 : i32
    %c0_i32_1 = arith.constant 0 : i32
    return %c0_i32, %c0_i32_0 : i32, i32
  }
  func.func @transform_4(%arg0: i32) -> (i32, i32) {
    %c0_i32 = arith.constant 0 : i32
    %c0_i32_0 = arith.constant 0 : i32
    %c0_i32_1 = arith.constant 0 : i32
    return %c0_i32, %c0_i32_0 : i32, i32
  }
  func.func @transform_5(%arg0: i32) -> (i32, i32) {
    %c0_i32 = arith.constant 0 : i32
    %c0_i32_0 = arith.constant 0 : i32
    %c0_i32_1 = arith.constant 0 : i32
    return %c0_i32, %c0_i32_0 : i32, i32
  }
  func.func @transform_6(%arg0: i32) -> (i32, i32) {
    %c0_i32 = arith.constant 0 : i32
    %c0_i32_0 = arith.constant 0 : i32
    %c0_i32_1 = arith.constant 0 : i32
    return %c0_i32, %c0_i32_0 : i32, i32
  }
  func.func @transform_7(%arg0: i32) -> (i32, i32) {
    %c0_i32 = arith.constant 0 : i32
    %c0_i32_0 = arith.constant 0 : i32
    %c0_i32_1 = arith.constant 0 : i32
    return %c0_i32, %c0_i32_0 : i32, i32
  }
  func.func @transform_8(%arg0: i32) -> (i32, i32) {
    %c0_i32 = arith.constant 0 : i32
    %c0_i32_0 = arith.constant 0 : i32
    %c0_i32_1 = arith.constant 0 : i32
    return %c0_i32, %c0_i32_0 : i32, i32
  }
  func.func @transform_9(%arg0: i32) -> (i32, i32) {
    %c0_i32 = arith.constant 0 : i32
    %c0_i32_0 = arith.constant 0 : i32
    %c0_i32_1 = arith.constant 0 : i32
    return %c0_i32, %c0_i32_0 : i32, i32
  }
  func.func @transform_10(%arg0: i32) -> (i32, i32) {
    %c0_i32 = arith.constant 0 : i32
    %c0_i32_0 = arith.constant 0 : i32
    %c0_i32_1 = arith.constant 0 : i32
    return %c0_i32, %c0_i32_0 : i32, i32
  }
  func.func @transform_11(%arg0: i32) -> (i32, i32) {
    %c0_i32 = arith.constant 0 : i32
    %c0_i32_0 = arith.constant 0 : i32
    %c0_i32_1 = arith.constant 0 : i32
    return %c0_i32, %c0_i32_0 : i32, i32
  }
  func.func @transform_12(%arg0: i32) -> (i32, i32) {
    %c0_i32 = arith.constant 0 : i32
    %c0_i32_0 = arith.constant 0 : i32
    %c0_i32_1 = arith.constant 0 : i32
    return %c0_i32, %c0_i32_0 : i32, i32
  }
  func.func @transform_13(%arg0: i32) -> (i32, i32) {
    %c0_i32 = arith.constant 0 : i32
    %c0_i32_0 = arith.constant 0 : i32
    %c0_i32_1 = arith.constant 0 : i32
    return %c0_i32, %c0_i32_0 : i32, i32
  }
  func.func @transform_14(%arg0: i32) -> (i32, i32, i32) {
    %c0_i32 = arith.constant 0 : i32
    %c0_i32_0 = arith.constant 0 : i32
    %c0_i32_1 = arith.constant 0 : i32
    return %arg0, %c0_i32, %c0_i32_0 : i32, i32, i32
  }
}

module attributes {stable_mosaic.version = 11 : i64} {
  func.func @transformer_kernel(%arg0: i32, %arg1: memref<1x64x32xf32, #tpu.memory_space<vmem>>, %arg2: memref<1x32xf32, #tpu.memory_space<vmem>>, %arg3: memref<1x32xf32, #tpu.memory_space<vmem>>, %arg4: memref<32x32xf32, #tpu.memory_space<vmem>>, %arg5: memref<32x32xf32, #tpu.memory_space<vmem>>, %arg6: memref<32x32xf32, #tpu.memory_space<vmem>>, %arg7: memref<32x32xf32, #tpu.memory_space<vmem>>, %arg8: memref<1x32xf32, #tpu.memory_space<vmem>>, %arg9: memref<1x32xf32, #tpu.memory_space<vmem>>, %arg10: memref<1x32xf32, #tpu.memory_space<vmem>>, %arg11: memref<32x128xf32, #tpu.memory_space<vmem>>, %arg12: memref<1x128xf32, #tpu.memory_space<vmem>>, %arg13: memref<128x32xf32, #tpu.memory_space<vmem>>, %arg14: memref<1x32xf32, #tpu.memory_space<vmem>>, %arg15: memref<1x64x32xf32, #tpu.memory_space<vmem>>) attributes {dimension_semantics = [#tpu.dimension_semantics<parallel>], iteration_bounds = array<i64: 2>, scalar_prefetch = 0 : i64, scratch_operands = 0 : i64, tpu.core_type = #tpu.core_type<tc>, window_params = [{transform_indices = @transform_0, window_bounds = array<i64: 1, 64, 32>}, {pipeline_mode = #tpu.pipeline_mode<synchronous>, transform_indices = @transform_1, window_bounds = array<i64: 1, 32>}, {pipeline_mode = #tpu.pipeline_mode<synchronous>, transform_indices = @transform_2, window_bounds = array<i64: 1, 32>}, {pipeline_mode = #tpu.pipeline_mode<synchronous>, transform_indices = @transform_3, window_bounds = array<i64: 32, 32>}, {pipeline_mode = #tpu.pipeline_mode<synchronous>, transform_indices = @transform_4, window_bounds = array<i64: 32, 32>}, {pipeline_mode = #tpu.pipeline_mode<synchronous>, transform_indices = @transform_5, window_bounds = array<i64: 32, 32>}, {pipeline_mode = #tpu.pipeline_mode<synchronous>, transform_indices = @transform_6, window_bounds = array<i64: 32, 32>}, {pipeline_mode = #tpu.pipeline_mode<synchronous>, transform_indices = @transform_7, window_bounds = array<i64: 1, 32>}, {pipeline_mode = #tpu.pipeline_mode<synchronous>, transform_indices = @transform_8, window_bounds = array<i64: 1, 32>}, {pipeline_mode = #tpu.pipeline_mode<synchronous>, transform_indices = @transform_9, window_bounds = array<i64: 1, 32>}, {pipeline_mode = #tpu.pipeline_mode<synchronous>, transform_indices = @transform_10, window_bounds = array<i64: 32, 128>}, {pipeline_mode = #tpu.pipeline_mode<synchronous>, transform_indices = @transform_11, window_bounds = array<i64: 1, 128>}, {pipeline_mode = #tpu.pipeline_mode<synchronous>, transform_indices = @transform_12, window_bounds = array<i64: 128, 32>}, {pipeline_mode = #tpu.pipeline_mode<synchronous>, transform_indices = @transform_13, window_bounds = array<i64: 1, 32>}, {transform_indices = @transform_14, window_bounds = array<i64: 1, 64, 32>}]} {
    %c0 = arith.constant 0 : index
    %c0_0 = arith.constant 0 : index
    %c0_1 = arith.constant 0 : index
    %0 = vector.load %arg1[%c0, %c0_0, %c0_1] : memref<1x64x32xf32, #tpu.memory_space<vmem>>, vector<1x64x32xf32>
    %1 = vector.shape_cast %0 : vector<1x64x32xf32> to vector<64x32xf32>
    %c0_2 = arith.constant 0 : index
    %c0_3 = arith.constant 0 : index
    %2 = vector.load %arg2[%c0_2, %c0_3] : memref<1x32xf32, #tpu.memory_space<vmem>>, vector<1x32xf32>
    %c0_4 = arith.constant 0 : index
    %c0_5 = arith.constant 0 : index
    %3 = vector.load %arg3[%c0_4, %c0_5] : memref<1x32xf32, #tpu.memory_space<vmem>>, vector<1x32xf32>
    %cst = arith.constant dense<0.000000e+00> : vector<64xf32>
    %4 = vector.multi_reduction <add>, %1, %cst [1] : vector<64x32xf32> to vector<64xf32>
    %5 = vector.shape_cast %4 : vector<64xf32> to vector<64x1xf32>
    %cst_6 = arith.constant 3.200000e+01 : f32
    %6 = vector.broadcast %cst_6 : f32 to vector<64x1xf32>
    %7 = arith.divf %5, %6 : vector<64x1xf32>
    %8 = vector.broadcast %7 : vector<64x1xf32> to vector<64x32xf32>
    %9 = arith.subf %1, %8 : vector<64x32xf32>
    %10 = arith.mulf %9, %9 : vector<64x32xf32>
    %cst_7 = arith.constant dense<0.000000e+00> : vector<64xf32>
    %11 = vector.multi_reduction <add>, %10, %cst_7 [1] : vector<64x32xf32> to vector<64xf32>
    %12 = vector.shape_cast %11 : vector<64xf32> to vector<64x1xf32>
    %cst_8 = arith.constant 3.200000e+01 : f32
    %13 = vector.broadcast %cst_8 : f32 to vector<64x1xf32>
    %14 = arith.divf %12, %13 : vector<64x1xf32>
    %15 = vector.broadcast %7 : vector<64x1xf32> to vector<64x32xf32>
    %16 = arith.subf %1, %15 : vector<64x32xf32>
    %cst_9 = arith.constant 9.99999974E-6 : f32
    %17 = vector.broadcast %cst_9 : f32 to vector<64x1xf32>
    %18 = arith.addf %14, %17 : vector<64x1xf32>
    %19 = math.rsqrt %18 : vector<64x1xf32>
    %20 = vector.broadcast %19 : vector<64x1xf32> to vector<64x32xf32>
    %21 = arith.mulf %16, %20 : vector<64x32xf32>
    %22 = vector.broadcast %2 : vector<1x32xf32> to vector<64x32xf32>
    %23 = arith.mulf %21, %22 : vector<64x32xf32>
    %24 = vector.broadcast %3 : vector<1x32xf32> to vector<64x32xf32>
    %25 = arith.addf %23, %24 : vector<64x32xf32>
    %c0_10 = arith.constant 0 : index
    %c0_11 = arith.constant 0 : index
    %26 = vector.load %arg4[%c0_10, %c0_11] : memref<32x32xf32, #tpu.memory_space<vmem>>, vector<32x32xf32>
    %cst_12 = arith.constant dense<0.000000e+00> : vector<64x32xf32>
    %27 = tpu.matmul %25, %26, %cst_12 {dimension_numbers = #tpu.dot_dimension_numbers<[1], [0], [0], [1], [0, 0, 1, 1], [], []>} : vector<64x32xf32>, vector<32x32xf32>, vector<64x32xf32> -> vector<64x32xf32>
    %c0_13 = arith.constant 0 : index
    %c0_14 = arith.constant 0 : index
    %28 = vector.load %arg5[%c0_13, %c0_14] : memref<32x32xf32, #tpu.memory_space<vmem>>, vector<32x32xf32>
    %cst_15 = arith.constant dense<0.000000e+00> : vector<64x32xf32>
    %29 = tpu.matmul %25, %28, %cst_15 {dimension_numbers = #tpu.dot_dimension_numbers<[1], [0], [0], [1], [0, 0, 1, 1], [], []>} : vector<64x32xf32>, vector<32x32xf32>, vector<64x32xf32> -> vector<64x32xf32>
    %c0_16 = arith.constant 0 : index
    %c0_17 = arith.constant 0 : index
    %30 = vector.load %arg6[%c0_16, %c0_17] : memref<32x32xf32, #tpu.memory_space<vmem>>, vector<32x32xf32>
    %cst_18 = arith.constant dense<0.000000e+00> : vector<64x32xf32>
    %31 = tpu.matmul %25, %30, %cst_18 {dimension_numbers = #tpu.dot_dimension_numbers<[1], [0], [0], [1], [0, 0, 1, 1], [], []>} : vector<64x32xf32>, vector<32x32xf32>, vector<64x32xf32> -> vector<64x32xf32>
    %32 = vector.shape_cast %27 : vector<64x32xf32> to vector<64x8x4xf32>
    %33 = vector.shape_cast %29 : vector<64x32xf32> to vector<64x8x4xf32>
    %34 = vector.shape_cast %31 : vector<64x32xf32> to vector<64x8x4xf32>
    "tpu.trace_start"() <{level = 10 : i32, message = "qhd,khd->hqk"}> : () -> ()
    %cst_19 = arith.constant dense<0.000000e+00> : vector<8x64x64xf32>
    %35 = tpu.matmul %32, %33, %cst_19 {dimension_numbers = #tpu.dot_dimension_numbers<[2], [2], [0], [0], [0, 1, 0, 0, 1, 0], [1], [1]>} : vector<64x8x4xf32>, vector<64x8x4xf32>, vector<8x64x64xf32> -> vector<8x64x64xf32>
    "tpu.trace_stop"() : () -> ()
    %cst_20 = arith.constant dense<0xFF800000> : vector<8x64xf32>
    %36 = vector.multi_reduction <maximumf>, %35, %cst_20 [2] : vector<8x64x64xf32> to vector<8x64xf32>
    %37 = vector.shape_cast %36 : vector<8x64xf32> to vector<8x64x1xf32>
    %38 = vector.broadcast %37 : vector<8x64x1xf32> to vector<8x64x64xf32>
    %39 = arith.subf %35, %38 : vector<8x64x64xf32>
    %40 = math.exp %39 : vector<8x64x64xf32>
    %cst_21 = arith.constant dense<0.000000e+00> : vector<8x64xf32>
    %41 = vector.multi_reduction <add>, %40, %cst_21 [2] : vector<8x64x64xf32> to vector<8x64xf32>
    %42 = vector.shape_cast %41 : vector<8x64xf32> to vector<8x64x1xf32>
    %43 = vector.broadcast %42 : vector<8x64x1xf32> to vector<8x64x64xf32>
    %44 = arith.divf %40, %43 : vector<8x64x64xf32>
    "tpu.trace_start"() <{level = 10 : i32, message = "hqk,khd->qhd"}> : () -> ()
    %cst_22 = arith.constant dense<0.000000e+00> : vector<8x4x64xf32>
    %45 = tpu.matmul %34, %44, %cst_22 {dimension_numbers = #tpu.dot_dimension_numbers<[0], [2], [2], [1], [0, 1, 0, 2, 1, 1], [1], [0]>} : vector<64x8x4xf32>, vector<8x64x64xf32>, vector<8x4x64xf32> -> vector<8x4x64xf32>
    %46 = tpu.transpose %45, [2, 0, 1] : vector<8x4x64xf32> -> vector<64x8x4xf32>
    "tpu.trace_stop"() : () -> ()
    %47 = vector.shape_cast %46 : vector<64x8x4xf32> to vector<64x32xf32>
    %c0_23 = arith.constant 0 : index
    %c0_24 = arith.constant 0 : index
    %48 = vector.load %arg7[%c0_23, %c0_24] : memref<32x32xf32, #tpu.memory_space<vmem>>, vector<32x32xf32>
    %cst_25 = arith.constant dense<0.000000e+00> : vector<64x32xf32>
    %49 = tpu.matmul %47, %48, %cst_25 {dimension_numbers = #tpu.dot_dimension_numbers<[1], [0], [0], [1], [0, 0, 1, 1], [], []>} : vector<64x32xf32>, vector<32x32xf32>, vector<64x32xf32> -> vector<64x32xf32>
    %50 = arith.addf %1, %49 : vector<64x32xf32>
    %c0_26 = arith.constant 0 : index
    %c0_27 = arith.constant 0 : index
    %51 = vector.load %arg8[%c0_26, %c0_27] : memref<1x32xf32, #tpu.memory_space<vmem>>, vector<1x32xf32>
    %52 = vector.broadcast %51 : vector<1x32xf32> to vector<64x32xf32>
    %53 = arith.addf %50, %52 : vector<64x32xf32>
    %c0_28 = arith.constant 0 : index
    %c0_29 = arith.constant 0 : index
    %54 = vector.load %arg9[%c0_28, %c0_29] : memref<1x32xf32, #tpu.memory_space<vmem>>, vector<1x32xf32>
    %c0_30 = arith.constant 0 : index
    %c0_31 = arith.constant 0 : index
    %55 = vector.load %arg10[%c0_30, %c0_31] : memref<1x32xf32, #tpu.memory_space<vmem>>, vector<1x32xf32>
    %cst_32 = arith.constant dense<0.000000e+00> : vector<64xf32>
    %56 = vector.multi_reduction <add>, %53, %cst_32 [1] : vector<64x32xf32> to vector<64xf32>
    %57 = vector.shape_cast %56 : vector<64xf32> to vector<64x1xf32>
    %cst_33 = arith.constant 3.200000e+01 : f32
    %58 = vector.broadcast %cst_33 : f32 to vector<64x1xf32>
    %59 = arith.divf %57, %58 : vector<64x1xf32>
    %60 = vector.broadcast %59 : vector<64x1xf32> to vector<64x32xf32>
    %61 = arith.subf %53, %60 : vector<64x32xf32>
    %62 = arith.mulf %61, %61 : vector<64x32xf32>
    %cst_34 = arith.constant dense<0.000000e+00> : vector<64xf32>
    %63 = vector.multi_reduction <add>, %62, %cst_34 [1] : vector<64x32xf32> to vector<64xf32>
    %64 = vector.shape_cast %63 : vector<64xf32> to vector<64x1xf32>
    %cst_35 = arith.constant 3.200000e+01 : f32
    %65 = vector.broadcast %cst_35 : f32 to vector<64x1xf32>
    %66 = arith.divf %64, %65 : vector<64x1xf32>
    %67 = vector.broadcast %59 : vector<64x1xf32> to vector<64x32xf32>
    %68 = arith.subf %53, %67 : vector<64x32xf32>
    %cst_36 = arith.constant 9.99999974E-6 : f32
    %69 = vector.broadcast %cst_36 : f32 to vector<64x1xf32>
    %70 = arith.addf %66, %69 : vector<64x1xf32>
    %71 = math.rsqrt %70 : vector<64x1xf32>
    %72 = vector.broadcast %71 : vector<64x1xf32> to vector<64x32xf32>
    %73 = arith.mulf %68, %72 : vector<64x32xf32>
    %74 = vector.broadcast %54 : vector<1x32xf32> to vector<64x32xf32>
    %75 = arith.mulf %73, %74 : vector<64x32xf32>
    %76 = vector.broadcast %55 : vector<1x32xf32> to vector<64x32xf32>
    %77 = arith.addf %75, %76 : vector<64x32xf32>
    %cst_37 = arith.constant 0.000000e+00 : f32
    %78 = vector.broadcast %cst_37 : f32 to vector<64x32xf32>
    %c0_38 = arith.constant 0 : index
    %c0_39 = arith.constant 0 : index
    %79 = vector.load %arg11[%c0_38, %c0_39] : memref<32x128xf32, #tpu.memory_space<vmem>>, vector<32x128xf32>
    %cst_40 = arith.constant dense<0.000000e+00> : vector<64x128xf32>
    %80 = tpu.matmul %77, %79, %cst_40 {dimension_numbers = #tpu.dot_dimension_numbers<[1], [0], [0], [1], [0, 0, 1, 1], [], []>} : vector<64x32xf32>, vector<32x128xf32>, vector<64x128xf32> -> vector<64x128xf32>
    %c0_41 = arith.constant 0 : index
    %c0_42 = arith.constant 0 : index
    %81 = vector.load %arg12[%c0_41, %c0_42] : memref<1x128xf32, #tpu.memory_space<vmem>>, vector<1x128xf32>
    %82 = vector.broadcast %81 : vector<1x128xf32> to vector<64x128xf32>
    %83 = arith.addf %80, %82 : vector<64x128xf32>
    %cst_43 = arith.constant 5.000000e-01 : f32
    %84 = vector.broadcast %cst_43 : f32 to vector<64x128xf32>
    %85 = arith.mulf %84, %83 : vector<64x128xf32>
    %cst_44 = arith.constant 0.707106769 : f32
    %86 = vector.broadcast %cst_44 : f32 to vector<64x128xf32>
    %87 = arith.mulf %83, %86 : vector<64x128xf32>
    %cst_45 = arith.constant 0.000000e+00 : f32
    %88 = vector.broadcast %cst_45 : f32 to vector<64x128xf32>
    %89 = arith.cmpf oge, %87, %88 : vector<64x128xf32>
    %cst_46 = arith.constant 1.000000e+00 : f32
    %cst_47 = arith.constant -1.000000e+00 : f32
    %90 = vector.broadcast %cst_46 : f32 to vector<64x128xf32>
    %91 = vector.broadcast %cst_47 : f32 to vector<64x128xf32>
    %92 = arith.select %89, %90, %91 : vector<64x128xi1>, vector<64x128xf32>
    %93 = math.absf %87 : vector<64x128xf32>
    %cst_48 = arith.constant 0.327591091 : f32
    %94 = vector.broadcast %cst_48 : f32 to vector<64x128xf32>
    %95 = arith.mulf %94, %93 : vector<64x128xf32>
    %cst_49 = arith.constant 1.000000e+00 : f32
    %96 = vector.broadcast %cst_49 : f32 to vector<64x128xf32>
    %97 = arith.addf %96, %95 : vector<64x128xf32>
    %cst_50 = arith.constant 1.000000e+00 : f32
    %98 = vector.broadcast %cst_50 : f32 to vector<64x128xf32>
    %99 = arith.divf %98, %97 : vector<64x128xf32>
    %cst_51 = arith.constant 1.06140542 : f32
    %100 = vector.broadcast %cst_51 : f32 to vector<64x128xf32>
    %101 = arith.mulf %100, %99 : vector<64x128xf32>
    %cst_52 = arith.constant -1.45315206 : f32
    %102 = vector.broadcast %cst_52 : f32 to vector<64x128xf32>
    %103 = arith.addf %101, %102 : vector<64x128xf32>
    %104 = arith.mulf %103, %99 : vector<64x128xf32>
    %cst_53 = arith.constant 1.42141378 : f32
    %105 = vector.broadcast %cst_53 : f32 to vector<64x128xf32>
    %106 = arith.addf %104, %105 : vector<64x128xf32>
    %107 = arith.mulf %106, %99 : vector<64x128xf32>
    %cst_54 = arith.constant -0.284496725 : f32
    %108 = vector.broadcast %cst_54 : f32 to vector<64x128xf32>
    %109 = arith.addf %107, %108 : vector<64x128xf32>
    %110 = arith.mulf %109, %99 : vector<64x128xf32>
    %cst_55 = arith.constant 0.254829586 : f32
    %111 = vector.broadcast %cst_55 : f32 to vector<64x128xf32>
    %112 = arith.addf %110, %111 : vector<64x128xf32>
    %113 = arith.mulf %112, %99 : vector<64x128xf32>
    %cst_56 = arith.constant 0.000000e+00 : f32
    %114 = vector.broadcast %cst_56 : f32 to vector<64x128xf32>
    %115 = arith.subf %114, %93 : vector<64x128xf32>
    %116 = arith.mulf %115, %93 : vector<64x128xf32>
    %117 = math.exp %116 : vector<64x128xf32>
    %118 = arith.mulf %113, %117 : vector<64x128xf32>
    %cst_57 = arith.constant 1.000000e+00 : f32
    %119 = vector.broadcast %cst_57 : f32 to vector<64x128xf32>
    %120 = arith.subf %119, %118 : vector<64x128xf32>
    %121 = arith.mulf %92, %120 : vector<64x128xf32>
    %cst_58 = arith.constant 1.000000e+00 : f32
    %122 = vector.broadcast %cst_58 : f32 to vector<64x128xf32>
    %123 = arith.addf %122, %121 : vector<64x128xf32>
    %124 = arith.mulf %85, %123 : vector<64x128xf32>
    %c0_59 = arith.constant 0 : index
    %c0_60 = arith.constant 0 : index
    %125 = vector.load %arg13[%c0_59, %c0_60] : memref<128x32xf32, #tpu.memory_space<vmem>>, vector<128x32xf32>
    %cst_61 = arith.constant dense<0.000000e+00> : vector<64x32xf32>
    %126 = tpu.matmul %124, %125, %cst_61 {dimension_numbers = #tpu.dot_dimension_numbers<[1], [0], [0], [1], [0, 0, 1, 1], [], []>} : vector<64x128xf32>, vector<128x32xf32>, vector<64x32xf32> -> vector<64x32xf32>
    %127 = arith.addf %78, %126 : vector<64x32xf32>
    %128 = arith.addf %53, %127 : vector<64x32xf32>
    %c0_62 = arith.constant 0 : index
    %c0_63 = arith.constant 0 : index
    %129 = vector.load %arg14[%c0_62, %c0_63] : memref<1x32xf32, #tpu.memory_space<vmem>>, vector<1x32xf32>
    %130 = vector.broadcast %129 : vector<1x32xf32> to vector<64x32xf32>
    %131 = arith.addf %128, %130 : vector<64x32xf32>
    %c0_64 = arith.constant 0 : index
    %c0_65 = arith.constant 0 : index
    %c0_66 = arith.constant 0 : index
    %132 = vector.load %arg15[%c0_64, %c0_65, %c0_66] : memref<1x64x32xf32, #tpu.memory_space<vmem>>, vector<1x64x32xf32>
    %133 = vector.shape_cast %132 : vector<1x64x32xf32> to vector<64x32xf32>
    %134 = vector.shape_cast %131 : vector<64x32xf32> to vector<1x64x32xf32>
    tpu.vector_store %arg15[%c0_64, %c0_65, %c0_66], %134 {strides = array<i32>} : memref<1x64x32xf32, #tpu.memory_space<vmem>>, vector<1x64x32xf32>,
    return
  }
  func.func @transform_0(%arg0: i32) -> (i32, i32, i32) {
    %c0_i32 = arith.constant 0 : i32
    %c0_i32_0 = arith.constant 0 : i32
    %c0_i32_1 = arith.constant 0 : i32
    return %arg0, %c0_i32, %c0_i32_0 : i32, i32, i32
  }
  func.func @transform_1(%arg0: i32) -> (i32, i32) {
    %c0_i32 = arith.constant 0 : i32
    %c0_i32_0 = arith.constant 0 : i32
    %c0_i32_1 = arith.constant 0 : i32
    return %c0_i32, %c0_i32_0 : i32, i32
  }
  func.func @transform_2(%arg0: i32) -> (i32, i32) {
    %c0_i32 = arith.constant 0 : i32
    %c0_i32_0 = arith.constant 0 : i32
    %c0_i32_1 = arith.constant 0 : i32
    return %c0_i32, %c0_i32_0 : i32, i32
  }
  func.func @transform_3(%arg0: i32) -> (i32, i32) {
    %c0_i32 = arith.constant 0 : i32
    %c0_i32_0 = arith.constant 0 : i32
    %c0_i32_1 = arith.constant 0 : i32
    return %c0_i32, %c0_i32_0 : i32, i32
  }
  func.func @transform_4(%arg0: i32) -> (i32, i32) {
    %c0_i32 = arith.constant 0 : i32
    %c0_i32_0 = arith.constant 0 : i32
    %c0_i32_1 = arith.constant 0 : i32
    return %c0_i32, %c0_i32_0 : i32, i32
  }
  func.func @transform_5(%arg0: i32) -> (i32, i32) {
    %c0_i32 = arith.constant 0 : i32
    %c0_i32_0 = arith.constant 0 : i32
    %c0_i32_1 = arith.constant 0 : i32
    return %c0_i32, %c0_i32_0 : i32, i32
  }
  func.func @transform_6(%arg0: i32) -> (i32, i32) {
    %c0_i32 = arith.constant 0 : i32
    %c0_i32_0 = arith.constant 0 : i32
    %c0_i32_1 = arith.constant 0 : i32
    return %c0_i32, %c0_i32_0 : i32, i32
  }
  func.func @transform_7(%arg0: i32) -> (i32, i32) {
    %c0_i32 = arith.constant 0 : i32
    %c0_i32_0 = arith.constant 0 : i32
    %c0_i32_1 = arith.constant 0 : i32
    return %c0_i32, %c0_i32_0 : i32, i32
  }
  func.func @transform_8(%arg0: i32) -> (i32, i32) {
    %c0_i32 = arith.constant 0 : i32
    %c0_i32_0 = arith.constant 0 : i32
    %c0_i32_1 = arith.constant 0 : i32
    return %c0_i32, %c0_i32_0 : i32, i32
  }
  func.func @transform_9(%arg0: i32) -> (i32, i32) {
    %c0_i32 = arith.constant 0 : i32
    %c0_i32_0 = arith.constant 0 : i32
    %c0_i32_1 = arith.constant 0 : i32
    return %c0_i32, %c0_i32_0 : i32, i32
  }
  func.func @transform_10(%arg0: i32) -> (i32, i32) {
    %c0_i32 = arith.constant 0 : i32
    %c0_i32_0 = arith.constant 0 : i32
    %c0_i32_1 = arith.constant 0 : i32
    return %c0_i32, %c0_i32_0 : i32, i32
  }
  func.func @transform_11(%arg0: i32) -> (i32, i32) {
    %c0_i32 = arith.constant 0 : i32
    %c0_i32_0 = arith.constant 0 : i32
    %c0_i32_1 = arith.constant 0 : i32
    return %c0_i32, %c0_i32_0 : i32, i32
  }
  func.func @transform_12(%arg0: i32) -> (i32, i32) {
    %c0_i32 = arith.constant 0 : i32
    %c0_i32_0 = arith.constant 0 : i32
    %c0_i32_1 = arith.constant 0 : i32
    return %c0_i32, %c0_i32_0 : i32, i32
  }
  func.func @transform_13(%arg0: i32) -> (i32, i32) {
    %c0_i32 = arith.constant 0 : i32
    %c0_i32_0 = arith.constant 0 : i32
    %c0_i32_1 = arith.constant 0 : i32
    return %c0_i32, %c0_i32_0 : i32, i32
  }
  func.func @transform_14(%arg0: i32) -> (i32, i32, i32) {
    %c0_i32 = arith.constant 0 : i32
    %c0_i32_0 = arith.constant 0 : i32
    %c0_i32_1 = arith.constant 0 : i32
    return %arg0, %c0_i32, %c0_i32_0 : i32, i32, i32
  }
}

</mosaic_0001>

<bundles_post_ra>
// kernel: tpu_custom_call.1
= control target key start
LH: loop header
LB: loop body
LE: loop exit
PB: predicated region body
PF: predicated region fallthrough
CT: control target
= control target key end

     0   :  { %s9560_s29 = smov 0   ;;  %s13161_s0 = inlined_call_operand.vmem [shape: f32[2,64,32], index: 0, kind: input, shape index: {}]   ;;  %s13162_s1 = inlined_call_operand.vmem [shape: f32[1,32], index: 1, kind: input, shape index: {}]   ;;  %s13163_s2 = inlined_call_operand.vmem [shape: f32[1,32], index: 2, kind: input, shape index: {}]   ;;  %s13164_s3 = inlined_call_operand.vmem [shape: f32[32,32], index: 3, kind: input, shape index: {}]   ;;  %s13165_s4 = inlined_call_operand.vmem [shape: f32[32,32], index: 4, kind: input, shape index: {}]   ;;  %s13166_s5 = inlined_call_operand.vmem [shape: f32[32,32], index: 5, kind: input, shape index: {}]   ;;  %s13167_s6 = inlined_call_operand.vmem [shape: f32[32,32], index: 6, kind: input, shape index: {}]   ;;  %s13168_s7 = inlined_call_operand.vmem [shape: f32[1,32], index: 7, kind: input, shape index: {}]   ;;  %s13169_s8 = inlined_call_operand.vmem [shape: f32[1,32], index: 8, kind: input, shape index: {}]   ;;  %s13170_s9 = inlined_call_operand.vmem [shape: f32[1,32], index: 9, kind: input, shape index: {}]   ;;  %s13171_s10 = inlined_call_operand.vmem [shape: f32[32,128], index: 10, kind: input, shape index: {}]   ;;  %s13172_s11 = inlined_call_operand.vmem [shape: f32[1,128], index: 11, kind: input, shape index: {}]   ;;  %s13173_s12 = inlined_call_operand.vmem [shape: f32[128,32], index: 12, kind: input, shape index: {}]   ;;  %s13174_s13 = inlined_call_operand.vmem [shape: f32[1,32], index: 13, kind: input, shape index: {}]   ;;  %s13175_s14 = inlined_call_operand.vmem [shape: f32[2,64,32], index: 14, kind: output, shape index: {}]  }
   0x1 LB: > { %s7993_s30 = sadd.s32 4294967295, %s9463_s29   ;;  %p7997_p0 = scmp.ge.s32.totalorder %s9463_s29, 1  ;;  %s9463_s29 = sphi %s9560_s29, %s24_s29  }
   0x2   : > { %p412_p1 = scmp.lt.s32.totalorder %s9463_s29, 3 }
   0x4   : > { %p413_p2 = pnand %p7997_p0, %p412_p1 }
   0x6   : > { %416 = sbr.rel (%p413_p2) target bundleno = 3683 (0xe63), region = 76 }
   0xd   : > { %p458_p3 = scmp.lt.s32.totalorder %s7993_s30, 1  ;;  %vm478_vm0 = vcmask 261120   ;;  %v612_v56 = vld [vmem:[%s13164_s3] sm:$0xff]  ;;  %v613_v57 = vld [vmem:[%s13164_s3 + $0x8] sm:$0xff]  ;;  %v614_v59 = vld [vmem:[%s13164_s3 + $0x10] sm:$0xff]  ;;  %vm1691_vm1 = vcmask 31744  }
   0xe   : > { %v8897_v58 = vpack.c.bf16 %v613_v57, %v612_v56  ;;  %v615_v60 = vld [vmem:[%s13164_s3 + $0x18] sm:$0xff]  ;;  %v745_v62 = vld [vmem:[%s13165_s4] sm:$0xff]  ;;  %v746_v63 = vld [vmem:[%s13165_s4 + $0x8] sm:$0xff]  ;;  %s9465_s23 = smov 120   ;;  %s9466_s24 = smov 124   ;;  %vm1708_vm2 = vcmask 1043456  }
   0xf   : > { %s13610_s30 = smov (!%p458_p3, %s7993_s30), 1  ;;  %v8901_v61 = vpack.c.bf16 %v615_v60, %v614_v59  ;;  %s9467_s25 = smov 108   ;;  %vm2685_vm3 = vcmask 523264   ;;  %vm9473_vm5 = vmmov 0   ;;  %vm7086_vm6 = vcmask 64512  }
  0x10   : > { %s13258_s15 = sshll.u32 %s13610_s30, 6  ;;  %8898 = vmatprep.subr.bf16.mxu0 %v8897_v58  ;;  %s9468_s26 = smov 116   ;;  %vm10941_vm4 = vmpackc.low %vm2685_vm3, %vm2685_vm3  ;;  %vm7095_vm7 = vcmask 97280   ;;  %vm7104_vm8 = vcmask 130048   ;;  %vm7113_vm9 = vcmask 162816   ;;  %vm7122_vm10 = vcmask 195584  }
  0x11   : > { %s9576_s18 = scalar_lea.vmem %s13161_s0, %s13258_s15  ;;  %8900 = vmatpush3.bf16.msra.mxu0 %v8897_v58  ;;  %s9469_s27 = smov 104   ;;  %vm7131_vm11 = vcmask 228352  }
  0x12   : > { %v468_v0 = vld [vmem:[%s9576_s18] sm:$0xff]  ;;  %v470_v1 = vld [vmem:[%s9576_s18 + $0x10] sm:$0xff]  ;;  %v469_v2 = vld [vmem:[%s9576_s18 + $0x8] sm:$0xff]  ;;  %8902 = vmatprep.subr.bf16.mxu0 %v8901_v61  ;;  %s9470_s28 = smov 112   ;;  %s9471_s16 = smov 100  }
  0x13   : > { %v479_v3 = vsel %vm478_vm0, %v468_v0, 0.0  ;;  %v485_v4 = vsel %vm478_vm0, %v470_v1, 0.0  ;;  %v471_v5 = vld [vmem:[%s9576_s18 + $0x18] sm:$0xff]  ;;  %v482_v6 = vsel %vm478_vm0, %v469_v2, 0.0  ;;  %v472_v8 = vld [vmem:[%s9576_s18 + $0x20] sm:$0xff]  ;;  %v473_v9 = vld [vmem:[%s9576_s18 + $0x28] sm:$0xff] }
  0x14   : > { %480 = vadd.xlane.f32.xlu0 %v479_v3  ;;  %486 = vadd.xlane.f32.xlu1 %v485_v4  ;;  %v488_v7 = vsel %vm478_vm0, %v471_v5, 0.0  ;;  %v491_v10 = vsel %vm478_vm0, %v472_v8, 0.0  ;;  %v494_v11 = vsel %vm478_vm0, %v473_v9, 0.0  ;;  %v474_v12 = vld [vmem:[%s9576_s18 + $0x30] sm:$0xff]  ;;  %v475_v13 = vld [vmem:[%s9576_s18 + $0x38] sm:$0xff]  ;;  %s9477_s17 = smov 4  }
  0x15   : > { %v497_v14 = vsel %vm478_vm0, %v474_v12, 0.0  ;;  %v500_v15 = vsel %vm478_vm0, %v475_v13, 0.0  ;;  %8904 = vmatpush3.bf16.msra.mxu0 %v8901_v61  ;;  %s9478_s19 = smov 12   ;;  %s9479_s20 = smov 8  }
  0x16   : > { %s9480_s21 = smov 20   ;;  %s9481_s22 = smov 16  }
  0x18   : > { %483 = vadd.xlane.f32.xlu0 %v482_v6  ;;  %489 = vadd.xlane.f32.xlu1 %v488_v7 }
  0x1c   : > { %492 = vadd.xlane.f32.xlu0 %v491_v10  ;;  %495 = vadd.xlane.f32.xlu1 %v494_v11 }
  0x20   : > { %498 = vadd.xlane.f32.xlu0 %v497_v14  ;;  %501 = vadd.xlane.f32.xlu1 %v500_v15 }
  0xa1   : > { %v481_v16 = vpop.xlane.xlu0 %480  ;;  %v487_v17 = vpop.xlane.xlu1 %486 }
  0xa2   : > { %v504_v18 = vmul.f32 0.03125, %v481_v16  ;;  %v506_v19 = vmul.f32 0.03125, %v487_v17 }
  0xa4   : > { %v9594_v20 = vsub.f32 %v468_v0, %v504_v18  ;;  %v9596_v21 = vsub.f32 %v470_v1, %v506_v19  ;;  %v9652_v0 = vpack.c.bf16 %v746_v63, %v745_v62  ;;  %v747_v1 = vld [vmem:[%s13165_s4 + $0x10] sm:$0xff] }
  0xa5   : > { %v484_v22 = vpop.xlane.xlu0 %483  ;;  %v490_v23 = vpop.xlane.xlu1 %489 }
  0xa6   : > { %v505_v24 = vmul.f32 0.03125, %v484_v22  ;;  %v507_v25 = vmul.f32 0.03125, %v490_v23  ;;  %v520_v26 = vmul.f32 %v9594_v20, %v9594_v20  ;;  %v522_v27 = vmul.f32 %v9596_v21, %v9596_v21  ;;  %9097 = vmatprep.subr.bf16.mxu1 %v9652_v0  ;;  %8906 = vmatprep.subr.bf16.mxu0 %v9652_v0 }
  0xa7   : > { %9099 = vmatpush3.bf16.msra.mxu1 %v9652_v0 }
  0xa8   : > { %v9602_v28 = vsub.f32 %v469_v2, %v505_v24  ;;  %v9604_v29 = vsub.f32 %v471_v5, %v507_v25  ;;  %v528_v30 = vsel %vm478_vm0, %v520_v26, 0.0  ;;  %v534_v33 = vsel %vm478_vm0, %v522_v27, 0.0  ;;  %v748_v2 = vld [vmem:[%s13165_s4 + $0x18] sm:$0xff] }
  0xa9   : > { %529 = vadd.xlane.f32.xlu0 %v528_v30  ;;  %v493_v31 = vpop.xlane.xlu0 %492  ;;  %v496_v32 = vpop.xlane.xlu1 %495  ;;  %v9663_v3 = vpack.c.bf16 %v748_v2, %v747_v1  ;;  %v8002_v30 = vld [vmem:[%s13162_s1] ss:$0 sm:$0xff]  ;;  %v856_v2 = vld [vmem:[%s13166_s5 + $0x10] sm:$0xff] }
  0xaa   : > { %v508_v34 = vmul.f32 0.03125, %v493_v31  ;;  %v509_v35 = vmul.f32 0.03125, %v496_v32  ;;  %v521_v36 = vmul.f32 %v9602_v28, %v9602_v28  ;;  %v523_v37 = vmul.f32 %v9604_v29, %v9604_v29 }
  0xab   : > { %9098 = vmatprep.subr.bf16.mxu1 %v9663_v3 }
  0xac   : > { %v9612_v38 = vsub.f32 %v472_v8, %v508_v34  ;;  %v9614_v39 = vsub.f32 %v473_v9, %v509_v35  ;;  %v531_v40 = vsel %vm478_vm0, %v521_v36, 0.0  ;;  %v537_v43 = vsel %vm478_vm0, %v523_v37, 0.0  ;;  %9100 = vmatpush3.bf16.msra.mxu1 %v9663_v3  ;;  %v8003_v34 = vld [vmem:[%s13163_s2] ss:$0 sm:$0xff] }
  0xad   : > { %535 = vadd.xlane.f32.xlu0 %v534_v33  ;;  %532 = vadd.xlane.f32.xlu1 %v531_v40  ;;  %v499_v41 = vpop.xlane.xlu0 %498  ;;  %v502_v42 = vpop.xlane.xlu1 %501 }
  0xae   : > { %v510_v44 = vmul.f32 0.03125, %v499_v41  ;;  %v511_v45 = vmul.f32 0.03125, %v502_v42  ;;  %v524_v46 = vmul.f32 %v9612_v38, %v9612_v38  ;;  %v525_v47 = vmul.f32 %v9614_v39, %v9614_v39 }
  0xb0   : > { %v9622_v48 = vsub.f32 %v474_v12, %v510_v44  ;;  %v9624_v49 = vsub.f32 %v475_v13, %v511_v45  ;;  %v540_v50 = vsel %vm478_vm0, %v524_v46, 0.0  ;;  %v543_v51 = vsel %vm478_vm0, %v525_v47, 0.0 }
  0xb1   : > { %538 = vadd.xlane.f32.xlu1 %v537_v43  ;;  %541 = vadd.xlane.f32.xlu0 %v540_v50 }
  0xb2   : > { %v526_v52 = vmul.f32 %v9622_v48, %v9622_v48  ;;  %v527_v53 = vmul.f32 %v9624_v49, %v9624_v49 }
  0xb4   : > { %v546_v54 = vsel %vm478_vm0, %v526_v52, 0.0  ;;  %v549_v55 = vsel %vm478_vm0, %v527_v53, 0.0 }
  0xb5   : > { %544 = vadd.xlane.f32.xlu1 %v543_v51  ;;  %547 = vadd.xlane.f32.xlu0 %v546_v54 }
  0xb9   : > { %550 = vadd.xlane.f32.xlu1 %v549_v55 }
 0x136   : > { %v530_v4 = vpop.xlane.xlu0 %529 }
 0x137   : > { %v552_v5 = vmul.f32 0.03125, %v530_v4 }
 0x139   : > { %v560_v6 = vadd.f32 1e-05, %v552_v5 }
 0x13a   : > { %v533_v7 = vpop.xlane.xlu1 %532  ;;  %v536_v8 = vpop.xlane.xlu0 %535 }
 0x13b   : > { %9129 = vrsqrt.f32 %v560_v6  ;;  %v553_v9 = vmul.f32 0.03125, %v533_v7  ;;  %v554_v10 = vmul.f32 0.03125, %v536_v8 }
 0x13d   : > { %v561_v11 = vadd.f32 1e-05, %v553_v9  ;;  %v562_v12 = vadd.f32 1e-05, %v554_v10 }
 0x13e   : > { %v539_v13 = vpop.xlane.xlu1 %538  ;;  %v542_v14 = vpop.xlane.xlu0 %541 }
 0x13f   : > { %9131 = vrsqrt.f32 %v561_v11  ;;  %v555_v15 = vmul.f32 0.03125, %v539_v13  ;;  %v556_v16 = vmul.f32 0.03125, %v542_v14 }
 0x140   : > { %9133 = vrsqrt.f32 %v562_v12 }
 0x141   : > { %v563_v17 = vadd.f32 1e-05, %v555_v15  ;;  %v564_v18 = vadd.f32 1e-05, %v556_v16 }
 0x142   : > { %v545_v19 = vpop.xlane.xlu1 %544  ;;  %v548_v22 = vpop.xlane.xlu0 %547 }
 0x143   : > { %9135 = vrsqrt.f32 %v563_v17  ;;  %v557_v23 = vmul.f32 0.03125, %v545_v19  ;;  %v558_v24 = vmul.f32 0.03125, %v548_v22 }
 0x144   : > { %9137 = vrsqrt.f32 %v564_v18 }
 0x145   : > { %v9130_v25 = vpop.eup %9129  ;;  %v565_v26 = vadd.f32 1e-05, %v557_v23  ;;  %v566_v27 = vadd.f32 1e-05, %v558_v24 }
 0x146   : > { %v551_v31 = vpop.xlane.xlu1 %550  ;;  %v576_v32 = vmul.f32 %v9130_v25, %v9594_v20 }
 0x147   : > { %9139 = vrsqrt.f32 %v565_v26  ;;  %v559_v33 = vmul.f32 0.03125, %v551_v31 }
 0x148   : > { %9141 = vrsqrt.f32 %v566_v27  ;;  %v590_v35 = vmul.f32 %v8002_v30, %v576_v32 }
 0x149   : > { %v9132_v36 = vpop.eup %9131  ;;  %v567_v37 = vadd.f32 1e-05, %v559_v33 }
 0x14a   : > { %v9134_v40 = vpop.eup %9133  ;;  %v604_v41 = vadd.f32 %v8003_v34, %v590_v35  ;;  %v577_v42 = vmul.f32 %v9132_v36, %v9602_v28  ;;  %v854_v28 = vld [vmem:[%s13166_s5] sm:$0xff] }
 0x14b   : > { %9143 = vrsqrt.f32 %v567_v37  ;;  %v578_v43 = vmul.f32 %v9134_v40, %v9596_v21  ;;  %v855_v21 = vld [vmem:[%s13166_s5 + $0x8] sm:$0xff] }
 0x14c   : > { %8497 = vmatprep.mubr.msk.f32.mxu0 %vm478_vm0, %v604_v41  ;;  %v591_v20 = vmul.f32 %v8002_v30, %v577_v42  ;;  %v8913_v59 = vpack.c.bf16 %v855_v21, %v854_v28 }
 0x14d   : > { %v9136_v44 = vpop.eup %9135  ;;  %v592_v45 = vmul.f32 %v8002_v30, %v578_v43 }
 0x14e   : > { %v9138_v46 = vpop.eup %9137  ;;  %v605_v47 = vadd.f32 %v8003_v34, %v591_v20  ;;  %v579_v50 = vmul.f32 %v9136_v44, %v9604_v29 }
 0x14f   : > { %v606_v51 = vadd.f32 %v8003_v34, %v592_v45  ;;  %v580_v52 = vmul.f32 %v9138_v46, %v9612_v38 }
 0x150   : > { %8498 = vmatmul.mubr.msk.f32.vlgmr.msra.gmra.mrb[0].mxu0 %vm478_vm0, %v605_v47  ;;  %v593_v53 = vmul.f32 %v8002_v30, %v579_v50 }
 0x151   : > { %v9140_v54 = vpop.eup %9139  ;;  %8500 = vmatprep.mubr.msk.f32.mxu0 %vm478_vm0, %v606_v51  ;;  %v594_v55 = vmul.f32 %v8002_v30, %v580_v52  ;;  %8908 = vmatpush3.bf16.msra.mxu0 %v9652_v0 }
 0x152   : > { %v9142_v29 = vpop.eup %9141  ;;  %v607_v56 = vadd.f32 %v8003_v34, %v593_v53  ;;  %v581_v38 = vmul.f32 %v9140_v54, %v9614_v39  ;;  %8910 = vmatprep.subr.bf16.mxu0 %v9663_v3 }
 0x153   : > { %v608_v57 = vadd.f32 %v8003_v34, %v594_v55  ;;  %v582_v58 = vmul.f32 %v9142_v29, %v9622_v48 }
 0x154   : > { %8501 = vmatmul.mubr.msk.f32.gmra.mrb[2].mxu0 %vm478_vm0, %v607_v56  ;;  %v595_v60 = vmul.f32 %v8002_v30, %v581_v38 }
 0x155   : > { %v9144_v61 = vpop.eup %9143  ;;  %8523 = vmatprep.mubr.msk.f32.mxu1 %vm478_vm0, %v608_v57  ;;  %8503 = vmatprep.mubr.msk.f32.mxu0 %vm478_vm0, %v608_v57  ;;  %v596_v62 = vmul.f32 %v8002_v30, %v582_v58 }
 0x156   : > { %v609_v63 = vadd.f32 %v8003_v34, %v595_v60  ;;  %v583_v0 = vmul.f32 %v9144_v61, %v9624_v49  ;;  %8912 = vmatpush3.bf16.msra.mxu0 %v9663_v3  ;;  %v857_v49 = vld [vmem:[%s13166_s5 + $0x18] sm:$0xff] }
 0x157   : > { %v610_v39 = vadd.f32 %v8003_v34, %v596_v62  ;;  %8914 = vmatprep.subr.bf16.mxu0 %v8913_v59  ;;  %v8917_v3 = vpack.c.bf16 %v857_v49, %v856_v2 }
 0x158   : > { %8504 = vmatmul.mubr.msk.f32.gmra.mrb[4].mxu0 %vm478_vm0, %v609_v63  ;;  %8524 = vmatmul.mubr.msk.f32.vlgmr.msra.gmra.mrb[0].mxu1 %vm478_vm0, %v609_v63  ;;  %v597_v48 = vmul.f32 %v8002_v30, %v583_v0 }
 0x159   : > { %8506 = vmatprep.mubr.msk.f32.mxu0 %vm478_vm0, %v610_v39  ;;  %8526 = vmatprep.mubr.msk.f32.mxu1 %vm478_vm0, %v610_v39 }
 0x15a   : > { %v611_v1 = vadd.f32 %v8003_v34, %v597_v48 }
 0x15c   : > { %8507 = vmatmul.mubr.msk.f32.gmra.mrb[6].mxu0 %vm478_vm0, %v611_v1  ;;  %8527 = vmatmul.mubr.msk.f32.gmra.mrb[2].mxu1 %vm478_vm0, %v611_v1 }
 0x15d   : > { %8517 = vmatprep.mubr.msk.f32.mxu0 %vm478_vm0, %v604_v41 }
 0x160   : > { %8518 = vmatmul.mubr.msk.f32.vlgmr.msra.gmra.mrb[8].mxu0 %vm478_vm0, %v605_v47 }
 0x161   : > { %8520 = vmatprep.mubr.msk.f32.mxu0 %vm478_vm0, %v606_v51  ;;  %8916 = vmatpush3.bf16.msra.mxu0 %v8913_v59 }
 0x162   : > { %8918 = vmatprep.subr.bf16.mxu0 %v8917_v3 }
 0x164   : > { %8521 = vmatmul.mubr.msk.f32.gmra.mrb[10].mxu0 %vm478_vm0, %v607_v56 }
 0x165   : > { %8920 = vmatpush3.bf16.msra.mxu0 %v8917_v3  ;;  %8537 = vmatprep.mubr.msk.f32.mxu0 %vm478_vm0, %v604_v41 }
 0x168   : > { %8538 = vmatmul.mubr.msk.f32.vlgmr.msra.gmra.mrb[12].mxu0 %vm478_vm0, %v605_v47 }
 0x169   : > { %8540 = vmatprep.mubr.msk.f32.mxu0 %vm478_vm0, %v606_v51 }
 0x16c   : > { %8541 = vmatmul.mubr.msk.f32.gmra.mrb[14].mxu0 %vm478_vm0, %v607_v56 }
 0x16d   : > { %8543 = vmatprep.mubr.msk.f32.mxu0 %vm478_vm0, %v608_v57 }
 0x170   : > { %8544 = vmatmul.mubr.msk.f32.gmra.mrb[16].mxu0 %vm478_vm0, %v609_v63 }
 0x171   : > { %8546 = vmatprep.mubr.msk.f32.mxu0 %vm478_vm0, %v610_v39 }
 0x174   : > { %8547 = vmatmul.mubr.msk.f32.gmra.mrb[18].mxu0 %vm478_vm0, %v611_v1 }
 0x223   : > { %v9720_v4 = vpop.f32.mrb[0].mxu0 }
 0x224   : > { %v706_v5 = vpop.f32.mrb[1].mxu0 }
 0x225   : > { %8551 = vmatprep.mubr.msk.f32.mxu1 %vm1691_vm1, %v706_v5 }
 0x227   : > { %v9723_v6 = vpop.f32.mrb[2].mxu0 }
 0x228   : > { %v9725_v7 = vpop.f32.mrb[3].mxu0 }
 0x22b   : > { %v9727_v8 = vpop.f32.mrb[4].mxu0  ;;  %v9729_v9 = vpop.f32.mrb[0].mxu1 }
 0x22c   : > { %1125 = vrot.lane.b32.xlu0 %v9729_v9, %s9465_s23  ;;  %1101 = vrot.lane.b32.xlu1 %v9729_v9, %s9466_s24  ;;  %v9735_v10 = vpop.f32.mrb[5].mxu0  ;;  %v9737_v11 = vpop.f32.mrb[1].mxu1 }
 0x22f   : > { %v9739_v12 = vpop.f32.mrb[6].mxu0  ;;  %v9741_v13 = vpop.f32.mrb[2].mxu1 }
 0x230   : > { %1197 = vrot.lane.b32.xlu0 %v9729_v9, %s9467_s25  ;;  %1149 = vrot.lane.b32.xlu1 %v9729_v9, %s9468_s26  ;;  %v9747_v14 = vpop.f32.mrb[7].mxu0  ;;  %v9749_v15 = vpop.f32.mrb[3].mxu1 }
 0x233   : > { %v9751_v16 = vpop.f32.mrb[8].mxu0 }
 0x234   : > { %989 = vrot.lane.b32.xlu0 %v9720_v4, %s9465_s23  ;;  %973 = vrot.lane.b32.xlu1 %v9720_v4, %s9466_s24  ;;  %v9757_v17 = vpop.f32.mrb[9].mxu0 }
 0x237   : > { %v9759_v18 = vpop.f32.mrb[10].mxu0 }
 0x238   : > { %1221 = vrot.lane.b32.xlu0 %v9729_v9, %s9469_s27  ;;  %1173 = vrot.lane.b32.xlu1 %v9729_v9, %s9470_s28  ;;  %v9765_v19 = vpop.f32.mrb[11].mxu0 }
 0x23b   : > { %v9767_v22 = vpop.f32.mrb[12].mxu0 }
 0x23c   : > { %13259 = vst [vmem:[#allocation2_spill] sm:$0xff] %v9767_v22  ;;  %1021 = vrot.lane.b32.xlu0 %v9720_v4, %s9470_s28  ;;  %1005 = vrot.lane.b32.xlu1 %v9720_v4, %s9468_s26  ;;  %v9773_v23 = vpop.f32.mrb[13].mxu0 }
 0x23d   : > { %13260 = vst [vmem:[#allocation3_spill] sm:$0xff] %v9773_v23 }
 0x23f   : > { %v9775_v24 = vpop.f32.mrb[14].mxu0 }
 0x240   : > { %13261 = vst [vmem:[#allocation4_spill] sm:$0xff] %v9775_v24  ;;  %1053 = vrot.lane.b32.xlu0 %v9720_v4, %s9469_s27  ;;  %1245 = vrot.lane.b32.xlu1 %v9729_v9, %s9471_s16  ;;  %v9781_v25 = vpop.f32.mrb[15].mxu0 }
 0x241   : > { %13262 = vst [vmem:[#allocation5_spill] sm:$0xff] %v9781_v25 }
 0x243   : > { %v9783_v26 = vpop.f32.mrb[16].mxu0 }
 0x244   : > { %13263 = vst [vmem:[#allocation6_spill] sm:$0xff] %v9783_v26  ;;  %1037 = vrot.lane.b32.xlu1 %v9720_v4, %s9467_s25  ;;  %1099 = vrot.lane.b32.xlu0 %v9737_v11, %s9466_s24  ;;  %v9789_v27 = vpop.f32.mrb[17].mxu0 }
 0x245   : > { %13264 = vst [vmem:[#allocation7_spill] sm:$0xff] %v9789_v27 }
 0x247   : > { %v9791_v30 = vpop.f32.mrb[18].mxu0 }
 0x248   : > { %13265 = vst [vmem:[#allocation8_spill] sm:$0xff] %v9791_v30  ;;  %1069 = vrot.lane.b32.xlu1 %v9720_v4, %s9471_s16  ;;  %1123 = vrot.lane.b32.xlu0 %v9737_v11, %s9465_s23  ;;  %v9797_v31 = vpop.f32.mrb[19].mxu0 }
 0x249   : > { %13266 = vst [vmem:[#allocation9_spill] sm:$0xff] %v9797_v31 }
 0x24c   : > { %1147 = vrot.lane.b32.xlu1 %v9737_v11, %s9468_s26  ;;  %971 = vrot.lane.b32.xlu0 %v706_v5, %s9466_s24 }
 0x250   : > { %1195 = vrot.lane.b32.xlu1 %v9737_v11, %s9467_s25  ;;  %1171 = vrot.lane.b32.xlu0 %v9737_v11, %s9470_s28 }
 0x254   : > { %1003 = vrot.lane.b32.xlu1 %v706_v5, %s9468_s26  ;;  %987 = vrot.lane.b32.xlu0 %v706_v5, %s9465_s23 }
 0x258   : > { %1243 = vrot.lane.b32.xlu1 %v9737_v11, %s9471_s16  ;;  %1219 = vrot.lane.b32.xlu0 %v9737_v11, %s9469_s27 }
 0x25c   : > { %1035 = vrot.lane.b32.xlu1 %v706_v5, %s9467_s25  ;;  %1019 = vrot.lane.b32.xlu0 %v706_v5, %s9470_s28 }
 0x260   : > { %1067 = vrot.lane.b32.xlu1 %v706_v5, %s9471_s16  ;;  %1051 = vrot.lane.b32.xlu0 %v706_v5, %s9469_s27 }
 0x264   : > { %1129 = vrot.lane.b32.xlu0 %v9741_v13, %s9465_s23  ;;  %1105 = vrot.lane.b32.xlu1 %v9741_v13, %s9466_s24 }
 0x268   : > { %1177 = vrot.lane.b32.xlu0 %v9741_v13, %s9470_s28  ;;  %1153 = vrot.lane.b32.xlu1 %v9741_v13, %s9468_s26 }
 0x26c   : > { %993 = vrot.lane.b32.xlu0 %v9723_v6, %s9465_s23  ;;  %977 = vrot.lane.b32.xlu1 %v9723_v6, %s9466_s24 }
 0x270   : > { %1225 = vrot.lane.b32.xlu0 %v9741_v13, %s9469_s27  ;;  %1201 = vrot.lane.b32.xlu1 %v9741_v13, %s9467_s25 }
 0x274   : > { %1025 = vrot.lane.b32.xlu0 %v9723_v6, %s9470_s28  ;;  %1009 = vrot.lane.b32.xlu1 %v9723_v6, %s9468_s26 }
 0x278   : > { %1057 = vrot.lane.b32.xlu0 %v9723_v6, %s9469_s27  ;;  %1249 = vrot.lane.b32.xlu1 %v9741_v13, %s9471_s16 }
 0x27c   : > { %1041 = vrot.lane.b32.xlu1 %v9723_v6, %s9467_s25  ;;  %1103 = vrot.lane.b32.xlu0 %v9749_v15, %s9466_s24 }
 0x280   : > { %1073 = vrot.lane.b32.xlu1 %v9723_v6, %s9471_s16  ;;  %1127 = vrot.lane.b32.xlu0 %v9749_v15, %s9465_s23 }
 0x284   : > { %1151 = vrot.lane.b32.xlu1 %v9749_v15, %s9468_s26  ;;  %975 = vrot.lane.b32.xlu0 %v9725_v7, %s9466_s24 }
 0x288   : > { %1199 = vrot.lane.b32.xlu1 %v9749_v15, %s9467_s25  ;;  %1175 = vrot.lane.b32.xlu0 %v9749_v15, %s9470_s28 }
 0x28c   : > { %1007 = vrot.lane.b32.xlu1 %v9725_v7, %s9468_s26  ;;  %991 = vrot.lane.b32.xlu0 %v9725_v7, %s9465_s23 }
 0x290   : > { %1247 = vrot.lane.b32.xlu1 %v9749_v15, %s9471_s16  ;;  %1223 = vrot.lane.b32.xlu0 %v9749_v15, %s9469_s27 }
 0x294   : > { %1039 = vrot.lane.b32.xlu1 %v9725_v7, %s9467_s25  ;;  %1023 = vrot.lane.b32.xlu0 %v9725_v7, %s9470_s28 }
 0x298   : > { %1071 = vrot.lane.b32.xlu1 %v9725_v7, %s9471_s16  ;;  %1055 = vrot.lane.b32.xlu0 %v9725_v7, %s9469_s27 }
 0x29c   : > { %981 = vrot.lane.b32.xlu1 %v9727_v8, %s9466_s24  ;;  %997 = vrot.lane.b32.xlu0 %v9727_v8, %s9465_s23 }
 0x29e   : > { %v9876_v32 = vpop.permute.xlu1 %1101  ;;  %v9878_v33 = vpop.permute.xlu0 %1125 }
 0x2a0   : > { %1013 = vrot.lane.b32.xlu1 %v9727_v8, %s9468_s26  ;;  %1029 = vrot.lane.b32.xlu0 %v9727_v8, %s9470_s28 }
 0x2a2   : > { %v9884_v34 = vpop.permute.xlu1 %1149  ;;  %v9886_v35 = vpop.permute.xlu0 %1197 }
 0x2a4   : > { %1045 = vrot.lane.b32.xlu1 %v9727_v8, %s9467_s25  ;;  %1061 = vrot.lane.b32.xlu0 %v9727_v8, %s9469_s27 }
 0x2a6   : > { %v9892_v36 = vpop.permute.xlu1 %973  ;;  %v9894_v37 = vpop.permute.xlu0 %989 }
 0x2a8   : > { %1077 = vrot.lane.b32.xlu1 %v9727_v8, %s9471_s16  ;;  %979 = vrot.lane.b32.xlu0 %v9735_v10, %s9466_s24 }
 0x2aa   : > { %v9900_v40 = vpop.permute.xlu1 %1173  ;;  %v9902_v41 = vpop.permute.xlu0 %1221 }
 0x2ac   : > { %1011 = vrot.lane.b32.xlu1 %v9735_v10, %s9468_s26  ;;  %995 = vrot.lane.b32.xlu0 %v9735_v10, %s9465_s23 }
 0x2ae   : > { %v9908_v42 = vpop.permute.xlu1 %1005  ;;  %v9910_v43 = vpop.permute.xlu0 %1021 }
 0x2af   : > { %13267 = vst [vmem:[#allocation10_spill] sm:$0xff] %v9908_v42  ;;  %13268 = vst [vmem:[#allocation11_spill] sm:$0xff] %v9910_v43 }
 0x2b0   : > { %1043 = vrot.lane.b32.xlu1 %v9735_v10, %s9467_s25  ;;  %1027 = vrot.lane.b32.xlu0 %v9735_v10, %s9470_s28 }
 0x2b2   : > { %v9916_v20 = vpop.permute.xlu1 %1245  ;;  %v9918_v44 = vpop.permute.xlu0 %1053 }
 0x2b3   : > { %13269 = vst [vmem:[#allocation12_spill] sm:$0xff] %v9918_v44 }
 0x2b4   : > { %1075 = vrot.lane.b32.xlu1 %v9735_v10, %s9471_s16  ;;  %1059 = vrot.lane.b32.xlu0 %v9735_v10, %s9469_s27 }
 0x2b6   : > { %v9924_v45 = vpop.permute.xlu1 %1037  ;;  %v9926_v46 = vpop.permute.xlu0 %1099 }
 0x2b7   : > { %13270 = vst [vmem:[#allocation13_spill] sm:$0xff] %v9924_v45 }
 0x2b8   : > { %1001 = vrot.lane.b32.xlu0 %v9739_v12, %s9465_s23  ;;  %985 = vrot.lane.b32.xlu1 %v9739_v12, %s9466_s24 }
 0x2ba   : > { %v9932_v47 = vpop.permute.xlu1 %1069  ;;  %v9934_v50 = vpop.permute.xlu0 %1123 }
 0x2bb   : > { %13271 = vst [vmem:[#allocation14_spill] sm:$0xff] %v9932_v47 }
 0x2bc   : > { %1033 = vrot.lane.b32.xlu0 %v9739_v12, %s9470_s28  ;;  %1017 = vrot.lane.b32.xlu1 %v9739_v12, %s9468_s26 }
 0x2be   : > { %v9940_v51 = vpop.permute.xlu1 %1147  ;;  %v972_v52 = vpop.permute.xlu0 %971 }
 0x2bf   : > { %8565 = vmatprep.mubr.msk.f32.mxu0 %vm1691_vm1, %v972_v52 }
 0x2c0   : > { %1065 = vrot.lane.b32.xlu0 %v9739_v12, %s9469_s27  ;;  %1049 = vrot.lane.b32.xlu1 %v9739_v12, %s9467_s25 }
 0x2c2   : > { %v9947_v53 = vpop.permute.xlu1 %1195  ;;  %v9949_v28 = vpop.permute.xlu0 %1171 }
 0x2c4   : > { %1081 = vrot.lane.b32.xlu1 %v9739_v12, %s9471_s16  ;;  %983 = vrot.lane.b32.xlu0 %v9747_v14, %s9466_s24 }
 0x2c6   : > { %v9955_v21 = vpop.permute.xlu1 %1003  ;;  %v9957_v54 = vpop.permute.xlu0 %987 }
 0x2c7   : > { %13272 = vst [vmem:[#allocation15_spill] sm:$0xff] %v9955_v21 }
 0x2c8   : > { %1015 = vrot.lane.b32.xlu1 %v9747_v14, %s9468_s26  ;;  %999 = vrot.lane.b32.xlu0 %v9747_v14, %s9465_s23 }
 0x2ca   : > { %v9963_v55 = vpop.permute.xlu1 %1243  ;;  %v9965_v29 = vpop.permute.xlu0 %1219 }
 0x2cc   : > { %1047 = vrot.lane.b32.xlu1 %v9747_v14, %s9467_s25  ;;  %1031 = vrot.lane.b32.xlu0 %v9747_v14, %s9470_s28 }
 0x2ce   : > { %v9971_v56 = vpop.permute.xlu1 %1035  ;;  %v9973_v38 = vpop.permute.xlu0 %1019 }
 0x2cf   : > { %13273 = vst [vmem:[#allocation16_spill] sm:$0xff] %v9971_v56  ;;  %13274 = vst [vmem:[#allocation17_spill] sm:$0xff] %v9973_v38 }
 0x2d0   : > { %1079 = vrot.lane.b32.xlu1 %v9747_v14, %s9471_s16  ;;  %1063 = vrot.lane.b32.xlu0 %v9747_v14, %s9469_s27 }
 0x2d2   : > { %v9979_v57 = vpop.permute.xlu1 %1067  ;;  %v9981_v58 = vpop.permute.xlu0 %1051 }
 0x2d3   : > { %13275 = vst [vmem:[#allocation18_spill] sm:$0xff] %v9979_v57  ;;  %13276 = vst [vmem:[#allocation19_spill] sm:$0xff] %v9981_v58 }
 0x2d4   : > { %1117 = vrot.lane.b32.xlu0 %v9751_v16, %s9465_s23  ;;  %1093 = vrot.lane.b32.xlu1 %v9751_v16, %s9466_s24 }
 0x2d6   : > { %v9987_v59 = vpop.permute.xlu1 %1105  ;;  %v9989_v60 = vpop.permute.xlu0 %1129 }
 0x2d8   : > { %1189 = vrot.lane.b32.xlu0 %v9751_v16, %s9467_s25  ;;  %1141 = vrot.lane.b32.xlu1 %v9751_v16, %s9468_s26 }
 0x2da   : > { %v9995_v61 = vpop.permute.xlu1 %1153  ;;  %v9997_v62 = vpop.permute.xlu0 %1177 }
 0x2dc   : > { %1213 = vrot.lane.b32.xlu0 %v9751_v16, %s9469_s27  ;;  %1165 = vrot.lane.b32.xlu1 %v9751_v16, %s9470_s28 }
 0x2de   : > { %v10003_v63 = vpop.permute.xlu1 %977  ;;  %v10005_v0 = vpop.permute.xlu0 %993 }
 0x2df   : > { %13277 = vst [vmem:[#allocation20_spill] sm:$0xff] %v10003_v63 }
 0x2e0   : > { %1237 = vrot.lane.b32.xlu1 %v9751_v16, %s9471_s16  ;;  %1091 = vrot.lane.b32.xlu0 %v9757_v17, %s9466_s24 }
 0x2e2   : > { %v10011_v39 = vpop.permute.xlu1 %1201  ;;  %v10013_v48 = vpop.permute.xlu0 %1225 }
 0x2e4   : > { %1139 = vrot.lane.b32.xlu1 %v9757_v17, %s9468_s26  ;;  %1115 = vrot.lane.b32.xlu0 %v9757_v17, %s9465_s23 }
 0x2e6   : > { %v10019_v1 = vpop.permute.xlu1 %1009  ;;  %v10021_v2 = vpop.permute.xlu0 %1025 }
 0x2e7   : > { %13278 = vst [vmem:[#allocation21_spill] sm:$0xff] %v10019_v1  ;;  %13279 = vst [vmem:[#allocation22_spill] sm:$0xff] %v10021_v2 }
 0x2e8   : > { %1187 = vrot.lane.b32.xlu1 %v9757_v17, %s9467_s25  ;;  %1163 = vrot.lane.b32.xlu0 %v9757_v17, %s9470_s28 }
 0x2ea   : > { %v10027_v49 = vpop.permute.xlu1 %1249  ;;  %v10029_v3 = vpop.permute.xlu0 %1057 }
 0x2eb   : > { %13280 = vst [vmem:[#allocation23_spill] sm:$0xff] %v10029_v3 }
 0x2ec   : > { %1235 = vrot.lane.b32.xlu1 %v9757_v17, %s9471_s16  ;;  %1211 = vrot.lane.b32.xlu0 %v9757_v17, %s9469_s27 }
 0x2ee   : > { %v10035_v5 = vpop.permute.xlu1 %1041  ;;  %v10037_v52 = vpop.permute.xlu0 %1103 }
 0x2ef   : > { %13281 = vst [vmem:[#allocation24_spill] sm:$0xff] %v10035_v5 }
 0x2f0   : > { %1097 = vrot.lane.b32.xlu1 %v9759_v18, %s9466_s24  ;;  %1121 = vrot.lane.b32.xlu0 %v9759_v18, %s9465_s23 }
 0x2f2   : > { %v10043_v47 = vpop.permute.xlu1 %1073  ;;  %v10045_v57 = vpop.permute.xlu0 %1127 }
 0x2f3   : > { %13282 = vst [vmem:[#allocation25_spill] sm:$0xff] %v10043_v47 }
 0x2f4   : > { %1145 = vrot.lane.b32.xlu1 %v9759_v18, %s9468_s26  ;;  %1169 = vrot.lane.b32.xlu0 %v9759_v18, %s9470_s28 }
 0x2f6   : > { %v10051_v3 = vpop.permute.xlu1 %1151  ;;  %v10053_v5 = vpop.permute.xlu0 %975 }
 0x2f8   : > { %1193 = vrot.lane.b32.xlu1 %v9759_v18, %s9467_s25  ;;  %1217 = vrot.lane.b32.xlu0 %v9759_v18, %s9469_s27 }
 0x2fa   : > { %v10059_v45 = vpop.permute.xlu1 %1199  ;;  %v10061_v47 = vpop.permute.xlu0 %1175 }
 0x2fc   : > { %1241 = vrot.lane.b32.xlu1 %v9759_v18, %s9471_s16  ;;  %1119 = vrot.lane.b32.xlu0 %v9765_v19, %s9465_s23 }
 0x2fe   : > { %v10067_v44 = vpop.permute.xlu1 %1007  ;;  %v10069_v56 = vpop.permute.xlu0 %991 }
 0x2ff   : > { %13283 = vst [vmem:[#allocation26_spill] sm:$0xff] %v10067_v44 }
 0x300   : > { %1095 = vrot.lane.b32.xlu1 %v9765_v19, %s9466_s24  ;;  %1167 = vrot.lane.b32.xlu0 %v9765_v19, %s9470_s28 }
 0x302   : > { %v10075_v58 = vpop.permute.xlu1 %1247  ;;  %v10077_v1 = vpop.permute.xlu0 %1223 }
 0x304   : > { %1143 = vrot.lane.b32.xlu1 %v9765_v19, %s9468_s26  ;;  %1215 = vrot.lane.b32.xlu0 %v9765_v19, %s9469_s27 }
 0x306   : > { %v10083_v2 = vpop.permute.xlu1 %1039  ;;  %v10085_v44 = vpop.permute.xlu0 %1023 }
 0x307   : > { %13284 = vst [vmem:[#allocation27_spill] sm:$0xff] %v10083_v2  ;;  %13285 = vst [vmem:[#allocation28_spill] sm:$0xff] %v10085_v44 }
 0x308   : > { %1191 = vrot.lane.b32.xlu1 %v9765_v19, %s9467_s25  ;;  %1267 = vrot.lane.b32.xlu0 %v9773_v23, %s9466_s24 }
 0x30a   : > { %v10091_v42 = vpop.permute.xlu1 %1071  ;;  %v10093_v43 = vpop.permute.xlu0 %1055 }
 0x30b   : > { %13286 = vst [vmem:[#allocation29_spill] sm:$0xff] %v10091_v42  ;;  %13287 = vst [vmem:[#allocation30_spill] sm:$0xff] %v10093_v43 }
 0x30c   : > { %1239 = vrot.lane.b32.xlu1 %v9765_v19, %s9471_s16  ;;  %1275 = vrot.lane.b32.xlu0 %v9789_v27, %s9466_s24 }
 0x30e   : > { %v10099_v30 = vpop.permute.xlu1 %981  ;;  %v10101_v2 = vpop.permute.xlu0 %997 }
 0x30f   : > { %13288 = vst [vmem:[#allocation31_spill] sm:$0xff] %v10099_v30  ;;  %13289 = vst [vmem:[#allocation32_spill] sm:$0xff] %v10101_v2 }
 0x310   : > { %1269 = vrot.lane.b32.xlu1 %v9767_v22, %s9466_s24 }
 0x312   : > { %v10105_v44 = vpop.permute.xlu1 %1013  ;;  %v10107_v31 = vpop.permute.xlu0 %1029 }
 0x313   : > { %13290 = vst [vmem:[#allocation33_spill] sm:$0xff] %v10105_v44  ;;  %13291 = vst [vmem:[#allocation34_spill] sm:$0xff] %v10107_v31 }
 0x314   : > { %1273 = vrot.lane.b32.xlu1 %v9775_v24, %s9466_s24 }
 0x316   : > { %v10111_v42 = vpop.permute.xlu1 %1045  ;;  %v10113_v43 = vpop.permute.xlu0 %1061 }
 0x317   : > { %13292 = vst [vmem:[#allocation35_spill] sm:$0xff] %v10111_v42  ;;  %13293 = vst [vmem:[#allocation36_spill] sm:$0xff] %v10113_v43 }
 0x318   : > { %1271 = vrot.lane.b32.xlu1 %v9781_v25, %s9466_s24 }
 0x31a   : > { %v10117_v27 = vpop.permute.xlu1 %1077  ;;  %v10119_v21 = vpop.permute.xlu0 %979 }
 0x31b   : > { %13294 = vst [vmem:[#allocation37_spill] sm:$0xff] %v10117_v27  ;;  %13295 = vst [vmem:[#allocation38_spill] sm:$0xff] %v10119_v21 }
 0x31c   : > { %1277 = vrot.lane.b32.xlu1 %v9783_v26, %s9466_s24 }
 0x31e   : > { %v10123_v44 = vpop.permute.xlu1 %1011  ;;  %v10125_v31 = vpop.permute.xlu0 %995 }
 0x31f   : > { %13296 = vst [vmem:[#allocation39_spill] sm:$0xff] %v10123_v44  ;;  %13297 = vst [vmem:[#allocation40_spill] sm:$0xff] %v10125_v31 }
 0x322   : > { %v10127_v38 = vpop.permute.xlu1 %1043  ;;  %v10129_v24 = vpop.permute.xlu0 %1027 }
 0x323   : > { %13298 = vst [vmem:[#allocation41_spill] sm:$0xff] %v10127_v38  ;;  %13299 = vst [vmem:[#allocation42_spill] sm:$0xff] %v10129_v24 }
 0x326   : > { %v10131_v42 = vpop.permute.xlu1 %1075  ;;  %v10133_v43 = vpop.permute.xlu0 %1059 }
 0x327   : > { %13300 = vst [vmem:[#allocation43_spill] sm:$0xff] %v10131_v42  ;;  %13301 = vst [vmem:[#allocation44_spill] sm:$0xff] %v10133_v43 }
 0x32a   : > { %v10135_v30 = vpop.permute.xlu1 %985  ;;  %1435 = vxpose.xlu0.b32.start [1/8] (short) (narrow) %v9757_v17, 8  ;;  %v10138_v27 = vpop.permute.xlu0 %1001 }
 0x32b   : > { %13302 = vst [vmem:[#allocation45_spill] sm:$0xff] %v10135_v30  ;;  %13303 = vst [vmem:[#allocation46_spill] sm:$0xff] %v10138_v27 }
 0x32e   : > { %v10140_v25 = vpop.permute.xlu1 %1017  ;;  %1436 = vxpose.xlu0.b32.cont [2/8] (short) (narrow) %v9751_v16, 8  ;;  %v10143_v44 = vpop.permute.xlu0 %1033 }
 0x32f   : > { %13304 = vst [vmem:[#allocation47_spill] sm:$0xff] %v10140_v25  ;;  %13305 = vst [vmem:[#allocation48_spill] sm:$0xff] %v10143_v44 }
 0x332   : > { %v10145_v26 = vpop.permute.xlu1 %1049  ;;  %1437 = vxpose.xlu0.b32.cont [3/8] (short) (narrow) %v9765_v19, 8  ;;  %v10148_v38 = vpop.permute.xlu0 %1065 }
 0x333   : > { %13306 = vst [vmem:[#allocation49_spill] sm:$0xff] %v10145_v26  ;;  %13307 = vst [vmem:[#allocation50_spill] sm:$0xff] %v10148_v38 }
 0x336   : > { %v10150_v42 = vpop.permute.xlu1 %1081  ;;  %1438 = vxpose.xlu0.b32.cont [4/8] (short) (narrow) %v9759_v18, 8  ;;  %v10153_v43 = vpop.permute.xlu0 %983 }
 0x337   : > { %13308 = vst [vmem:[#allocation51_spill] sm:$0xff] %v10150_v42  ;;  %13309 = vst [vmem:[#allocation52_spill] sm:$0xff] %v10153_v43 }
 0x33a   : > { %v10155_v17 = vpop.permute.xlu1 %1015  ;;  %1439 = vxpose.xlu0.b32.cont [5/8] (short) (narrow) %v9737_v11, 8  ;;  %v10158_v25 = vpop.permute.xlu0 %999 }
 0x33b   : > { %13310 = vst [vmem:[#allocation53_spill] sm:$0xff] %v10155_v17  ;;  %13311 = vst [vmem:[#allocation54_spill] sm:$0xff] %v10158_v25 }
 0x33e   : > { %v10160_v16 = vpop.permute.xlu1 %1047  ;;  %1440 = vxpose.xlu0.b32.cont [6/8] (short) (narrow) %v9729_v9, 8  ;;  %v10163_v26 = vpop.permute.xlu0 %1031 }
 0x33f   : > { %13312 = vst [vmem:[#allocation55_spill] sm:$0xff] %v10160_v16  ;;  %13313 = vst [vmem:[#allocation56_spill] sm:$0xff] %v10163_v26 }
 0x342   : > { %v10165_v19 = vpop.permute.xlu1 %1079  ;;  %1441 = vxpose.xlu0.b32.cont [7/8] (short) (narrow) %v9749_v15, 8  ;;  %v10168_v42 = vpop.permute.xlu0 %1063 }
 0x343   : > { %13314 = vst [vmem:[#allocation57_spill] sm:$0xff] %v10165_v19  ;;  %13315 = vst [vmem:[#allocation58_spill] sm:$0xff] %v10168_v42 }
 0x346   : > { %v1094_v18 = vpop.permute.xlu1 %1093  ;;  %1442 = vxpose.xlu0.b32.end [8/8] (short) (narrow) %v9741_v13, 8  ;;  %v1118_v38 = vpop.permute.xlu0 %1117 }
 0x34a   : > { %v1142_v17 = vpop.permute.xlu1 %1141  ;;  %v10171_v11 = vpop.permute.xlu0 %1189 }
 0x34e   : > { %v1166_v44 = vpop.permute.xlu1 %1165  ;;  %v1214_v24 = vpop.permute.xlu0 %1213 }
 0x352   : > { %v10173_v16 = vpop.permute.xlu1 %1237  ;;  %v1092_v9 = vpop.permute.xlu0 %1091 }
 0x353   : > { %1467 = vxpose.xlu1.b32.start [1/8] (short) (narrow) %v1092_v9, 8 }
 0x356   : > { %v1140_v26 = vpop.permute.xlu1 %1139  ;;  %v1116_v30 = vpop.permute.xlu0 %1115 }
 0x357   : > { %1468 = vxpose.xlu1.b32.cont [2/8] (short) (narrow) %v1094_v18, 8  ;;  %1499 = vxpose.xlu0.b32.start [1/8] (short) (narrow) %v1116_v30, 8  ;;  %v13362_v18 = vld [vmem:[#allocation24_spill] sm:$0xff] }
 0x35a   : > { %v1188_v15 = vpop.permute.xlu1 %1187  ;;  %v1164_v19 = vpop.permute.xlu0 %1163 }
 0x35b   : > { %1500 = vxpose.xlu0.b32.cont [2/8] (short) (narrow) %v1118_v38, 8  ;;  %v13344_v38 = vld [vmem:[#allocation42_spill] sm:$0xff] }
 0x35e   : > { %v10175_v42 = vpop.permute.xlu1 %1235  ;;  %v1212_v13 = vpop.permute.xlu0 %1211 }
 0x362   : > { %v1098_v43 = vpop.permute.xlu1 %1097  ;;  %v1122_v27 = vpop.permute.xlu0 %1121 }
 0x366   : > { %v1146_v25 = vpop.permute.xlu1 %1145  ;;  %v1170_v21 = vpop.permute.xlu0 %1169 }
 0x36a   : > { %v1194_v2 = vpop.permute.xlu1 %1193  ;;  %v1218_v63 = vpop.permute.xlu0 %1217 }
 0x36e   : > { %v10177_v22 = vpop.permute.xlu1 %1241  ;;  %v1120_v31 = vpop.permute.xlu0 %1119 }
 0x36f   : > { %1501 = vxpose.xlu0.b32.cont [3/8] (short) (narrow) %v1120_v31, 8 }
 0x372   : > { %v1096_v9 = vpop.permute.xlu1 %1095 }
 0x373   : > { %1469 = vxpose.xlu1.b32.cont [3/8] (short) (narrow) %v1096_v9, 8  ;;  %1502 = vxpose.xlu0.b32.cont [4/8] (short) (narrow) %v1122_v27, 8  ;;  %v1168_v27 = vpop.permute.xlu0 %1167  ;;  %v13366_v9 = vld [vmem:[#allocation35_spill] sm:$0xff] }
 0x376   : > { %v1144_v30 = vpop.permute.xlu1 %1143 }
 0x377   : > { %1470 = vxpose.xlu1.b32.cont [4/8] (short) (narrow) %v1098_v43, 8  ;;  %1503 = vxpose.xlu0.b32.cont [5/8] (short) (narrow) %v9934_v50, 8  ;;  %v1216_v31 = vpop.permute.xlu0 %1215  ;;  %v13331_v43 = vld [vmem:[#allocation52_spill] sm:$0xff]  ;;  %v13337_v50 = vld [vmem:[#allocation9_spill] sm:$0xff] }
 0x37b   : > { %1471 = vxpose.xlu1.b32.cont [5/8] (short) (narrow) %v9926_v46, 8  ;;  %1504 = vxpose.xlu0.b32.cont [6/8] (short) (narrow) %v9878_v33, 8  ;;  %v1192_v33 = vpop.permute.xlu1 %1191  ;;  %v13335_v46 = vld [vmem:[#allocation15_spill] sm:$0xff] }
 0x37f   : > { %1472 = vxpose.xlu1.b32.cont [6/8] (short) (narrow) %v9876_v32, 8  ;;  %1505 = vxpose.xlu0.b32.cont [7/8] (short) (narrow) %v10045_v57, 8  ;;  %v13345_v57 = vld [vmem:[#allocation21_spill] sm:$0xff] }
 0x383   : > { %1473 = vxpose.xlu1.b32.cont [7/8] (short) (narrow) %v10037_v52, 8  ;;  %1506 = vxpose.xlu0.b32.end [8/8] (short) (narrow) %v9989_v60, 8  ;;  %v13348_v60 = vld [vmem:[#allocation56_spill] sm:$0xff]  ;;  %v13358_v52 = vld [vmem:[#allocation13_spill] sm:$0xff] }
 0x387   : > { %1474 = vxpose.xlu1.b32.end [8/8] (short) (narrow) %v9987_v59, 8  ;;  %1563 = vxpose.xlu0.b32.start [1/8] (short) (narrow) %v1164_v19, 8  ;;  %v13347_v59 = vld [vmem:[#allocation39_spill] sm:$0xff]  ;;  %v13361_v19 = vld [vmem:[#allocation44_spill] sm:$0xff] }
 0x38b   : > { %1531 = vxpose.xlu1.b32.start [1/8] (short) (narrow) %v1140_v26, 8  ;;  %1564 = vxpose.xlu0.b32.cont [2/8] (short) (narrow) %v1166_v44, 8  ;;  %v10192_v26 = vpop.permute.xlu0 %1267  ;;  %v13333_v44 = vld [vmem:[#allocation4_spill] sm:$0xff] }
 0x38c   : > { %13316 = vst [vmem:[#allocation59_spill] sm:$0xff] %v10192_v26 }
 0x38f   : > { %1532 = vxpose.xlu1.b32.cont [2/8] (short) (narrow) %v1142_v17, 8  ;;  %1565 = vxpose.xlu0.b32.cont [3/8] (short) (narrow) %v1168_v27, 8  ;;  %v10196_v32 = vpop.permute.xlu0 %1275  ;;  %v13359_v17 = vld [vmem:[#allocation23_spill] sm:$0xff]  ;;  %v13367_v27 = vld [vmem:[#allocation50_spill] sm:$0xff] }
 0x390   : > { %13317 = vst [vmem:[#allocation60_spill] sm:$0xff] %v10196_v32 }
 0x393   : > { %1533 = vxpose.xlu1.b32.cont [3/8] (short) (narrow) %v1144_v30, 8  ;;  %1566 = vxpose.xlu0.b32.cont [4/8] (short) (narrow) %v1170_v21, 8  ;;  %v13368_v30 = vld [vmem:[#allocation55_spill] sm:$0xff] }
 0x397   : > { %1534 = vxpose.xlu1.b32.cont [4/8] (short) (narrow) %v1146_v25, 8  ;;  %1567 = vxpose.xlu0.b32.cont [5/8] (short) (narrow) %v9949_v28, 8  ;;  %v13339_v28 = vld [vmem:[#allocation11_spill] sm:$0xff] }
 0x39b   : > { %1535 = vxpose.xlu1.b32.cont [5/8] (short) (narrow) %v9940_v51, 8  ;;  %1568 = vxpose.xlu0.b32.cont [6/8] (short) (narrow) %v9900_v40, 8  ;;  %v13328_v40 = vld [vmem:[#allocation5_spill] sm:$0xff]  ;;  %v13338_v51 = vld [vmem:[#allocation8_spill] sm:$0xff] }
 0x39f   : > { %1536 = vxpose.xlu1.b32.cont [6/8] (short) (narrow) %v9884_v34, 8  ;;  %1569 = vxpose.xlu0.b32.cont [7/8] (short) (narrow) %v10061_v47, 8  ;;  %v13324_v34 = vld [vmem:[#allocation20_spill] sm:$0xff]  ;;  %v13336_v47 = vld [vmem:[#allocation6_spill] sm:$0xff] }
 0x3a3   : > { %1537 = vxpose.xlu1.b32.cont [7/8] (short) (narrow) %v10051_v3, 8  ;;  %1570 = vxpose.xlu0.b32.end [8/8] (short) (narrow) %v9997_v62, 8  ;;  %v13350_v62 = vld [vmem:[#allocation48_spill] sm:$0xff] }
 0x3a7   : > { %1538 = vxpose.xlu1.b32.end [8/8] (short) (narrow) %v9995_v61, 8  ;;  %1627 = vxpose.xlu0.b32.start [1/8] (short) (narrow) %v1212_v13, 8  ;;  %v13349_v61 = vld [vmem:[#allocation33_spill] sm:$0xff]  ;;  %v13365_v13 = vld [vmem:[#allocation58_spill] sm:$0xff] }
 0x3aa   : > { %v1451_v25 = vpop.trf.xlu0 }
 0x3ab   : > { %1595 = vxpose.xlu1.b32.start [1/8] (short) (narrow) %v1188_v15, 8  ;;  %1628 = vxpose.xlu0.b32.cont [2/8] (short) (narrow) %v1214_v24, 8  ;;  %v13323_v24 = vld [vmem:[#allocation2_spill] sm:$0xff]  ;;  %v13364_v15 = vld [vmem:[#allocation41_spill] sm:$0xff] }
 0x3ac   : > { %8549 = vmatprep.subr.msk.mxu1 %vm1708_vm2, %v1451_v25 }
 0x3ad   : > { %8550 = vmatpush3.msk.msra.mxu1 %vm1708_vm2, %v1451_v25  ;;  %v13370_v25 = vld [vmem:[#allocation18_spill] sm:$0xff] }
 0x3ae   : > { %8552 = vmatmul.mubr.msk.f32.vlgmr.msra.gmra.mrb[4].mxu1 %vm1691_vm1, %v9720_v4  ;;  %v1240_v4 = vpop.permute.xlu1 %1239 }
 0x3af   : > { %8554 = vmatprep.mubr.msk.f32.mxu1 %vm1691_vm1, %v9725_v7  ;;  %1596 = vxpose.xlu1.b32.cont [2/8] (short) (narrow) %v10171_v11, 8  ;;  %v13363_v11 = vld [vmem:[#allocation36_spill] sm:$0xff] }
 0x3b0   : > { %1629 = vxpose.xlu0.b32.cont [3/8] (short) (narrow) %v1216_v31, 8  ;;  %v13369_v31 = vld [vmem:[#allocation49_spill] sm:$0xff] }
 0x3b2   : > { %8555 = vmatmul.mubr.msk.f32.gmra.mrb[6].mxu1 %vm1691_vm1, %v9723_v6  ;;  %v10228_v6 = vpop.permute.xlu1 %1269 }
 0x3b3   : > { %8557 = vmatprep.mubr.msk.f32.mxu1 %vm1691_vm1, %v9735_v10  ;;  %1597 = vxpose.xlu1.b32.cont [3/8] (short) (narrow) %v1192_v33, 8  ;;  %13318 = vst [vmem:[#allocation61_spill] sm:$0xff] %v10228_v6 }
 0x3b4   : > { %1630 = vxpose.xlu0.b32.cont [4/8] (short) (narrow) %v1218_v63, 8  ;;  %v13351_v63 = vld [vmem:[#allocation53_spill] sm:$0xff] }
 0x3b6   : > { %8558 = vmatmul.mubr.msk.f32.gmra.mrb[8].mxu1 %vm1691_vm1, %v9727_v8  ;;  %v10231_v7 = vpop.permute.xlu1 %1273 }
 0x3b7   : > { %8560 = vmatprep.mubr.msk.f32.mxu1 %vm1691_vm1, %v9747_v14  ;;  %1598 = vxpose.xlu1.b32.cont [4/8] (short) (narrow) %v1194_v2, 8  ;;  %13319 = vst [vmem:[#allocation62_spill] sm:$0xff] %v10231_v7 }
 0x3b8   : > { %1631 = vxpose.xlu0.b32.cont [5/8] (short) (narrow) %v9965_v29, 8  ;;  %v13342_v29 = vld [vmem:[#allocation22_spill] sm:$0xff] }
 0x3ba   : > { %8561 = vmatmul.mubr.msk.f32.gmra.mrb[10].mxu1 %vm1691_vm1, %v9739_v12  ;;  %v10235_v8 = vpop.permute.xlu1 %1271 }
 0x3bb   : > { %8579 = vmatprep.mubr.msk.f32.mxu1 %vm1691_vm1, %v9957_v54  ;;  %1599 = vxpose.xlu1.b32.cont [5/8] (short) (narrow) %v9947_v53, 8  ;;  %13320 = vst [vmem:[#allocation63_spill] sm:$0xff] %v10235_v8  ;;  %v13340_v54 = vld [vmem:[#allocation28_spill] sm:$0xff] }
 0x3bc   : > { %1632 = vxpose.xlu0.b32.cont [6/8] (short) (narrow) %v9902_v41, 8  ;;  %v13329_v41 = vld [vmem:[#allocation31_spill] sm:$0xff] }
 0x3be   : > { %v10238_v10 = vpop.permute.xlu1 %1277 }
 0x3bf   : > { %1600 = vxpose.xlu1.b32.cont [6/8] (short) (narrow) %v9886_v35, 8  ;;  %13321 = vst [vmem:[#allocation64_spill] sm:$0xff] %v10238_v10  ;;  %v13325_v35 = vld [vmem:[#allocation32_spill] sm:$0xff] }
 0x3c0   : > { %1633 = vxpose.xlu0.b32.cont [7/8] (short) (narrow) %v10077_v1, 8  ;;  %v13355_v1 = vld [vmem:[#allocation7_spill] sm:$0xff] }
 0x3c3   : > { %1601 = vxpose.xlu1.b32.cont [7/8] (short) (narrow) %v10059_v45, 8  ;;  %v13334_v45 = vld [vmem:[#allocation45_spill] sm:$0xff] }
 0x3c4   : > { %1634 = vxpose.xlu0.b32.end [8/8] (short) (narrow) %v10013_v48, 8  ;;  %v13354_v48 = vld [vmem:[#allocation16_spill] sm:$0xff] }
 0x3c7   : > { %1602 = vxpose.xlu1.b32.end [8/8] (short) (narrow) %v10011_v39, 8  ;;  %v13353_v39 = vld [vmem:[#allocation47_spill] sm:$0xff] }
 0x3cb   : > { %1659 = vxpose.xlu1.b32.start [1/8] (short) (narrow) %v10175_v42, 8  ;;  %v13330_v42 = vld [vmem:[#allocation46_spill] sm:$0xff] }
 0x3cf   : > { %1660 = vxpose.xlu1.b32.cont [2/8] (short) (narrow) %v10173_v16, 8  ;;  %v13360_v16 = vld [vmem:[#allocation27_spill] sm:$0xff] }
 0x3d3   : > { %1661 = vxpose.xlu1.b32.cont [3/8] (short) (narrow) %v1240_v4, 8  ;;  %v13371_v4 = vld [vmem:[#allocation14_spill] sm:$0xff] }
 0x3d7   : > { %1662 = vxpose.xlu1.b32.cont [4/8] (short) (narrow) %v10177_v22, 8  ;;  %v13322_v22 = vld [vmem:[#allocation40_spill] sm:$0xff] }
 0x3db   : > { %1663 = vxpose.xlu1.b32.cont [5/8] (short) (narrow) %v9963_v55, 8  ;;  %v13341_v55 = vld [vmem:[#allocation10_spill] sm:$0xff] }
 0x3df   : > { %1664 = vxpose.xlu1.b32.cont [6/8] (short) (narrow) %v9916_v20, 8  ;;  %v13332_v20 = vld [vmem:[#allocation17_spill] sm:$0xff] }
 0x3e3   : > { %1665 = vxpose.xlu1.b32.cont [7/8] (short) (narrow) %v10075_v58, 8  ;;  %v13346_v58 = vld [vmem:[#allocation34_spill] sm:$0xff] }
 0x3e7   : > { %1666 = vxpose.xlu1.b32.end [8/8] (short) (narrow) %v10027_v49, 8  ;;  %v1515_v12 = vpop.trf.xlu0  ;;  %v13356_v49 = vld [vmem:[#allocation12_spill] sm:$0xff] }
 0x3e8   : > { %8577 = vmatprep.subr.msk.mxu1 %vm1708_vm2, %v1515_v12 }
 0x3e9   : > { %8578 = vmatpush3.msk.msra.mxu1 %vm1708_vm2, %v1515_v12  ;;  %v13372_v12 = vld [vmem:[#allocation29_spill] sm:$0xff] }
 0x3ea   : > { %8580 = vmatmul.mubr.msk.f32.vlgmr.msra.gmra.mrb[12].mxu1 %vm1691_vm1, %v9894_v37  ;;  %v13326_v37 = vld [vmem:[#allocation38_spill] sm:$0xff] }
 0x3eb   : > { %v1483_v14 = vpop.trf.xlu1  ;;  %8582 = vmatprep.mubr.msk.f32.mxu1 %vm1691_vm1, %v10069_v56  ;;  %v13343_v56 = vld [vmem:[#allocation26_spill] sm:$0xff] }
 0x3ec   : > { %8563 = vmatprep.subr.msk.mxu0 %vm1708_vm2, %v1483_v14 }
 0x3ed   : > { %1291 = vrot.lane.b32.xlu0 %v9773_v23, %s9465_s23  ;;  %8564 = vmatpush3.msk.msra.mxu0 %vm1708_vm2, %v1483_v14  ;;  %v13373_v14 = vld [vmem:[#allocation25_spill] sm:$0xff] }
 0x3ee   : > { %8566 = vmatmul.mubr.msk.f32.vlgmr.msra.gmra.mrb[20].mxu0 %vm1691_vm1, %v9892_v36  ;;  %8583 = vmatmul.mubr.msk.f32.gmra.mrb[14].mxu1 %vm1691_vm1, %v10005_v0  ;;  %v13327_v36 = vld [vmem:[#allocation54_spill] sm:$0xff]  ;;  %v13352_v0 = vld [vmem:[#allocation19_spill] sm:$0xff] }
 0x3ef   : > { %8568 = vmatprep.mubr.msk.f32.mxu0 %vm1691_vm1, %v10053_v5  ;;  %8585 = vmatprep.mubr.msk.f32.mxu1 %vm1691_vm1, %v13322_v22  ;;  %v13357_v5 = vld [vmem:[#allocation30_spill] sm:$0xff]  ;;  %v13374_v22 = vld [vmem:[#allocation43_spill] sm:$0xff] }
 0x3f1   : > { %1293 = vrot.lane.b32.xlu0 %v13323_v24, %s9465_s23 }
 0x3f2   : > { %8569 = vmatmul.mubr.msk.f32.gmra.mrb[22].mxu0 %vm1691_vm1, %v13324_v34  ;;  %8586 = vmatmul.mubr.msk.f32.gmra.mrb[16].mxu1 %vm1691_vm1, %v13325_v35  ;;  %v13375_v34 = vld [vmem:[#allocation37_spill] sm:$0xff] }
 0x3f3   : > { %8571 = vmatprep.mubr.msk.f32.mxu0 %vm1691_vm1, %v13326_v37  ;;  %8588 = vmatprep.mubr.msk.f32.mxu1 %vm1691_vm1, %v13327_v36  ;;  %v13376_v35 = vld [vmem:[#allocation57_spill] sm:$0xff]  ;;  %v13377_v37 = vld [vmem:[#allocation51_spill] sm:$0xff] }
 0x3f5   : > { %1295 = vrot.lane.b32.xlu0 %v13328_v40, %s9465_s23 }
 0x3f6   : > { %8572 = vmatmul.mubr.msk.f32.gmra.mrb[24].mxu0 %vm1691_vm1, %v13329_v41  ;;  %8589 = vmatmul.mubr.msk.f32.gmra.mrb[18].mxu1 %vm1691_vm1, %v13330_v42 }
 0x3f7   : > { %8574 = vmatprep.mubr.msk.f32.mxu0 %vm1691_vm1, %v13331_v43  ;;  %8607 = vmatprep.mubr.msk.f32.mxu1 %vm1691_vm1, %v13332_v20 }
 0x3f9   : > { %1321 = vrot.lane.b32.xlu0 %v13333_v44, %s9468_s26 }
 0x3fa   : > { %8575 = vmatmul.mubr.msk.f32.gmra.mrb[26].mxu0 %vm1691_vm1, %v13334_v45 }
 0x3fb   : > { %8593 = vmatprep.mubr.msk.f32.mxu0 %vm1691_vm1, %v13335_v46 }
 0x3fd   : > { %1301 = vrot.lane.b32.xlu0 %v13336_v47, %s9465_s23 }
 0x401   : > { %1303 = vrot.lane.b32.xlu0 %v13337_v50, %s9465_s23 }
 0x405   : > { %1329 = vrot.lane.b32.xlu0 %v13338_v51, %s9468_s26  ;;  %1279 = vrot.lane.b32.xlu1 %v13337_v50, %s9466_s24 }
 0x407   : > { %v1579_v53 = vpop.trf.xlu0 }
 0x408   : > { %8605 = vmatprep.subr.msk.mxu1 %vm1708_vm2, %v1579_v53 }
 0x409   : > { %1281 = vrot.lane.b32.xlu1 %v13338_v51, %s9466_s24  ;;  %8606 = vmatpush3.msk.msra.mxu1 %vm1708_vm2, %v1579_v53  ;;  %s9483_s24 = smov 28  }
 0x40a   : > { %8608 = vmatmul.mubr.msk.f32.vlgmr.msra.gmra.mrb[20].mxu1 %vm1691_vm1, %v13339_v28 }
 0x40b   : > { %v1547_v21 = vpop.trf.xlu1  ;;  %8610 = vmatprep.mubr.msk.f32.mxu1 %vm1691_vm1, %v13340_v54 }
 0x40c   : > { %8591 = vmatprep.subr.msk.mxu0 %vm1708_vm2, %v1547_v21 }
 0x40d   : > { %1315 = vrot.lane.b32.xlu1 %v9773_v23, %s9468_s26  ;;  %8592 = vmatpush3.msk.msra.mxu0 %vm1708_vm2, %v1547_v21 }
 0x40e   : > { %8594 = vmatmul.mubr.msk.f32.vlgmr.msra.gmra.mrb[28].mxu0 %vm1691_vm1, %v13341_v55  ;;  %8611 = vmatmul.mubr.msk.f32.gmra.mrb[22].mxu1 %vm1691_vm1, %v13342_v29 }
 0x40f   : > { %8596 = vmatprep.mubr.msk.f32.mxu0 %vm1691_vm1, %v13343_v56  ;;  %8613 = vmatprep.mubr.msk.f32.mxu1 %vm1691_vm1, %v13344_v38 }
 0x411   : > { %1317 = vrot.lane.b32.xlu1 %v13323_v24, %s9468_s26 }
 0x412   : > { %8597 = vmatmul.mubr.msk.f32.gmra.mrb[30].mxu0 %vm1691_vm1, %v13345_v57  ;;  %8614 = vmatmul.mubr.msk.f32.gmra.mrb[24].mxu1 %vm1691_vm1, %v13346_v58 }
 0x413   : > { %8599 = vmatprep.mubr.msk.f32.mxu0 %vm1691_vm1, %v13347_v59  ;;  %8616 = vmatprep.mubr.msk.f32.mxu1 %vm1691_vm1, %v13348_v60 }
 0x415   : > { %1319 = vrot.lane.b32.xlu1 %v13328_v40, %s9468_s26 }
 0x416   : > { %8600 = vmatmul.mubr.msk.f32.gmra.mrb[32].mxu0 %vm1691_vm1, %v13349_v61  ;;  %8617 = vmatmul.mubr.msk.f32.gmra.mrb[26].mxu1 %vm1691_vm1, %v13350_v62 }
 0x417   : > { %8602 = vmatprep.mubr.msk.f32.mxu0 %vm1691_vm1, %v13351_v63  ;;  %8635 = vmatprep.mubr.msk.f32.mxu1 %vm1691_vm1, %v13352_v0 }
 0x419   : > { %1297 = vrot.lane.b32.xlu1 %v13333_v44, %s9465_s23 }
 0x41a   : > { %8603 = vmatmul.mubr.msk.f32.gmra.mrb[34].mxu0 %vm1691_vm1, %v13353_v39 }
 0x41b   : > { %8621 = vmatprep.mubr.msk.f32.mxu0 %vm1691_vm1, %v13354_v48 }
 0x41d   : > { %1299 = vrot.lane.b32.xlu1 %v13355_v1, %s9465_s23 }
 0x421   : > { %1323 = vrot.lane.b32.xlu1 %v13355_v1, %s9468_s26 }
 0x425   : > { %1325 = vrot.lane.b32.xlu1 %v13336_v47, %s9468_s26 }
 0x428   : > { %v1643_v2 = vpop.trf.xlu0 }
 0x429   : > { %8633 = vmatprep.subr.msk.mxu1 %vm1708_vm2, %v1643_v2  ;;  %1327 = vrot.lane.b32.xlu1 %v13337_v50, %s9468_s26 }
 0x42a   : > { %8634 = vmatpush3.msk.msra.mxu1 %vm1708_vm2, %v1643_v2 }
 0x42b   : > { %8636 = vmatmul.mubr.msk.f32.vlgmr.msra.gmra.mrb[28].mxu1 %vm1691_vm1, %v13356_v49  ;;  %v1611_v3 = vpop.trf.xlu1 }
 0x42c   : > { %8638 = vmatprep.mubr.msk.f32.mxu1 %vm1691_vm1, %v13357_v5  ;;  %8619 = vmatprep.subr.msk.mxu0 %vm1708_vm2, %v1611_v3 }
 0x42d   : > { %1305 = vrot.lane.b32.xlu1 %v13338_v51, %s9465_s23  ;;  %8620 = vmatpush3.msk.msra.mxu0 %vm1708_vm2, %v1611_v3  ;;  %s9482_s23 = smov 24  }
 0x42e   : > { %8622 = vmatmul.mubr.msk.f32.vlgmr.msra.gmra.mrb[36].mxu0 %vm1691_vm1, %v13358_v52 }
 0x42f   : > { %8639 = vmatmul.mubr.msk.f32.gmra.mrb[30].mxu1 %vm1691_vm1, %v13359_v17  ;;  %8624 = vmatprep.mubr.msk.f32.mxu0 %vm1691_vm1, %v13360_v16 }
 0x430   : > { %8641 = vmatprep.mubr.msk.f32.mxu1 %vm1691_vm1, %v13361_v19 }
 0x432   : > { %8625 = vmatmul.mubr.msk.f32.gmra.mrb[38].mxu0 %vm1691_vm1, %v13362_v18 }
 0x433   : > { %8642 = vmatmul.mubr.msk.f32.gmra.mrb[32].mxu1 %vm1691_vm1, %v13363_v11  ;;  %8627 = vmatprep.mubr.msk.f32.mxu0 %vm1691_vm1, %v13364_v15 }
 0x434   : > { %8644 = vmatprep.mubr.msk.f32.mxu1 %vm1691_vm1, %v13365_v13 }
 0x436   : > { %8628 = vmatmul.mubr.msk.f32.gmra.mrb[40].mxu0 %vm1691_vm1, %v13366_v9 }
 0x437   : > { %8645 = vmatmul.mubr.msk.f32.gmra.mrb[34].mxu1 %vm1691_vm1, %v13367_v27  ;;  %8630 = vmatprep.mubr.msk.f32.mxu0 %vm1691_vm1, %v13368_v30 }
 0x43a   : > { %8631 = vmatmul.mubr.msk.f32.gmra.mrb[42].mxu0 %vm1691_vm1, %v13369_v31 }
 0x43b   : > { %8649 = vmatprep.mubr.msk.f32.mxu0 %vm1691_vm1, %v13370_v25 }
 0x44b   : > { %v1675_v33 = vpop.trf.xlu1 }
 0x44c   : > { %8647 = vmatprep.subr.msk.mxu0 %vm1708_vm2, %v1675_v33 }
 0x44d   : > { %8648 = vmatpush3.msk.msra.mxu0 %vm1708_vm2, %v1675_v33 }
 0x44e   : > { %8650 = vmatmul.mubr.msk.f32.vlgmr.msra.gmra.mrb[44].mxu0 %vm1691_vm1, %v13371_v4 }
 0x44f   : > { %8652 = vmatprep.mubr.msk.f32.mxu0 %vm1691_vm1, %v13372_v12 }
 0x452   : > { %8653 = vmatmul.mubr.msk.f32.gmra.mrb[46].mxu0 %vm1691_vm1, %v13373_v14 }
 0x453   : > { %8655 = vmatprep.mubr.msk.f32.mxu0 %vm1691_vm1, %v13374_v22 }
 0x456   : > { %8656 = vmatmul.mubr.msk.f32.gmra.mrb[48].mxu0 %vm1691_vm1, %v13375_v34 }
 0x457   : > { %8658 = vmatprep.mubr.msk.f32.mxu0 %vm1691_vm1, %v13376_v35 }
 0x45a   : > { %8659 = vmatmul.mubr.msk.f32.gmra.mrb[50].mxu0 %vm1691_vm1, %v13377_v37 }
 0x477   : > { %v10473_v9 = vpop.permute.xlu1 %1279 }
 0x478   : > { %13378 = vst [vmem:[#allocation40_spill] sm:$0xff] %v10473_v9 }
 0x47b   : > { %v10485_v4 = vpop.permute.xlu1 %1281 }
 0x47c   : > { %13379 = vst [vmem:[#allocation20_spill] sm:$0xff] %v10485_v4 }
 0x47f   : > { %v10491_v22 = vpop.permute.xlu1 %1315 }
 0x480   : > { %13380 = vst [vmem:[#allocation32_spill] sm:$0xff] %v10491_v22 }
 0x481   : > { %v10399_v36 = vpop.f32.mrb[4].mxu1 }
 0x482   : > { %v10401_v41 = vpop.f32.mrb[5].mxu1  ;;  %v2689_v42 = vsel %vm2685_vm3, %v10399_v36, -inf }
 0x483   : > { %2690 = vmax.xlane.f32.xlu1 %v2689_v42  ;;  %v2686_v43 = vsel %vm2685_vm3, %v10401_v41, -inf }
 0x484   : > { %2687 = vmax.xlane.f32.xlu0 %v2686_v43 }
 0x485   : > { %v10407_v20 = vpop.f32.mrb[6].mxu1 }
 0x486   : > { %v10409_v45 = vpop.f32.mrb[7].mxu1  ;;  %v2695_v46 = vsel %vm2685_vm3, %v10407_v20, -inf }
 0x487   : > { %2696 = vmax.xlane.f32.xlu1 %v2695_v46  ;;  %v2692_v53 = vsel %vm2685_vm3, %v10409_v45, -inf  ;;  %v10503_v46 = vpop.permute.xlu1 %1317 }
 0x488   : > { %2693 = vmax.xlane.f32.xlu0 %v2692_v53  ;;  %13381 = vst [vmem:[#allocation38_spill] sm:$0xff] %v10503_v46 }
 0x489   : > { %v10415_v28 = vpop.f32.mrb[8].mxu1 }
 0x48a   : > { %v10417_v21 = vpop.f32.mrb[9].mxu1  ;;  %v2701_v54 = vsel %vm2685_vm3, %v10415_v28, -inf }
 0x48b   : > { %2702 = vmax.xlane.f32.xlu1 %v2701_v54  ;;  %v2698_v55 = vsel %vm2685_vm3, %v10417_v21, -inf }
 0x48c   : > { %2699 = vmax.xlane.f32.xlu0 %v2698_v55 }
 0x48d   : > { %v10423_v29 = vpop.f32.mrb[10].mxu1 }
 0x48e   : > { %v10425_v56 = vpop.f32.mrb[11].mxu1  ;;  %v2707_v38 = vsel %vm2685_vm3, %v10423_v29, -inf }
 0x48f   : > { %2708 = vmax.xlane.f32.xlu1 %v2707_v38  ;;  %v2704_v57 = vsel %vm2685_vm3, %v10425_v56, -inf }
 0x490   : > { %2705 = vmax.xlane.f32.xlu0 %v2704_v57 }
 0x4bd   : > { %v10431_v58 = vpop.f32.mrb[12].mxu1 }
 0x4be   : > { %v10433_v59 = vpop.f32.mrb[13].mxu1  ;;  %v2737_v60 = vsel %vm2685_vm3, %v10431_v58, -inf }
 0x4bf   : > { %2738 = vmax.xlane.f32.xlu1 %v2737_v60  ;;  %v2734_v11 = vsel %vm2685_vm3, %v10433_v59, -inf }
 0x4c1   : > { %v10437_v61 = vpop.f32.mrb[20].mxu0  ;;  %v10439_v62 = vpop.f32.mrb[14].mxu1 }
 0x4c2   : > { %v10441_v63 = vpop.f32.mrb[21].mxu0  ;;  %v10443_v0 = vpop.f32.mrb[15].mxu1  ;;  %v2713_v39 = vsel %vm2685_vm3, %v10437_v61, -inf  ;;  %v2743_v15 = vsel %vm2685_vm3, %v10439_v62, -inf }
 0x4c3   : > { %2714 = vmax.xlane.f32.xlu0 %v2713_v39  ;;  %v2710_v5 = vsel %vm2685_vm3, %v10441_v63, -inf  ;;  %v2740_v25 = vsel %vm2685_vm3, %v10443_v0, -inf }
 0x4c5   : > { %v10447_v48 = vpop.f32.mrb[22].mxu0  ;;  %v10449_v2 = vpop.f32.mrb[16].mxu1 }
 0x4c6   : > { %v10451_v49 = vpop.f32.mrb[23].mxu0  ;;  %v10453_v3 = vpop.f32.mrb[17].mxu1  ;;  %v2719_v52 = vsel %vm2685_vm3, %v10447_v48, -inf  ;;  %v2749_v33 = vsel %vm2685_vm3, %v10449_v2, -inf }
 0x4c7   : > { %2711 = vmax.xlane.f32.xlu0 %v2710_v5  ;;  %2720 = vmax.xlane.f32.xlu1 %v2719_v52  ;;  %v2716_v30 = vsel %vm2685_vm3, %v10451_v49, -inf  ;;  %v2746_v34 = vsel %vm2685_vm3, %v10453_v3, -inf }
 0x4c9   : > { %v10459_v17 = vpop.f32.mrb[24].mxu0  ;;  %v10461_v16 = vpop.f32.mrb[18].mxu1 }
 0x4ca   : > { %v10463_v19 = vpop.f32.mrb[25].mxu0  ;;  %v10465_v18 = vpop.f32.mrb[19].mxu1  ;;  %v2725_v31 = vsel %vm2685_vm3, %v10459_v17, -inf  ;;  %v2755_v35 = vsel %vm2685_vm3, %v10461_v16, -inf }
 0x4cb   : > { %2735 = vmax.xlane.f32.xlu0 %v2734_v11  ;;  %2744 = vmax.xlane.f32.xlu1 %v2743_v15  ;;  %v2722_v12 = vsel %vm2685_vm3, %v10463_v19, -inf  ;;  %v2752_v60 = vsel %vm2685_vm3, %v10465_v18, -inf }
 0x4cd   : > { %v10471_v13 = vpop.f32.mrb[26].mxu0 }
 0x4ce   : > { %v10475_v27 = vpop.f32.mrb[27].mxu0  ;;  %v2731_v14 = vsel %vm2685_vm3, %v10471_v13, -inf }
 0x4cf   : > { %2717 = vmax.xlane.f32.xlu0 %v2716_v30  ;;  %2726 = vmax.xlane.f32.xlu1 %v2725_v31  ;;  %v2728_v43 = vsel %vm2685_vm3, %v10475_v27, -inf  ;;  %v10529_v31 = vpop.permute.xlu1 %1319 }
 0x4d0   : > { %13383 = vst [vmem:[#allocation5_spill] sm:$0xff] %v10529_v31 }
 0x4d3   : > { %2741 = vmax.xlane.f32.xlu0 %v2740_v25  ;;  %2750 = vmax.xlane.f32.xlu1 %v2749_v33  ;;  %v10531_v25 = vpop.permute.xlu0 %1291 }
 0x4d4   : > { %13384 = vst [vmem:[#allocation31_spill] sm:$0xff] %v10531_v25 }
 0x4d7   : > { %2723 = vmax.xlane.f32.xlu0 %v2722_v12  ;;  %2732 = vmax.xlane.f32.xlu1 %v2731_v14  ;;  %v10555_v46 = vpop.permute.xlu0 %1293 }
 0x4d8   : > { %13388 = vst [vmem:[#allocation45_spill] sm:$0xff] %v10555_v46 }
 0x4db   : > { %2747 = vmax.xlane.f32.xlu0 %v2746_v34  ;;  %2756 = vmax.xlane.f32.xlu1 %v2755_v35  ;;  %v10563_v22 = vpop.permute.xlu0 %1295 }
 0x4dc   : > { %13390 = vst [vmem:[#allocation11_spill] sm:$0xff] %v10563_v22 }
 0x4dd   : > { %v10497_v37 = vpop.f32.mrb[20].mxu1 }
 0x4de   : > { %v10499_v42 = vpop.f32.mrb[21].mxu1  ;;  %v2785_v30 = vsel %vm2685_vm3, %v10497_v37, -inf }
 0x4df   : > { %2729 = vmax.xlane.f32.xlu0 %v2728_v43  ;;  %v2782_v43 = vsel %vm2685_vm3, %v10499_v42, -inf }
 0x4e1   : > { %v10505_v53 = vpop.f32.mrb[28].mxu0  ;;  %v10507_v54 = vpop.f32.mrb[22].mxu1 }
 0x4e2   : > { %v10509_v55 = vpop.f32.mrb[29].mxu0  ;;  %v10511_v38 = vpop.f32.mrb[23].mxu1  ;;  %v2761_v57 = vsel %vm2685_vm3, %v10505_v53, -inf  ;;  %v2791_v31 = vsel %vm2685_vm3, %v10507_v54, -inf }
 0x4e3   : > { %2762 = vmax.xlane.f32.xlu1 %v2761_v57  ;;  %2753 = vmax.xlane.f32.xlu0 %v2752_v60  ;;  %v2758_v15 = vsel %vm2685_vm3, %v10509_v55, -inf  ;;  %v10545_v57 = vpop.permute.xlu1 %1297 }
 0x4e4   : > { %13387 = vst [vmem:[#allocation17_spill] sm:$0xff] %v10545_v57 }
 0x4e5   : > { %v10517_v39 = vpop.f32.mrb[30].mxu0  ;;  %v10519_v5 = vpop.f32.mrb[24].mxu1 }
 0x4e6   : > { %13382 = vst [vmem:[#allocation54_spill] sm:$0xff] %v10519_v5  ;;  %v10521_v52 = vpop.f32.mrb[31].mxu0  ;;  %v10523_v11 = vpop.f32.mrb[25].mxu1  ;;  %v2767_v35 = vsel %vm2685_vm3, %v10517_v39, -inf  ;;  %v2797_v46 = vsel %vm2685_vm3, %v10519_v5, -inf }
 0x4e7   : > { %2759 = vmax.xlane.f32.xlu0 %v2758_v15  ;;  %2786 = vmax.xlane.f32.xlu1 %v2785_v30  ;;  %v2764_v30 = vsel %vm2685_vm3, %v10521_v52, -inf  ;;  %v10561_v57 = vpop.permute.xlu1 %1299 }
 0x4e8   : > { %13389 = vst [vmem:[#allocation15_spill] sm:$0xff] %v10561_v57  ;;  %v2794_v57 = vsel %vm2685_vm3, %v10523_v11, -inf }
 0x4e9   : > { %v10533_v33 = vpop.f32.mrb[32].mxu0  ;;  %v10535_v12 = vpop.f32.mrb[26].mxu1 }
 0x4ea   : > { %13385 = vst [vmem:[#allocation46_spill] sm:$0xff] %v10535_v12  ;;  %v10537_v14 = vpop.f32.mrb[33].mxu0  ;;  %v10539_v34 = vpop.f32.mrb[27].mxu1 }
 0x4eb   : > { %13386 = vst [vmem:[#allocation52_spill] sm:$0xff] %v10539_v34  ;;  %2768 = vmax.xlane.f32.xlu1 %v2767_v35  ;;  %2783 = vmax.xlane.f32.xlu0 %v2782_v43  ;;  %v2773_v35 = vsel %vm2685_vm3, %v10533_v33, -inf  ;;  %v2788_v43 = vsel %vm2685_vm3, %v10511_v38, -inf  ;;  %v2770_v4 = vsel %vm2685_vm3, %v10537_v14, -inf  ;;  %v2800_v10 = vsel %vm2685_vm3, %v10539_v34, -inf }
 0x4ed   : > { %v10547_v60 = vpop.f32.mrb[34].mxu0 }
 0x4ee   : > { %v10549_v15 = vpop.f32.mrb[35].mxu0 }
 0x4ef   : > { %2765 = vmax.xlane.f32.xlu0 %v2764_v30  ;;  %2792 = vmax.xlane.f32.xlu1 %v2791_v31  ;;  %v10569_v31 = vpop.permute.xlu1 %1323  ;;  %v2779_v30 = vsel %vm2685_vm3, %v10547_v60, -inf  ;;  %v2776_v22 = vsel %vm2685_vm3, %v10549_v15, -inf }
 0x4f0   : > { %13391 = vst [vmem:[#allocation28_spill] sm:$0xff] %v10569_v31 }
 0x4f3   : > { %2774 = vmax.xlane.f32.xlu1 %v2773_v35  ;;  %2789 = vmax.xlane.f32.xlu0 %v2788_v43  ;;  %v10575_v35 = vpop.permute.xlu0 %1321 }
 0x4f4   : > { %13392 = vst [vmem:[#allocation10_spill] sm:$0xff] %v10575_v35 }
 0x4f7   : > { %2771 = vmax.xlane.f32.xlu0 %v2770_v4  ;;  %2798 = vmax.xlane.f32.xlu1 %v2797_v46  ;;  %v2803_v4 = vsel %vm2685_vm3, %v10535_v12, -inf  ;;  %v10583_v46 = vpop.permute.xlu1 %1325  ;;  %v10587_v25 = vpop.permute.xlu0 %1301 }
 0x4f8   : > { %13394 = vst [vmem:[#allocation26_spill] sm:$0xff] %v10583_v46  ;;  %13396 = vst [vmem:[#allocation21_spill] sm:$0xff] %v10587_v25 }
 0x4fb   : > { %2780 = vmax.xlane.f32.xlu1 %v2779_v30  ;;  %2795 = vmax.xlane.f32.xlu0 %v2794_v57  ;;  %v10613_v6 = vpop.permute.xlu0 %1303 }
 0x4fc   : > { %13401 = vst [vmem:[#allocation48_spill] sm:$0xff] %v10613_v6 }
 0x4fe   : > { %v10577_v43 = vpop.f32.mrb[28].mxu1 }
 0x4ff   : > { %13393 = vst [vmem:[#allocation22_spill] sm:$0xff] %v10577_v43  ;;  %v10585_v31 = vpop.f32.mrb[29].mxu1  ;;  %2777 = vmax.xlane.f32.xlu0 %v2776_v22  ;;  %2804 = vmax.xlane.f32.xlu1 %v2803_v4  ;;  %v10601_v22 = vpop.permute.xlu1 %1327  ;;  %v2833_v8 = vsel %vm2685_vm3, %v10577_v43, -inf }
 0x500   : > { %13395 = vst [vmem:[#allocation42_spill] sm:$0xff] %v10585_v31  ;;  %13399 = vst [vmem:[#allocation56_spill] sm:$0xff] %v10601_v22  ;;  %v2830_v12 = vsel %vm2685_vm3, %v10585_v31, -inf }
 0x501   : > { %v10589_v9 = vpop.f32.mrb[36].mxu0 }
 0x502   : > { %v10591_v30 = vpop.f32.mrb[30].mxu1  ;;  %v10593_v57 = vpop.f32.mrb[37].mxu0  ;;  %v2809_v35 = vsel %vm2685_vm3, %v10589_v9, -inf }
 0x503   : > { %13397 = vst [vmem:[#allocation34_spill] sm:$0xff] %v10591_v30  ;;  %v10599_v32 = vpop.f32.mrb[31].mxu1  ;;  %2810 = vmax.xlane.f32.xlu1 %v2809_v35  ;;  %2801 = vmax.xlane.f32.xlu0 %v2800_v10  ;;  %v2806_v7 = vsel %vm2685_vm3, %v10593_v57, -inf  ;;  %v10629_v6 = vpop.permute.xlu1 %1305  ;;  %v2839_v50 = vsel %vm2685_vm3, %v10591_v30, -inf }
 0x504   : > { %13398 = vst [vmem:[#allocation39_spill] sm:$0xff] %v10599_v32  ;;  %13405 = vst [vmem:[#allocation16_spill] sm:$0xff] %v10629_v6  ;;  %v2836_v47 = vsel %vm2685_vm3, %v10599_v32, -inf }
 0x505   : > { %v10603_v4 = vpop.f32.mrb[38].mxu0 }
 0x506   : > { %v10605_v46 = vpop.f32.mrb[32].mxu1  ;;  %v10607_v25 = vpop.f32.mrb[39].mxu0  ;;  %v2815_v51 = vsel %vm2685_vm3, %v10603_v4, -inf }
 0x507   : > { %13400 = vst [vmem:[#allocation33_spill] sm:$0xff] %v10605_v46  ;;  %v10615_v26 = vpop.f32.mrb[33].mxu1  ;;  %2807 = vmax.xlane.f32.xlu0 %v2806_v7  ;;  %2834 = vmax.xlane.f32.xlu1 %v2833_v8  ;;  %v10631_v7 = vpop.permute.xlu0 %1329 }
 0x508   : > { %13402 = vst [vmem:[#allocation53_spill] sm:$0xff] %v10615_v26  ;;  %13406 = vst [vmem:[#allocation12_spill] sm:$0xff] %v10631_v7  ;;  %v2812_v7 = vsel %vm2685_vm3, %v10607_v25, -inf }
 0x509   : > { %v10617_v10 = vpop.f32.mrb[40].mxu0 }
 0x50a   : > { %v10619_v35 = vpop.f32.mrb[34].mxu1  ;;  %v10621_v22 = vpop.f32.mrb[41].mxu0  ;;  %v2821_v1 = vsel %vm2685_vm3, %v10617_v10, -inf }
 0x50b   : > { %13403 = vst [vmem:[#allocation19_spill] sm:$0xff] %v10619_v35  ;;  %v10627_v34 = vpop.f32.mrb[35].mxu1  ;;  %2816 = vmax.xlane.f32.xlu1 %v2815_v51  ;;  %2831 = vmax.xlane.f32.xlu0 %v2830_v12 }
 0x50c   : > { %13404 = vst [vmem:[#allocation47_spill] sm:$0xff] %v10627_v34 }
 0x50d   : > { %v10633_v8 = vpop.f32.mrb[42].mxu0 }
 0x50e   : > { %v10635_v43 = vpop.f32.mrb[43].mxu0 }
 0x50f   : > { %2840 = vmax.xlane.f32.xlu0 %v2839_v50  ;;  %2837 = vmax.xlane.f32.xlu1 %v2836_v47 }
 0x510   : > { %v2691_v31 = vpop.xlane.xlu1 %2690 }
 0x511   : > { %v2879_v51 = vsub.f32 %v10399_v36, %v2691_v31  ;;  %v2688_v12 = vpop.xlane.xlu0 %2687  ;;  %v2845_v36 = vsel %vm2685_vm3, %v10605_v46, -inf }
 0x512   : > { %v2878_v6 = vsub.f32 %v10401_v41, %v2688_v12  ;;  %v2842_v41 = vsel %vm2685_vm3, %v10615_v26, -inf }
 0x513   : > { %v2944_v44 = vmul.f32 1.442695, %v2879_v51  ;;  %2813 = vmax.xlane.f32.xlu0 %v2812_v7  ;;  %2822 = vmax.xlane.f32.xlu1 %v2821_v1  ;;  %v2818_v1 = vsel %vm2685_vm3, %v10621_v22, -inf }
 0x514   : > { %v2942_v30 = vmul.f32 1.442695, %v2878_v6  ;;  %v2697_v5 = vpop.xlane.xlu1 %2696 }
 0x515   : > { %9145 = vpow2.f32 %v2944_v44  ;;  %v2881_v47 = vsub.f32 %v10407_v20, %v2697_v5  ;;  %v2694_v50 = vpop.xlane.xlu0 %2693 }
 0x516   : > { %9147 = vpow2.f32 %v2942_v30  ;;  %v2880_v44 = vsub.f32 %v10409_v45, %v2694_v50 }
 0x517   : > { %v2948_v31 = vmul.f32 1.442695, %v2881_v47  ;;  %2846 = vmax.xlane.f32.xlu0 %v2845_v36  ;;  %2843 = vmax.xlane.f32.xlu1 %v2842_v41 }
 0x518   : > { %v2946_v47 = vmul.f32 1.442695, %v2880_v44  ;;  %v2703_v41 = vpop.xlane.xlu1 %2702  ;;  %v2851_v44 = vsel %vm2685_vm3, %v10619_v35, -inf }
 0x519   : > { %v2700_v12 = vpop.xlane.xlu0 %2699  ;;  %9149 = vpow2.f32 %v2948_v31 }
 0x51a   : > { %v2882_v6 = vsub.f32 %v10417_v21, %v2700_v12  ;;  %v2827_v12 = vsel %vm2685_vm3, %v10633_v8, -inf }
 0x51b   : > { %2819 = vmax.xlane.f32.xlu0 %v2818_v1 }
 0x51c   : > { %v2950_v30 = vmul.f32 1.442695, %v2882_v6 }
 0x51d   : > { %v2706_v20 = vpop.xlane.xlu0 %2705 }
 0x51e   : > { %v2884_v7 = vsub.f32 %v10425_v56, %v2706_v20  ;;  %9151 = vpow2.f32 %v2950_v30  ;;  %v2883_v56 = vsub.f32 %v10415_v28, %v2703_v41 }
 0x51f   : > { %v10656_v5 = vpop.eup %9145  ;;  %9153 = vpow2.f32 %v2946_v47  ;;  %v2824_v47 = vsel %vm2685_vm3, %v10635_v43, -inf }
 0x520   : > { %v10659_v51 = vpop.eup %9147  ;;  %v3073_v36 = vsel %vm2685_vm3, %v10656_v5, 0.0  ;;  %v2954_v50 = vmul.f32 1.442695, %v2884_v7  ;;  %v2952_v30 = vmul.f32 1.442695, %v2883_v56 }
 0x521   : > { %3074 = vadd.xlane.f32.xlu1 %v3073_v36  ;;  %v10663_v31 = vpop.f32.mrb[44].mxu0  ;;  %v3070_v21 = vsel %vm2685_vm3, %v10659_v51, 0.0 }
 0x522   : > { %3071 = vadd.xlane.f32.xlu0 %v3070_v21  ;;  %v10667_v45 = vpop.f32.mrb[45].mxu0  ;;  %9155 = vpow2.f32 %v2954_v50  ;;  %v2857_v41 = vsel %vm2685_vm3, %v10663_v31, -inf  ;;  %v2709_v50 = vpop.xlane.xlu1 %2708 }
 0x523   : > { %v10672_v1 = vpop.eup %9149  ;;  %9157 = vpow2.f32 %v2952_v30 }
 0x524   : > { %v3079_v7 = vsel %vm2685_vm3, %v10672_v1, 0.0 }
 0x525   : > { %2828 = vmax.xlane.f32.xlu1 %v2827_v12  ;;  %v10674_v6 = vpop.f32.mrb[46].mxu0  ;;  %v2848_v12 = vsel %vm2685_vm3, %v10627_v34, -inf }
 0x526   : > { %13407 = vst [vmem:[#allocation30_spill] sm:$0xff] %v10674_v6  ;;  %2852 = vmax.xlane.f32.xlu0 %v2851_v44  ;;  %v10678_v20 = vpop.f32.mrb[47].mxu0 }
 0x527   : > { %13408 = vst [vmem:[#allocation13_spill] sm:$0xff] %v10678_v20 }
 0x528   : > { %v10690_v21 = vpop.eup %9151 }
 0x529   : > { %3080 = vadd.xlane.f32.xlu1 %v3079_v7  ;;  %v10682_v28 = vpop.f32.mrb[48].mxu0  ;;  %v10696_v44 = vpop.eup %9153  ;;  %v3082_v30 = vsel %vm2685_vm3, %v10690_v21, 0.0 }
 0x52a   : > { %13409 = vst [vmem:[#allocation23_spill] sm:$0xff] %v10682_v28  ;;  %2825 = vmax.xlane.f32.xlu0 %v2824_v47  ;;  %v10686_v36 = vpop.f32.mrb[49].mxu0  ;;  %v2885_v47 = vsub.f32 %v10423_v29, %v2709_v50  ;;  %v2863_v50 = vsel %vm2685_vm3, %v10674_v6, -inf }
 0x52b   : > { %13410 = vst [vmem:[#allocation27_spill] sm:$0xff] %v10686_v36 }
 0x52c   : > { %v10703_v35 = vpop.eup %9155  ;;  %v2956_v46 = vmul.f32 1.442695, %v2885_v47  ;;  %v13203_v47 = vmov 0.0|0.0  }
 0x52d   : > { %2858 = vmax.xlane.f32.xlu1 %v2857_v41  ;;  %v10692_v56 = vpop.f32.mrb[50].mxu0  ;;  %v3076_v41 = vsel %vm2685_vm3, %v10696_v44, 0.0  ;;  %v3088_v34 = vsel %vm2685_vm3, %v10703_v35, 0.0  ;;  %v10711_v26 = vpop.eup %9157  ;;  %8921 = vmatprep.subr.bf16.mxu1 %v13203_v47 }
 0x52e   : > { %13411 = vst [vmem:[#allocation44_spill] sm:$0xff] %v10692_v56  ;;  %2849 = vmax.xlane.f32.xlu0 %v2848_v12  ;;  %v10698_v7 = vpop.f32.mrb[51].mxu0  ;;  %v2854_v12 = vsel %vm2685_vm3, %v10667_v45, -inf  ;;  %9159 = vpow2.f32 %v2956_v46  ;;  %v3085_v29 = vsel %vm2685_vm3, %v10711_v26, 0.0  ;;  %8937 = vmatprep.subr.bf16.mxu0 %v13203_v47  ;;  %v2875_v6 = vsel %vm2685_vm3, %v10692_v56, -inf }
 0x52f   : > { %13412 = vst [vmem:[#allocation24_spill] sm:$0xff] %v10698_v7 }
 0x531   : > { %3083 = vadd.xlane.f32.xlu1 %v3082_v30 }
 0x532   : > { %3077 = vadd.xlane.f32.xlu0 %v3076_v41  ;;  %v2869_v41 = vsel %vm2685_vm3, %v10682_v28, -inf }
 0x535   : > { %3089 = vadd.xlane.f32.xlu1 %v3088_v34  ;;  %v2860_v34 = vsel %vm2685_vm3, %v10678_v20, -inf }
 0x536   : > { %2855 = vmax.xlane.f32.xlu0 %v2854_v12 }
 0x538   : > { %v10721_v30 = vpop.eup %9159 }
 0x539   : > { %v3091_v46 = vsel %vm2685_vm3, %v10721_v30, 0.0 }
 0x53a   : > { %3086 = vadd.xlane.f32.xlu0 %v3085_v29 }
 0x53e   : > { %2864 = vmax.xlane.f32.xlu0 %v2863_v50  ;;  %v2866_v50 = vsel %vm2685_vm3, %v10686_v36, -inf }
 0x542   : > { %2861 = vmax.xlane.f32.xlu0 %v2860_v34 }
 0x546   : > { %3092 = vadd.xlane.f32.xlu0 %v3091_v46 }
 0x54a   : > { %2870 = vmax.xlane.f32.xlu0 %v2869_v41 }
 0x54c   : > { %v2739_v12 = vpop.xlane.xlu1 %2738 }
 0x54d   : > { %v2895_v29 = vsub.f32 %v10431_v58, %v2739_v12  ;;  %v2872_v58 = vsel %vm2685_vm3, %v10698_v7, -inf }
 0x54e   : > { %2867 = vmax.xlane.f32.xlu0 %v2866_v50 }
 0x54f   : > { %v2976_v47 = vmul.f32 1.442695, %v2895_v29 }
 0x550   : > { %v2715_v20 = vpop.xlane.xlu0 %2714 }
 0x551   : > { %9161 = vpow2.f32 %v2976_v47  ;;  %v2887_v34 = vsub.f32 %v10437_v61, %v2715_v20 }
 0x552   : > { %2876 = vmax.xlane.f32.xlu0 %v2875_v6 }
 0x553   : > { %v2960_v46 = vmul.f32 1.442695, %v2887_v34 }
 0x554   : > { %v2721_v32 = vpop.xlane.xlu1 %2720  ;;  %v2712_v28 = vpop.xlane.xlu0 %2711 }
 0x555   : > { %9163 = vpow2.f32 %v2960_v46  ;;  %v2886_v41 = vsub.f32 %v10441_v63, %v2712_v28  ;;  %v2889_v29 = vsub.f32 %v10447_v48, %v2721_v32 }
 0x556   : > { %2873 = vmax.xlane.f32.xlu0 %v2872_v58 }
 0x557   : > { %v2958_v12 = vmul.f32 1.442695, %v2886_v41  ;;  %v2964_v56 = vmul.f32 1.442695, %v2889_v29 }
 0x558   : > { %v2745_v47 = vpop.xlane.xlu1 %2744  ;;  %v2736_v50 = vpop.xlane.xlu0 %2735 }
 0x559   : > { %v2897_v61 = vsub.f32 %v10439_v62, %v2745_v47  ;;  %v2894_v20 = vsub.f32 %v10433_v59, %v2736_v50  ;;  %9165 = vpow2.f32 %v2958_v12 }
 0x55b   : > { %v10739_v6 = vpop.eup %9161  ;;  %v2980_v34 = vmul.f32 1.442695, %v2897_v61  ;;  %v2974_v46 = vmul.f32 1.442695, %v2894_v20 }
 0x55c   : > { %13413 = vst [vmem:[#allocation36_spill] sm:$0xff] %v10739_v6  ;;  %v2727_v63 = vpop.xlane.xlu1 %2726  ;;  %v2718_v28 = vpop.xlane.xlu0 %2717  ;;  %v3121_v58 = vsel %vm2685_vm3, %v10739_v6, 0.0 }
 0x55d   : > { %9167 = vpow2.f32 %v2980_v34  ;;  %v2888_v32 = vsub.f32 %v10451_v49, %v2718_v28  ;;  %3122 = vadd.xlane.f32.xlu0 %v3121_v58  ;;  %v2891_v59 = vsub.f32 %v10459_v17, %v2727_v63 }
 0x55e   : > { %9169 = vpow2.f32 %v2974_v46 }
 0x55f   : > { %v10744_v48 = vpop.eup %9163  ;;  %v2962_v62 = vmul.f32 1.442695, %v2888_v32  ;;  %9171 = vpow2.f32 %v2964_v56  ;;  %v2968_v34 = vmul.f32 1.442695, %v2891_v59 }
 0x560   : > { %v2751_v41 = vpop.xlane.xlu1 %2750  ;;  %v2742_v12 = vpop.xlane.xlu0 %2741  ;;  %v3097_v29 = vsel %vm2685_vm3, %v10744_v48, 0.0 }
 0x561   : > { %v2899_v47 = vsub.f32 %v10449_v2, %v2751_v41  ;;  %v2896_v50 = vsub.f32 %v10443_v0, %v2742_v12  ;;  %3098 = vadd.xlane.f32.xlu1 %v3097_v29  ;;  %9173 = vpow2.f32 %v2962_v62 }
 0x563   : > { %v2984_v49 = vmul.f32 1.442695, %v2899_v47  ;;  %v2978_v61 = vmul.f32 1.442695, %v2896_v50  ;;  %v10751_v20 = vpop.eup %9165 }
 0x564   : > { %v2733_v46 = vpop.xlane.xlu1 %2732  ;;  %v2724_v56 = vpop.xlane.xlu0 %2723  ;;  %v3094_v63 = vsel %vm2685_vm3, %v10751_v20, 0.0 }
 0x565   : > { %9175 = vpow2.f32 %v2984_v49  ;;  %v2890_v17 = vsub.f32 %v10463_v19, %v2724_v56  ;;  %3095 = vadd.xlane.f32.xlu0 %v3094_v63  ;;  %v2893_v58 = vsub.f32 %v10471_v13, %v2733_v46 }
 0x566   : > { %9177 = vpow2.f32 %v2978_v61 }
 0x567   : > { %v10756_v2 = vpop.eup %9167  ;;  %v2966_v0 = vmul.f32 1.442695, %v2890_v17  ;;  %9179 = vpow2.f32 %v2968_v34  ;;  %v2972_v49 = vmul.f32 1.442695, %v2893_v58 }
 0x568   : > { %13414 = vst [vmem:[#allocation41_spill] sm:$0xff] %v10756_v2  ;;  %v10758_v28 = vpop.eup %9169  ;;  %v2757_v32 = vpop.xlane.xlu1 %2756  ;;  %v3127_v59 = vsel %vm2685_vm3, %v10756_v2, 0.0 }
 0x569   : > { %13415 = vst [vmem:[#allocation58_spill] sm:$0xff] %v10758_v28  ;;  %v2748_v62 = vpop.xlane.xlu0 %2747  ;;  %v2901_v19 = vsub.f32 %v10461_v16, %v2757_v32  ;;  %v3118_v12 = vsel %vm2685_vm3, %v10758_v28, 0.0  ;;  %v10767_v29 = vpop.eup %9171  ;;  %9181 = vpow2.f32 %v2966_v0  ;;  %3128 = vadd.xlane.f32.xlu0 %v3127_v59 }
 0x56a   : > { %v2898_v41 = vsub.f32 %v10453_v3, %v2748_v62  ;;  %3119 = vadd.xlane.f32.xlu1 %v3118_v12  ;;  %v3103_v3 = vsel %vm2685_vm3, %v10767_v29, 0.0 }
 0x56b   : > { %v2988_v47 = vmul.f32 1.442695, %v2901_v19  ;;  %v10769_v13 = vpop.eup %9173 }
 0x56c   : > { %v2982_v50 = vmul.f32 1.442695, %v2898_v41  ;;  %v3100_v16 = vsel %vm2685_vm3, %v10769_v13, 0.0 }
 0x56d   : > { %v2730_v61 = vpop.xlane.xlu0 %2729  ;;  %9183 = vpow2.f32 %v2988_v47  ;;  %3101 = vadd.xlane.f32.xlu0 %v3100_v16 }
 0x56e   : > { %v2892_v34 = vsub.f32 %v10475_v27, %v2730_v61  ;;  %9185 = vpow2.f32 %v2982_v50  ;;  %3104 = vadd.xlane.f32.xlu1 %v3103_v3 }
 0x56f   : > { %v10776_v46 = vpop.eup %9175  ;;  %9187 = vpow2.f32 %v2972_v49 }
 0x570   : > { %v2970_v56 = vmul.f32 1.442695, %v2892_v34  ;;  %v10778_v17 = vpop.eup %9177  ;;  %v2763_v63 = vpop.xlane.xlu1 %2762  ;;  %v3133_v27 = vsel %vm2685_vm3, %v10776_v46, 0.0 }
 0x571   : > { %13416 = vst [vmem:[#allocation35_spill] sm:$0xff] %v10778_v17  ;;  %v2754_v0 = vpop.xlane.xlu0 %2753  ;;  %v2903_v58 = vsub.f32 %v10505_v53, %v2763_v63  ;;  %v3124_v62 = vsel %vm2685_vm3, %v10778_v17, 0.0  ;;  %v10786_v59 = vpop.eup %9179 }
 0x572   : > { %9189 = vpow2.f32 %v2970_v56  ;;  %v2900_v32 = vsub.f32 %v10465_v18, %v2754_v0  ;;  %3134 = vadd.xlane.f32.xlu1 %v3133_v27  ;;  %3125 = vadd.xlane.f32.xlu0 %v3124_v62  ;;  %v3109_v53 = vsel %vm2685_vm3, %v10786_v59, 0.0 }
 0x573   : > { %v10788_v41 = vpop.eup %9181  ;;  %v2992_v12 = vmul.f32 1.442695, %v2903_v58 }
 0x574   : > { %v2986_v19 = vmul.f32 1.442695, %v2900_v32  ;;  %v10790_v47 = vpop.xlane.xlu1 %2786  ;;  %v3106_v18 = vsel %vm2685_vm3, %v10788_v41, 0.0 }
 0x575   : > { %v2760_v50 = vpop.xlane.xlu0 %2759 }
 0x576   : > { %v2902_v49 = vsub.f32 %v10509_v55, %v2760_v50  ;;  %9191 = vpow2.f32 %v2986_v19  ;;  %3110 = vadd.xlane.f32.xlu0 %v3109_v53  ;;  %3107 = vadd.xlane.f32.xlu1 %v3106_v18 }
 0x577   : > { %v10797_v61 = vpop.eup %9183  ;;  %9193 = vpow2.f32 %v2992_v12 }
 0x578   : > { %v10799_v34 = vpop.eup %9185  ;;  %v2990_v3 = vmul.f32 1.442695, %v2902_v49  ;;  %v2769_v16 = vpop.xlane.xlu1 %2768  ;;  %v3139_v55 = vsel %vm2685_vm3, %v10797_v61, 0.0 }
 0x579   : > { %v2784_v56 = vpop.xlane.xlu0 %2783  ;;  %v2905_v63 = vsub.f32 %v10517_v39, %v2769_v16  ;;  %v3130_v27 = vsel %vm2685_vm3, %v10799_v34, 0.0  ;;  %v10807_v58 = vpop.eup %9187 }
 0x57a   : > { %v2910_v0 = vsub.f32 %v10499_v42, %v2784_v56  ;;  %3140 = vadd.xlane.f32.xlu1 %v3139_v55  ;;  %3131 = vadd.xlane.f32.xlu0 %v3130_v27  ;;  %9195 = vpow2.f32 %v2990_v3  ;;  %v3115_v49 = vsel %vm2685_vm3, %v10807_v58, 0.0 }
 0x57b   : > { %v2996_v19 = vmul.f32 1.442695, %v2905_v63 }
 0x57c   : > { %v10809_v32 = vpop.eup %9189  ;;  %v3006_v62 = vmul.f32 1.442695, %v2910_v0  ;;  %v10811_v12 = vpop.xlane.xlu1 %2792 }
 0x57d   : > { %v2766_v50 = vpop.xlane.xlu0 %2765  ;;  %v3112_v39 = vsel %vm2685_vm3, %v10809_v32, 0.0 }
 0x57e   : > { %v2904_v42 = vsub.f32 %v10521_v52, %v2766_v50  ;;  %9197 = vpow2.f32 %v3006_v62  ;;  %3116 = vadd.xlane.f32.xlu0 %v3115_v49  ;;  %3113 = vadd.xlane.f32.xlu1 %v3112_v39 }
 0x57f   : > { %9199 = vpow2.f32 %v2996_v19 }
 0x580   : > { %v10818_v53 = vpop.eup %9191  ;;  %v2994_v18 = vmul.f32 1.442695, %v2904_v42  ;;  %v2775_v3 = vpop.xlane.xlu1 %2774 }
 0x581   : > { %v2790_v16 = vpop.xlane.xlu0 %2789  ;;  %v2907_v56 = vsub.f32 %v10533_v33, %v2775_v3  ;;  %v3136_v55 = vsel %vm2685_vm3, %v10818_v53, 0.0  ;;  %v10823_v63 = vpop.eup %9193 }
 0x582   : > { %3137 = vadd.xlane.f32.xlu0 %v3136_v55  ;;  %9201 = vpow2.f32 %v2994_v18  ;;  %v3145_v19 = vsel %vm2685_vm3, %v10823_v63, 0.0 }
 0x583   : > { %v3000_v52 = vmul.f32 1.442695, %v2907_v56 }
 0x584   : > { %v10825_v0 = vpop.xlane.xlu1 %2798  ;;  %v10830_v50 = vpop.eup %9195 }
 0x585   : > { %v2772_v27 = vpop.xlane.xlu0 %2771  ;;  %9203 = vpow2.f32 %v3000_v52  ;;  %v3142_v3 = vsel %vm2685_vm3, %v10830_v50, 0.0 }
 0x586   : > { %v2906_v62 = vsub.f32 %v10537_v14, %v2772_v27  ;;  %3146 = vadd.xlane.f32.xlu0 %v3145_v19 }
 0x588   : > { %v10832_v33 = vpop.eup %9197  ;;  %v2998_v39 = vmul.f32 1.442695, %v2906_v62  ;;  %v2781_v42 = vpop.xlane.xlu1 %2780 }
 0x589   : > { %v10834_v49 = vpop.xlane.xlu0 %2795  ;;  %v2909_v18 = vsub.f32 %v10547_v60, %v2781_v42  ;;  %v3166_v14 = vsel %vm2685_vm3, %v10832_v33, 0.0  ;;  %v10841_v56 = vpop.eup %9199  ;;  %v2911_v42 = vsub.f32 %v10497_v37, %v10790_v47 }
 0x58a   : > { %13417 = vst [vmem:[#allocation50_spill] sm:$0xff] %v10841_v56  ;;  %3143 = vadd.xlane.f32.xlu0 %v3142_v3  ;;  %3167 = vadd.xlane.f32.xlu1 %v3166_v14  ;;  %9205 = vpow2.f32 %v2998_v39  ;;  %v3151_v60 = vsel %vm2685_vm3, %v10841_v56, 0.0 }
 0x58b   : > { %v3004_v55 = vmul.f32 1.442695, %v2909_v18 }
 0x58c   : > { %v10843_v27 = vpop.xlane.xlu1 %2804  ;;  %v10848_v19 = vpop.eup %9201 }
 0x58d   : > { %v2778_v52 = vpop.xlane.xlu0 %2777  ;;  %13418 = vst [vmem:[#allocation55_spill] sm:$0xff] %v10848_v19  ;;  %9207 = vpow2.f32 %v3004_v55  ;;  %v3148_v39 = vsel %vm2685_vm3, %v10848_v19, 0.0 }
 0x58e   : > { %v2908_v62 = vsub.f32 %v10549_v15, %v2778_v52  ;;  %3152 = vadd.xlane.f32.xlu0 %v3151_v60  ;;  %v2912_v15 = vsub.f32 %v10511_v38, %v2790_v16  ;;  %v3008_v52 = vmul.f32 1.442695, %v2911_v42  ;;  %v2913_v38 = vsub.f32 %v10507_v54, %v10811_v12 }
 0x58f   : > { %v10856_v18 = vpop.eup %9203 }
 0x590   : > { %v3002_v2 = vmul.f32 1.442695, %v2908_v62  ;;  %v2811_v3 = vpop.xlane.xlu1 %2810  ;;  %v3157_v55 = vsel %vm2685_vm3, %v10856_v18, 0.0  ;;  %v3010_v19 = vmul.f32 1.442695, %v2912_v15 }
 0x591   : > { %v10852_v14 = vpop.xlane.xlu0 %2801  ;;  %v2919_v60 = vsub.f32 %v10589_v9, %v2811_v3  ;;  %v3012_v3 = vmul.f32 1.442695, %v2913_v38 }
 0x592   : > { %3149 = vadd.xlane.f32.xlu0 %v3148_v39  ;;  %9209 = vpow2.f32 %v3002_v2 }
 0x593   : > { %9211 = vpow2.f32 %v3008_v52  ;;  %v3024_v2 = vmul.f32 1.442695, %v2919_v60 }
 0x594   : > { %v10860_v56 = vpop.xlane.xlu1 %2834  ;;  %v10865_v62 = vpop.eup %9205 }
 0x595   : > { %v2808_v37 = vpop.xlane.xlu0 %2807  ;;  %v3154_v42 = vsel %vm2685_vm3, %v10865_v62, 0.0 }
 0x596   : > { %v2918_v47 = vsub.f32 %v10593_v57, %v2808_v37  ;;  %3158 = vadd.xlane.f32.xlu0 %v3157_v55 }
 0x597   : > { %v10873_v57 = vpop.eup %9207 }
 0x598   : > { %v3022_v17 = vmul.f32 1.442695, %v2918_v47  ;;  %v2817_v16 = vpop.xlane.xlu1 %2816  ;;  %v3163_v54 = vsel %vm2685_vm3, %v10873_v57, 0.0 }
 0x599   : > { %v10869_v9 = vpop.xlane.xlu0 %2831  ;;  %v2921_v39 = vsub.f32 %v10603_v4, %v2817_v16 }
 0x59a   : > { %9213 = vpow2.f32 %v3022_v17  ;;  %3155 = vadd.xlane.f32.xlu0 %v3154_v42 }
 0x59b   : > { %9215 = vpow2.f32 %v3010_v19  ;;  %v3028_v60 = vmul.f32 1.442695, %v2921_v39 }
 0x59c   : > { %9217 = vpow2.f32 %v3024_v2  ;;  %v10880_v12 = vpop.eup %9209  ;;  %v10882_v52 = vpop.xlane.xlu1 %2837 }
 0x59d   : > { %v10876_v15 = vpop.xlane.xlu0 %2840  ;;  %9219 = vpow2.f32 %v3012_v3  ;;  %v3160_v19 = vsel %vm2685_vm3, %v10880_v12, 0.0  ;;  %v10887_v47 = vpop.eup %9211 }
 0x59e   : > { %3164 = vadd.xlane.f32.xlu0 %v3163_v54  ;;  %9221 = vpow2.f32 %v3028_v60  ;;  %v3169_v42 = vsel %vm2685_vm3, %v10887_v47, 0.0 }
 0x5a0   : > { %v10891_v38 = vpop.xlane.xlu1 %2822 }
 0x5a1   : > { %v2814_v37 = vpop.xlane.xlu0 %2813 }
 0x5a2   : > { %v2920_v17 = vsub.f32 %v10607_v25, %v2814_v37  ;;  %3161 = vadd.xlane.f32.xlu0 %v3160_v19 }
 0x5a4   : > { %v3026_v4 = vmul.f32 1.442695, %v2920_v17  ;;  %v10889_v55 = vpop.eup %9213  ;;  %v10909_v37 = vpop.xlane.xlu1 %2843 }
 0x5a5   : > { %v10893_v2 = vpop.eup %9215  ;;  %v10895_v16 = vpop.xlane.xlu0 %2846  ;;  %v3190_v25 = vsel %vm2685_vm3, %v10889_v55, 0.0  ;;  %13422 = vst [vmem:[#allocation29_spill] sm:$0xff] %v10909_v37 }
 0x5a6   : > { %13419 = vst [vmem:[#allocation49_spill] sm:$0xff] %v10893_v2  ;;  %13420 = vst [vmem:[#allocation18_spill] sm:$0xff] %v10895_v16  ;;  %v10901_v3 = vpop.eup %9217  ;;  %9223 = vpow2.f32 %v3026_v4  ;;  %3170 = vadd.xlane.f32.xlu0 %v3169_v42  ;;  %3191 = vadd.xlane.f32.xlu1 %v3190_v25  ;;  %v3172_v54 = vsel %vm2685_vm3, %v10893_v2, 0.0 }
 0x5a7   : > { %v3193_v39 = vsel %vm2685_vm3, %v10901_v3, 0.0  ;;  %v10907_v60 = vpop.eup %9219 }
 0x5a8   : > { %13421 = vst [vmem:[#allocation14_spill] sm:$0xff] %v10907_v60  ;;  %v3175_v19 = vsel %vm2685_vm3, %v10907_v60, 0.0  ;;  %v10915_v4 = vpop.eup %9221 }
 0x5a9   : > { %v10911_v17 = vpop.xlane.xlu0 %2819  ;;  %v3199_v2 = vsel %vm2685_vm3, %v10915_v4, 0.0 }
 0x5aa   : > { %3194 = vadd.xlane.f32.xlu0 %v3193_v39  ;;  %3173 = vadd.xlane.f32.xlu1 %v3172_v54 }
 0x5ae   : > { %v3075_v42 = vpop.xlane.xlu1 %3074  ;;  %3176 = vadd.xlane.f32.xlu0 %v3175_v19 }
 0x5af   : > { %9225 = vrcp.f32 %v3075_v42  ;;  %v3072_v25 = vpop.xlane.xlu0 %3071 }
 0x5b0   : > { %v10917_v6 = vpop.eup %9223  ;;  %9227 = vrcp.f32 %v3072_v25 }
 0x5b1   : > { %v3196_v39 = vsel %vm2685_vm3, %v10917_v6, 0.0 }
 0x5b2   : > { %v10923_v54 = vpop.xlane.xlu1 %2828  ;;  %3200 = vadd.xlane.f32.xlu0 %v3199_v2  ;;  %3197 = vadd.xlane.f32.xlu1 %v3196_v39 }
 0x5b3   : > { %v10927_v28 = vpop.xlane.xlu0 %2852 }
 0x5b4   : > { %13423 = vst [vmem:[#allocation25_spill] sm:$0xff] %v10927_v28 }
 0x5b6   : > { %v3081_v19 = vpop.xlane.xlu1 %3080 }
 0x5b7   : > { %v10929_v42 = vpop.xlane.xlu0 %2825  ;;  %9229 = vrcp.f32 %v3081_v19 }
 0x5b9   : > { %v9226_v7 = vpop.eup %9225 }
 0x5ba   : > { %v9228_v25 = vpop.eup %9227  ;;  %v3265_v16 = vmul.f32 %v9226_v7, %v10656_v5  ;;  %v10932_v36 = vpop.xlane.xlu1 %2858  ;;  %v13427_v7 = vmov 0.0|0.0  }
 0x5bb   : > { %v3263_v37 = vmul.f32 %v9228_v25, %v10659_v51  ;;  %v10937_v39 = vpop.xlane.xlu0 %2849 }
 0x5bc   : > { %13424 = vst [vmem:[#allocation43_spill] sm:$0xff] %v10937_v39 }
 0x5bd   : > { %v8922_v28 = vpack.c.bf16 %v3265_v16, %v3263_v37 }
 0x5be   : > { %v3084_v25 = vpop.xlane.xlu1 %3083 }
 0x5bf   : > { %8924 = vmatpush3.bf16.xpose.msk.msra.mxu1 %vm10941_vm4, %v8922_v28  ;;  %v3078_v5 = vpop.xlane.xlu0 %3077 }
 0x5c0   : > { %8925 = vmatprep.subr.bf16.mxu1 %v13427_v7  ;;  %9231 = vrcp.f32 %v3078_v5 }
 0x5c1   : > { %9233 = vrcp.f32 %v3084_v25  ;;  %v9230_v28 = vpop.eup %9229 }
 0x5c2   : > { %v3269_v19 = vmul.f32 %v9230_v28, %v10672_v1  ;;  %v2914_v28 = vsub.f32 %v10523_v11, %v10834_v49 }
 0x5c3   : > { %1339 = vrot.lane.b32.xlu1 %v9773_v23, %s9470_s28  ;;  %v10950_v51 = vpop.xlane.xlu0 %2855 }
 0x5c7   : > { %1341 = vrot.lane.b32.xlu1 %v13323_v24, %s9470_s28  ;;  %v3087_v2 = vpop.xlane.xlu0 %3086 }
 0x5c8   : > { %1363 = vrot.lane.b32.xlu0 %v9773_v23, %s9467_s25  ;;  %9235 = vrcp.f32 %v3087_v2  ;;  %v3090_v2 = vpop.xlane.xlu1 %3089 }
 0x5c9   : > { %9237 = vrcp.f32 %v3090_v2 }
 0x5ca   : > { %v9232_v37 = vpop.eup %9231 }
 0x5cb   : > { %1365 = vrot.lane.b32.xlu1 %v13323_v24, %s9467_s25  ;;  %v10958_v16 = vpop.xlane.xlu0 %2864  ;;  %v3267_v5 = vmul.f32 %v9232_v37, %v10696_v44  ;;  %v9234_v23 = vpop.eup %9233 }
 0x5cc   : > { %13428 = vst [vmem:[#allocation37_spill] sm:$0xff] %v10958_v16  ;;  %1343 = vrot.lane.b32.xlu0 %v13328_v40, %s9470_s28  ;;  %v3271_v1 = vmul.f32 %v9234_v23, %v10690_v21  ;;  %v13429_v23 = vld [vmem:[#allocation54_spill] sm:$0xff] }
 0x5cd   : > { %v8926_v25 = vpack.c.bf16 %v3269_v19, %v3267_v5  ;;  %v3014_v19 = vmul.f32 1.442695, %v2914_v28  ;;  %v2922_v5 = vsub.f32 %v10621_v22, %v10911_v17  ;;  %v2915_v21 = vsub.f32 %v13429_v23, %v10825_v0 }
 0x5cf   : > { %1367 = vrot.lane.b32.xlu1 %v13328_v40, %s9467_s25  ;;  %v10966_v39 = vpop.xlane.xlu0 %2861  ;;  %8928 = vmatpush3.bf16.xpose.msk.msra.mxu1 %vm10941_vm4, %v8926_v25  ;;  %v3030_v11 = vmul.f32 1.442695, %v2922_v5  ;;  %v3016_v22 = vmul.f32 1.442695, %v2915_v21 }
 0x5d0   : > { %8929 = vmatprep.subr.bf16.mxu1 %v13427_v7 }
 0x5d2   : > { %v9236_v24 = vpop.eup %9235 }
 0x5d3   : > { %v3093_v16 = vpop.xlane.xlu0 %3092  ;;  %v3273_v44 = vmul.f32 %v9236_v24, %v10711_v26  ;;  %v9238_v26 = vpop.eup %9237  ;;  %v2923_v24 = vsub.f32 %v10617_v10, %v10891_v38 }
 0x5d4   : > { %9239 = vrcp.f32 %v3093_v16  ;;  %v3275_v17 = vmul.f32 %v9238_v26, %v10703_v35 }
 0x5d5   : > { %v8930_v37 = vpack.c.bf16 %v3273_v44, %v3271_v1  ;;  %9241 = vpow2.f32 %v3014_v19  ;;  %v3032_v1 = vmul.f32 1.442695, %v2923_v24 }
 0x5d6   : > { %9243 = vpow2.f32 %v3030_v11 }
 0x5d7   : > { %8932 = vmatpush3.bf16.xpose.msk.msra.mxu1 %vm10941_vm4, %v8930_v37  ;;  %v10979_v25 = vpop.xlane.xlu0 %2870  ;;  %9245 = vpow2.f32 %v3016_v22 }
 0x5d8   : > { %8933 = vmatprep.subr.bf16.mxu1 %v13427_v7  ;;  %9247 = vpow2.f32 %v3032_v1 }
 0x5db   : > { %v10986_v16 = vpop.xlane.xlu0 %2867 }
 0x5de   : > { %v9240_v49 = vpop.eup %9239 }
 0x5df   : > { %v3277_v2 = vmul.f32 %v9240_v49, %v10721_v30  ;;  %v10992_v0 = vpop.xlane.xlu0 %2876  ;;  %v10995_v10 = vpop.eup %9241 }
 0x5e0   : > { %v3178_v38 = vsel %vm2685_vm3, %v10995_v10, 0.0  ;;  %v10999_v35 = vpop.eup %9243 }
 0x5e1   : > { %v8934_v44 = vpack.c.bf16 %v3277_v2, %v3275_v17  ;;  %v11003_v28 = vpop.eup %9245  ;;  %v3202_v37 = vsel %vm2685_vm3, %v10999_v35, 0.0 }
 0x5e2   : > { %v11007_v19 = vpop.eup %9247  ;;  %v3181_v21 = vsel %vm2685_vm3, %v11003_v28, 0.0 }
 0x5e3   : > { %8936 = vmatpush3.bf16.xpose.msk.msra.mxu1 %vm10941_vm4, %v8934_v44  ;;  %v11001_v30 = vpop.xlane.xlu0 %2873  ;;  %v3205_v26 = vsel %vm2685_vm3, %v11007_v19, 0.0 }
 0x5e4   : > { %8953 = vmatprep.subr.bf16.mxu1 %v13427_v7 }
 0x5ea   : > { %v11009_v5 = vpop.xlane.xlu0 %3122 }
 0x5eb   : > { %3179 = vadd.xlane.f32.xlu0 %v3178_v38 }
 0x5ee   : > { %v3099_v23 = vpop.xlane.xlu1 %3098 }
 0x5ef   : > { %3203 = vadd.xlane.f32.xlu0 %v3202_v37  ;;  %9249 = vrcp.f32 %v3099_v23 }
 0x5f2   : > { %v3096_v24 = vpop.xlane.xlu0 %3095 }
 0x5f3   : > { %3182 = vadd.xlane.f32.xlu1 %v3181_v21  ;;  %3206 = vadd.xlane.f32.xlu0 %v3205_v26  ;;  %9251 = vrcp.f32 %v3096_v24 }
 0x5f6   : > { %v11017_v49 = vpop.xlane.xlu0 %3128 }
 0x5f7   : > { %v11015_v11 = vpop.xlane.xlu1 %3119  ;;  %13430 = vst [vmem:[#allocation57_spill] sm:$0xff] %v11017_v49  ;;  %v13432_v49 = vld [vmem:[#allocation4_spill] sm:$0xff] }
 0x5f9   : > { %v9250_v2 = vpop.eup %9249 }
 0x5fa   : > { %v3102_v17 = vpop.xlane.xlu0 %3101  ;;  %v3281_v44 = vmul.f32 %v9250_v2, %v10744_v48 }
 0x5fb   : > { %v3105_v22 = vpop.xlane.xlu1 %3104 }
 0x5fc   : > { %9253 = vrcp.f32 %v3105_v22 }
 0x5fd   : > { %9255 = vrcp.f32 %v3102_v17  ;;  %v9252_v1 = vpop.eup %9251 }
 0x5fe   : > { %v3279_v38 = vmul.f32 %v9252_v1, %v10751_v20 }
 0x5ff   : > { %v3135_v37 = vpop.xlane.xlu1 %3134  ;;  %v11021_v23 = vpop.xlane.xlu0 %3125 }
 0x600   : > { %13431 = vst [vmem:[#allocation51_spill] sm:$0xff] %v11021_v23  ;;  %v8938_v21 = vpack.c.bf16 %v3281_v44, %v3279_v38  ;;  %v13433_v44 = vld [vmem:[#allocation7_spill] sm:$0xff] }
 0x602   : > { %8940 = vmatpush3.bf16.xpose.msk.msra.mxu0 %vm10941_vm4, %v8938_v21 }
 0x603   : > { %v3108_v26 = vpop.xlane.xlu1 %3107  ;;  %v3111_v24 = vpop.xlane.xlu0 %3110  ;;  %8941 = vmatprep.subr.bf16.mxu0 %v13427_v7 }
 0x604   : > { %9257 = vrcp.f32 %v3108_v26  ;;  %1345 = vrot.lane.b32.xlu1 %v13432_v49, %s9470_s28 }
 0x605   : > { %9259 = vrcp.f32 %v3111_v24 }
 0x606   : > { %v9254_v22 = vpop.eup %9253  ;;  %9261 = vrcp.f32 %v3135_v37 }
 0x607   : > { %v9256_v48 = vpop.eup %9255  ;;  %v3285_v20 = vmul.f32 %v9254_v22, %v10767_v29  ;;  %v3141_v17 = vpop.xlane.xlu1 %3140  ;;  %v13434_v29 = vld [vmem:[#allocation6_spill] sm:$0xff] }
 0x608   : > { %v3132_v2 = vpop.xlane.xlu0 %3131  ;;  %v3283_v1 = vmul.f32 %v9256_v48, %v10769_v13  ;;  %1347 = vrot.lane.b32.xlu1 %v13433_v44, %s9470_s28 }
 0x609   : > { %9263 = vrcp.f32 %v3132_v2  ;;  %1369 = vrot.lane.b32.xlu0 %v13432_v49, %s9467_s25  ;;  %v13435_v2 = vld [vmem:[#allocation9_spill] sm:$0xff] }
 0x60a   : > { %v8942_v38 = vpack.c.bf16 %v3285_v20, %v3283_v1 }
 0x60b   : > { %v3114_v21 = vpop.xlane.xlu1 %3113 }
 0x60c   : > { %v3117_v26 = vpop.xlane.xlu0 %3116  ;;  %9265 = vrcp.f32 %v3114_v21  ;;  %8944 = vmatpush3.bf16.xpose.msk.msra.mxu0 %vm10941_vm4, %v8942_v38  ;;  %1371 = vrot.lane.b32.xlu1 %v13433_v44, %s9467_s25 }
 0x60d   : > { %9267 = vrcp.f32 %v3117_v26  ;;  %1349 = vrot.lane.b32.xlu0 %v13434_v29, %s9470_s28  ;;  %8945 = vmatprep.subr.bf16.mxu0 %v13427_v7 }
 0x60e   : > { %v9258_v13 = vpop.eup %9257  ;;  %9269 = vrcp.f32 %v3141_v17 }
 0x60f   : > { %v9260_v37 = vpop.eup %9259  ;;  %v3287_v24 = vmul.f32 %v9258_v13, %v10788_v41 }
 0x610   : > { %v3138_v22 = vpop.xlane.xlu0 %3137  ;;  %v3289_v48 = vmul.f32 %v9260_v37, %v10786_v59  ;;  %1373 = vrot.lane.b32.xlu1 %v13434_v29, %s9467_s25  ;;  %v9262_v20 = vpop.eup %9261 }
 0x611   : > { %9271 = vrcp.f32 %v3138_v22  ;;  %1351 = vrot.lane.b32.xlu0 %v13435_v2, %s9470_s28  ;;  %v11048_v26 = vmul.f32 %v9262_v20, %v10776_v46 }
 0x612   : > { %v8946_v1 = vpack.c.bf16 %v3289_v48, %v3287_v24  ;;  %v13436_v48 = vld [vmem:[#allocation52_spill] sm:$0xff] }
 0x613   : > { %v9264_v38 = vpop.eup %9263  ;;  %v2916_v20 = vsub.f32 %v13436_v48, %v10852_v14 }
 0x614   : > { %v3147_v21 = vpop.xlane.xlu0 %3146  ;;  %v11051_v17 = vmul.f32 %v9264_v38, %v10799_v34  ;;  %8948 = vmatpush3.bf16.xpose.msk.msra.mxu0 %vm10941_vm4, %v8946_v1  ;;  %1375 = vrot.lane.b32.xlu1 %v13435_v2, %s9467_s25 }
 0x615   : > { %8949 = vmatprep.subr.bf16.mxu0 %v13427_v7  ;;  %9273 = vrcp.f32 %v3147_v21  ;;  %v3018_v14 = vmul.f32 1.442695, %v2916_v20 }
 0x616   : > { %v9266_v59 = vpop.eup %9265 }
 0x617   : > { %v9268_v13 = vpop.eup %9267  ;;  %v3291_v37 = vmul.f32 %v9266_v59, %v10809_v32 }
 0x618   : > { %v3144_v46 = vpop.xlane.xlu0 %3143  ;;  %v9270_v24 = vpop.eup %9269  ;;  %v3293_v34 = vmul.f32 %v9268_v13, %v10807_v58  ;;  %v2924_v58 = vsub.f32 %v10635_v43, %v10929_v42 }
 0x619   : > { %9275 = vrcp.f32 %v3144_v46  ;;  %v11065_v38 = vmul.f32 %v9270_v24, %v10797_v61 }
 0x61a   : > { %v8950_v1 = vpack.c.bf16 %v3293_v34, %v3291_v37  ;;  %v3034_v13 = vmul.f32 1.442695, %v2924_v58  ;;  %9277 = vpow2.f32 %v3018_v14  ;;  %v13438_v34 = vsub.f32 %v10633_v8, %v10923_v54  ;;  %v3168_v54 = vpop.xlane.xlu1 %3167 }
 0x61b   : > { %v9272_v22 = vpop.eup %9271 }
 0x61c   : > { %v11068_v23 = vmul.f32 %v9272_v22, %v10818_v53  ;;  %v11070_v41 = vpop.xlane.xlu0 %3152  ;;  %8952 = vmatpush3.bf16.xpose.msk.msra.mxu0 %vm10941_vm4, %v8950_v1  ;;  %v13437_v53 = vld [vmem:[#allocation46_spill] sm:$0xff]  ;;  %9279 = vpow2.f32 %v3034_v13  ;;  %v3036_v22 = vmul.f32 1.442695, %v13438_v34 }
 0x61d   : > { %8969 = vmatprep.subr.bf16.mxu0 %v13427_v7  ;;  %v2917_v59 = vsub.f32 %v13437_v53, %v10843_v27 }
 0x61f   : > { %v9274_v61 = vpop.eup %9273  ;;  %v3020_v42 = vmul.f32 1.442695, %v2917_v59 }
 0x620   : > { %v11079_v21 = vpop.xlane.xlu0 %3149  ;;  %v11084_v24 = vmul.f32 %v9274_v61, %v10823_v63 }
 0x623   : > { %v9276_v37 = vpop.eup %9275 }
 0x624   : > { %v3159_v46 = vpop.xlane.xlu0 %3158  ;;  %v11087_v43 = vmul.f32 %v9276_v37, %v10830_v50  ;;  %v11094_v63 = vpop.eup %9277 }
 0x625   : > { %9281 = vrcp.f32 %v3159_v46  ;;  %v3184_v58 = vsel %vm2685_vm3, %v11094_v63, 0.0 }
 0x626   : > { %v11096_v50 = vpop.eup %9279 }
 0x627   : > { %v3208_v37 = vsel %vm2685_vm3, %v11096_v50, 0.0 }
 0x628   : > { %v3156_v48 = vpop.xlane.xlu0 %3155 }
 0x629   : > { %9283 = vrcp.f32 %v3156_v48 }
 0x62a   : > { %9285 = vpow2.f32 %v3020_v42 }
 0x62b   : > { %9287 = vpow2.f32 %v3036_v22 }
 0x62c   : > { %v3165_v20 = vpop.xlane.xlu0 %3164 }
 0x62d   : > { %9289 = vrcp.f32 %v3165_v20 }
 0x62f   : > { %v9282_v8 = vpop.eup %9281 }
 0x630   : > { %v3162_v1 = vpop.xlane.xlu0 %3161  ;;  %3185 = vadd.xlane.f32.xlu0 %v3184_v58  ;;  %v11103_v53 = vmul.f32 %v9282_v8, %v10856_v18 }
 0x631   : > { %9291 = vrcp.f32 %v3162_v1 }
 0x632   : > { %9293 = vrcp.f32 %v3168_v54 }
 0x633   : > { %v9284_v14 = vpop.eup %9283  ;;  %v3192_v42 = vpop.xlane.xlu1 %3191 }
 0x634   : > { %v11100_v61 = vpop.eup %9285  ;;  %v11106_v59 = vmul.f32 %v9284_v14, %v10865_v62  ;;  %v3171_v13 = vpop.xlane.xlu0 %3170  ;;  %3209 = vadd.xlane.f32.xlu0 %v3208_v37 }
 0x635   : > { %v11110_v46 = vpop.eup %9287  ;;  %9295 = vrcp.f32 %v3171_v13  ;;  %v3187_v18 = vsel %vm2685_vm3, %v11100_v61, 0.0 }
 0x636   : > { %9297 = vrcp.f32 %v3192_v42  ;;  %v3211_v62 = vsel %vm2685_vm3, %v11110_v46, 0.0 }
 0x637   : > { %v9290_v48 = vpop.eup %9289  ;;  %v11124_v8 = vpop.xlane.xlu1 %3173 }
 0x638   : > { %v3195_v22 = vpop.xlane.xlu0 %3194  ;;  %3188 = vadd.xlane.f32.xlu1 %v3187_v18  ;;  %3212 = vadd.xlane.f32.xlu0 %v3211_v62  ;;  %v11119_v1 = vmul.f32 %v9290_v48, %v10873_v57 }
 0x639   : > { %9299 = vrcp.f32 %v3195_v22 }
 0x63b   : > { %v9292_v20 = vpop.eup %9291 }
 0x63c   : > { %v11122_v58 = vmul.f32 %v9292_v20, %v10880_v12  ;;  %v11126_v54 = vpop.xlane.xlu0 %3176  ;;  %v9294_v14 = vpop.eup %9293 }
 0x63d   : > { %v11131_v22 = vmul.f32 %v9294_v14, %v10832_v33  ;;  %v13440_v14 = vld [vmem:[#allocation8_spill] sm:$0xff] }
 0x63f   : > { %v9296_v37 = vpop.eup %9295  ;;  %v3198_v42 = vpop.xlane.xlu1 %3197 }
 0x640   : > { %v3201_v18 = vpop.xlane.xlu0 %3200  ;;  %v11134_v57 = vmul.f32 %v9296_v37, %v10887_v47  ;;  %9301 = vrcp.f32 %v3198_v42  ;;  %v9298_v12 = vpop.eup %9297 }
 0x641   : > { %9303 = vrcp.f32 %v3201_v18  ;;  %v11139_v20 = vmul.f32 %v9298_v12, %v10889_v55  ;;  %v13447_v55 = vld [vmem:[#allocation34_spill] sm:$0xff] }
 0x643   : > { %v9300_v48 = vpop.eup %9299  ;;  %13439 = vst [vmem:[#allocation54_spill] sm:$0xff] %v11139_v20 }
 0x644   : > { %v11142_v13 = vmul.f32 %v9300_v48, %v10901_v3  ;;  %v13443_v3 = vld [vmem:[#allocation22_spill] sm:$0xff] }
 0x645   : > { %v2927_v12 = vsub.f32 %v13443_v3, %v10860_v56  ;;  %v13444_v48 = vld [vmem:[#allocation42_spill] sm:$0xff]  ;;  %v2929_v56 = vsub.f32 %v13447_v55, %v10876_v15  ;;  %v11179_v15 = vpop.permute.xlu1 %1339  ;;  %v11189_v55 = vpop.permute.xlu0 %1363 }
 0x646   : > { %v2926_v33 = vsub.f32 %v13444_v48, %v10869_v9  ;;  %v13448_v9 = vld [vmem:[#allocation37_spill] sm:$0xff] }
 0x647   : > { %v3040_v62 = vmul.f32 1.442695, %v2927_v12  ;;  %v3044_v48 = vmul.f32 1.442695, %v2929_v56 }
 0x648   : > { %v3038_v32 = vmul.f32 1.442695, %v2926_v33  ;;  %v13449_v33 = vld [vmem:[#allocation30_spill] sm:$0xff] }
 0x649   : > { %1353 = vrot.lane.b32.xlu1 %v13440_v14, %s9470_s28  ;;  %9305 = vpow2.f32 %v3040_v62  ;;  %v2937_v12 = vsub.f32 %v13449_v33, %v13448_v9  ;;  %v11203_v9 = vpop.permute.xlu0 %1343 }
 0x64a   : > { %v9302_v47 = vpop.eup %9301  ;;  %9307 = vpow2.f32 %v3038_v32 }
 0x64b   : > { %v9304_v37 = vpop.eup %9303  ;;  %v11149_v42 = vmul.f32 %v9302_v47, %v10917_v6  ;;  %v2934_v6 = vsub.f32 %v10667_v45, %v10950_v51  ;;  %v13450_v45 = vld [vmem:[#allocation13_spill] sm:$0xff] }
 0x64c   : > { %v11152_v18 = vmul.f32 %v9304_v37, %v10915_v4  ;;  %v13445_v4 = vld [vmem:[#allocation39_spill] sm:$0xff]  ;;  %v13446_v37 = vsub.f32 %v10663_v31, %v10932_v36  ;;  %v2936_v51 = vsub.f32 %v13450_v45, %v10966_v39 }
 0x64d   : > { %13441 = vst [vmem:[#allocation4_spill] sm:$0xff] %v11149_v42  ;;  %v2928_v47 = vsub.f32 %v13445_v4, %v10882_v52  ;;  %v3054_v3 = vmul.f32 1.442695, %v2934_v6  ;;  %v3060_v52 = vmul.f32 1.442695, %v2937_v12  ;;  %v11193_v4 = vpop.permute.xlu1 %1341 }
 0x64e   : > { %13442 = vst [vmem:[#allocation7_spill] sm:$0xff] %v11152_v18  ;;  %1377 = vrot.lane.b32.xlu0 %v13440_v14, %s9467_s25  ;;  %v3056_v34 = vmul.f32 1.442695, %v13446_v37  ;;  %v3058_v31 = vmul.f32 1.442695, %v2936_v51 }
 0x64f   : > { %v3042_v27 = vmul.f32 1.442695, %v2928_v47 }
 0x650   : > { %9309 = vpow2.f32 %v3056_v34 }
 0x651   : > { %9311 = vpow2.f32 %v3054_v3  ;;  %v11211_v45 = vpop.permute.xlu1 %1365 }
 0x652   : > { %9313 = vpow2.f32 %v3042_v27 }
 0x653   : > { %9315 = vpow2.f32 %v3044_v48  ;;  %v11175_v36 = vpop.eup %9305 }
 0x654   : > { %v11177_v32 = vpop.eup %9307  ;;  %9317 = vpow2.f32 %v3060_v52  ;;  %v3217_v39 = vsel %vm2685_vm3, %v11175_v36, 0.0 }
 0x655   : > { %9319 = vpow2.f32 %v3058_v31  ;;  %v3214_v62 = vsel %vm2685_vm3, %v11177_v32, 0.0 }
 0x65a   : > { %v11181_v34 = vpop.eup %9309 }
 0x65b   : > { %v11187_v27 = vpop.eup %9311  ;;  %v3241_v47 = vsel %vm2685_vm3, %v11181_v34, 0.0 }
 0x65c   : > { %v11191_v6 = vpop.eup %9313  ;;  %v3238_v37 = vsel %vm2685_vm3, %v11187_v27, 0.0 }
 0x65d   : > { %13451 = vst [vmem:[#allocation6_spill] sm:$0xff] %v11191_v6  ;;  %v11199_v56 = vpop.eup %9315  ;;  %v3220_v12 = vsel %vm2685_vm3, %v11191_v6, 0.0 }
 0x65e   : > { %13452 = vst [vmem:[#allocation9_spill] sm:$0xff] %v11199_v56  ;;  %v11201_v3 = vpop.eup %9317  ;;  %v3223_v33 = vsel %vm2685_vm3, %v11199_v56, 0.0  ;;  %v13455_v56 = vld [vmem:[#allocation3_spill] sm:$0xff] }
 0x65f   : > { %13453 = vst [vmem:[#allocation52_spill] sm:$0xff] %v11201_v3  ;;  %v11209_v48 = vpop.eup %9319  ;;  %v3247_v52 = vsel %vm2685_vm3, %v11201_v3, 0.0 }
 0x660   : > { %13454 = vst [vmem:[#allocation46_spill] sm:$0xff] %v11209_v48  ;;  %v3244_v31 = vsel %vm2685_vm3, %v11209_v48, 0.0 }
 0x66d   : > { %3215 = vadd.xlane.f32.xlu1 %v3214_v62  ;;  %3218 = vadd.xlane.f32.xlu0 %v3217_v39  ;;  %v11217_v62 = vpop.permute.xlu1 %1367 }
 0x671   : > { %3242 = vadd.xlane.f32.xlu0 %v3241_v47  ;;  %3239 = vadd.xlane.f32.xlu1 %v3238_v37 }
 0x675   : > { %3224 = vadd.xlane.f32.xlu0 %v3223_v33  ;;  %3221 = vadd.xlane.f32.xlu1 %v3220_v12 }
 0x678   : > { %v3180_v51 = vpop.xlane.xlu0 %3179 }
 0x679   : > { %3248 = vadd.xlane.f32.xlu0 %v3247_v52  ;;  %3245 = vadd.xlane.f32.xlu1 %v3244_v31  ;;  %9321 = vrcp.f32 %v3180_v51 }
 0x67c   : > { %v3204_v39 = vpop.xlane.xlu0 %3203 }
 0x67d   : > { %9323 = vrcp.f32 %v3204_v39  ;;  %v13460_v39 = vld [vmem:[#allocation2_spill] sm:$0xff] }
 0x680   : > { %v3183_v47 = vpop.xlane.xlu1 %3182  ;;  %v3207_v37 = vpop.xlane.xlu0 %3206 }
 0x681   : > { %9325 = vrcp.f32 %v3183_v47 }
 0x682   : > { %9327 = vrcp.f32 %v3207_v37 }
 0x683   : > { %v9322_v33 = vpop.eup %9321 }
 0x684   : > { %v11222_v48 = vmul.f32 %v9322_v33, %v10995_v10  ;;  %v13464_v33 = vld [vmem:[#allocation18_spill] sm:$0xff]  ;;  %v13466_v10 = vld [vmem:[#allocation23_spill] sm:$0xff]  ;;  %v11255_v42 = vpop.permute.xlu1 %1345 }
 0x686   : > { %13456 = vst [vmem:[#allocation8_spill] sm:$0xff] %v11222_v48 }
 0x687   : > { %v9324_v12 = vpop.eup %9323 }
 0x688   : > { %v11228_v51 = vmul.f32 %v9324_v12, %v10999_v35  ;;  %v13461_v35 = vld [vmem:[#allocation29_spill] sm:$0xff] }
 0x689   : > { %v13465_v12 = vld [vmem:[#allocation33_spill] sm:$0xff] }
 0x68a   : > { %1387 = vrot.lane.b32.xlu1 %v13455_v56, %s9469_s27  ;;  %13458 = vst [vmem:[#allocation42_spill] sm:$0xff] %v11228_v51  ;;  %v2931_v47 = vsub.f32 %v13465_v12, %v13464_v33  ;;  %v2939_v51 = vsub.f32 %v13466_v10, %v10979_v25 }
 0x68b   : > { %v9326_v3 = vpop.eup %9325 }
 0x68c   : > { %v9328_v6 = vpop.eup %9327  ;;  %v11225_v52 = vmul.f32 %v9326_v3, %v11003_v28  ;;  %v13462_v28 = vld [vmem:[#allocation53_spill] sm:$0xff]  ;;  %v13463_v3 = vld [vmem:[#allocation27_spill] sm:$0xff]  ;;  %v3048_v48 = vmul.f32 1.442695, %v2931_v47 }
 0x68d   : > { %v11231_v31 = vmul.f32 %v9328_v6, %v11007_v19  ;;  %v2930_v19 = vsub.f32 %v13462_v28, %v13461_v35  ;;  %v2938_v37 = vsub.f32 %v13463_v3, %v10986_v16  ;;  %v11257_v35 = vpop.permute.xlu0 %1369  ;;  %v11261_v16 = vpop.permute.xlu1 %1347 }
 0x68e   : > { %13457 = vst [vmem:[#allocation22_spill] sm:$0xff] %v11225_v52  ;;  %1389 = vrot.lane.b32.xlu1 %v13460_v39, %s9469_s27  ;;  %v3064_v52 = vmul.f32 1.442695, %v2939_v51 }
 0x68f   : > { %13459 = vst [vmem:[#allocation39_spill] sm:$0xff] %v11231_v31  ;;  %1411 = vrot.lane.b32.xlu0 %v13455_v56, %s9471_s16  ;;  %v3046_v6 = vmul.f32 1.442695, %v2930_v19  ;;  %v3062_v31 = vmul.f32 1.442695, %v2938_v37 }
 0x691   : > { %9329 = vpow2.f32 %v3046_v6  ;;  %v11267_v25 = vpop.permute.xlu0 %1349 }
 0x692   : > { %1413 = vrot.lane.b32.xlu1 %v13460_v39, %s9471_s16  ;;  %9331 = vpow2.f32 %v3062_v31  ;;  %v11271_v31 = vpop.permute.xlu1 %1371 }
 0x693   : > { %1391 = vrot.lane.b32.xlu0 %v13328_v40, %s9469_s27  ;;  %9333 = vpow2.f32 %v3048_v48 }
 0x694   : > { %9335 = vpow2.f32 %v3064_v52 }
 0x695   : > { %v11277_v47 = vpop.permute.xlu0 %1351 }
 0x696   : > { %1415 = vrot.lane.b32.xlu1 %v13328_v40, %s9471_s16  ;;  %v11283_v37 = vpop.permute.xlu1 %1373 }
 0x69a   : > { %v11285_v12 = vpop.permute.xlu1 %1375 }
 0x69b   : > { %v11259_v28 = vpop.eup %9329 }
 0x69c   : > { %13467 = vst [vmem:[#allocation34_spill] sm:$0xff] %v11259_v28  ;;  %v3226_v19 = vsel %vm2685_vm3, %v11259_v28, 0.0  ;;  %v11265_v6 = vpop.eup %9331 }
 0x69d   : > { %13468 = vst [vmem:[#allocation37_spill] sm:$0xff] %v11265_v6  ;;  %v11269_v51 = vpop.eup %9333  ;;  %v3250_v48 = vsel %vm2685_vm3, %v11265_v6, 0.0 }
 0x69e   : > { %13469 = vst [vmem:[#allocation30_spill] sm:$0xff] %v11269_v51  ;;  %v11275_v52 = vpop.eup %9335  ;;  %v3229_v10 = vsel %vm2685_vm3, %v11269_v51, 0.0 }
 0x69f   : > { %13470 = vst [vmem:[#allocation13_spill] sm:$0xff] %v11275_v52  ;;  %v3253_v3 = vsel %vm2685_vm3, %v11275_v52, 0.0  ;;  %v13479_v52 = vld [vmem:[#allocation19_spill] sm:$0xff] }
 0x6b2   : > { %3227 = vadd.xlane.f32.xlu0 %v3226_v19 }
 0x6b6   : > { %3251 = vadd.xlane.f32.xlu0 %v3250_v48 }
 0x6ba   : > { %3230 = vadd.xlane.f32.xlu1 %v3229_v10  ;;  %3254 = vadd.xlane.f32.xlu0 %v3253_v3 }
 0x6bd   : > { %v3186_v33 = vpop.xlane.xlu0 %3185 }
 0x6be   : > { %9337 = vrcp.f32 %v3186_v33 }
 0x6c1   : > { %v3210_v19 = vpop.xlane.xlu0 %3209 }
 0x6c2   : > { %9339 = vrcp.f32 %v3210_v19 }
 0x6c5   : > { %v3189_v6 = vpop.xlane.xlu1 %3188  ;;  %v3213_v48 = vpop.xlane.xlu0 %3212 }
 0x6c6   : > { %9341 = vrcp.f32 %v3189_v6 }
 0x6c7   : > { %9343 = vrcp.f32 %v3213_v48 }
 0x6c8   : > { %v9338_v28 = vpop.eup %9337 }
 0x6c9   : > { %v11294_v33 = vmul.f32 %v9338_v28, %v11094_v63  ;;  %v13480_v63 = vld [vmem:[#allocation44_spill] sm:$0xff] }
 0x6cb   : > { %1393 = vrot.lane.b32.xlu1 %v13432_v49, %s9469_s27  ;;  %13471 = vst [vmem:[#allocation3_spill] sm:$0xff] %v11294_v33 }
 0x6cc   : > { %v9340_v51 = vpop.eup %9339 }
 0x6cd   : > { %v11300_v6 = vmul.f32 %v9340_v51, %v11096_v50  ;;  %v13475_v50 = vld [vmem:[#allocation43_spill] sm:$0xff]  ;;  %v13477_v51 = vld [vmem:[#allocation24_spill] sm:$0xff] }
 0x6cf   : > { %1395 = vrot.lane.b32.xlu1 %v13433_v44, %s9469_s27  ;;  %13473 = vst [vmem:[#allocation29_spill] sm:$0xff] %v11300_v6  ;;  %v2941_v6 = vsub.f32 %v13480_v63, %v10992_v0 }
 0x6d0   : > { %v9342_v10 = vpop.eup %9341  ;;  %1417 = vrot.lane.b32.xlu0 %v13432_v49, %s9471_s16 }
 0x6d1   : > { %v9344_v3 = vpop.eup %9343  ;;  %v11297_v19 = vmul.f32 %v9342_v10, %v11100_v61  ;;  %v13476_v61 = vld [vmem:[#allocation47_spill] sm:$0xff]  ;;  %v2940_v10 = vsub.f32 %v13477_v51, %v11001_v30  ;;  %v3068_v18 = vmul.f32 1.442695, %v2941_v6 }
 0x6d2   : > { %v11303_v48 = vmul.f32 %v9344_v3, %v11110_v46  ;;  %v2932_v46 = vsub.f32 %v13476_v61, %v13475_v50  ;;  %v13478_v3 = vld [vmem:[#allocation25_spill] sm:$0xff]  ;;  %v11329_v50 = vpop.permute.xlu1 %1353  ;;  %v11331_v61 = vpop.permute.xlu0 %1377 }
 0x6d3   : > { %13472 = vst [vmem:[#allocation2_spill] sm:$0xff] %v11297_v19  ;;  %1419 = vrot.lane.b32.xlu1 %v13433_v44, %s9471_s16  ;;  %v2933_v33 = vsub.f32 %v13479_v52, %v13478_v3 }
 0x6d4   : > { %13474 = vst [vmem:[#allocation53_spill] sm:$0xff] %v11303_v48  ;;  %1397 = vrot.lane.b32.xlu0 %v13434_v29, %s9469_s27  ;;  %v3050_v28 = vmul.f32 1.442695, %v2932_v46  ;;  %v3066_v48 = vmul.f32 1.442695, %v2940_v10 }
 0x6d5   : > { %v3052_v19 = vmul.f32 1.442695, %v2933_v33 }
 0x6d6   : > { %9345 = vpow2.f32 %v3050_v28 }
 0x6d7   : > { %1421 = vrot.lane.b32.xlu1 %v13434_v29, %s9471_s16  ;;  %9347 = vpow2.f32 %v3066_v48 }
 0x6d8   : > { %1399 = vrot.lane.b32.xlu0 %v13435_v2, %s9469_s27  ;;  %9349 = vpow2.f32 %v3052_v19 }
 0x6d9   : > { %9351 = vpow2.f32 %v3068_v18 }
 0x6db   : > { %1423 = vrot.lane.b32.xlu1 %v13435_v2, %s9471_s16 }
 0x6e0   : > { %v11327_v20 = vpop.eup %9345 }
 0x6e1   : > { %v3232_v30 = vsel %vm2685_vm3, %v11327_v20, 0.0  ;;  %v11335_v52 = vpop.eup %9347 }
 0x6e2   : > { %13481 = vst [vmem:[#allocation27_spill] sm:$0xff] %v11335_v52  ;;  %v11337_v46 = vpop.eup %9349  ;;  %v3256_v19 = vsel %vm2685_vm3, %v11335_v52, 0.0 }
 0x6e3   : > { %v11341_v18 = vpop.eup %9351  ;;  %v3235_v63 = vsel %vm2685_vm3, %v11337_v46, 0.0 }
 0x6e4   : > { %v3259_v28 = vsel %vm2685_vm3, %v11341_v18, 0.0 }
 0x6f7   : > { %3233 = vadd.xlane.f32.xlu0 %v3232_v30 }
 0x6fa   : > { %v3216_v0 = vpop.xlane.xlu1 %3215  ;;  %v3219_v33 = vpop.xlane.xlu0 %3218 }
 0x6fb   : > { %9353 = vrcp.f32 %v3216_v0  ;;  %3257 = vadd.xlane.f32.xlu0 %v3256_v19 }
 0x6fc   : > { %9355 = vrcp.f32 %v3219_v33 }
 0x6fe   : > { %v3240_v6 = vpop.xlane.xlu1 %3239  ;;  %v3243_v48 = vpop.xlane.xlu0 %3242 }
 0x6ff   : > { %9357 = vrcp.f32 %v3240_v6  ;;  %3236 = vadd.xlane.f32.xlu1 %v3235_v63  ;;  %3260 = vadd.xlane.f32.xlu0 %v3259_v28  ;;  %v13485_v63 = vld [vmem:[#allocation62_spill] sm:$0xff]  ;;  %v13486_v28 = vld [vmem:[#allocation60_spill] sm:$0xff] }
 0x700   : > { %9359 = vrcp.f32 %v3243_v48 }
 0x701   : > { %9361 = vrcp.f32 %v11015_v11 }
 0x702   : > { %9363 = vrcp.f32 %v11009_v5 }
 0x705   : > { %v9354_v51 = vpop.eup %9353 }
 0x706   : > { %v9356_v10 = vpop.eup %9355  ;;  %v11348_v3 = vmul.f32 %v9354_v51, %v11177_v32  ;;  %v13482_v32 = vld [vmem:[#allocation59_spill] sm:$0xff]  ;;  %v13491_v51 = vld [vmem:[#allocation45_spill] sm:$0xff] }
 0x707   : > { %v11351_v30 = vmul.f32 %v9356_v10, %v11175_v36  ;;  %v9474_v36 = vmov 0.0   ;;  %v13493_v10 = vld [vmem:[#allocation11_spill] sm:$0xff] }
 0x708   : > { %8677 = vmatprep.mubr.msk.f32.mxu1 %vm9473_vm5, %v9474_v36  ;;  %8696 = vmatprep.mubr.msk.f32.mxu0 %vm9473_vm5, %v9474_v36 }
 0x709   : > { %v9358_v0 = vpop.eup %9357  ;;  %v9018_v33 = vpack.c.bf16 %v11351_v30, %v11348_v3  ;;  %v13542_v3 = vld [vmem:[#allocation52_spill] sm:$0xff] }
 0x70a   : > { %v9360_v19 = vpop.eup %9359  ;;  %v11356_v52 = vmul.f32 %v9358_v0, %v11187_v27  ;;  %v13484_v27 = vld [vmem:[#allocation63_spill] sm:$0xff]  ;;  %v13495_v0 = vld [vmem:[#allocation17_spill] sm:$0xff] }
 0x70b   : > { %v11359_v6 = vmul.f32 %v9360_v19, %v11181_v34  ;;  %v13483_v34 = vld [vmem:[#allocation61_spill] sm:$0xff]  ;;  %v13497_v19 = vld [vmem:[#allocation15_spill] sm:$0xff] }
 0x70d   : > { %v9034_v48 = vpack.c.bf16 %v11359_v6, %v11356_v52 }
 0x710   : > { %1401 = vrot.lane.b32.xlu1 %v13440_v14, %s9469_s27 }
 0x715   : > { %1425 = vrot.lane.b32.xlu0 %v13440_v14, %s9471_s16 }
 0x733   : > { %3390 = vxpose.xlu0.b32.start [1/8] (short) (narrow) %v13455_v56, 8  ;;  %v13487_v56 = vld [vmem:[#allocation64_spill] sm:$0xff] }
 0x737   : > { %3391 = vxpose.xlu0.b32.cont [2/8] (short) (narrow) %v13460_v39, 8  ;;  %v13489_v39 = vld [vmem:[#allocation31_spill] sm:$0xff] }
 0x739   : > { %3422 = vxpose.xlu1.b32.start [1/8] (short) (narrow) %v13482_v32, 8  ;;  %v11397_v32 = vpop.xlane.xlu0 %3224 }
 0x73b   : > { %3392 = vxpose.xlu0.b32.cont [3/8] (short) (narrow) %v13328_v40, 8  ;;  %v13488_v40 = vld [vmem:[#allocation40_spill] sm:$0xff] }
 0x73d   : > { %3423 = vxpose.xlu1.b32.cont [2/8] (short) (narrow) %v13483_v34, 8  ;;  %v13498_v34 = vld [vmem:[#allocation10_spill] sm:$0xff] }
 0x73f   : > { %3393 = vxpose.xlu0.b32.cont [4/8] (short) (narrow) %v13432_v49, 8  ;;  %v13490_v49 = vld [vmem:[#allocation20_spill] sm:$0xff] }
 0x741   : > { %3424 = vxpose.xlu1.b32.cont [3/8] (short) (narrow) %v13484_v27, 8  ;;  %v13499_v27 = vld [vmem:[#allocation21_spill] sm:$0xff] }
 0x743   : > { %3394 = vxpose.xlu0.b32.cont [5/8] (short) (narrow) %v13433_v44, 8  ;;  %v13492_v44 = vld [vmem:[#allocation32_spill] sm:$0xff] }
 0x745   : > { %3425 = vxpose.xlu1.b32.cont [4/8] (short) (narrow) %v13485_v63, 8  ;;  %v13500_v63 = vld [vmem:[#allocation28_spill] sm:$0xff] }
 0x747   : > { %3395 = vxpose.xlu0.b32.cont [6/8] (short) (narrow) %v13434_v29, 8  ;;  %v13494_v29 = vld [vmem:[#allocation38_spill] sm:$0xff] }
 0x749   : > { %3426 = vxpose.xlu1.b32.cont [5/8] (short) (narrow) %v13486_v28, 8 }
 0x74b   : > { %3396 = vxpose.xlu0.b32.cont [7/8] (short) (narrow) %v13435_v2, 8  ;;  %v13496_v2 = vld [vmem:[#allocation5_spill] sm:$0xff] }
 0x74d   : > { %3427 = vxpose.xlu1.b32.cont [6/8] (short) (narrow) %v13487_v56, 8  ;;  %v11404_v56 = vpop.xlane.xlu0 %3248 }
 0x74f   : > { %3397 = vxpose.xlu0.b32.end [8/8] (short) (narrow) %v13440_v14, 8  ;;  %v11395_v14 = vpop.xlane.xlu1 %3221 }
 0x751   : > { %3428 = vxpose.xlu1.b32.cont [7/8] (short) (narrow) %v13488_v40, 8  ;;  %v13501_v40 = vld [vmem:[#allocation48_spill] sm:$0xff] }
 0x753   : > { %3454 = vxpose.xlu0.b32.start [1/8] (short) (narrow) %v13489_v39, 8  ;;  %v11402_v28 = vpop.xlane.xlu1 %3245  ;;  %v13502_v39 = vld [vmem:[#allocation26_spill] sm:$0xff] }
 0x755   : > { %3429 = vxpose.xlu1.b32.end [8/8] (short) (narrow) %v13490_v49, 8  ;;  %v13503_v49 = vld [vmem:[#allocation16_spill] sm:$0xff] }
 0x757   : > { %3455 = vxpose.xlu0.b32.cont [2/8] (short) (narrow) %v13491_v51, 8  ;;  %v1388_v51 = vpop.permute.xlu1 %1387 }
 0x759   : > { %3486 = vxpose.xlu1.b32.start [1/8] (short) (narrow) %v13492_v44, 8  ;;  %v1412_v44 = vpop.permute.xlu0 %1411 }
 0x75b   : > { %3456 = vxpose.xlu0.b32.cont [3/8] (short) (narrow) %v13493_v10, 8  ;;  %v13504_v10 = vld [vmem:[#allocation56_spill] sm:$0xff] }
 0x75d   : > { %3487 = vxpose.xlu1.b32.cont [2/8] (short) (narrow) %v13494_v29, 8  ;;  %v13505_v29 = vld [vmem:[#allocation12_spill] sm:$0xff] }
 0x75f   : > { %3457 = vxpose.xlu0.b32.cont [4/8] (short) (narrow) %v13495_v0, 8  ;;  %v1390_v0 = vpop.permute.xlu1 %1389 }
 0x761   : > { %3488 = vxpose.xlu1.b32.cont [3/8] (short) (narrow) %v13496_v2, 8  ;;  %v1392_v2 = vpop.permute.xlu0 %1391 }
 0x763   : > { %3458 = vxpose.xlu0.b32.cont [5/8] (short) (narrow) %v13497_v19, 8 }
 0x765   : > { %3489 = vxpose.xlu1.b32.cont [4/8] (short) (narrow) %v13498_v34, 8  ;;  %v11414_v19 = vpop.xlane.xlu0 %3227  ;;  %v1414_v34 = vpop.permute.xlu1 %1413 }
 0x767   : > { %3459 = vxpose.xlu0.b32.cont [6/8] (short) (narrow) %v13499_v27, 8 }
 0x769   : > { %3490 = vxpose.xlu1.b32.cont [5/8] (short) (narrow) %v13500_v63, 8  ;;  %v11419_v27 = vpop.xlane.xlu0 %3251  ;;  %v9362_v63 = vpop.eup %9361 }
 0x76a   : > { %v9364_v11 = vpop.eup %9363 }
 0x76b   : > { %3460 = vxpose.xlu0.b32.cont [7/8] (short) (narrow) %v13501_v40, 8  ;;  %v13507_v40 = vld [vmem:[#allocation57_spill] sm:$0xff] }
 0x76d   : > { %3491 = vxpose.xlu1.b32.cont [6/8] (short) (narrow) %v13502_v39, 8 }
 0x76f   : > { %3461 = vxpose.xlu0.b32.end [8/8] (short) (narrow) %v13503_v49, 8  ;;  %v13508_v49 = vld [vmem:[#allocation58_spill] sm:$0xff] }
 0x771   : > { %3492 = vxpose.xlu1.b32.cont [7/8] (short) (narrow) %v13504_v10, 8 }
 0x773   : > { %3550 = vxpose.xlu0.b32.start [1/8] (short) (narrow) %v11189_v55, 8  ;;  %v1416_v55 = vpop.permute.xlu1 %1415 }
 0x775   : > { %3493 = vxpose.xlu1.b32.end [8/8] (short) (narrow) %v13505_v29, 8 }
 0x777   : > { %3551 = vxpose.xlu0.b32.cont [2/8] (short) (narrow) %v11211_v45, 8  ;;  %v11424_v45 = vpop.xlane.xlu1 %3230 }
 0x779   : > { %3518 = vxpose.xlu1.b32.start [1/8] (short) (narrow) %v11179_v15, 8  ;;  %v11426_v15 = vpop.xlane.xlu0 %3254 }
 0x77b   : > { %3552 = vxpose.xlu0.b32.cont [3/8] (short) (narrow) %v11217_v62, 8 }
 0x77d   : > { %3519 = vxpose.xlu1.b32.cont [2/8] (short) (narrow) %v11193_v4, 8  ;;  %v1394_v4 = vpop.permute.xlu1 %1393  ;;  %v1418_v62 = vpop.permute.xlu0 %1417 }
 0x77f   : > { %3553 = vxpose.xlu0.b32.cont [4/8] (short) (narrow) %v11257_v35, 8 }
 0x781   : > { %3520 = vxpose.xlu1.b32.cont [3/8] (short) (narrow) %v11203_v9, 8  ;;  %v1396_v9 = vpop.permute.xlu1 %1395 }
 0x783   : > { %3554 = vxpose.xlu0.b32.cont [5/8] (short) (narrow) %v11271_v31, 8 }
 0x785   : > { %3521 = vxpose.xlu1.b32.cont [4/8] (short) (narrow) %v11255_v42, 8  ;;  %v1398_v42 = vpop.permute.xlu0 %1397  ;;  %v1420_v35 = vpop.permute.xlu1 %1419 }
 0x787   : > { %3555 = vxpose.xlu0.b32.cont [6/8] (short) (narrow) %v11283_v37, 8 }
 0x789   : > { %3522 = vxpose.xlu1.b32.cont [5/8] (short) (narrow) %v11261_v16, 8  ;;  %v1400_v31 = vpop.permute.xlu0 %1399  ;;  %v1422_v37 = vpop.permute.xlu1 %1421 }
 0x78b   : > { %3556 = vxpose.xlu0.b32.cont [7/8] (short) (narrow) %v11285_v12, 8 }
 0x78d   : > { %3523 = vxpose.xlu1.b32.cont [6/8] (short) (narrow) %v11267_v25, 8  ;;  %v11435_v16 = vpop.xlane.xlu0 %3233 }
 0x78f   : > { %3557 = vxpose.xlu0.b32.end [8/8] (short) (narrow) %v11331_v61, 8  ;;  %v13506_v61 = vld [vmem:[#allocation51_spill] sm:$0xff] }
 0x790   : > { %9365 = vrcp.f32 %v13506_v61  ;;  %v13514_v61 = vld [vmem:[#allocation50_spill] sm:$0xff] }
 0x791   : > { %3524 = vxpose.xlu1.b32.cont [7/8] (short) (narrow) %v11277_v47, 8  ;;  %v11438_v25 = vpop.xlane.xlu0 %3257  ;;  %v1424_v47 = vpop.permute.xlu1 %1423  ;;  %9367 = vrcp.f32 %v13507_v40  ;;  %v13516_v40 = vpack.c.bf16 %v11103_v53, %v11106_v59 }
 0x792   : > { %9369 = vrcp.f32 %v11079_v21  ;;  %v13510_v21 = vld [vmem:[#allocation35_spill] sm:$0xff] }
 0x793   : > { %3582 = vxpose.xlu0.b32.start [1/8] (short) (narrow) %v1388_v51, 8  ;;  %v3295_v51 = vmul.f32 %v9362_v63, %v13508_v49  ;;  %9371 = vrcp.f32 %v11070_v41 }
 0x794   : > { %9373 = vrcp.f32 %v11126_v54 }
 0x795   : > { %3525 = vxpose.xlu1.b32.end [8/8] (short) (narrow) %v11329_v50, 8  ;;  %v11441_v12 = vpop.xlane.xlu1 %3236  ;;  %v11443_v50 = vpop.xlane.xlu0 %3260  ;;  %9375 = vrcp.f32 %v11124_v8  ;;  %v13521_v8 = vld [vmem:[#allocation49_spill] sm:$0xff] }
 0x796   : > { %9377 = vrcp.f32 %v11395_v14 }
 0x797   : > { %3583 = vxpose.xlu0.b32.cont [2/8] (short) (narrow) %v1390_v0, 8  ;;  %9379 = vrcp.f32 %v11397_v32 }
 0x798   : > { %9381 = vrcp.f32 %v11402_v28 }
 0x799   : > { %3614 = vxpose.xlu1.b32.start [1/8] (short) (narrow) %v1412_v44, 8  ;;  %v1402_v39 = vpop.permute.xlu1 %1401  ;;  %v1426_v5 = vpop.permute.xlu0 %1425  ;;  %v13509_v44 = vld [vmem:[#allocation36_spill] sm:$0xff]  ;;  %9383 = vrcp.f32 %v11404_v56 }
 0x79a   : > { %v3297_v10 = vmul.f32 %v9364_v11, %v13509_v44  ;;  %v13528_v44 = vld [vmem:[#allocation8_spill] sm:$0xff]  ;;  %9385 = vrcp.f32 %v11424_v45 }
 0x79b   : > { %3584 = vxpose.xlu0.b32.cont [3/8] (short) (narrow) %v1392_v2, 8  ;;  %v9366_v2 = vpop.eup %9365  ;;  %9387 = vrcp.f32 %v11426_v15 }
 0x79c   : > { %v8954_v0 = vpack.c.bf16 %v3297_v10, %v3295_v51  ;;  %v13525_v51 = vld [vmem:[#allocation4_spill] sm:$0xff]  ;;  %9389 = vrcp.f32 %v11414_v19  ;;  %v13539_v19 = vld [vmem:[#allocation6_spill] sm:$0xff] }
 0x79d   : > { %3615 = vxpose.xlu1.b32.cont [2/8] (short) (narrow) %v1414_v34, 8  ;;  %v9368_v34 = vpop.eup %9367  ;;  %9391 = vrcp.f32 %v11419_v27  ;;  %v13540_v27 = vld [vmem:[#allocation9_spill] sm:$0xff] }
 0x79e   : > { %9393 = vrcp.f32 %v11441_v12  ;;  %v13543_v12 = vld [vmem:[#allocation30_spill] sm:$0xff] }
 0x79f   : > { %3585 = vxpose.xlu0.b32.cont [4/8] (short) (narrow) %v1394_v4, 8  ;;  %v13511_v4 = vld [vmem:[#allocation41_spill] sm:$0xff]  ;;  %9395 = vrcp.f32 %v11443_v50 }
 0x7a0   : > { %9397 = vrcp.f32 %v11435_v16  ;;  %v13544_v16 = vld [vmem:[#allocation13_spill] sm:$0xff] }
 0x7a1   : > { %3616 = vxpose.xlu1.b32.cont [3/8] (short) (narrow) %v1416_v55, 8  ;;  %v3299_v55 = vmul.f32 %v9366_v2, %v13510_v21  ;;  %v13534_v21 = vld [vmem:[#allocation3_spill] sm:$0xff]  ;;  %9399 = vrcp.f32 %v11438_v25 }
 0x7a3   : > { %3586 = vxpose.xlu0.b32.cont [5/8] (short) (narrow) %v1396_v9, 8  ;;  %v9370_v9 = vpop.eup %9369 }
 0x7a5   : > { %3617 = vxpose.xlu1.b32.cont [4/8] (short) (narrow) %v1418_v62, 8  ;;  %v3301_v62 = vmul.f32 %v9368_v34, %v13511_v4  ;;  %v13533_v34 = vld [vmem:[#allocation2_spill] sm:$0xff]  ;;  %v13536_v4 = vld [vmem:[#allocation53_spill] sm:$0xff] }
 0x7a7   : > { %3587 = vxpose.xlu0.b32.cont [6/8] (short) (narrow) %v1398_v42, 8  ;;  %v13512_v42 = vpack.c.bf16 %v11084_v24, %v11087_v43  ;;  %v13515_v43 = vpack.c.bf16 %v11048_v26, %v11051_v17  ;;  %v13517_v26 = vpack.c.bf16 %v11065_v38, %v11068_v23  ;;  %v13518_v17 = vpack.c.bf16 %v11119_v1, %v11122_v58  ;;  %v13520_v1 = vld [vmem:[#allocation14_spill] sm:$0xff] }
 0x7a8   : > { %v13519_v23 = vpack.c.bf16 %v11134_v57, %v11131_v22  ;;  %v13524_v57 = vld [vmem:[#allocation7_spill] sm:$0xff] }
 0x7a9   : > { %3618 = vxpose.xlu1.b32.cont [5/8] (short) (narrow) %v1420_v35, 8  ;;  %v8958_v35 = vpack.c.bf16 %v3301_v62, %v3299_v55  ;;  %v13535_v55 = vpack.c.bf16 %v13533_v34, %v13534_v21  ;;  %v13537_v62 = vld [vmem:[#allocation29_spill] sm:$0xff] }
 0x7ab   : > { %3588 = vxpose.xlu0.b32.cont [7/8] (short) (narrow) %v1400_v31, 8  ;;  %v9372_v31 = vpop.eup %9371 }
 0x7ac   : > { %v3317_v63 = vmul.f32 %v9372_v31, %v13514_v61  ;;  %v9374_v59 = vpop.eup %9373  ;;  %v13545_v61 = vld [vmem:[#allocation34_spill] sm:$0xff] }
 0x7ad   : > { %3619 = vxpose.xlu1.b32.cont [6/8] (short) (narrow) %v1422_v37, 8  ;;  %v13513_v37 = vld [vmem:[#allocation55_spill] sm:$0xff]  ;;  %v9376_v38 = vpop.eup %9375  ;;  %v3333_v58 = vmul.f32 %v9374_v59, %v13520_v1 }
 0x7ae   : > { %v3331_v54 = vmul.f32 %v9376_v38, %v13521_v8  ;;  %v9378_v14 = vpop.eup %9377 }
 0x7af   : > { %3589 = vxpose.xlu0.b32.end [8/8] (short) (narrow) %v1402_v39, 8  ;;  %v13522_v39 = vld [vmem:[#allocation54_spill] sm:$0xff]  ;;  %v3363_v45 = vmul.f32 %v9378_v14, %v13539_v19 }
 0x7b0   : > { %v13523_v49 = vpack.c.bf16 %v11142_v13, %v13522_v39  ;;  %v8990_v22 = vpack.c.bf16 %v3333_v58, %v3331_v54  ;;  %v13527_v13 = vld [vmem:[#allocation22_spill] sm:$0xff]  ;;  %v13547_v58 = vld [vmem:[#allocation27_spill] sm:$0xff] }
 0x7b1   : > { %3620 = vxpose.xlu1.b32.cont [7/8] (short) (narrow) %v1424_v47, 8  ;;  %v3315_v47 = vmul.f32 %v9370_v9, %v13513_v37  ;;  %v13529_v10 = vpack.c.bf16 %v13527_v13, %v13528_v44 }
 0x7b3   : > { %v3406_v29 = vpop.trf.xlu0  ;;  %v8974_v24 = vpack.c.bf16 %v3317_v63, %v3315_v47 }
 0x7b4   : > { %8678 = vmatmul.mubr.msk.f32.vlgmr.msra.gmra.mrb[36].mxu1 %vm2685_vm3, %v3406_v29  ;;  %v13530_v29 = vld [vmem:[#allocation39_spill] sm:$0xff] }
 0x7b5   : > { %8956 = vmatpush3.bf16.xpose.msk.msra.mxu1 %vm10941_vm4, %v8954_v0  ;;  %3621 = vxpose.xlu1.b32.end [8/8] (short) (narrow) %v1426_v5, 8  ;;  %v13526_v5 = vpack.c.bf16 %v13524_v57, %v13525_v51  ;;  %v13531_v0 = vld [vmem:[#allocation42_spill] sm:$0xff] }
 0x7b6   : > { %8957 = vmatprep.subr.bf16.mxu1 %v13427_v7  ;;  %8715 = vmatprep.mubr.msk.f32.mxu1 %vm9473_vm5, %v9474_v36  ;;  %v13532_v2 = vpack.c.bf16 %v13530_v29, %v13531_v0 }
 0x7b9   : > { %v3438_v41 = vpop.trf.xlu1 }
 0x7ba   : > { %8697 = vmatmul.mubr.msk.f32.vlgmr.msra.gmra.mrb[52].mxu0 %vm2685_vm3, %v3438_v41  ;;  %v13538_v41 = vpack.c.bf16 %v13536_v4, %v13537_v62 }
 0x7bb   : > { %8972 = vmatpush3.bf16.xpose.msk.msra.mxu0 %vm10941_vm4, %v13512_v42  ;;  %8734 = vmatprep.mubr.msk.f32.mxu0 %vm9473_vm5, %v9474_v36  ;;  %v9380_v42 = vpop.eup %9379 }
 0x7bc   : > { %8973 = vmatprep.subr.bf16.mxu0 %v13427_v7  ;;  %v9382_v32 = vpop.eup %9381  ;;  %v3365_v15 = vmul.f32 %v9380_v42, %v13540_v27 }
 0x7bd   : > { %8960 = vmatpush3.bf16.xpose.msk.msra.mxu1 %vm10941_vm4, %v8958_v35  ;;  %v9384_v56 = vpop.eup %9383  ;;  %v13541_v35 = vld [vmem:[#allocation46_spill] sm:$0xff] }
 0x7be   : > { %8961 = vmatprep.subr.bf16.mxu1 %v13427_v7  ;;  %v3379_v31 = vmul.f32 %v9382_v32, %v13541_v35  ;;  %v3381_v30 = vmul.f32 %v9384_v56, %v13542_v3  ;;  %v9386_v52 = vpop.eup %9385 }
 0x7bf   : > { %v3369_v50 = vmul.f32 %v9386_v52, %v13543_v12 }
 0x7c0   : > { %v9038_v6 = vpack.c.bf16 %v3381_v30, %v3379_v31  ;;  %v9475_v31 = vmov 1983009808   ;;  %v4683_v30 = vlaneseq }
 0x7c1   : > { %v4681_v3 = vunpack.c.l.s4 %v9475_v31 }
 0x7c3   : > { %8976 = vmatpush3.bf16.xpose.msk.msra.mxu0 %vm10941_vm4, %v8974_v24  ;;  %v13546_v24 = vld [vmem:[#allocation37_spill] sm:$0xff] }
 0x7c4   : > { %8977 = vmatprep.subr.bf16.mxu0 %v13427_v7 }
 0x7c5   : > { %8964 = vmatpush3.bf16.xpose.msk.msra.mxu1 %vm10941_vm4, %v13515_v43 }
 0x7c6   : > { %8965 = vmatprep.subr.bf16.mxu1 %v13427_v7 }
 0x7cb   : > { %8980 = vmatpush3.bf16.xpose.msk.msra.mxu0 %vm10941_vm4, %v13516_v40 }
 0x7cc   : > { %8981 = vmatprep.subr.bf16.mxu0 %v13427_v7 }
 0x7cd   : > { %8968 = vmatpush3.bf16.xpose.msk.msra.mxu1 %vm10941_vm4, %v13517_v26 }
 0x7ce   : > { %8985 = vmatprep.subr.bf16.mxu1 %v13427_v7 }
 0x7d3   : > { %8984 = vmatpush3.bf16.xpose.msk.msra.mxu0 %vm10941_vm4, %v13518_v17  ;;  %v3470_v53 = vpop.trf.xlu0 }
 0x7d4   : > { %8716 = vmatmul.mubr.msk.f32.vlgmr.msra.gmra.mrb[38].mxu1 %vm2685_vm3, %v3470_v53  ;;  %9001 = vmatprep.subr.bf16.mxu0 %v13427_v7 }
 0x7d5   : > { %8988 = vmatpush3.bf16.xpose.msk.msra.mxu1 %vm10941_vm4, %v13519_v23  ;;  %8753 = vmatprep.mubr.msk.f32.mxu1 %vm9473_vm5, %v9474_v36 }
 0x7d6   : > { %8989 = vmatprep.subr.bf16.mxu1 %v13427_v7 }
 0x7d9   : > { %v3502_v11 = vpop.trf.xlu1 }
 0x7da   : > { %8735 = vmatmul.mubr.msk.f32.vlgmr.msra.gmra.mrb[54].mxu0 %vm2685_vm3, %v3502_v11 }
 0x7db   : > { %9004 = vmatpush3.bf16.xpose.msk.msra.mxu0 %vm10941_vm4, %v13523_v49  ;;  %8772 = vmatprep.mubr.msk.f32.mxu0 %vm9473_vm5, %v9474_v36 }
 0x7dc   : > { %9005 = vmatprep.subr.bf16.mxu0 %v13427_v7 }
 0x7dd   : > { %8992 = vmatpush3.bf16.xpose.msk.msra.mxu1 %vm10941_vm4, %v8990_v22 }
 0x7de   : > { %8993 = vmatprep.subr.bf16.mxu1 %v13427_v7 }
 0x7e3   : > { %9008 = vmatpush3.bf16.xpose.msk.msra.mxu0 %vm10941_vm4, %v13526_v5 }
 0x7e4   : > { %9009 = vmatprep.subr.bf16.mxu0 %v13427_v7 }
 0x7e5   : > { %8996 = vmatpush3.bf16.xpose.msk.msra.mxu1 %vm10941_vm4, %v13529_v10 }
 0x7e6   : > { %8997 = vmatprep.subr.bf16.mxu1 %v13427_v7 }
 0x7eb   : > { %9012 = vmatpush3.bf16.xpose.msk.msra.mxu0 %vm10941_vm4, %v13532_v2 }
 0x7ec   : > { %9013 = vmatprep.subr.bf16.mxu0 %v13427_v7 }
 0x7ed   : > { %9000 = vmatpush3.bf16.xpose.msk.msra.mxu1 %vm10941_vm4, %v13535_v55 }
 0x7ee   : > { %9017 = vmatprep.subr.bf16.mxu1 %v13427_v7 }
 0x7f3   : > { %9016 = vmatpush3.bf16.xpose.msk.msra.mxu0 %vm10941_vm4, %v13538_v41  ;;  %v3566_v9 = vpop.trf.xlu0 }
 0x7f4   : > { %9033 = vmatprep.subr.bf16.mxu0 %v13427_v7 }
 0x7f9   : > { %v3534_v28 = vpop.trf.xlu1 }
 0x7fa   : > { %8754 = vmatmul.mubr.msk.f32.vlgmr.msra.gmra.mrb[40].mxu1 %vm2685_vm3, %v3534_v28  ;;  %8773 = vmatmul.mubr.msk.f32.vlgmr.msra.gmra.mrb[56].mxu0 %vm2685_vm3, %v3566_v9 }
 0x7fb   : > { %9020 = vmatpush3.bf16.xpose.msk.msra.mxu1 %vm10941_vm4, %v9018_v33  ;;  %9036 = vmatpush3.bf16.xpose.msk.msra.mxu0 %vm10941_vm4, %v9034_v48  ;;  %v9022_v33 = vpack.c.bf16 %v3365_v15, %v3363_v45  ;;  %v9388_v48 = vpop.eup %9387 }
 0x7fc   : > { %9021 = vmatprep.subr.bf16.mxu1 %v13427_v7  ;;  %9037 = vmatprep.subr.bf16.mxu0 %v13427_v7  ;;  %v9390_v37 = vpop.eup %9389  ;;  %v3385_v47 = vmul.f32 %v9388_v48, %v13544_v16  ;;  %v4684_v48 = vshrl.u32 %v4683_v30, 7 }
 0x7fd   : > { %8791 = vmatprep.mubr.msk.f32.mxu1 %vm9473_vm5, %v9474_v36  ;;  %8810 = vmatprep.mubr.msk.f32.mxu0 %vm9473_vm5, %v9474_v36  ;;  %v9392_v36 = vpop.eup %9391  ;;  %v3367_v63 = vmul.f32 %v9390_v37, %v13545_v61 }
 0x7fe   : > { %v3383_v25 = vmul.f32 %v9392_v36, %v13546_v24  ;;  %v9394_v43 = vpop.eup %9393  ;;  %v9476_v36 = vmov 1934713408  }
 0x7ff   : > { %v9026_v40 = vpack.c.bf16 %v3369_v50, %v3367_v63  ;;  %v9396_v17 = vpop.eup %9395  ;;  %v3373_v23 = vmul.f32 %v9394_v43, %v11337_v46  ;;  %v4745_v12 = vunpack.c.l.s4 %v9476_v36 }
 0x800   : > { %v9042_v26 = vpack.c.bf16 %v3385_v47, %v3383_v25  ;;  %v9398_v53 = vpop.eup %9397  ;;  %v3389_v38 = vmul.f32 %v9396_v17, %v11341_v18 }
 0x801   : > { %v9400_v59 = vpop.eup %9399  ;;  %v3371_v1 = vmul.f32 %v9398_v53, %v11327_v20  ;;  %v4746_v25 = vunpack.c.0.s8 %v4745_v12 }
 0x802   : > { %v3387_v8 = vmul.f32 %v9400_v59, %v13547_v58 }
 0x803   : > { %9024 = vmatpush3.bf16.xpose.msk.msra.mxu1 %vm10941_vm4, %v9022_v33  ;;  %9040 = vmatpush3.bf16.xpose.msk.msra.mxu0 %vm10941_vm4, %v9038_v6  ;;  %v9030_v54 = vpack.c.bf16 %v3373_v23, %v3371_v1  ;;  %v4682_v6 = vunpack.c.0.s8 %v4681_v3  ;;  %v11642_v58 = vsub.s32 %v4746_v25, %v4684_v48 }
 0x804   : > { %9025 = vmatprep.subr.bf16.mxu1 %v13427_v7  ;;  %9041 = vmatprep.subr.bf16.mxu0 %v13427_v7  ;;  %v9046_v11 = vpack.c.bf16 %v3389_v38, %v3387_v8 }
 0x805   : > { %v11637_v47 = vsub.s32 %v4682_v6, %v4684_v48 }
 0x80b   : > { %9028 = vmatpush3.bf16.xpose.msk.msra.mxu1 %vm10941_vm4, %v9026_v40  ;;  %9044 = vmatpush3.bf16.xpose.msk.msra.mxu0 %vm10941_vm4, %v9042_v26 }
 0x80c   : > { %9029 = vmatprep.subr.bf16.mxu1 %v13427_v7  ;;  %9045 = vmatprep.subr.bf16.mxu0 %v13427_v7 }
 0x813   : > { %9032 = vmatpush3.bf16.xpose.msk.msra.mxu1 %vm10941_vm4, %v9030_v54  ;;  %9048 = vmatpush3.bf16.xpose.msk.msra.mxu0 %vm10941_vm4, %v9046_v11  ;;  %v3598_v39 = vpop.trf.xlu0 }
 0x819   : > { %v3630_v49 = vpop.trf.xlu1 }
 0x81a   : > { %8792 = vmatmul.mubr.msk.f32.vlgmr.msra.gmra.mrb[42].mxu1 %vm2685_vm3, %v3598_v39  ;;  %8811 = vmatmul.mubr.msk.f32.vlgmr.msra.gmra.mrb[58].mxu0 %vm2685_vm3, %v3630_v49 }
 0x887   : > { %v3739_v7 = vpop.f32.mrb[36].mxu1 }
 0x888   : > { %4422 = vxpose.xlu0.b32.start.end [1/1] (short) (narrow) %v3739_v7, 64  ;;  %v8679_v46 = vpop.f32.mrb[37].mxu1 }
 0x88d   : > { %v3836_v20 = vpop.f32.mrb[52].mxu0 }
 0x88e   : > { %4454 = vxpose.xlu1.b32.start.end [1/1] (short) (narrow) %v3836_v20, 64  ;;  %v8698_v18 = vpop.f32.mrb[53].mxu0 }
 0x8a7   : > { %v3933_v22 = vpop.f32.mrb[38].mxu1 }
 0x8a8   : > { %4486 = vxpose.xlu0.b32.start.end [1/1] (short) (narrow) %v3933_v22, 64  ;;  %v8717_v57 = vpop.f32.mrb[39].mxu1 }
 0x8ad   : > { %v4030_v51 = vpop.f32.mrb[54].mxu0 }
 0x8ae   : > { %4518 = vxpose.xlu1.b32.start.end [1/1] (short) (narrow) %v4030_v51, 64  ;;  %v8736_v5 = vpop.f32.mrb[55].mxu0 }
 0x8cd   : > { %v4127_v60 = vpop.f32.mrb[40].mxu1  ;;  %v4224_v13 = vpop.f32.mrb[56].mxu0 }
 0x8ce   : > { %4550 = vxpose.xlu0.b32.start.end [1/1] (short) (narrow) %v4127_v60, 64  ;;  %4582 = vxpose.xlu1.b32.start.end [1/1] (short) (narrow) %v4224_v13, 64  ;;  %v8755_v44 = vpop.f32.mrb[41].mxu1  ;;  %v8774_v10 = vpop.f32.mrb[57].mxu0 }
 0x8ed   : > { %v4321_v29 = vpop.f32.mrb[42].mxu1  ;;  %v4418_v0 = vpop.f32.mrb[58].mxu0 }
 0x8ee   : > { %4646 = vxpose.xlu1.b32.start.end [1/1] (short) (narrow) %v4418_v0, 64  ;;  %4614 = vxpose.xlu0.b32.start.end [1/1] (short) (narrow) %v4321_v29, 64  ;;  %v8793_v2 = vpop.f32.mrb[43].mxu1  ;;  %v8812_v34 = vpop.f32.mrb[59].mxu0 }
 0x908   : > { %v4438_v21 = vpop.trf.xlu0 }
 0x90c   : > { %v4439_v55 = vpop.trf.xlu0 }
 0x90e   : > { %v4470_v4 = vpop.trf.xlu1 }
 0x910   : > { %v11615_v62 = vpop.trf.xlu0 }
 0x912   : > { %v4471_v41 = vpop.trf.xlu1 }
 0x914   : > { %v11617_v14 = vpop.trf.xlu0 }
 0x916   : > { %v4472_v9 = vpop.trf.xlu1 }
 0x918   : > { %v11619_v42 = vpop.trf.xlu0 }
 0x91a   : > { %v11621_v32 = vpop.trf.xlu1 }
 0x91c   : > { %v11623_v28 = vpop.trf.xlu0 }
 0x91e   : > { %v11625_v56 = vpop.trf.xlu1 }
 0x920   : > { %v11627_v19 = vpop.trf.xlu0 }
 0x922   : > { %v11629_v45 = vpop.trf.xlu1 }
 0x924   : > { %v11631_v27 = vpop.trf.xlu0 }
 0x926   : > { %v11633_v15 = vpop.trf.xlu1 }
 0x928   : > { %v4502_v35 = vpop.trf.xlu0 }
 0x929   : > { %v4678_v61 = vcombine.low %v4438_v21, %v4502_v35  ;;  %v4679_v40 = vcombine.high %v4438_v21, %v4502_v35 }
 0x92a   : > { %v11635_v52 = vpop.trf.xlu1 }
 0x92b   : > { %v4686_v59 = vrot.slane %v4678_v61, %v11637_v47  ;;  %v4693_v39 = vrot.slane %v4679_v40, %v11637_v47 }
 0x92c   : > { %v4503_v33 = vpop.trf.xlu0 }
 0x92d   : > { %v4814_v26 = vcombine.low %v4439_v55, %v4503_v33  ;;  %v4815_v49 = vcombine.high %v4439_v55, %v4503_v33 }
 0x92e   : > { %v4534_v37 = vpop.trf.xlu1 }
 0x92f   : > { %v4694_v50 = vcombine.low %v4470_v4, %v4534_v37  ;;  %v4695_v63 = vcombine.high %v4470_v4, %v4534_v37  ;;  %v4822_v7 = vrot.slane %v4814_v26, %v11637_v47  ;;  %v4829_v0 = vrot.slane %v4815_v49, %v11637_v47 }
 0x930   : > { %v4504_v16 = vpop.trf.xlu0 }
 0x931   : > { %v4702_v43 = vrot.slane %v4694_v50, %v11637_v47  ;;  %v4709_v23 = vrot.slane %v4695_v63, %v11637_v47  ;;  %v4950_v20 = vcombine.low %v11615_v62, %v4504_v16  ;;  %v4951_v18 = vcombine.high %v11615_v62, %v4504_v16 }
 0x932   : > { %v4535_v24 = vpop.trf.xlu1 }
 0x933   : > { %v4830_v17 = vcombine.low %v4471_v41, %v4535_v24  ;;  %v4831_v38 = vcombine.high %v4471_v41, %v4535_v24  ;;  %v4742_v8 = vcombine.low %v4686_v59, %v4702_v43  ;;  %v4743_v54 = vcombine.high %v4686_v59, %v4702_v43 }
 0x934   : > { %v4505_v53 = vpop.trf.xlu0  ;;  %v4758_v51 = vcombine.low %v4693_v39, %v4709_v23  ;;  %v4759_v5 = vcombine.high %v4693_v39, %v4709_v23  ;;  %v4958_v21 = vrot.slane %v4950_v20, %v11637_v47  ;;  %v4965_v55 = vrot.slane %v4951_v18, %v11637_v47 }
 0x935   : > { %v4838_v11 = vrot.slane %v4830_v17, %v11637_v47  ;;  %v4845_v60 = vrot.slane %v4831_v38, %v11637_v47  ;;  %v4750_v44 = vrot.slane %v4742_v8, %v11642_v58  ;;  %v4757_v10 = vrot.slane %v4743_v54, %v11642_v58 }
 0x936   : > { %v4536_v1 = vpop.trf.xlu1  ;;  %v4766_v62 = vrot.slane %v4758_v51, %v11642_v58  ;;  %v4773_v41 = vrot.slane %v4759_v5, %v11642_v58  ;;  %v5086_v6 = vcombine.low %v11617_v14, %v4505_v53  ;;  %v5087_v48 = vcombine.high %v11617_v14, %v4505_v53 }
 0x937   : > { %v4966_v22 = vcombine.low %v4472_v9, %v4536_v1  ;;  %v4967_v57 = vcombine.high %v4472_v9, %v4536_v1  ;;  %v4878_v29 = vcombine.low %v4822_v7, %v4838_v11  ;;  %v4879_v2 = vcombine.high %v4822_v7, %v4838_v11 }
 0x938   : > { %v4506_v46 = vpop.trf.xlu0  ;;  %v4894_v9 = vcombine.low %v4829_v0, %v4845_v60  ;;  %v4895_v35 = vcombine.high %v4829_v0, %v4845_v60  ;;  %v8172_v30 = vcombine.low %v4750_v44, %v4757_v10  ;;  %v8174_v16 = vcombine.high %v4750_v44, %v4757_v10 }
 0x939   : > { %v4974_v34 = vrot.slane %v4966_v22, %v11637_v47  ;;  %v4981_v4 = vrot.slane %v4967_v57, %v11637_v47  ;;  %v11660_v33 = vrot.slane %v4878_v29, %v11642_v58  ;;  %v11665_v37 = vrot.slane %v4879_v2, %v11642_v58 }
 0x93a   : > { %v4537_v13 = vpop.trf.xlu1  ;;  %v8176_v25 = vcombine.low %v4766_v62, %v4773_v41  ;;  %v11670_v43 = vrot.slane %v4894_v9, %v11642_v58  ;;  %v11673_v40 = vrot.slane %v4895_v35, %v11642_v58  ;;  %v5222_v14 = vcombine.low %v11619_v42, %v4506_v46 }
 0x93b   : > { %v5014_v36 = vcombine.low %v4958_v21, %v4974_v34  ;;  %v5015_v12 = vcombine.high %v4958_v21, %v4974_v34  ;;  %v5102_v50 = vcombine.low %v11621_v32, %v4537_v13  ;;  %v5030_v61 = vcombine.low %v4965_v55, %v4981_v4 }
 0x93c   : > { %v4507_v31 = vpop.trf.xlu0  ;;  %v5031_v63 = vcombine.high %v4965_v55, %v4981_v4  ;;  %v5103_v24 = vcombine.high %v11621_v32, %v4537_v13  ;;  %v8178_v17 = vcombine.high %v4766_v62, %v4773_v41  ;;  %v5094_v53 = vrot.slane %v5086_v6, %v11637_v47 }
 0x93d   : > { %v5101_v59 = vrot.slane %v5087_v48, %v11637_v47  ;;  %v5223_v23 = vcombine.high %v11619_v42, %v4506_v46  ;;  %v8180_v32 = vcombine.low %v11660_v33, %v11665_v37  ;;  %v11684_v38 = vrot.slane %v5014_v36, %v11642_v58 }
 0x93e   : > { %v4538_v3 = vpop.trf.xlu1  ;;  %v11687_v1 = vrot.slane %v5015_v12, %v11642_v58  ;;  %v5110_v8 = vrot.slane %v5102_v50, %v11637_v47  ;;  %v8182_v11 = vcombine.high %v11660_v33, %v11665_v37  ;;  %v11695_v39 = vrot.slane %v5030_v61, %v11642_v58 }
 0x93f   : > { %v11698_v42 = vrot.slane %v5031_v63, %v11642_v58  ;;  %v5117_v49 = vrot.slane %v5103_v24, %v11637_v47  ;;  %v8184_v7 = vcombine.low %v11670_v43, %v11673_v40  ;;  %v8186_v46 = vcombine.high %v11670_v43, %v11673_v40 }
 0x940   : > { %v11690_v54 = vpop.trf.xlu0  ;;  %v5230_v20 = vrot.slane %v5222_v14, %v11637_v47  ;;  %v5238_v18 = vcombine.low %v11625_v56, %v4538_v3  ;;  %v11710_v57 = vrot.slane %v5223_v23, %v11637_v47  ;;  %v5358_v51 = vcombine.low %v11623_v28, %v4507_v31 }
 0x941   : > { %v5359_v5 = vcombine.high %v11623_v28, %v4507_v31  ;;  %v5239_v60 = vcombine.high %v11625_v56, %v4538_v3  ;;  %v8188_v13 = vcombine.low %v11684_v38, %v11687_v1  ;;  %v5150_v44 = vcombine.low %v5094_v53, %v5110_v8 }
 0x942   : > { %v11676_v26 = vpop.trf.xlu1  ;;  %v5774_v10 = vrot.slane %v8172_v30, %v11637_v47  ;;  %v5790_v29 = vrot.slane %v8174_v16, %v11637_v47  ;;  %v8190_v0 = vcombine.high %v11684_v38, %v11687_v1  ;;  %v8192_v2 = vcombine.low %v11695_v39, %v11698_v42 }
 0x943   : > { %v5151_v34 = vcombine.high %v5094_v53, %v5110_v8  ;;  %v5166_v21 = vcombine.low %v5101_v59, %v5117_v49  ;;  %v5246_v28 = vrot.slane %v5238_v18, %v11637_v47  ;;  %v5806_v56 = vrot.slane %v8176_v25, %v11637_v47 }
 0x944   : > { %v5822_v55 = vrot.slane %v8178_v17, %v11637_v47  ;;  %v5830_v4 = vcombine.low %v5774_v10, %v5790_v29  ;;  %v11726_v62 = vpop.trf.xlu0  ;;  %v8194_v9 = vcombine.high %v11695_v39, %v11698_v42  ;;  %v5167_v35 = vcombine.high %v5101_v59, %v5117_v49 }
 0x945   : > { %v11733_v31 = vrot.slane %v5358_v51, %v11637_v47  ;;  %v5253_v3 = vrot.slane %v5239_v60, %v11637_v47  ;;  %v11737_v30 = vrot.slane %v5150_v44, %v11642_v58  ;;  %v11740_v33 = vrot.slane %v5359_v5, %v11637_v47 }
 0x946   : > { %v11707_v22 = vpop.trf.xlu1  ;;  %v11743_v6 = vrot.slane %v5830_v4, %v11642_v58  ;;  %v5862_v48 = vcombine.low %v5806_v56, %v5822_v55  ;;  %v11746_v37 = vrot.slane %v5151_v34, %v11642_v58  ;;  %v11749_v36 = vrot.slane %v5166_v21, %v11642_v58 }
 0x947   : > { %v5831_v12 = vcombine.high %v5774_v10, %v5790_v29  ;;  %v5863_v50 = vcombine.high %v5806_v56, %v5822_v55  ;;  %v5286_v16 = vcombine.low %v5230_v20, %v5246_v28  ;;  %v5287_v61 = vcombine.high %v5230_v20, %v5246_v28 }
 0x948   : > { %13548 = vst [vmem:[#allocation18_spill] sm:$0xff] %v11743_v6  ;;  %v11752_v63 = vrot.slane %v5862_v48, %v11642_v58  ;;  %v5374_v24 = vcombine.low %v11629_v45, %v11676_v26  ;;  %v11761_v40 = vrot.slane %v5167_v35, %v11642_v58  ;;  %v5302_v14 = vcombine.low %v11710_v57, %v5253_v3 }
 0x949   : > { %v5494_v17 = vcombine.low %v11627_v19, %v11690_v54  ;;  %v5375_v53 = vcombine.high %v11629_v45, %v11676_v26  ;;  %v5303_v59 = vcombine.high %v11710_v57, %v5253_v3  ;;  %v11772_v8 = vrot.slane %v5831_v12, %v11642_v58 }
 0x94a   : > { %v11728_v41 = vpop.trf.xlu1  ;;  %13549 = vst [vmem:[#allocation33_spill] sm:$0xff] %v11752_v63  ;;  %v5895_v23 = vcombine.high %v11743_v6, %v11752_v63  ;;  %v11775_v49 = vrot.slane %v5863_v50, %v11642_v58  ;;  %v8196_v20 = vcombine.low %v11737_v30, %v11746_v37  ;;  %v5495_v18 = vcombine.high %v11627_v19, %v11690_v54 }
 0x94b   : > { %v5910_v51 = vrot.slane %v8180_v32, %v11637_v47  ;;  %v5926_v45 = vrot.slane %v8182_v11, %v11637_v47  ;;  %v11784_v26 = vrot.slane %v5286_v16, %v11642_v58  ;;  %v11787_v57 = vrot.slane %v5287_v61, %v11642_v58 }
 0x94c   : > { %6862 = vrot.lane.b32.xlu0 %v5895_v23, %s9477_s17  ;;  %v5382_v5 = vrot.slane %v5374_v24, %v11637_v47  ;;  %v5942_v60 = vrot.slane %v8184_v7, %v11637_v47  ;;  %v8198_v32 = vcombine.high %v11737_v30, %v11746_v37  ;;  %v5389_v54 = vrot.slane %v5375_v53, %v11637_v47 }
 0x94d   : > { %v5958_v11 = vrot.slane %v8186_v46, %v11637_v47  ;;  %v5966_v10 = vcombine.low %v5910_v51, %v5926_v45  ;;  %v8200_v29 = vcombine.low %v11749_v36, %v11761_v40  ;;  %v11803_v34 = vrot.slane %v5302_v14, %v11642_v58 }
 0x94e   : > { %v11756_v25 = vpop.trf.xlu1  ;;  %v11758_v43 = vpop.trf.xlu0  ;;  %v11806_v7 = vrot.slane %v5303_v59, %v11642_v58  ;;  %v5897_v21 = vcombine.high %v11772_v8, %v11775_v49  ;;  %v8202_v28 = vcombine.high %v11749_v36, %v11761_v40  ;;  %v5510_v55 = vcombine.low %v11633_v15, %v11707_v22 }
 0x94f   : > { %v11813_v56 = vrot.slane %v5966_v10, %v11642_v58  ;;  %v5998_v46 = vcombine.low %v5942_v60, %v5958_v11  ;;  %v8204_v4 = vcombine.low %v11784_v26, %v11787_v57  ;;  %v5502_v35 = vrot.slane %v5494_v17, %v11637_v47 }
 0x950   : > { %v11821_v3 = vrot.slane %v5495_v18, %v11637_v47  ;;  %v5422_v48 = vcombine.low %v11733_v31, %v5382_v5  ;;  %6926 = vrot.lane.b32.xlu0 %v5897_v21, %s9478_s19  ;;  %v5423_v16 = vcombine.high %v11733_v31, %v5382_v5  ;;  %v5438_v61 = vcombine.low %v11740_v33, %v5389_v54 }
 0x951   : > { %13550 = vst [vmem:[#allocation23_spill] sm:$0xff] %v11813_v56  ;;  %v11832_v24 = vrot.slane %v5998_v46, %v11642_v58  ;;  %v5511_v14 = vcombine.high %v11633_v15, %v11707_v22  ;;  %v8206_v17 = vcombine.high %v11784_v26, %v11787_v57  ;;  %v8208_v53 = vcombine.low %v11803_v34, %v11806_v7 }
 0x952   : > { %v11792_v44 = vpop.trf.xlu1  ;;  %v11794_v19 = vpop.trf.xlu0  ;;  %v5439_v59 = vcombine.high %v11740_v33, %v5389_v54  ;;  %v5646_v23 = vcombine.low %v11635_v52, %v11728_v41  ;;  %v5518_v18 = vrot.slane %v5510_v55, %v11637_v47  ;;  %v5647_v5 = vcombine.high %v11635_v52, %v11728_v41 }
 0x953   : > { %13551 = vst [vmem:[#allocation43_spill] sm:$0xff] %v11832_v24  ;;  %v6031_v31 = vcombine.high %v11813_v56, %v11832_v24  ;;  %v5967_v15 = vcombine.high %v5910_v51, %v5926_v45  ;;  %v8210_v22 = vcombine.high %v11803_v34, %v11806_v7  ;;  %v5630_v10 = vcombine.low %v11631_v27, %v11726_v62 }
 0x954   : > { %v5631_v33 = vcombine.high %v11631_v27, %v11726_v62  ;;  %v5999_v54 = vcombine.high %v5942_v60, %v5958_v11  ;;  %v11859_v55 = vrot.slane %v5422_v48, %v11642_v58  ;;  %v11862_v52 = vrot.slane %v5423_v16, %v11642_v58 }
 0x955   : > { %v11865_v41 = vrot.slane %v5438_v61, %v11642_v58  ;;  %6864 = vrot.lane.b32.xlu1 %v6031_v31, %s9477_s17  ;;  %v5525_v51 = vrot.slane %v5511_v14, %v11637_v47  ;;  %v11870_v27 = vrot.slane %v5439_v59, %v11642_v58  ;;  %v5896_v62 = vcombine.low %v11772_v8, %v11775_v49 }
 0x956   : > { %v11825_v12 = vpop.trf.xlu1  ;;  %v11827_v50 = vpop.trf.xlu0  ;;  %v5654_v45 = vrot.slane %v5646_v23, %v11637_v47  ;;  %v11879_v60 = vrot.slane %v8188_v13, %v11637_v47  ;;  %v5558_v11 = vcombine.low %v5502_v35, %v5518_v18  ;;  %v5559_v48 = vcombine.high %v5502_v35, %v5518_v18 }
 0x957   : > { %v5661_v16 = vrot.slane %v5647_v5, %v11637_v47  ;;  %v5981_v61 = vrot.slane %v5967_v15, %v11642_v58  ;;  %v6013_v14 = vrot.slane %v5999_v54, %v11642_v58  ;;  %v11888_v8 = vrot.slane %v8190_v0, %v11637_v47 }
 0x958   : > { %v11894_v13 = vrot.slane %v8192_v2, %v11637_v47  ;;  %v11900_v49 = vrot.slane %v8194_v9, %v11637_v47  ;;  %v5638_v38 = vrot.slane %v5630_v10, %v11637_v47  ;;  %v5645_v1 = vrot.slane %v5631_v33, %v11637_v47 }
 0x959   : > { %v5574_v0 = vcombine.low %v11821_v3, %v5525_v51  ;;  %v5575_v23 = vcombine.high %v11821_v3, %v5525_v51  ;;  %6894 = vrot.lane.b32.xlu1 %v5896_v62, %s9479_s20  ;;  %v8212_v39 = vcombine.low %v11859_v55, %v11862_v52  ;;  %v6102_v2 = vcombine.low %v11879_v60, %v11888_v8 }
 0x95a   : > { %v11854_v21 = vpop.trf.xlu1  ;;  %v11856_v46 = vpop.trf.xlu0  ;;  %v6134_v9 = vcombine.low %v11894_v13, %v11900_v49  ;;  %v5694_v18 = vcombine.low %v5638_v38, %v5654_v45  ;;  %v5695_v3 = vcombine.high %v5638_v38, %v5654_v45  ;;  %v6032_v5 = vcombine.low %v5981_v61, %v6013_v14 }
 0x95b   : > { %v11922_v15 = vrot.slane %v5558_v11, %v11642_v58  ;;  %v11925_v10 = vrot.slane %v5559_v48, %v11642_v58  ;;  %v5710_v33 = vcombine.low %v5645_v1, %v5661_v16  ;;  %v5711_v54 = vcombine.high %v5645_v1, %v5661_v16 }
 0x95c   : > { %v11932_v42 = vrot.slane %v5574_v0, %v11642_v58  ;;  %v11935_v31 = vrot.slane %v5575_v23, %v11642_v58  ;;  %v6182_v45 = vrot.slane %v8196_v20, %v11637_v47  ;;  %v6198_v11 = vrot.slane %v8198_v32, %v11637_v47 }
 0x95d   : > { %6896 = vrot.lane.b32.xlu1 %v6032_v5, %s9479_s20  ;;  %v11947_v48 = vrot.slane %v6102_v2, %v11642_v58  ;;  %v11950_v16 = vrot.slane %v6134_v9, %v11642_v58  ;;  %v6214_v38 = vrot.slane %v8200_v29, %v11637_v47  ;;  %v6230_v20 = vrot.slane %v8202_v28, %v11637_v47 }
 0x95e   : > { %v11902_v35 = vpop.trf.xlu1  ;;  %v11904_v59 = vpop.trf.xlu0  ;;  %v8218_v30 = vcombine.high %v11865_v41, %v11870_v27  ;;  %v11963_v37 = vrot.slane %v5694_v18, %v11642_v58  ;;  %v11966_v32 = vrot.slane %v5695_v3, %v11642_v58  ;;  %v6033_v1 = vcombine.high %v5981_v61, %v6013_v14 }
 0x95f   : > { %13552 = vst [vmem:[#allocation47_spill] sm:$0xff] %v11947_v48  ;;  %13553 = vst [vmem:[#allocation24_spill] sm:$0xff] %v11950_v16  ;;  %v11973_v23 = vrot.slane %v5710_v33, %v11642_v58  ;;  %v11976_v36 = vrot.slane %v5711_v54, %v11642_v58  ;;  %v6103_v61 = vcombine.high %v11879_v60, %v11888_v8 }
 0x960   : > { %13554 = vst [vmem:[#allocation25_spill] sm:$0xff] %v11963_v37  ;;  %13555 = vst [vmem:[#allocation19_spill] sm:$0xff] %v11966_v32  ;;  %v6135_v14 = vcombine.high %v11894_v13, %v11900_v49  ;;  %v6238_v9 = vcombine.low %v6182_v45, %v6198_v11  ;;  %v6167_v18 = vcombine.high %v11947_v48, %v11950_v16 }
 0x961   : > { %13556 = vst [vmem:[#allocation44_spill] sm:$0xff] %v11973_v23  ;;  %13557 = vst [vmem:[#allocation59_spill] sm:$0xff] %v11976_v36  ;;  %6928 = vrot.lane.b32.xlu1 %v6033_v1, %s9478_s19  ;;  %v6270_v3 = vcombine.low %v6214_v38, %v6230_v20  ;;  %v6239_v5 = vcombine.high %v6182_v45, %v6198_v11  ;;  %v6271_v33 = vcombine.high %v6214_v38, %v6230_v20 }
 0x962   : > { %v11927_v51 = vpop.trf.xlu1  ;;  %v11929_v62 = vpop.trf.xlu0  ;;  %v6318_v54 = vrot.slane %v8204_v4, %v11637_v47  ;;  %v6334_v60 = vrot.slane %v8206_v17, %v11637_v47  ;;  %v12003_v8 = vrot.slane %v8208_v53, %v11637_v47  ;;  %v12009_v13 = vrot.slane %v8210_v22, %v11637_v47 }
 0x963   : > { %v12027_v7 = vrot.slane %v6103_v61, %v11642_v58  ;;  %v12030_v22 = vrot.slane %v6135_v14, %v11642_v58  ;;  %v12033_v45 = vrot.slane %v6238_v9, %v11642_v58  ;;  %v12036_v11 = vrot.slane %v6270_v3, %v11642_v58 }
 0x964   : > { %v12039_v38 = vrot.slane %v6239_v5, %v11642_v58  ;;  %v12042_v20 = vrot.slane %v6271_v33, %v11642_v58  ;;  %v6374_v61 = vcombine.low %v6318_v54, %v6334_v60  ;;  %v6406_v14 = vcombine.low %v12003_v8, %v12009_v13 }
 0x965   : > { %6866 = vrot.lane.b32.xlu1 %v6167_v18, %s9477_s17  ;;  %v6454_v9 = vrot.slane %v8212_v39, %v11637_v47  ;;  %v13558_v18 = vcombine.high %v11859_v55, %v11862_v52  ;;  %v6375_v34 = vcombine.high %v6318_v54, %v6334_v60  ;;  %v13559_v1 = vcombine.low %v11865_v41, %v11870_v27 }
 0x966   : > { %v11978_v40 = vpop.trf.xlu1  ;;  %v11980_v28 = vpop.trf.xlu0  ;;  %v12063_v26 = vrot.slane %v8218_v30, %v11637_v47  ;;  %v6407_v41 = vcombine.high %v12003_v8, %v12009_v13  ;;  %v12088_v30 = vrot.slane %v6374_v61, %v11642_v58 }
 0x967   : > { %v6470_v3 = vrot.slane %v13558_v18, %v11637_v47  ;;  %v12060_v57 = vrot.slane %v13559_v1, %v11637_v47 }
 0x969   : > { %v6510_v27 = vcombine.low %v6454_v9, %v6470_v3  ;;  %v6511_v60 = vcombine.high %v6454_v9, %v6470_v3 }
 0x96a   : > { %v12019_v17 = vpop.trf.xlu1  ;;  %v12021_v53 = vpop.trf.xlu0 }
 0x96e   : > { %v4662_v5 = vpop.trf.xlu1  ;;  %v4630_v33 = vpop.trf.xlu0 }
 0x96f   : > { %v4726_v49 = vcombine.low %v11756_v25, %v4662_v5  ;;  %v4727_v55 = vcombine.high %v11756_v25, %v4662_v5  ;;  %v4710_v52 = vcombine.low %v11758_v43, %v4630_v33  ;;  %v4711_v54 = vcombine.high %v11758_v43, %v4630_v33 }
 0x971   : > { %v4734_v1 = vrot.slane %v4726_v49, %v11637_v47  ;;  %v4741_v25 = vrot.slane %v4727_v55, %v11637_v47  ;;  %v4718_v18 = vrot.slane %v4710_v52, %v11637_v47  ;;  %v4725_v43 = vrot.slane %v4711_v54, %v11637_v47 }
 0x972   : > { %v4663_v5 = vpop.trf.xlu1  ;;  %v4631_v33 = vpop.trf.xlu0  ;;  %v12091_v49 = vrot.slane %v6406_v14, %v11642_v58  ;;  %v12094_v55 = vrot.slane %v6375_v34, %v11642_v58  ;;  %v6542_v52 = vcombine.low %v12060_v57, %v12063_v26 }
 0x973   : > { %v4862_v54 = vcombine.low %v11792_v44, %v4663_v5  ;;  %v4863_v39 = vcombine.high %v11792_v44, %v4663_v5  ;;  %v4846_v8 = vcombine.low %v11794_v19, %v4631_v33  ;;  %v4847_v13 = vcombine.high %v11794_v19, %v4631_v33 }
 0x974   : > { %v4774_v9 = vcombine.low %v4718_v18, %v4734_v1  ;;  %v4775_v61 = vcombine.high %v4718_v18, %v4734_v1  ;;  %v4790_v3 = vcombine.low %v4725_v43, %v4741_v25  ;;  %v4791_v4 = vcombine.high %v4725_v43, %v4741_v25 }
 0x975   : > { %v4870_v14 = vrot.slane %v4862_v54, %v11637_v47  ;;  %v4877_v34 = vrot.slane %v4863_v39, %v11637_v47  ;;  %v4854_v2 = vrot.slane %v4846_v8, %v11637_v47  ;;  %v4861_v29 = vrot.slane %v4847_v13, %v11637_v47 }
 0x976   : > { %v4664_v0 = vpop.trf.xlu1  ;;  %v4632_v48 = vpop.trf.xlu0  ;;  %v12107_v44 = vrot.slane %v6407_v41, %v11642_v58  ;;  %v12110_v5 = vrot.slane %v6510_v27, %v11642_v58  ;;  %v12113_v19 = vrot.slane %v6511_v60, %v11642_v58  ;;  %v12118_v33 = vrot.slane %v6542_v52, %v11642_v58 }
 0x977   : > { %v4910_v25 = vcombine.low %v4854_v2, %v4870_v14  ;;  %v4911_v39 = vcombine.high %v4854_v2, %v4870_v14  ;;  %v4926_v18 = vcombine.low %v4861_v29, %v4877_v34  ;;  %v4927_v43 = vcombine.high %v4861_v29, %v4877_v34 }
 0x978   : > { %13560 = vst [vmem:[#allocation61_spill] sm:$0xff] %v12113_v19  ;;  %v13561_v41 = vcombine.low %v11922_v15, %v11925_v10  ;;  %v13562_v60 = vcombine.high %v11922_v15, %v11925_v10  ;;  %v13563_v2 = vcombine.low %v11932_v42, %v11935_v31  ;;  %v4782_v52 = vrot.slane %v4774_v9, %v11642_v58 }
 0x979   : > { %v4789_v8 = vrot.slane %v4775_v61, %v11642_v58  ;;  %v4798_v13 = vrot.slane %v4790_v3, %v11642_v58  ;;  %v4805_v14 = vrot.slane %v4791_v4, %v11642_v58  ;;  %v4998_v34 = vcombine.low %v11825_v12, %v4664_v0 }
 0x97a   : > { %v12124_v54 = vrot.slane %v13561_v41, %v11637_v47  ;;  %v12130_v27 = vrot.slane %v13562_v60, %v11637_v47  ;;  %v12136_v29 = vrot.slane %v13563_v2, %v11637_v47  ;;  %v4999_v15 = vcombine.high %v11825_v12, %v4664_v0  ;;  %v4665_v0 = vpop.trf.xlu1  ;;  %v4633_v16 = vpop.trf.xlu0 }
 0x97b   : > { %v4982_v10 = vcombine.low %v11827_v50, %v4632_v48  ;;  %v4983_v41 = vcombine.high %v11827_v50, %v4632_v48  ;;  %v4918_v60 = vrot.slane %v4910_v25, %v11642_v58  ;;  %v4925_v2 = vrot.slane %v4911_v39, %v11642_v58 }
 0x97c   : > { %v4934_v9 = vrot.slane %v4926_v18, %v11642_v58  ;;  %v4941_v61 = vrot.slane %v4927_v43, %v11642_v58  ;;  %v5006_v3 = vrot.slane %v4998_v34, %v11637_v47  ;;  %v5013_v4 = vrot.slane %v4999_v15, %v11637_v47 }
 0x97d   : > { %v4990_v1 = vrot.slane %v4982_v10, %v11637_v47  ;;  %v4997_v12 = vrot.slane %v4983_v41, %v11637_v47  ;;  %v8173_v24 = vcombine.low %v4782_v52, %v4789_v8  ;;  %v8175_v50 = vcombine.high %v4782_v52, %v4789_v8 }
 0x97e   : > { %v13564_v48 = vcombine.high %v11932_v42, %v11935_v31  ;;  %v8177_v18 = vcombine.low %v4798_v13, %v4805_v14  ;;  %v8179_v43 = vcombine.high %v4798_v13, %v4805_v14  ;;  %v5134_v41 = vcombine.low %v11854_v21, %v4665_v0 }
 0x97f   : > { %v5046_v34 = vcombine.low %v4990_v1, %v5006_v3  ;;  %v5047_v15 = vcombine.high %v4990_v1, %v5006_v3  ;;  %v5062_v10 = vcombine.low %v4997_v12, %v5013_v4  ;;  %v5063_v56 = vcombine.high %v4997_v12, %v5013_v4 }
 0x980   : > { %v12158_v25 = vrot.slane %v13564_v48, %v11637_v47  ;;  %v5118_v63 = vcombine.low %v11856_v46, %v4633_v16  ;;  %v8181_v52 = vcombine.low %v4918_v60, %v4925_v2  ;;  %v8183_v8 = vcombine.high %v4918_v60, %v4925_v2  ;;  %v4666_v2 = vpop.trf.xlu1 }
 0x981   : > { %v8185_v6 = vcombine.low %v4934_v9, %v4941_v61  ;;  %v8187_v19 = vcombine.high %v4934_v9, %v4941_v61  ;;  %v5054_v42 = vrot.slane %v5046_v34, %v11642_v58  ;;  %v5061_v31 = vrot.slane %v5047_v15, %v11642_v58 }
 0x982   : > { %v5135_v48 = vcombine.high %v11854_v21, %v4665_v0  ;;  %v5119_v13 = vcombine.high %v11856_v46, %v4633_v16  ;;  %v12169_v1 = vrot.slane %v8173_v24, %v11637_v47  ;;  %v12172_v14 = vrot.slane %v8175_v50, %v11637_v47  ;;  %v4634_v24 = vpop.trf.xlu0 }
 0x983   : > { %v12175_v3 = vrot.slane %v8177_v18, %v11637_v47  ;;  %v12178_v60 = vrot.slane %v8179_v43, %v11637_v47  ;;  %v5070_v9 = vrot.slane %v5062_v10, %v11642_v58  ;;  %v5077_v61 = vrot.slane %v5063_v56, %v11642_v58 }
 0x984   : > { %v5142_v21 = vrot.slane %v5134_v41, %v11637_v47  ;;  %v5126_v46 = vrot.slane %v5118_v63, %v11637_v47  ;;  %v12185_v16 = vrot.slane %v8181_v52, %v11637_v47  ;;  %v12188_v4 = vrot.slane %v8183_v8, %v11637_v47 }
 0x985   : > { %v12191_v12 = vrot.slane %v8185_v6, %v11637_v47  ;;  %v12194_v0 = vrot.slane %v8187_v19, %v11637_v47  ;;  %v8189_v50 = vcombine.low %v5054_v42, %v5061_v31  ;;  %v8191_v18 = vcombine.high %v5054_v42, %v5061_v31 }
 0x986   : > { %v12197_v56 = vrot.slane %v5135_v48, %v11637_v47  ;;  %v12200_v63 = vrot.slane %v5119_v13, %v11637_v47  ;;  %v5270_v43 = vcombine.low %v11902_v35, %v4666_v2  ;;  %v5271_v34 = vcombine.high %v11902_v35, %v4666_v2  ;;  %v4667_v13 = vpop.trf.xlu1 }
 0x987   : > { %v5254_v15 = vcombine.low %v11904_v59, %v4634_v24  ;;  %v5255_v6 = vcombine.high %v11904_v59, %v4634_v24  ;;  %v8193_v10 = vcombine.low %v5070_v9, %v5077_v61  ;;  %v8195_v41 = vcombine.high %v5070_v9, %v5077_v61  ;;  %v4635_v9 = vpop.trf.xlu0 }
 0x988   : > { %v5182_v19 = vcombine.low %v5126_v46, %v5142_v21  ;;  %v5183_v52 = vcombine.high %v5126_v46, %v5142_v21  ;;  %v5278_v8 = vrot.slane %v5270_v43, %v11637_v47  ;;  %v5285_v42 = vrot.slane %v5271_v34, %v11637_v47 }
 0x989   : > { %v5262_v31 = vrot.slane %v5254_v15, %v11637_v47  ;;  %v5269_v48 = vrot.slane %v5255_v6, %v11637_v47  ;;  %v12211_v39 = vrot.slane %v8189_v50, %v11637_v47  ;;  %v12214_v35 = vrot.slane %v8191_v18, %v11637_v47 }
 0x98a   : > { %v5846_v43 = vcombine.low %v12169_v1, %v12172_v14  ;;  %v5878_v50 = vcombine.low %v12175_v3, %v12178_v60  ;;  %v5406_v18 = vcombine.low %v11927_v51, %v4667_v13  ;;  %v5407_v34 = vcombine.high %v11927_v51, %v4667_v13  ;;  %v4668_v59 = vpop.trf.xlu1 }
 0x98b   : > { %v5318_v61 = vcombine.low %v5262_v31, %v5278_v8  ;;  %v5319_v21 = vcombine.high %v5262_v31, %v5278_v8  ;;  %v5334_v46 = vcombine.low %v5269_v48, %v5285_v42  ;;  %v5335_v24 = vcombine.high %v5269_v48, %v5285_v42 }
 0x98c   : > { %v5854_v31 = vrot.slane %v5846_v43, %v11642_v58  ;;  %v5886_v48 = vrot.slane %v5878_v50, %v11642_v58  ;;  %v5414_v2 = vrot.slane %v5406_v18, %v11637_v47  ;;  %v5421_v51 = vrot.slane %v5407_v34, %v11637_v47  ;;  %v4636_v34 = vpop.trf.xlu0 }
 0x98d   : > { %v12227_v15 = vrot.slane %v5318_v61, %v11642_v58  ;;  %v12230_v6 = vrot.slane %v5319_v21, %v11642_v58  ;;  %v12233_v8 = vrot.slane %v5334_v46, %v11642_v58  ;;  %v12236_v42 = vrot.slane %v5335_v24, %v11642_v58 }
 0x98e   : > { %v5899_v24 = vcombine.high %v5854_v31, %v5886_v48  ;;  %v5898_v43 = vcombine.low %v5854_v31, %v5886_v48  ;;  %v5390_v50 = vcombine.low %v11929_v62, %v4635_v9  ;;  %v5391_v18 = vcombine.high %v11929_v62, %v4635_v9 }
 0x98f   : > { %v12253_v36 = vrot.slane %v8193_v10, %v11637_v47  ;;  %v12256_v13 = vrot.slane %v8195_v41, %v11637_v47  ;;  %v12259_v61 = vrot.slane %v5182_v19, %v11642_v58  ;;  %v12262_v21 = vrot.slane %v5183_v52, %v11642_v58 }
 0x990   : > { %6990 = vrot.lane.b32.xlu1 %v5899_v24, %s9480_s21  ;;  %6958 = vrot.lane.b32.xlu0 %v5898_v43, %s9481_s22  ;;  %v5398_v62 = vrot.slane %v5390_v50, %v11637_v47  ;;  %v5405_v10 = vrot.slane %v5391_v18, %v11637_v47  ;;  %v5982_v41 = vcombine.low %v12185_v16, %v12188_v4 }
 0x991   : > { %v6014_v19 = vcombine.low %v12191_v12, %v12194_v0  ;;  %v5542_v9 = vcombine.low %v11978_v40, %v4668_v59  ;;  %v5543_v52 = vcombine.high %v11978_v40, %v4668_v59  ;;  %v5526_v31 = vcombine.low %v11980_v28, %v4636_v34 }
 0x992   : > { %v5454_v48 = vcombine.low %v5398_v62, %v5414_v2  ;;  %v5455_v24 = vcombine.high %v5398_v62, %v5414_v2  ;;  %v5470_v46 = vcombine.low %v5405_v10, %v5421_v51  ;;  %v5471_v43 = vcombine.high %v5405_v10, %v5421_v51 }
 0x993   : > { %v12276_v50 = vrot.slane %v5982_v41, %v11642_v58  ;;  %v12279_v18 = vrot.slane %v6014_v19, %v11642_v58  ;;  %v5550_v23 = vrot.slane %v5542_v9, %v11637_v47  ;;  %v5557_v32 = vrot.slane %v5543_v52, %v11637_v47 }
 0x994   : > { %v12284_v37 = vrot.slane %v5454_v48, %v11642_v58  ;;  %v12287_v40 = vrot.slane %v5455_v24, %v11642_v58  ;;  %v12290_v59 = vrot.slane %v5470_v46, %v11642_v58  ;;  %v12293_v2 = vrot.slane %v5471_v43, %v11642_v58  ;;  %v4669_v24 = vpop.trf.xlu1  ;;  %v4637_v43 = vpop.trf.xlu0 }
 0x995   : > { %v13565_v51 = vcombine.low %v12027_v7, %v12030_v22  ;;  %v6034_v62 = vcombine.low %v12276_v50, %v12279_v18  ;;  %v5527_v10 = vcombine.high %v11980_v28, %v4636_v34  ;;  %v5534_v41 = vrot.slane %v5526_v31, %v11637_v47 }
 0x996   : > { %v5847_v19 = vcombine.high %v12169_v1, %v12172_v14  ;;  %v8213_v46 = vcombine.low %v12284_v37, %v12287_v40  ;;  %v13566_v28 = vcombine.low %v12200_v63, %v12197_v56  ;;  %v8197_v48 = vcombine.low %v12259_v61, %v12262_v21 }
 0x997   : > { %6898 = vrot.lane.b32.xlu1 %v13565_v51, %s9479_s20  ;;  %6960 = vrot.lane.b32.xlu0 %v6034_v62, %s9481_s22  ;;  %v5541_v1 = vrot.slane %v5527_v10, %v11637_v47  ;;  %v5590_v14 = vcombine.low %v5534_v41, %v5550_v23  ;;  %v5591_v31 = vcombine.high %v5534_v41, %v5550_v23 }
 0x998   : > { %v12317_v34 = vrot.slane %v13566_v28, %v11642_v58  ;;  %v13567_v51 = vcombine.high %v12200_v63, %v12197_v56  ;;  %v8199_v28 = vcombine.high %v12259_v61, %v12262_v21  ;;  %v12330_v9 = vrot.slane %v5847_v19, %v11642_v58 }
 0x999   : > { %v12333_v62 = vrot.slane %v5590_v14, %v11642_v58  ;;  %v12336_v23 = vrot.slane %v5591_v31, %v11642_v58  ;;  %v5606_v10 = vcombine.low %v5541_v1, %v5557_v32  ;;  %v5607_v41 = vcombine.high %v5541_v1, %v5557_v32 }
 0x99a   : > { %v5213_v52 = vrot.slane %v13567_v51, %v11642_v58  ;;  %v5879_v56 = vcombine.high %v12175_v3, %v12178_v60  ;;  %v5678_v63 = vcombine.low %v12019_v17, %v4669_v24  ;;  %v5679_v51 = vcombine.high %v12019_v17, %v4669_v24 }
 0x99b   : > { %v5662_v61 = vcombine.low %v12021_v53, %v4637_v43  ;;  %v12344_v21 = vrot.slane %v5606_v10, %v11642_v58  ;;  %v12347_v19 = vrot.slane %v5607_v41, %v11642_v58  ;;  %v13568_v3 = vcombine.high %v12033_v45, %v12036_v11 }
 0x99c   : > { %v5893_v17 = vrot.slane %v5879_v56, %v11642_v58  ;;  %v5686_v60 = vrot.slane %v5678_v63, %v11637_v47  ;;  %v5693_v1 = vrot.slane %v5679_v51, %v11637_v47  ;;  %v5663_v31 = vcombine.high %v12021_v53, %v4637_v43 }
 0x99d   : > { %6868 = vrot.lane.b32.xlu0 %v13568_v3, %s9477_s17  ;;  %v8201_v24 = vcombine.low %v12317_v34, %v5213_v52  ;;  %v8203_v10 = vcombine.high %v12317_v34, %v5213_v52  ;;  %v12368_v3 = vrot.slane %v8197_v48, %v11637_v47  ;;  %v5670_v63 = vrot.slane %v5662_v61, %v11637_v47 }
 0x99e   : > { %v5900_v56 = vcombine.low %v12330_v9, %v5893_v17  ;;  %v5677_v51 = vrot.slane %v5663_v31, %v11637_v47  ;;  %v12374_v53 = vrot.slane %v8199_v28, %v11637_v47  ;;  %v13569_v52 = vcombine.low %v12227_v15, %v12230_v6 }
 0x99f   : > { %v6035_v43 = vcombine.high %v12276_v50, %v12279_v18  ;;  %v5983_v48 = vcombine.high %v12185_v16, %v12188_v4  ;;  %v5726_v61 = vcombine.low %v5670_v63, %v5686_v60  ;;  %v5727_v31 = vcombine.high %v5670_v63, %v5686_v60 }
 0x9a0   : > { %v12380_v34 = vrot.slane %v13569_v52, %v11637_v47  ;;  %7022 = vrot.lane.b32.xlu1 %v5900_v56, %s9482_s23  ;;  %v5742_v32 = vcombine.low %v5677_v51, %v5693_v1  ;;  %v5743_v28 = vcombine.high %v5677_v51, %v5693_v1  ;;  %v13570_v41 = vcombine.high %v12227_v15, %v12230_v6 }
 0x9a1   : > { %6992 = vrot.lane.b32.xlu0 %v6035_v43, %s9480_s21  ;;  %v6015_v50 = vcombine.high %v12191_v12, %v12194_v0  ;;  %v6118_v16 = vcombine.low %v12211_v39, %v12214_v35  ;;  %v6150_v4 = vcombine.low %v12253_v36, %v12256_v13  ;;  %v5734_v18 = vrot.slane %v5726_v61, %v11642_v58 }
 0x9a2   : > { %v12391_v14 = vrot.slane %v13570_v41, %v11637_v47  ;;  %v5741_v60 = vrot.slane %v5727_v31, %v11642_v58  ;;  %v5750_v1 = vrot.slane %v5742_v32, %v11642_v58  ;;  %v5757_v15 = vrot.slane %v5743_v28, %v11642_v58 }
 0x9a3   : > { %v13571_v6 = vcombine.low %v12233_v8, %v12236_v42  ;;  %v13572_v12 = vcombine.high %v12233_v8, %v12236_v42  ;;  %v5997_v56 = vrot.slane %v5983_v48, %v11642_v58  ;;  %v6029_v63 = vrot.slane %v6015_v50, %v11642_v58 }
 0x9a4   : > { %v8229_v51 = vcombine.low %v5734_v18, %v5741_v60  ;;  %v8231_v32 = vcombine.high %v5734_v18, %v5741_v60  ;;  %v8233_v52 = vcombine.low %v5750_v1, %v5757_v15  ;;  %v8235_v43 = vcombine.high %v5750_v1, %v5757_v15 }
 0x9a5   : > { %v12408_v41 = vrot.slane %v13571_v6, %v11637_v47  ;;  %v12414_v0 = vrot.slane %v13572_v12, %v11637_v47  ;;  %v13573_v61 = vcombine.high %v12027_v7, %v12030_v22  ;;  %v12423_v31 = vrot.slane %v8201_v24, %v11637_v47 }
 0x9a6   : > { %v12426_v8 = vrot.slane %v8203_v10, %v11637_v47  ;;  %v13574_v42 = vcombine.low %v12039_v38, %v12042_v20  ;;  %v6439_v48 = vcombine.high %v12088_v30, %v12091_v49  ;;  %v6440_v28 = vcombine.low %v12094_v55, %v12107_v44 }
 0x9a7   : > { %6930 = vrot.lane.b32.xlu1 %v13573_v61, %s9478_s19  ;;  %v5901_v7 = vcombine.high %v12330_v9, %v5893_v17  ;;  %v6126_v22 = vrot.slane %v6118_v16, %v11642_v58  ;;  %v6158_v24 = vrot.slane %v6150_v4, %v11642_v58  ;;  %v13575_v10 = vcombine.high %v12060_v57, %v12063_v26 }
 0x9a8   : > { %6900 = vrot.lane.b32.xlu0 %v13574_v42, %s9479_s20  ;;  %v6036_v18 = vcombine.low %v5997_v56, %v6029_v63  ;;  %v6575_v60 = vcombine.high %v12110_v5, %v12118_v33  ;;  %v13576_v1 = vcombine.low %v12124_v54, %v12130_v27  ;;  %v6678_v9 = vcombine.low %v12136_v29, %v12158_v25 }
 0x9a9   : > { %v12443_v50 = vrot.slane %v13575_v10, %v11642_v58  ;;  %v12459_v26 = vrot.slane %v8213_v46, %v11637_v47  ;;  %v6254_v57 = vcombine.low %v12368_v3, %v12374_v53  ;;  %v6390_v17 = vcombine.low %v12380_v34, %v12391_v14 }
 0x9aa   : > { %v12451_v15 = vrot.slane %v13576_v1, %v11642_v58  ;;  %v6422_v16 = vcombine.low %v12408_v41, %v12414_v0  ;;  %v13577_v4 = vcombine.high %v12284_v37, %v12287_v40  ;;  %v13578_v46 = vcombine.low %v12290_v59, %v12293_v2 }
 0x9ab   : > { %7054 = vrot.lane.b32.xlu1 %v5901_v7, %s9483_s24  ;;  %v13579_v61 = vcombine.high %v12290_v59, %v12293_v2  ;;  %v6286_v7 = vcombine.low %v12423_v31, %v12426_v8  ;;  %v13580_v37 = vcombine.low %v12333_v62, %v12336_v23  ;;  %v6170_v10 = vcombine.low %v6126_v22, %v6158_v24 }
 0x9ac   : > { %v6477_v6 = vrot.slane %v13577_v4, %v11637_v47  ;;  %v6493_v12 = vrot.slane %v13578_v46, %v11637_v47  ;;  %7024 = vrot.lane.b32.xlu0 %v6036_v18, %s9482_s23  ;;  %v12490_v1 = vrot.slane %v6390_v17, %v11642_v58  ;;  %v12493_v4 = vrot.slane %v6422_v16, %v11642_v58 }
 0x9ad   : > { %v6509_v42 = vrot.slane %v13579_v61, %v11637_v47  ;;  %v12487_v40 = vrot.slane %v13580_v37, %v11637_v47  ;;  %v13581_v59 = vcombine.high %v12333_v62, %v12336_v23  ;;  %v13582_v18 = vcombine.low %v12344_v21, %v12347_v19 }
 0x9ae   : > { %v13583_v17 = vcombine.high %v12344_v21, %v12347_v19  ;;  %v6037_v16 = vcombine.high %v5997_v56, %v6029_v63  ;;  %v6171_v37 = vcombine.high %v6126_v22, %v6158_v24  ;;  %v12515_v62 = vrot.slane %v6254_v57, %v11642_v58 }
 0x9af   : > { %v12499_v2 = vrot.slane %v13581_v59, %v11637_v47  ;;  %v12505_v46 = vrot.slane %v13582_v18, %v11637_v47  ;;  %6962 = vrot.lane.b32.xlu1 %v6170_v10, %s9481_s22  ;;  %v6119_v23 = vcombine.high %v12211_v39, %v12214_v35  ;;  %v6442_v59 = vcombine.low %v12490_v1, %v12493_v4  ;;  %v13586_v10 = vld [vmem:[#allocation19_spill] sm:$0xff] }
 0x9b0   : > { %v12511_v61 = vrot.slane %v13583_v17, %v11637_v47  ;;  %v13584_v18 = vcombine.high %v12039_v38, %v12042_v20  ;;  %v12526_v21 = vrot.slane %v6286_v7, %v11642_v58  ;;  %v6151_v19 = vcombine.high %v12253_v36, %v12256_v13  ;;  %v13585_v7 = vld [vmem:[#allocation25_spill] sm:$0xff] }
 0x9b1   : > { %v6443_v56 = vcombine.high %v12490_v1, %v12493_v4  ;;  %v6526_v63 = vcombine.low %v12459_v26, %v6477_v6  ;;  %v6733_v39 = vrot.slane %v8229_v51, %v11637_v47  ;;  %v6558_v35 = vcombine.low %v6493_v12, %v6509_v42 }
 0x9b2   : > { %6932 = vrot.lane.b32.xlu0 %v13584_v18, %s9478_s19  ;;  %v6391_v22 = vcombine.high %v12380_v34, %v12391_v14  ;;  %v6423_v38 = vcombine.high %v12408_v41, %v12414_v0  ;;  %v6749_v20 = vrot.slane %v8231_v32, %v11637_v47  ;;  %v6765_v24 = vrot.slane %v8233_v52, %v11637_v47 }
 0x9b3   : > { %v6781_v36 = vrot.slane %v8235_v43, %v11637_v47  ;;  %v12542_v13 = vrot.slane %v6526_v63, %v11642_v58  ;;  %6870 = vrot.lane.b32.xlu1 %v6439_v48, %s9477_s17  ;;  %v6255_v51 = vcombine.high %v12368_v3, %v12374_v53  ;;  %v12548_v57 = vrot.slane %v6558_v35, %v11642_v58 }
 0x9b4   : > { %v12551_v14 = vrot.slane %v6391_v22, %v11642_v58  ;;  %v12554_v34 = vrot.slane %v6423_v38, %v11642_v58  ;;  %v6306_v41 = vcombine.low %v12515_v62, %v12526_v21  ;;  %v12560_v0 = vrot.slane %v6119_v23, %v11642_v58 }
 0x9b5   : > { %v12563_v32 = vrot.slane %v6151_v19, %v11642_v58  ;;  %v6287_v52 = vcombine.high %v12423_v31, %v12426_v8  ;;  %v6578_v43 = vcombine.low %v12542_v13, %v12548_v57  ;;  %v13587_v17 = vcombine.low %v13585_v7, %v13586_v10  ;;  %v13589_v8 = vld [vmem:[#allocation44_spill] sm:$0xff]  ;;  %v13590_v19 = vld [vmem:[#allocation59_spill] sm:$0xff] }
 0x9b6   : > { %7056 = vrot.lane.b32.xlu0 %v6037_v16, %s9483_s24  ;;  %v6444_v48 = vcombine.low %v12551_v14, %v12554_v34  ;;  %v6579_v23 = vcombine.high %v12542_v13, %v12548_v57  ;;  %v13588_v18 = vcombine.high %v13585_v7, %v13586_v10  ;;  %v13591_v63 = vcombine.low %v13589_v8, %v13590_v19 }
 0x9b7   : > { %v12575_v16 = vrot.slane %v13587_v17, %v11637_v47  ;;  %v13592_v22 = vcombine.high %v13589_v8, %v13590_v19  ;;  %v6445_v17 = vcombine.high %v12551_v14, %v12554_v34  ;;  %6994 = vrot.lane.b32.xlu1 %v6171_v37, %s9480_s21  ;;  %v12601_v7 = vrot.slane %v6678_v9, %v11642_v58 }
 0x9b8   : > { %v12583_v31 = vrot.slane %v13588_v18, %v11637_v47  ;;  %v12589_v35 = vrot.slane %v13591_v63, %v11637_v47  ;;  %v6527_v10 = vcombine.high %v12459_v26, %v6477_v6  ;;  %v6559_v18 = vcombine.high %v6493_v12, %v6509_v42 }
 0x9b9   : > { %v12595_v38 = vrot.slane %v13592_v22, %v11637_v47  ;;  %v6662_v63 = vcombine.low %v12487_v40, %v12499_v2  ;;  %v6172_v47 = vcombine.low %v12560_v0, %v12563_v32  ;;  %v6694_v8 = vcombine.low %v12505_v46, %v12511_v61 }
 0x9ba   : > { %6964 = vrot.lane.b32.xlu0 %v6306_v41, %s9481_s22  ;;  %v6798_v19 = vcombine.low %v6733_v39, %v6749_v20  ;;  %v6830_v22 = vcombine.low %v6765_v24, %v6781_v36  ;;  %v6307_v9 = vcombine.high %v12515_v62, %v12526_v21  ;;  %v12614_v37 = vrot.slane %v6527_v10, %v11642_v58 }
 0x9bb   : > { %v12617_v26 = vrot.slane %v6559_v18, %v11642_v58  ;;  %v12620_v6 = vrot.slane %v6662_v63, %v11642_v58  ;;  %v6782_v12 = vcombine.low %v12575_v16, %v12583_v31  ;;  %v6814_v42 = vcombine.low %v12589_v35, %v12595_v38  ;;  %6902 = vrot.lane.b32.xlu1 %v6440_v28, %s9479_s20  ;;  %v7140_v28 = vld [vmem:[%s13167_s6] sm:$0xff]  ;;  %v13593_v18 = vld [vmem:[#allocation61_spill] sm:$0xff] }
 0x9bc   : > { %v12627_v41 = vrot.slane %v6694_v8, %v11642_v58  ;;  %v12630_v62 = vrot.slane %v6798_v19, %v11642_v58  ;;  %v12639_v10 = vrot.slane %v6830_v22, %v11642_v58  ;;  %v6799_v63 = vcombine.high %v6733_v39, %v6749_v20 }
 0x9bd   : > { %v6831_v19 = vcombine.high %v6765_v24, %v6781_v36  ;;  %v6663_v22 = vcombine.high %v12487_v40, %v12499_v2  ;;  %v7141_v40 = vld [vmem:[%s13167_s6 + $0x8] sm:$0xff]  ;;  %v12669_v2 = vrot.slane %v6782_v12, %v11642_v58  ;;  %v12672_v24 = vrot.slane %v6814_v42, %v11642_v58 }
 0x9be   : > { %6872 = vrot.lane.b32.xlu0 %v6575_v60, %s9477_s17  ;;  %v12658_v20 = vrot.slane %v6799_v63, %v11642_v58  ;;  %v6695_v60 = vcombine.high %v12505_v46, %v12511_v61  ;;  %v7142_v46 = vld [vmem:[%s13167_s6 + $0x10] sm:$0xff]  ;;  %v7143_v61 = vld [vmem:[%s13167_s6 + $0x18] sm:$0xff]  ;;  %v6441_v42 = vcombine.high %v12094_v55, %v12107_v44  ;;  %v9049_v39 = vpack.c.bf16 %v7141_v40, %v7140_v28 }
 0x9bf   : > { %v12675_v36 = vrot.slane %v6831_v19, %v11642_v58  ;;  %v12678_v63 = vrot.slane %v6663_v22, %v11642_v58  ;;  %7026 = vrot.lane.b32.xlu1 %v6172_v47, %s9482_s23  ;;  %v6576_v21 = vcombine.low %v13593_v18, %v12443_v50  ;;  %v9053_v8 = vpack.c.bf16 %v7143_v61, %v7142_v46 }
 0x9c0   : > { %v12688_v12 = vrot.slane %v6695_v60, %v11642_v58  ;;  %v6269_v55 = vrot.slane %v6255_v51, %v11642_v58  ;;  %v6301_v44 = vrot.slane %v6287_v52, %v11642_v58  ;;  %9050 = vmatprep.subr.bf16.mxu1 %v9049_v39  ;;  %v6846_v28 = vcombine.low %v12669_v2, %v12672_v24 }
 0x9c1   : > { %v6852_v19 = vcombine.low %v12658_v20, %v12675_v36  ;;  %v6853_v22 = vcombine.high %v12658_v20, %v12675_v36  ;;  %9052 = vmatpush3.bf16.msra.mxu1 %v9049_v39  ;;  %v6173_v20 = vcombine.high %v12560_v0, %v12563_v32  ;;  %v6577_v53 = vcombine.high %v13593_v18, %v12443_v50 }
 0x9c2   : > { %6996 = vrot.lane.b32.xlu0 %v6307_v9, %s9480_s21  ;;  %v6716_v47 = vcombine.low %v12678_v63, %v12688_v12  ;;  %v6717_v60 = vcombine.high %v12678_v63, %v12688_v12  ;;  %v6710_v9 = vcombine.low %v12451_v15, %v12601_v7  ;;  %9054 = vmatprep.subr.bf16.mxu1 %v9053_v8 }
 0x9c3   : > { %6934 = vrot.lane.b32.xlu1 %v6441_v42, %s9478_s19  ;;  %v6308_v3 = vcombine.low %v6269_v55, %v6301_v44  ;;  %v6711_v51 = vcombine.high %v12451_v15, %v12601_v7  ;;  %v6647_v0 = vcombine.high %v12124_v54, %v12130_v27  ;;  %v6679_v32 = vcombine.high %v12136_v29, %v12158_v25 }
 0x9c4   : > { %v6309_v52 = vcombine.high %v6269_v55, %v6301_v44  ;;  %v6847_v27 = vcombine.high %v12669_v2, %v12672_v24  ;;  %v6783_v29 = vcombine.high %v12575_v16, %v12583_v31  ;;  %v6815_v25 = vcombine.high %v12589_v35, %v12595_v38  ;;  %v6863_v38 = vpop.permute.xlu0 %6862 }
 0x9c5   : > { %9056 = vmatpush3.bf16.msra.mxu1 %v9053_v8  ;;  %v6661_v50 = vrot.slane %v6647_v0, %v11642_v58  ;;  %v13595_v13 = vcombine.low %v12620_v6, %v12627_v41  ;;  %v13596_v57 = vcombine.low %v12630_v62, %v12639_v10  ;;  %v13597_v14 = vcombine.high %v12614_v37, %v12617_v26  ;;  %v13601_v8 = vld [vmem:[#allocation33_spill] sm:$0xff] }
 0x9c6   : > { %6904 = vrot.lane.b32.xlu0 %v6576_v21, %s9479_s20  ;;  %v6797_v1 = vrot.slane %v6783_v29, %v11642_v58  ;;  %v6829_v4 = vrot.slane %v6815_v25, %v11642_v58  ;;  %v13598_v16 = vcombine.high %v12630_v62, %v12639_v10 }
 0x9c7   : > { %7058 = vrot.lane.b32.xlu1 %v6173_v20, %s9483_s24  ;;  %v6865_v34 = vpop.permute.xlu1 %6864  ;;  %v13603_v20 = vld [vmem:[#allocation23_spill] sm:$0xff] }
 0x9ca   : > { %7028 = vrot.lane.b32.xlu0 %v6308_v3, %s9482_s23  ;;  %v13604_v3 = vld [vmem:[#allocation43_spill] sm:$0xff] }
 0x9cb   : > { %6966 = vrot.lane.b32.xlu1 %v6442_v59, %s9481_s22  ;;  %v6693_v59 = vrot.slane %v6679_v32, %v11642_v58  ;;  %v13594_v58 = vcombine.low %v12614_v37, %v12617_v26  ;;  %v6895_v31 = vpop.permute.xlu1 %6894  ;;  %v6927_v37 = vpop.permute.xlu0 %6926 }
 0x9cd   : > { %v6712_v54 = vcombine.low %v6661_v50, %v6693_v59 }
 0x9ce   : > { %6936 = vrot.lane.b32.xlu0 %v6577_v53, %s9478_s19  ;;  %v13605_v53 = vcombine.low %v13603_v20, %v13604_v3 }
 0x9cf   : > { %6874 = vrot.lane.b32.xlu1 %v6711_v51, %s9477_s17  ;;  %v6897_v35 = vpop.permute.xlu1 %6896 }
 0x9d0   : > { %v7079_v51 = vsel %vm1691_vm1, %v13605_v53, %v6865_v34 }
 0x9d1   : > { %v7088_v32 = vsel %vm7086_vm6, %v7079_v51, %v6897_v35 }
 0x9d2   : > { %7060 = vrot.lane.b32.xlu0 %v6309_v52, %s9483_s24 }
 0x9d3   : > { %6998 = vrot.lane.b32.xlu1 %v6443_v56, %s9480_s21  ;;  %v6713_v56 = vcombine.high %v6661_v50, %v6693_v59 }
 0x9d6   : > { %6968 = vrot.lane.b32.xlu0 %v6578_v43, %s9481_s22  ;;  %v6848_v43 = vcombine.low %v6797_v1, %v6829_v4 }
 0x9d7   : > { %6906 = vrot.lane.b32.xlu1 %v6712_v54, %s9479_s20 }
 0x9da   : > { %6876 = vrot.lane.b32.xlu0 %v6847_v27, %s9477_s17 }
 0x9db   : > { %7030 = vrot.lane.b32.xlu1 %v6444_v48, %s9482_s23  ;;  %v6849_v48 = vcombine.high %v6797_v1, %v6829_v4 }
 0x9de   : > { %7000 = vrot.lane.b32.xlu0 %v6579_v23, %s9480_s21  ;;  %v13599_v23 = vcombine.high %v12620_v6, %v12627_v41  ;;  %v13600_v41 = vld [vmem:[#allocation18_spill] sm:$0xff] }
 0x9df   : > { %6938 = vrot.lane.b32.xlu1 %v6713_v56, %s9478_s19  ;;  %v13602_v39 = vcombine.low %v13600_v41, %v13601_v8  ;;  %v6302_v8 = vcombine.low %v12033_v45, %v12036_v11 }
 0x9e1   : > { %v7078_v40 = vsel %vm1691_vm1, %v13602_v39, %v6863_v38 }
 0x9e2   : > { %6908 = vrot.lane.b32.xlu0 %v6848_v43, %s9479_s20  ;;  %v7087_v36 = vsel %vm7086_vm6, %v7078_v40, %v6895_v31 }
 0x9e3   : > { %7062 = vrot.lane.b32.xlu1 %v6445_v17, %s9483_s24  ;;  %v6929_v17 = vpop.permute.xlu1 %6928  ;;  %v7096_v61 = vsel %vm7095_vm7, %v7087_v36, %v6927_v37 }
 0x9e4   : > { %v7097_v50 = vsel %vm7095_vm7, %v7088_v32, %v6929_v17 }
 0x9e6   : > { %7032 = vrot.lane.b32.xlu0 %v13594_v58, %s9482_s23 }
 0x9e7   : > { %6970 = vrot.lane.b32.xlu1 %v13595_v13, %s9481_s22  ;;  %v6867_v26 = vpop.permute.xlu1 %6866  ;;  %v13606_v13 = vld [vmem:[#allocation24_spill] sm:$0xff] }
 0x9ea   : > { %6940 = vrot.lane.b32.xlu0 %v6849_v48, %s9478_s19 }
 0x9eb   : > { %6972 = vrot.lane.b32.xlu1 %v13596_v57, %s9481_s22  ;;  %v13607_v57 = vld [vmem:[#allocation47_spill] sm:$0xff] }
 0x9ee   : > { %7064 = vrot.lane.b32.xlu0 %v13597_v14, %s9483_s24  ;;  %v6166_v14 = vcombine.low %v13607_v57, %v13606_v13 }
 0x9ef   : > { %7004 = vrot.lane.b32.xlu1 %v13598_v16, %s9480_s21 }
 0x9f0   : > { %v7080_v16 = vsel %vm1691_vm1, %v6166_v14, %v6867_v26 }
 0x9f2   : > { %7002 = vrot.lane.b32.xlu0 %v13599_v23, %s9480_s21 }
 0x9f3   : > { %7036 = vrot.lane.b32.xlu1 %v6852_v19, %s9482_s23 }
 0x9f6   : > { %7034 = vrot.lane.b32.xlu0 %v6716_v47, %s9482_s23 }
 0x9f7   : > { %7068 = vrot.lane.b32.xlu1 %v6853_v22, %s9483_s24 }
 0x9fa   : > { %7066 = vrot.lane.b32.xlu0 %v6717_v60, %s9483_s24  ;;  %s13608_s24 = sshll.u32 %s13610_s30, 6 }
 0x9fb   : > { %s467_s16 = scalar_lea.vmem %s13175_s14, %s13608_s24 }
 0xa02   : > { %v6959_v62 = vpop.permute.xlu0 %6958  ;;  %v6991_v21 = vpop.permute.xlu1 %6990 }
 0xa03   : > { %v7105_v12 = vsel %vm7104_vm8, %v7096_v61, %v6959_v62 }
 0xa04   : > { %v7114_v22 = vsel %vm7113_vm9, %v7105_v12, %v6991_v21 }
 0xa09   : > { %v6961_v10 = vpop.permute.xlu0 %6960  ;;  %v6899_v18 = vpop.permute.xlu1 %6898 }
 0xa0a   : > { %v7106_v59 = vsel %vm7104_vm8, %v7097_v50, %v6961_v10  ;;  %v7089_v23 = vsel %vm7086_vm6, %v7080_v16, %v6899_v18 }
 0xa0f   : > { %v6869_v6 = vpop.permute.xlu0 %6868 }
 0xa10   : > { %v7081_v26 = vsel %vm1691_vm1, %v6302_v8, %v6869_v6  ;;  %v9449_v8 = vld [vmem:[%s9576_s18 + $0x8] sm:$0xff] }
 0xa12   : > { %v7023_v63 = vpop.permute.xlu1 %7022 }
 0xa13   : > { %v6993_v46 = vpop.permute.xlu0 %6992  ;;  %v7123_v47 = vsel %vm7122_vm10, %v7114_v22, %v7023_v63 }
 0xa14   : > { %v7115_v54 = vsel %vm7113_vm9, %v7106_v59, %v6993_v46 }
 0xa19   : > { %v6931_v42 = vpop.permute.xlu1 %6930 }
 0xa1a   : > { %v6901_v19 = vpop.permute.xlu0 %6900  ;;  %v7098_v35 = vsel %vm7095_vm7, %v7089_v23, %v6931_v42 }
 0xa1b   : > { %v7090_v39 = vsel %vm7086_vm6, %v7081_v26, %v6901_v19 }
 0xa1d   : > { %v7055_v60 = vpop.permute.xlu1 %7054 }
 0xa1e   : > { %v7132_v55 = vsel %vm7131_vm11, %v7123_v47, %v7055_v60  ;;  %v7025_v44 = vpop.permute.xlu0 %7024  ;;  %v6438_v60 = vcombine.low %v12088_v30, %v12091_v49  ;;  %v6574_v30 = vcombine.low %v12110_v5, %v12118_v33 }
 0xa1f   : > { %8821 = vmatprep.mubr.msk.f32.mxu1 %vm478_vm0, %v7132_v55  ;;  %v7124_v29 = vsel %vm7122_vm10, %v7115_v54, %v7025_v44 }
 0xa21   : > { %v6963_v0 = vpop.permute.xlu1 %6962 }
 0xa22   : > { %v7107_v17 = vsel %vm7104_vm8, %v7098_v35, %v6963_v0 }
 0xa24   : > { %v6933_v52 = vpop.permute.xlu0 %6932 }
 0xa25   : > { %v6871_v27 = vpop.permute.xlu1 %6870  ;;  %v7099_v36 = vsel %vm7095_vm7, %v7090_v39, %v6933_v52  ;;  %v9450_v39 = vld [vmem:[%s9576_s18] sm:$0xff] }
 0xa26   : > { %v7082_v44 = vsel %vm1691_vm1, %v6438_v60, %v6871_v27 }
 0xa28   : > { %v7057_v25 = vpop.permute.xlu0 %7056 }
 0xa29   : > { %v7133_v1 = vsel %vm7131_vm11, %v7124_v29, %v7057_v25  ;;  %v6995_v4 = vpop.permute.xlu1 %6994 }
 0xa2a   : > { %8822 = vmatmul.mubr.msk.f32.vlgmr.msra.gmra.mrb[44].mxu1 %vm478_vm0, %v7133_v1  ;;  %v7116_v37 = vsel %vm7113_vm9, %v7107_v17, %v6995_v4 }
 0xa2c   : > { %v6965_v56 = vpop.permute.xlu0 %6964 }
 0xa2d   : > { %v6903_v43 = vpop.permute.xlu1 %6902  ;;  %v7108_v63 = vsel %vm7104_vm8, %v7099_v36, %v6965_v56 }
 0xa2e   : > { %v7091_v20 = vsel %vm7086_vm6, %v7082_v44, %v6903_v43 }
 0xa30   : > { %v6873_v58 = vpop.permute.xlu0 %6872 }
 0xa31   : > { %v7027_v48 = vpop.permute.xlu1 %7026  ;;  %v7083_v49 = vsel %vm1691_vm1, %v6574_v30, %v6873_v58  ;;  %v9455_v30 = vld [vmem:[%s9576_s18 + $0x38] sm:$0xff] }
 0xa32   : > { %v7125_v62 = vsel %vm7122_vm10, %v7116_v37, %v7027_v48 }
 0xa34   : > { %v6997_v34 = vpop.permute.xlu0 %6996 }
 0xa35   : > { %v6935_v31 = vpop.permute.xlu1 %6934  ;;  %v7117_v46 = vsel %vm7113_vm9, %v7108_v63, %v6997_v34 }
 0xa36   : > { %v7100_v53 = vsel %vm7095_vm7, %v7091_v20, %v6935_v31  ;;  %v9453_v20 = vld [vmem:[%s9576_s18 + $0x28] sm:$0xff] }
 0xa38   : > { %v6905_v38 = vpop.permute.xlu0 %6904 }
 0xa39   : > { %v7059_v21 = vpop.permute.xlu1 %7058  ;;  %v7092_v29 = vsel %vm7086_vm6, %v7083_v49, %v6905_v38 }
 0xa3a   : > { %v7134_v10 = vsel %vm7131_vm11, %v7125_v62, %v7059_v21 }
 0xa3b   : > { %8824 = vmatprep.mubr.msk.f32.mxu1 %vm478_vm0, %v7134_v10 }
 0xa3c   : > { %v7029_v41 = vpop.permute.xlu0 %7028 }
 0xa3d   : > { %v6967_v18 = vpop.permute.xlu1 %6966  ;;  %v7126_v12 = vsel %vm7122_vm10, %v7117_v46, %v7029_v41  ;;  %v8244_v41 = vld [vmem:[%s13168_s7] ss:$0 sm:$0xff] }
 0xa3e   : > { %v7109_v0 = vsel %vm7104_vm8, %v7100_v53, %v6967_v18 }
 0xa40   : > { %v6937_v40 = vpop.permute.xlu0 %6936 }
 0xa41   : > { %v6875_v61 = vpop.permute.xlu1 %6874  ;;  %v7101_v1 = vsel %vm7095_vm7, %v7092_v29, %v6937_v40  ;;  %v9456_v29 = vld [vmem:[%s9576_s18 + $0x30] sm:$0xff] }
 0xa42   : > { %v7084_v14 = vsel %vm1691_vm1, %v6710_v9, %v6875_v61 }
 0xa44   : > { %v7061_v42 = vpop.permute.xlu0 %7060 }
 0xa45   : > { %v7135_v45 = vsel %vm7131_vm11, %v7126_v12, %v7061_v42  ;;  %v6999_v11 = vpop.permute.xlu1 %6998 }
 0xa46   : > { %8825 = vmatmul.mubr.msk.f32.gmra.mrb[46].mxu1 %vm478_vm0, %v7135_v45  ;;  %v7118_v32 = vsel %vm7113_vm9, %v7109_v0, %v6999_v11  ;;  %v9451_v45 = vld [vmem:[%s9576_s18 + $0x18] sm:$0xff] }
 0xa48   : > { %v6969_v6 = vpop.permute.xlu0 %6968 }
 0xa49   : > { %v6907_v22 = vpop.permute.xlu1 %6906  ;;  %v7110_v4 = vsel %vm7104_vm8, %v7101_v1, %v6969_v6  ;;  %v9452_v6 = vld [vmem:[%s9576_s18 + $0x10] sm:$0xff] }
 0xa4a   : > { %v7093_v23 = vsel %vm7086_vm6, %v7084_v14, %v6907_v22 }
 0xa4c   : > { %v6877_v47 = vpop.permute.xlu0 %6876 }
 0xa4d   : > { %v7031_v19 = vpop.permute.xlu1 %7030  ;;  %v7085_v57 = vsel %vm1691_vm1, %v6846_v28, %v6877_v47 }
 0xa4e   : > { %v7127_v52 = vsel %vm7122_vm10, %v7118_v32, %v7031_v19 }
 0xa50   : > { %v7001_v55 = vpop.permute.xlu0 %7000 }
 0xa51   : > { %v6939_v3 = vpop.permute.xlu1 %6938  ;;  %v7119_v56 = vsel %vm7113_vm9, %v7110_v4, %v7001_v55 }
 0xa52   : > { %v7102_v38 = vsel %vm7095_vm7, %v7093_v23, %v6939_v3 }
 0xa54   : > { %v6909_v51 = vpop.permute.xlu0 %6908 }
 0xa55   : > { %v7063_v50 = vpop.permute.xlu1 %7062  ;;  %v7094_v34 = vsel %vm7086_vm6, %v7085_v57, %v6909_v51  ;;  %v9454_v51 = vld [vmem:[%s9576_s18 + $0x20] sm:$0xff] }
 0xa56   : > { %v7136_v59 = vsel %vm7131_vm11, %v7127_v52, %v7063_v50 }
 0xa57   : > { %8827 = vmatprep.mubr.msk.f32.mxu1 %vm478_vm0, %v7136_v59 }
 0xa58   : > { %v7033_v54 = vpop.permute.xlu0 %7032 }
 0xa59   : > { %v6971_v27 = vpop.permute.xlu1 %6970  ;;  %v7128_v48 = vsel %vm7122_vm10, %v7119_v56, %v7033_v54 }
 0xa5a   : > { %v7111_v2 = vsel %vm7104_vm8, %v7102_v38, %v6971_v27 }
 0xa5c   : > { %v6941_v25 = vpop.permute.xlu0 %6940 }
 0xa5d   : > { %v6973_v43 = vpop.permute.xlu1 %6972  ;;  %v7103_v31 = vsel %vm7095_vm7, %v7094_v34, %v6941_v25 }
 0xa5e   : > { %v7112_v24 = vsel %vm7104_vm8, %v7103_v31, %v6973_v43 }
 0xa60   : > { %v7065_v13 = vpop.permute.xlu0 %7064 }
 0xa61   : > { %v7137_v5 = vsel %vm7131_vm11, %v7128_v48, %v7065_v13  ;;  %v7005_v33 = vpop.permute.xlu1 %7004 }
 0xa62   : > { %8828 = vmatmul.mubr.msk.f32.gmra.mrb[48].mxu1 %vm478_vm0, %v7137_v5  ;;  %v7121_v9 = vsel %vm7113_vm9, %v7112_v24, %v7005_v33 }
 0xa64   : > { %v7003_v58 = vpop.permute.xlu0 %7002 }
 0xa65   : > { %v7037_v16 = vpop.permute.xlu1 %7036  ;;  %v7120_v15 = vsel %vm7113_vm9, %v7111_v2, %v7003_v58 }
 0xa66   : > { %v7130_v37 = vsel %vm7122_vm10, %v7121_v9, %v7037_v16 }
 0xa68   : > { %v7035_v35 = vpop.permute.xlu0 %7034 }
 0xa69   : > { %v7069_v7 = vpop.permute.xlu1 %7068  ;;  %v7129_v28 = vsel %vm7122_vm10, %v7120_v15, %v7035_v35 }
 0xa6a   : > { %v7139_v21 = vsel %vm7131_vm11, %v7130_v37, %v7069_v7  ;;  %v7432_v37 = vld [vmem:[%s13171_s10 + $0x10] sm:$0xff] }
 0xa6c   : > { %v7067_v17 = vpop.permute.xlu0 %7066 }
 0xa6d   : > { %v7138_v62 = vsel %vm7131_vm11, %v7129_v28, %v7067_v17  ;;  %v7430_v28 = vld [vmem:[%s13171_s10] sm:$0xff]  ;;  %v7431_v17 = vld [vmem:[%s13171_s10 + $0x8] sm:$0xff] }
 0xa6e   : > { %8830 = vmatprep.mubr.msk.f32.mxu1 %vm478_vm0, %v7138_v62 }
 0xa6f   : > { %8831 = vmatmul.mubr.msk.f32.gmra.mrb[50].mxu1 %vm478_vm0, %v7139_v21  ;;  %v9057_v21 = vpack.c.bf16 %v7431_v17, %v7430_v28 }
 0xa71   : > { %9058 = vmatprep.subr.bf16.mxu0 %v9057_v21 }
 0xa72   : > { %9060 = vmatpush3.bf16.msra.mxu0 %v9057_v21 }
 0xafd   : > { %v8823_v10 = vpop.f32.mrb[44].mxu1 }
 0xafe   : > { %v7274_v26 = vadd.f32 %v9449_v8, %v8823_v10  ;;  %v7234_v18 = vpop.f32.mrb[45].mxu1  ;;  %v7433_v10 = vld [vmem:[%s13171_s10 + $0x18] sm:$0xff] }
 0xaff   : > { %v7273_v40 = vadd.f32 %v9450_v39, %v7234_v18 }
 0xb00   : > { %v12885_v36 = vadd.f32 %v8244_v41, %v7274_v26 }
 0xb01   : > { %v12887_v63 = vadd.f32 %v8244_v41, %v7273_v40 }
 0xb02   : > { %v7301_v46 = vsel %vm478_vm0, %v12885_v36, 0.0 }
 0xb03   : > { %7302 = vadd.xlane.f32.xlu1 %v7301_v46  ;;  %v7298_v61 = vsel %vm478_vm0, %v12887_v63, 0.0 }
 0xb04   : > { %7299 = vadd.xlane.f32.xlu0 %v7298_v61 }
 0xb19   : > { %v8826_v12 = vpop.f32.mrb[46].mxu1 }
 0xb1a   : > { %v7244_v42 = vpop.f32.mrb[47].mxu1  ;;  %v7276_v11 = vadd.f32 %v9451_v45, %v8826_v12 }
 0xb1b   : > { %v7275_v22 = vadd.f32 %v9452_v6, %v7244_v42 }
 0xb1c   : > { %v12897_v19 = vadd.f32 %v8244_v41, %v7276_v11 }
 0xb1d   : > { %v12895_v47 = vadd.f32 %v8244_v41, %v7275_v22 }
 0xb1e   : > { %v7307_v55 = vsel %vm478_vm0, %v12897_v19, 0.0 }
 0xb1f   : > { %v7304_v60 = vsel %vm478_vm0, %v12895_v47, 0.0 }
 0xb20   : > { %7305 = vadd.xlane.f32.xlu0 %v7304_v60 }
 0xb24   : > { %7308 = vadd.xlane.f32.xlu0 %v7307_v55 }
 0xb35   : > { %v8829_v44 = vpop.f32.mrb[48].mxu1 }
 0xb36   : > { %v7278_v3 = vadd.f32 %v9453_v20, %v8829_v44  ;;  %v7254_v53 = vpop.f32.mrb[49].mxu1 }
 0xb37   : > { %v7277_v0 = vadd.f32 %v9454_v51, %v7254_v53 }
 0xb38   : > { %v12905_v32 = vadd.f32 %v8244_v41, %v7278_v3 }
 0xb39   : > { %v12907_v52 = vadd.f32 %v8244_v41, %v7277_v0 }
 0xb3a   : > { %v7313_v50 = vsel %vm478_vm0, %v12905_v32, 0.0 }
 0xb3b   : > { %7314 = vadd.xlane.f32.xlu0 %v7313_v50  ;;  %v7310_v59 = vsel %vm478_vm0, %v12907_v52, 0.0 }
 0xb3c   : > { %7311 = vadd.xlane.f32.xlu1 %v7310_v59 }
 0xb42   : > { %v8832_v54 = vpop.f32.mrb[50].mxu1 }
 0xb43   : > { %v7280_v49 = vadd.f32 %v9455_v30, %v8832_v54  ;;  %v7264_v27 = vpop.f32.mrb[51].mxu1 }
 0xb44   : > { %v7279_v25 = vadd.f32 %v9456_v29, %v7264_v27 }
 0xb45   : > { %v12915_v1 = vadd.f32 %v8244_v41, %v7280_v49 }
 0xb46   : > { %v12917_v4 = vadd.f32 %v8244_v41, %v7279_v25  ;;  %v9061_v41 = vpack.c.bf16 %v7433_v10, %v7432_v37  ;;  %v8245_v25 = vld [vmem:[%s13169_s8] ss:$0 sm:$0xff] }
 0xb47   : > { %v7319_v56 = vsel %vm478_vm0, %v12915_v1, 0.0 }
 0xb48   : > { %7320 = vadd.xlane.f32.xlu0 %v7319_v56  ;;  %v7316_v43 = vsel %vm478_vm0, %v12917_v4, 0.0  ;;  %9062 = vmatprep.subr.bf16.mxu0 %v9061_v41 }
 0xb49   : > { %7317 = vadd.xlane.f32.xlu1 %v7316_v43  ;;  %9064 = vmatpush3.bf16.msra.mxu0 %v9061_v41 }
 0xb90   : > { %v7303_v48 = vpop.xlane.xlu1 %7302 }
 0xb91   : > { %v7323_v13 = vmul.f32 0.03125, %v7303_v48  ;;  %v7300_v5 = vpop.xlane.xlu0 %7299 }
 0xb92   : > { %v7322_v33 = vmul.f32 0.03125, %v7300_v5 }
 0xb93   : > { %v12924_v58 = vsub.f32 %v12885_v36, %v7323_v13  ;;  %v8246_v13 = vld [vmem:[%s13170_s9] ss:$0 sm:$0xff] }
 0xb94   : > { %v12927_v57 = vsub.f32 %v12887_v63, %v7322_v33 }
 0xb95   : > { %v7339_v14 = vmul.f32 %v12924_v58, %v12924_v58 }
 0xb96   : > { %v7338_v34 = vmul.f32 %v12927_v57, %v12927_v57 }
 0xb97   : > { %v7349_v16 = vsel %vm478_vm0, %v7339_v14, 0.0 }
 0xb98   : > { %7350 = vadd.xlane.f32.xlu0 %v7349_v16  ;;  %v7346_v23 = vsel %vm478_vm0, %v7338_v34, 0.0 }
 0xb99   : > { %7347 = vadd.xlane.f32.xlu1 %v7346_v23 }
 0xbad   : > { %v7306_v31 = vpop.xlane.xlu0 %7305 }
 0xbae   : > { %v7324_v35 = vmul.f32 0.03125, %v7306_v31 }
 0xbb0   : > { %v12936_v38 = vsub.f32 %v12895_v47, %v7324_v35 }
 0xbb1   : > { %v7309_v2 = vpop.xlane.xlu0 %7308 }
 0xbb2   : > { %v7325_v24 = vmul.f32 0.03125, %v7309_v2  ;;  %v7340_v15 = vmul.f32 %v12936_v38, %v12936_v38 }
 0xbb4   : > { %v12941_v7 = vsub.f32 %v12897_v19, %v7325_v24  ;;  %v7352_v9 = vsel %vm478_vm0, %v7340_v15, 0.0 }
 0xbb5   : > { %7353 = vadd.xlane.f32.xlu1 %v7352_v9 }
 0xbb6   : > { %v7341_v62 = vmul.f32 %v12941_v7, %v12941_v7 }
 0xbb8   : > { %v7355_v8 = vsel %vm478_vm0, %v7341_v62, 0.0 }
 0xbb9   : > { %7356 = vadd.xlane.f32.xlu0 %v7355_v8 }
 0xbc8   : > { %v7315_v26 = vpop.xlane.xlu0 %7314 }
 0xbc9   : > { %v7327_v18 = vmul.f32 0.03125, %v7315_v26  ;;  %v7312_v39 = vpop.xlane.xlu1 %7311 }
 0xbca   : > { %v7326_v40 = vmul.f32 0.03125, %v7312_v39 }
 0xbcb   : > { %v12960_v46 = vsub.f32 %v12905_v32, %v7327_v18 }
 0xbcc   : > { %v12963_v61 = vsub.f32 %v12907_v52, %v7326_v40 }
 0xbcd   : > { %v7343_v12 = vmul.f32 %v12960_v46, %v12960_v46 }
 0xbce   : > { %v7342_v42 = vmul.f32 %v12963_v61, %v12963_v61 }
 0xbcf   : > { %v7361_v45 = vsel %vm478_vm0, %v7343_v12, 0.0 }
 0xbd0   : > { %7362 = vadd.xlane.f32.xlu0 %v7361_v45  ;;  %v7358_v11 = vsel %vm478_vm0, %v7342_v42, 0.0 }
 0xbd1   : > { %7359 = vadd.xlane.f32.xlu1 %v7358_v11 }
 0xbd5   : > { %v7321_v6 = vpop.xlane.xlu0 %7320 }
 0xbd6   : > { %v7329_v22 = vmul.f32 0.03125, %v7321_v6  ;;  %v7318_v60 = vpop.xlane.xlu1 %7317 }
 0xbd7   : > { %v7328_v55 = vmul.f32 0.03125, %v7318_v60 }
 0xbd8   : > { %v12972_v44 = vsub.f32 %v12915_v1, %v7329_v22 }
 0xbd9   : > { %v12975_v20 = vsub.f32 %v12917_v4, %v7328_v55 }
 0xbda   : > { %v7345_v3 = vmul.f32 %v12972_v44, %v12972_v44 }
 0xbdb   : > { %v7344_v53 = vmul.f32 %v12975_v20, %v12975_v20 }
 0xbdc   : > { %v7367_v51 = vsel %vm478_vm0, %v7345_v3, 0.0 }
 0xbdd   : > { %7368 = vadd.xlane.f32.xlu0 %v7367_v51  ;;  %v7364_v0 = vsel %vm478_vm0, %v7344_v53, 0.0 }
 0xbde   : > { %7365 = vadd.xlane.f32.xlu1 %v7364_v0 }
 0xc25   : > { %v7351_v50 = vpop.xlane.xlu0 %7350 }
 0xc26   : > { %v7371_v59 = vmul.f32 0.03125, %v7351_v50  ;;  %v7348_v54 = vpop.xlane.xlu1 %7347 }
 0xc27   : > { %v7370_v30 = vmul.f32 0.03125, %v7348_v54 }
 0xc28   : > { %v7379_v49 = vadd.f32 1e-05, %v7371_v59 }
 0xc29   : > { %v7378_v27 = vadd.f32 1e-05, %v7370_v30 }
 0xc2a   : > { %9401 = vrsqrt.f32 %v7379_v49  ;;  %v7786_v49 = vld [vmem:[%s13173_s12] sm:$0xff] }
 0xc2b   : > { %9403 = vrsqrt.f32 %v7378_v27  ;;  %v7787_v27 = vld [vmem:[%s13173_s12 + $0x8] sm:$0xff] }
 0xc34   : > { %v9402_v29 = vpop.eup %9401 }
 0xc35   : > { %v9404_v56 = vpop.eup %9403  ;;  %v7395_v43 = vmul.f32 %v9402_v29, %v12924_v58  ;;  %v7789_v29 = vld [vmem:[%s13173_s12 + $0x18] sm:$0xff] }
 0xc36   : > { %v7394_v48 = vmul.f32 %v9404_v56, %v12927_v57  ;;  %v7790_v56 = vld [vmem:[%s13173_s12 + $0x20] sm:$0xff] }
 0xc37   : > { %v7409_v5 = vmul.f32 %v8245_v25, %v7395_v43  ;;  %v7791_v43 = vld [vmem:[%s13173_s12 + $0x28] sm:$0xff] }
 0xc38   : > { %v7408_v33 = vmul.f32 %v8245_v25, %v7394_v48  ;;  %v9073_v48 = vpack.c.bf16 %v7791_v43, %v7790_v56 }
 0xc39   : > { %v7423_v34 = vadd.f32 %v8246_v13, %v7409_v5  ;;  %v7793_v5 = vld [vmem:[%s13173_s12 + $0x38] sm:$0xff] }
 0xc3a   : > { %v7422_v14 = vadd.f32 %v8246_v13, %v7408_v33 }
 0xc3c   : > { %8841 = vmatprep.mubr.msk.f32.mxu0 %vm478_vm0, %v7422_v14  ;;  %v7794_v14 = vld [vmem:[%s13173_s12 + $0x40] sm:$0xff] }
 0xc3d   : > { %8842 = vmatmul.mubr.msk.f32.vlgmr.msra.gmra.mrb[60].mxu0 %vm478_vm0, %v7423_v34  ;;  %v7795_v34 = vld [vmem:[%s13173_s12 + $0x48] sm:$0xff] }
 0xc42   : > { %v7354_v16 = vpop.xlane.xlu1 %7353 }
 0xc43   : > { %v7372_v23 = vmul.f32 0.03125, %v7354_v16  ;;  %v9081_v16 = vpack.c.bf16 %v7795_v34, %v7794_v14 }
 0xc45   : > { %v7380_v31 = vadd.f32 1e-05, %v7372_v23  ;;  %v7796_v23 = vld [vmem:[%s13173_s12 + $0x50] sm:$0xff] }
 0xc46   : > { %v7357_v35 = vpop.xlane.xlu0 %7356 }
 0xc47   : > { %9405 = vrsqrt.f32 %v7380_v31  ;;  %v7373_v58 = vmul.f32 0.03125, %v7357_v35  ;;  %v7797_v31 = vld [vmem:[%s13173_s12 + $0x58] sm:$0xff] }
 0xc48   : > { %v9085_v35 = vpack.c.bf16 %v7797_v31, %v7796_v23 }
 0xc49   : > { %v7381_v2 = vadd.f32 1e-05, %v7373_v58  ;;  %v7798_v58 = vld [vmem:[%s13173_s12 + $0x60] sm:$0xff] }
 0xc4b   : > { %9407 = vrsqrt.f32 %v7381_v2  ;;  %v7799_v2 = vld [vmem:[%s13173_s12 + $0x68] sm:$0xff] }
 0xc51   : > { %v9406_v57 = vpop.eup %9405 }
 0xc52   : > { %v7396_v24 = vmul.f32 %v9406_v57, %v12936_v38  ;;  %v9089_v57 = vpack.c.bf16 %v7799_v2, %v7798_v58 }
 0xc54   : > { %v7410_v15 = vmul.f32 %v8245_v25, %v7396_v24  ;;  %v7800_v24 = vld [vmem:[%s13173_s12 + $0x70] sm:$0xff] }
 0xc55   : > { %v9408_v9 = vpop.eup %9407 }
 0xc56   : > { %v7424_v28 = vadd.f32 %v8246_v13, %v7410_v15  ;;  %v7397_v17 = vmul.f32 %v9408_v9, %v12941_v7  ;;  %v7801_v15 = vld [vmem:[%s13173_s12 + $0x78] sm:$0xff] }
 0xc57   : > { %v9093_v9 = vpack.c.bf16 %v7801_v15, %v7800_v24 }
 0xc58   : > { %8844 = vmatprep.mubr.msk.f32.mxu0 %vm478_vm0, %v7424_v28  ;;  %v7411_v37 = vmul.f32 %v8245_v25, %v7397_v17  ;;  %v13056_v28 = vld [vmem:[%s13172_s11] ss:$0 sm:$0xff] }
 0xc5a   : > { %v7425_v62 = vadd.f32 %v8246_v13, %v7411_v37 }
 0xc5c   : > { %8845 = vmatmul.mubr.msk.f32.gmra.mrb[62].mxu0 %vm478_vm0, %v7425_v62 }
 0xc5d   : > { %v7363_v21 = vpop.xlane.xlu0 %7362 }
 0xc5e   : > { %v7375_v10 = vmul.f32 0.03125, %v7363_v21  ;;  %v7360_v41 = vpop.xlane.xlu1 %7359 }
 0xc5f   : > { %v7374_v8 = vmul.f32 0.03125, %v7360_v41 }
 0xc60   : > { %v7383_v26 = vadd.f32 1e-05, %v7375_v10 }
 0xc61   : > { %v7382_v18 = vadd.f32 1e-05, %v7374_v8 }
 0xc62   : > { %9409 = vrsqrt.f32 %v7383_v26 }
 0xc63   : > { %9411 = vrsqrt.f32 %v7382_v18 }
 0xc6a   : > { %v7369_v38 = vpop.xlane.xlu0 %7368 }
 0xc6b   : > { %v7377_v39 = vmul.f32 0.03125, %v7369_v38  ;;  %v7366_v40 = vpop.xlane.xlu1 %7365 }
 0xc6c   : > { %v9410_v12 = vpop.eup %9409  ;;  %v7376_v42 = vmul.f32 0.03125, %v7366_v40 }
 0xc6d   : > { %v9412_v7 = vpop.eup %9411  ;;  %v7385_v45 = vadd.f32 1e-05, %v7377_v39  ;;  %v7399_v11 = vmul.f32 %v9410_v12, %v12960_v46 }
 0xc6e   : > { %v7384_v6 = vadd.f32 1e-05, %v7376_v42  ;;  %v7398_v22 = vmul.f32 %v9412_v7, %v12963_v61 }
 0xc6f   : > { %9413 = vrsqrt.f32 %v7385_v45  ;;  %v7413_v60 = vmul.f32 %v8245_v25, %v7399_v11 }
 0xc70   : > { %9415 = vrsqrt.f32 %v7384_v6  ;;  %v7412_v55 = vmul.f32 %v8245_v25, %v7398_v22 }
 0xc71   : > { %v7427_v53 = vadd.f32 %v8246_v13, %v7413_v60 }
 0xc72   : > { %v7426_v3 = vadd.f32 %v8246_v13, %v7412_v55 }
 0xc74   : > { %8847 = vmatprep.mubr.msk.f32.mxu0 %vm478_vm0, %v7426_v3 }
 0xc75   : > { %8848 = vmatmul.mubr.msk.f32.gmra.mrb[64].mxu0 %vm478_vm0, %v7427_v53 }
 0xc79   : > { %v9414_v51 = vpop.eup %9413 }
 0xc7a   : > { %v9416_v0 = vpop.eup %9415  ;;  %v7401_v50 = vmul.f32 %v9414_v51, %v12972_v44  ;;  %v7788_v44 = vld [vmem:[%s13173_s12 + $0x10] sm:$0xff] }
 0xc7b   : > { %v7400_v59 = vmul.f32 %v9416_v0, %v12975_v20  ;;  %v9065_v20 = vpack.c.bf16 %v7787_v27, %v7786_v49 }
 0xc7c   : > { %v7415_v46 = vmul.f32 %v8245_v25, %v7401_v50 }
 0xc7d   : > { %v7414_v54 = vmul.f32 %v8245_v25, %v7400_v59  ;;  %v9069_v25 = vpack.c.bf16 %v7789_v29, %v7788_v44  ;;  %9066 = vmatprep.subr.bf16.mxu1 %v9065_v20 }
 0xc7e   : > { %v7429_v61 = vadd.f32 %v8246_v13, %v7415_v46  ;;  %9068 = vmatpush3.bf16.msra.mxu1 %v9065_v20 }
 0xc7f   : > { %v7428_v30 = vadd.f32 %v8246_v13, %v7414_v54  ;;  %9070 = vmatprep.subr.bf16.mxu1 %v9069_v25  ;;  %v7792_v13 = vld [vmem:[%s13173_s12 + $0x30] sm:$0xff] }
 0xc80   : > { %v9077_v33 = vpack.c.bf16 %v7793_v5, %v7792_v13 }
 0xc81   : > { %8850 = vmatprep.mubr.msk.f32.mxu0 %vm478_vm0, %v7428_v30 }
 0xc82   : > { %8851 = vmatmul.mubr.msk.f32.gmra.mrb[66].mxu0 %vm478_vm0, %v7429_v61  ;;  %9072 = vmatpush3.bf16.msra.mxu1 %v9069_v25 }
 0xc83   : > { %9074 = vmatprep.subr.bf16.mxu1 %v9073_v48 }
 0xc86   : > { %9076 = vmatpush3.bf16.msra.mxu1 %v9073_v48 }
 0xc87   : > { %9078 = vmatprep.subr.bf16.mxu1 %v9077_v33 }
 0xc8a   : > { %9080 = vmatpush3.bf16.msra.mxu1 %v9077_v33 }
 0xc8b   : > { %9082 = vmatprep.subr.bf16.mxu1 %v9081_v16 }
 0xc8e   : > { %9084 = vmatpush3.bf16.msra.mxu1 %v9081_v16 }
 0xc8f   : > { %9086 = vmatprep.subr.bf16.mxu1 %v9085_v35 }
 0xc92   : > { %9088 = vmatpush3.bf16.msra.mxu1 %v9085_v35 }
 0xc93   : > { %9090 = vmatprep.subr.bf16.mxu1 %v9089_v57 }
 0xc96   : > { %9092 = vmatpush3.bf16.msra.mxu1 %v9089_v57 }
 0xc97   : > { %9094 = vmatprep.subr.bf16.mxu1 %v9093_v9 }
 0xc9a   : > { %9096 = vmatpush3.bf16.msra.mxu1 %v9093_v9 }
 0xd10   : > { %v8843_v17 = vpop.f32.mrb[60].mxu0 }
 0xd11   : > { %v13059_v37 = vadd.f32 %v8843_v17, %v13056_v28  ;;  %v7531_v62 = vpop.f32.mrb[61].mxu0  ;;  %v9484_v17 = vmov -1.0  }
 0xd12   : > { %v13062_v21 = vadd.f32 %v13056_v28, %v7531_v62 }
 0xd13   : > { %v7579_v10 = vmul.f32 0.70710677, %v13059_v37 }
 0xd14   : > { %v13066_v41 = vmul.f32 0.70710677, %v13062_v21 }
 0xd15   : > { %v7603_v8 = vand.u32 2147483647, %v7579_v10  ;;  %vm7587_vm12 = vcmp.ge.f32.partialorder %v7579_v10, 0.0  ;;  %v7570_v10 = vmul.f32 0.5, %v13062_v21 }
 0xd16   : > { %v7602_v26 = vand.u32 2147483647, %v13066_v41  ;;  %vm7586_vm13 = vcmp.ge.f32.partialorder %v13066_v41, 0.0  ;;  %v7595_v62 = vsel %vm7587_vm12, 1.0, %v9484_v17 }
 0xd17   : > { %v7611_v18 = vmul.f32 0.3275911, %v7603_v8  ;;  %v7715_v12 = vsub.f32 0.0, %v7603_v8 }
 0xd18   : > { %v7610_v38 = vmul.f32 0.3275911, %v7602_v26  ;;  %v7714_v42 = vsub.f32 0.0, %v7602_v26 }
 0xd19   : > { %v7619_v39 = vadd.f32 1.0, %v7611_v18  ;;  %v7723_v45 = vmul.f32 %v7715_v12, %v7603_v8  ;;  %v7594_v18 = vsel %vm7586_vm13, 1.0, %v9484_v17  ;;  %v7571_v12 = vmul.f32 0.5, %v13059_v37 }
 0xd1a   : > { %v7618_v40 = vadd.f32 1.0, %v7610_v38  ;;  %v7722_v22 = vmul.f32 %v7714_v42, %v7602_v26 }
 0xd1b   : > { %9417 = vrcp.f32 %v7619_v39  ;;  %v7732_v3 = vmul.f32 1.442695, %v7723_v45 }
 0xd1c   : > { %9419 = vrcp.f32 %v7618_v40  ;;  %v7730_v0 = vmul.f32 1.442695, %v7722_v22 }
 0xd1d   : > { %9421 = vpow2.f32 %v7732_v3 }
 0xd1e   : > { %9423 = vpow2.f32 %v7730_v0 }
 0xd25   : > { %v9418_v7 = vpop.eup %9417 }
 0xd26   : > { %v9420_v11 = vpop.eup %9419  ;;  %v7643_v6 = vmul.f32 1.0614054, %v9418_v7 }
 0xd27   : > { %v7642_v60 = vmul.f32 1.0614054, %v9420_v11  ;;  %v9422_v23 = vpop.eup %9421 }
 0xd28   : > { %v7651_v55 = vadd.f32 -1.4531521, %v7643_v6  ;;  %v9424_v58 = vpop.eup %9423 }
 0xd29   : > { %v7650_v53 = vadd.f32 -1.4531521, %v7642_v60 }
 0xd2a   : > { %v7659_v51 = vmul.f32 %v9418_v7, %v7651_v55 }
 0xd2b   : > { %v7658_v50 = vmul.f32 %v9420_v11, %v7650_v53 }
 0xd2c   : > { %v7667_v59 = vadd.f32 1.4214138, %v7659_v51 }
 0xd2d   : > { %v7666_v46 = vadd.f32 1.4214138, %v7658_v50 }
 0xd2e   : > { %v7675_v54 = vmul.f32 %v9418_v7, %v7667_v59 }
 0xd2f   : > { %v8846_v30 = vpop.f32.mrb[62].mxu0  ;;  %v7674_v61 = vmul.f32 %v9420_v11, %v7666_v46 }
 0xd30   : > { %v7683_v49 = vadd.f32 -0.28449672, %v7675_v54  ;;  %v13070_v27 = vadd.f32 %v8846_v30, %v13056_v28  ;;  %v7541_v44 = vpop.f32.mrb[63].mxu0 }
 0xd31   : > { %v13073_v20 = vadd.f32 %v13056_v28, %v7541_v44  ;;  %v7682_v29 = vadd.f32 -0.28449672, %v7674_v61 }
 0xd32   : > { %v7691_v25 = vmul.f32 %v9418_v7, %v7683_v49  ;;  %v13076_v56 = vmul.f32 0.70710677, %v13070_v27 }
 0xd33   : > { %v13079_v43 = vmul.f32 0.70710677, %v13073_v20  ;;  %v7690_v48 = vmul.f32 %v9420_v11, %v7682_v29 }
 0xd34   : > { %v7699_v13 = vadd.f32 0.2548296, %v7691_v25  ;;  %v7605_v5 = vand.u32 2147483647, %v13076_v56  ;;  %vm7589_vm14 = vcmp.ge.f32.partialorder %v13076_v56, 0.0 }
 0xd35   : > { %v7604_v33 = vand.u32 2147483647, %v13079_v43  ;;  %v7698_v14 = vadd.f32 0.2548296, %v7690_v48  ;;  %vm7588_vm15 = vcmp.ge.f32.partialorder %v13079_v43, 0.0 }
 0xd36   : > { %v7707_v34 = vmul.f32 %v9418_v7, %v7699_v13  ;;  %v7613_v16 = vmul.f32 0.3275911, %v7605_v5  ;;  %v7717_v41 = vsub.f32 0.0, %v7605_v5 }
 0xd37   : > { %v7612_v31 = vmul.f32 0.3275911, %v7604_v33  ;;  %v7706_v35 = vmul.f32 %v9420_v11, %v7698_v14  ;;  %v7716_v42 = vsub.f32 0.0, %v7604_v33 }
 0xd38   : > { %v7747_v2 = vmul.f32 %v9422_v23, %v7707_v34  ;;  %v7621_v57 = vadd.f32 1.0, %v7613_v16  ;;  %v7725_v6 = vmul.f32 %v7717_v41, %v7605_v5 }
 0xd39   : > { %v7620_v24 = vadd.f32 1.0, %v7612_v31  ;;  %v7746_v15 = vmul.f32 %v9424_v58, %v7706_v35  ;;  %v7724_v60 = vmul.f32 %v7716_v42, %v7604_v33 }
 0xd3a   : > { %v7755_v9 = vsub.f32 1.0, %v7747_v2  ;;  %9425 = vrcp.f32 %v7621_v57  ;;  %v7736_v51 = vmul.f32 1.442695, %v7725_v6 }
 0xd3b   : > { %9427 = vrcp.f32 %v7620_v24  ;;  %v7754_v8 = vsub.f32 1.0, %v7746_v15  ;;  %v7734_v21 = vmul.f32 1.442695, %v7724_v60 }
 0xd3c   : > { %v7763_v26 = vmul.f32 %v7755_v9, %v7595_v62  ;;  %9429 = vpow2.f32 %v7736_v51 }
 0xd3d   : > { %v7762_v38 = vmul.f32 %v7754_v8, %v7594_v18  ;;  %9431 = vpow2.f32 %v7734_v21 }
 0xd3e   : > { %v7771_v39 = vadd.f32 1.0, %v7763_v26 }
 0xd3f   : > { %v7770_v40 = vadd.f32 1.0, %v7762_v38 }
 0xd40   : > { %v7779_v45 = vmul.f32 %v7771_v39, %v7571_v12 }
 0xd41   : > { %v7778_v7 = vmul.f32 %v7770_v40, %v7570_v10 }
 0xd43   : > { %8885 = vmatprep.mubr.f32.mxu1 %v7778_v7  ;;  %v7597_v7 = vsel %vm7589_vm14, 1.0, %v9484_v17 }
 0xd44   : > { %v9426_v11 = vpop.eup %9425  ;;  %8886 = vmatmul.mubr.f32.vlgmr.msra.gmra.mrb[52].mxu1 %v7779_v45 }
 0xd45   : > { %v9428_v22 = vpop.eup %9427  ;;  %v7645_v55 = vmul.f32 1.0614054, %v9426_v11 }
 0xd46   : > { %v7644_v3 = vmul.f32 1.0614054, %v9428_v22  ;;  %v9430_v9 = vpop.eup %9429 }
 0xd47   : > { %v7653_v53 = vadd.f32 -1.4531521, %v7645_v55  ;;  %v9432_v18 = vpop.eup %9431 }
 0xd48   : > { %v8849_v0 = vpop.f32.mrb[64].mxu0  ;;  %v7652_v50 = vadd.f32 -1.4531521, %v7644_v3  ;;  %v7572_v3 = vmul.f32 0.5, %v13073_v20 }
 0xd49   : > { %v13089_v59 = vadd.f32 %v8849_v0, %v13056_v28  ;;  %v7551_v37 = vpop.f32.mrb[65].mxu0  ;;  %v7661_v46 = vmul.f32 %v9426_v11, %v7653_v53 }
 0xd4a   : > { %v13092_v54 = vadd.f32 %v13056_v28, %v7551_v37  ;;  %v7660_v30 = vmul.f32 %v9428_v22, %v7652_v50 }
 0xd4b   : > { %v13095_v61 = vmul.f32 0.70710677, %v13089_v59  ;;  %v7669_v49 = vadd.f32 1.4214138, %v7661_v46 }
 0xd4c   : > { %v13098_v44 = vmul.f32 0.70710677, %v13092_v54  ;;  %v7668_v29 = vadd.f32 1.4214138, %v7660_v30 }
 0xd4d   : > { %v7607_v25 = vand.u32 2147483647, %v13095_v61  ;;  %v7677_v48 = vmul.f32 %v9426_v11, %v7669_v49  ;;  %v7573_v49 = vmul.f32 0.5, %v13070_v27  ;;  %vm7591_vm1 = vcmp.ge.f32.partialorder %v13095_v61, 0.0 }
 0xd4e   : > { %v7606_v13 = vand.u32 2147483647, %v13098_v44  ;;  %v7676_v5 = vmul.f32 %v9428_v22, %v7668_v29  ;;  %vm7590_vm2 = vcmp.ge.f32.partialorder %v13098_v44, 0.0  ;;  %v7574_v44 = vmul.f32 0.5, %v13092_v54 }
 0xd4f   : > { %v7615_v33 = vmul.f32 0.3275911, %v7607_v25  ;;  %v7685_v14 = vadd.f32 -0.28449672, %v7677_v48  ;;  %v7719_v12 = vsub.f32 0.0, %v7607_v25 }
 0xd50   : > { %v7614_v34 = vmul.f32 0.3275911, %v7606_v13  ;;  %v7684_v16 = vadd.f32 -0.28449672, %v7676_v5  ;;  %v7718_v45 = vsub.f32 0.0, %v7606_v13 }
 0xd51   : > { %v7623_v23 = vadd.f32 1.0, %v7615_v33  ;;  %v7693_v31 = vmul.f32 %v9426_v11, %v7685_v14  ;;  %v7727_v53 = vmul.f32 %v7719_v12, %v7607_v25 }
 0xd52   : > { %v7622_v35 = vadd.f32 1.0, %v7614_v34  ;;  %v7692_v58 = vmul.f32 %v9428_v22, %v7684_v16  ;;  %v7726_v21 = vmul.f32 %v7718_v45, %v7606_v13 }
 0xd53   : > { %9433 = vrcp.f32 %v7623_v23  ;;  %v7701_v2 = vadd.f32 0.2548296, %v7693_v31  ;;  %v7740_v14 = vmul.f32 1.442695, %v7727_v53 }
 0xd54   : > { %9435 = vrcp.f32 %v7622_v35  ;;  %v7700_v57 = vadd.f32 0.2548296, %v7692_v58  ;;  %v7738_v20 = vmul.f32 1.442695, %v7726_v21 }
 0xd55   : > { %v8852_v24 = vpop.f32.mrb[66].mxu0  ;;  %v7709_v15 = vmul.f32 %v9426_v11, %v7701_v2 }
 0xd56   : > { %v13103_v62 = vadd.f32 %v8852_v24, %v13056_v28  ;;  %v7561_v8 = vpop.f32.mrb[67].mxu0  ;;  %v7708_v26 = vmul.f32 %v9428_v22, %v7700_v57 }
 0xd57   : > { %v13107_v38 = vadd.f32 %v13056_v28, %v7561_v8  ;;  %v7749_v39 = vmul.f32 %v9430_v9, %v7709_v15  ;;  %v7596_v28 = vsel %vm7588_vm15, 1.0, %v9484_v17 }
 0xd58   : > { %v13111_v10 = vmul.f32 0.70710677, %v13103_v62  ;;  %v7748_v40 = vmul.f32 %v9432_v18, %v7708_v26 }
 0xd59   : > { %v13114_v41 = vmul.f32 0.70710677, %v13107_v38  ;;  %v7757_v42 = vsub.f32 1.0, %v7749_v39 }
 0xd5a   : > { %v7609_v56 = vand.u32 2147483647, %v13111_v10  ;;  %v7756_v11 = vsub.f32 1.0, %v7748_v40  ;;  %vm7593_vm3 = vcmp.ge.f32.partialorder %v13111_v10, 0.0 }
 0xd5b   : > { %v7608_v6 = vand.u32 2147483647, %v13114_v41  ;;  %v7765_v43 = vmul.f32 %v7757_v42, %v7597_v7  ;;  %vm7592_vm4 = vcmp.ge.f32.partialorder %v13114_v41, 0.0 }
 0xd5c   : > { %v7617_v22 = vmul.f32 0.3275911, %v7609_v56  ;;  %v7764_v60 = vmul.f32 %v7756_v11, %v7596_v28  ;;  %v7721_v35 = vsub.f32 0.0, %v7609_v56 }
 0xd5d   : > { %v9434_v55 = vpop.eup %9433  ;;  %v7616_v51 = vmul.f32 0.3275911, %v7608_v6  ;;  %v7773_v0 = vadd.f32 1.0, %v7765_v43  ;;  %v7720_v58 = vsub.f32 0.0, %v7608_v6 }
 0xd5e   : > { %v9436_v50 = vpop.eup %9435  ;;  %v7625_v37 = vadd.f32 1.0, %v7617_v22  ;;  %v7772_v46 = vadd.f32 1.0, %v7764_v60  ;;  %v7647_v30 = vmul.f32 1.0614054, %v9434_v55  ;;  %v7729_v9 = vmul.f32 %v7721_v35, %v7609_v56 }
 0xd5f   : > { %v7624_v29 = vadd.f32 1.0, %v7616_v51  ;;  %v7646_v48 = vmul.f32 1.0614054, %v9436_v50  ;;  %v7781_v34 = vmul.f32 %v7773_v0, %v7573_v49  ;;  %v7728_v18 = vmul.f32 %v7720_v58, %v7608_v6 }
 0xd60   : > { %9437 = vrcp.f32 %v7625_v37  ;;  %v7780_v5 = vmul.f32 %v7772_v46, %v7572_v3  ;;  %v7655_v33 = vadd.f32 -1.4531521, %v7647_v30  ;;  %v7744_v11 = vmul.f32 1.442695, %v7729_v9 }
 0xd61   : > { %9439 = vrcp.f32 %v7624_v29  ;;  %v7654_v16 = vadd.f32 -1.4531521, %v7646_v48  ;;  %v7742_v60 = vmul.f32 1.442695, %v7728_v18  ;;  %v7599_v30 = vsel %vm7591_vm1, 1.0, %v9484_v17 }
 0xd62   : > { %8888 = vmatprep.mubr.f32.mxu1 %v7780_v5  ;;  %v7663_v25 = vmul.f32 %v9434_v55, %v7655_v33  ;;  %9441 = vpow2.f32 %v7740_v14  ;;  %v7600_v18 = vsel %vm7592_vm4, 1.0, %v9484_v17 }
 0xd63   : > { %8889 = vmatmul.mubr.f32.gmra.mrb[54].mxu1 %v7781_v34  ;;  %v7662_v23 = vmul.f32 %v9436_v50, %v7654_v16  ;;  %9443 = vpow2.f32 %v7738_v20  ;;  %v7575_v20 = vmul.f32 0.5, %v13089_v59  ;;  %v7601_v59 = vsel %vm7593_vm3, 1.0, %v9484_v17 }
 0xd64   : > { %v7671_v13 = vadd.f32 1.4214138, %v7663_v25  ;;  %9445 = vpow2.f32 %v7744_v11 }
 0xd65   : > { %v7670_v31 = vadd.f32 1.4214138, %v7662_v23  ;;  %9447 = vpow2.f32 %v7742_v60 }
 0xd66   : > { %v7679_v27 = vmul.f32 %v9434_v55, %v7671_v13 }
 0xd67   : > { %v7678_v2 = vmul.f32 %v9436_v50, %v7670_v31 }
 0xd68   : > { %v7687_v57 = vadd.f32 -0.28449672, %v7679_v27 }
 0xd69   : > { %v7686_v24 = vadd.f32 -0.28449672, %v7678_v2 }
 0xd6a   : > { %v9438_v15 = vpop.eup %9437  ;;  %v7695_v8 = vmul.f32 %v9434_v55, %v7687_v57 }
 0xd6b   : > { %v9440_v26 = vpop.eup %9439  ;;  %v7694_v39 = vmul.f32 %v9436_v50, %v7686_v24  ;;  %v7649_v40 = vmul.f32 1.0614054, %v9438_v15 }
 0xd6c   : > { %v7703_v12 = vadd.f32 0.2548296, %v7695_v8  ;;  %v7648_v42 = vmul.f32 1.0614054, %v9440_v26  ;;  %v9442_v22 = vpop.eup %9441 }
 0xd6d   : > { %v7702_v7 = vadd.f32 0.2548296, %v7694_v39  ;;  %v7657_v45 = vadd.f32 -1.4531521, %v7649_v40  ;;  %v9444_v51 = vpop.eup %9443 }
 0xd6e   : > { %v7711_v28 = vmul.f32 %v9434_v55, %v7703_v12  ;;  %v7656_v43 = vadd.f32 -1.4531521, %v7648_v42  ;;  %v9446_v58 = vpop.eup %9445  ;;  %v7576_v12 = vmul.f32 0.5, %v13107_v38  ;;  %v7577_v42 = vmul.f32 0.5, %v13103_v62 }
 0xd6f   : > { %v7710_v3 = vmul.f32 %v9436_v50, %v7702_v7  ;;  %v7665_v53 = vmul.f32 %v9438_v15, %v7657_v45  ;;  %v7598_v50 = vsel %vm7590_vm2, 1.0, %v9484_v17  ;;  %v9448_v57 = vpop.eup %9447  ;;  %v8256_v45 = vld [vmem:[%s13174_s13] ss:$0 sm:$0xff] }
 0xd70   : > { %v7751_v56 = vmul.f32 %v9442_v22, %v7711_v28  ;;  %v7664_v0 = vmul.f32 %v9440_v26, %v7656_v43 }
 0xd71   : > { %v7750_v6 = vmul.f32 %v9444_v51, %v7710_v3  ;;  %v7673_v21 = vadd.f32 1.4214138, %v7665_v53 }
 0xd72   : > { %v7759_v37 = vsub.f32 1.0, %v7751_v56  ;;  %v7672_v46 = vadd.f32 1.4214138, %v7664_v0 }
 0xd73   : > { %v7758_v55 = vsub.f32 1.0, %v7750_v6  ;;  %v7681_v49 = vmul.f32 %v9438_v15, %v7673_v21 }
 0xd74   : > { %v7767_v29 = vmul.f32 %v7759_v37, %v7599_v30  ;;  %v7680_v48 = vmul.f32 %v9440_v26, %v7672_v46 }
 0xd75   : > { %v7766_v5 = vmul.f32 %v7758_v55, %v7598_v50  ;;  %v7689_v61 = vadd.f32 -0.28449672, %v7681_v49 }
 0xd76   : > { %v7775_v33 = vadd.f32 1.0, %v7767_v29  ;;  %v7688_v14 = vadd.f32 -0.28449672, %v7680_v48 }
 0xd77   : > { %v7774_v34 = vadd.f32 1.0, %v7766_v5  ;;  %v7697_v16 = vmul.f32 %v9438_v15, %v7689_v61 }
 0xd78   : > { %v7696_v25 = vmul.f32 %v9440_v26, %v7688_v14  ;;  %v7783_v31 = vmul.f32 %v7775_v33, %v7575_v20 }
 0xd79   : > { %v7782_v23 = vmul.f32 %v7774_v34, %v7574_v44  ;;  %v7705_v13 = vadd.f32 0.2548296, %v7697_v16 }
 0xd7a   : > { %v7704_v35 = vadd.f32 0.2548296, %v7696_v25 }
 0xd7b   : > { %8891 = vmatprep.mubr.f32.mxu1 %v7782_v23  ;;  %v7713_v27 = vmul.f32 %v9438_v15, %v7705_v13 }
 0xd7c   : > { %8892 = vmatmul.mubr.f32.gmra.mrb[56].mxu1 %v7783_v31  ;;  %v7712_v2 = vmul.f32 %v9440_v26, %v7704_v35 }
 0xd7d   : > { %v7753_v24 = vmul.f32 %v9446_v58, %v7713_v27 }
 0xd7e   : > { %v7752_v54 = vmul.f32 %v9448_v57, %v7712_v2 }
 0xd7f   : > { %v7761_v9 = vsub.f32 1.0, %v7753_v24 }
 0xd80   : > { %v7760_v8 = vsub.f32 1.0, %v7752_v54 }
 0xd81   : > { %v7769_v39 = vmul.f32 %v7761_v9, %v7601_v59 }
 0xd82   : > { %v7768_v40 = vmul.f32 %v7760_v8, %v7600_v18 }
 0xd83   : > { %v7777_v15 = vadd.f32 1.0, %v7769_v39 }
 0xd84   : > { %v7776_v26 = vadd.f32 1.0, %v7768_v40 }
 0xd85   : > { %v7785_v7 = vmul.f32 %v7777_v15, %v7577_v42 }
 0xd86   : > { %v7784_v10 = vmul.f32 %v7776_v26, %v7576_v12 }
 0xd88   : > { %8894 = vmatprep.mubr.f32.mxu1 %v7784_v10 }
 0xd89   : > { %8895 = vmatmul.mubr.f32.gmra.mrb[58].mxu1 %v7785_v7 }
 0xe17   : > { %v8887_v41 = vpop.f32.mrb[52].mxu1 }
 0xe18   : > { %v7908_v11 = vadd.f32 %v8887_v41, %v12885_v36  ;;  %v7868_v17 = vpop.f32.mrb[53].mxu1 }
 0xe19   : > { %v7907_v38 = vadd.f32 %v7868_v17, %v12887_v63 }
 0xe1a   : > { %v7923_v62 = vadd.f32 %v8256_v45, %v7908_v11 }
 0xe1b   : > { %v7922_v28 = vadd.f32 %v8256_v45, %v7907_v38 }
 0xe1c   : > { %7931 = vst.msk [vmem:[%s467_s16 + $0x8] sm:$0xff] %vm478_vm0, %v7923_v62 }
 0xe1d   : > { %7930 = vst.msk [vmem:[%s467_s16] sm:$0xff] %vm478_vm0, %v7922_v28 }
 0xe36   : > { %v8890_v43 = vpop.f32.mrb[54].mxu1 }
 0xe37   : > { %v7910_v22 = vadd.f32 %v8890_v43, %v12897_v19  ;;  %v7878_v60 = vpop.f32.mrb[55].mxu1 }
 0xe38   : > { %v7909_v36 = vadd.f32 %v7878_v60, %v12895_v47 }
 0xe39   : > { %v7925_v3 = vadd.f32 %v8256_v45, %v7910_v22 }
 0xe3a   : > { %v7924_v53 = vadd.f32 %v8256_v45, %v7909_v36 }
 0xe3b   : > { %7933 = vst.msk [vmem:[%s467_s16 + $0x18] sm:$0xff] %vm478_vm0, %v7925_v3 }
 0xe3c   : > { %7932 = vst.msk [vmem:[%s467_s16 + $0x10] sm:$0xff] %vm478_vm0, %v7924_v53 }
 0xe4f   : > { %v8893_v51 = vpop.f32.mrb[56].mxu1 }
 0xe50   : > { %v7912_v63 = vadd.f32 %v8893_v51, %v12905_v32  ;;  %v7888_v56 = vpop.f32.mrb[57].mxu1 }
 0xe51   : > { %v7911_v0 = vadd.f32 %v7888_v56, %v12907_v52 }
 0xe52   : > { %v7927_v6 = vadd.f32 %v8256_v45, %v7912_v63 }
 0xe53   : > { %v7926_v21 = vadd.f32 %v8256_v45, %v7911_v0 }
 0xe54   : > { %7935 = vst.msk [vmem:[%s467_s16 + $0x28] sm:$0xff] %vm478_vm0, %v7927_v6 }
 0xe55   : > { %7934 = vst.msk [vmem:[%s467_s16 + $0x20] sm:$0xff] %vm478_vm0, %v7926_v21 }
 0xe5c   : > { %v8896_v19 = vpop.f32.mrb[58].mxu1 }
 0xe5d   : > { %v7914_v47 = vadd.f32 %v8896_v19, %v12915_v1  ;;  %v7898_v37 = vpop.f32.mrb[59].mxu1 }
 0xe5e   : > { %v7913_v46 = vadd.f32 %v7898_v37, %v12917_v4 }
 0xe5f   : > { %v7929_v30 = vadd.f32 %v8256_v45, %v7914_v47 }
 0xe60   : > { %v7928_v55 = vadd.f32 %v8256_v45, %v7913_v46 }
 0xe61   : > { %7937 = vst.msk [vmem:[%s467_s16 + $0x38] sm:$0xff] %vm478_vm0, %v7929_v30 }
 0xe62   : > { %7936 = vst.msk [vmem:[%s467_s16 + $0x30] sm:$0xff] %vm478_vm0, %v7928_v55 }
 0xe63 PF: > { %s24_s29 = sadd.s32 1, %s9463_s29  }
 0xe64   : > { %p21_p4 = scmp.ge.s32.totalorder %s24_s29, 4  }
 0xe66   :  { %23 = sbr.rel (!%p21_p4) target bundleno = 1 (0x1), region = 106 }

// kernel: tpu_custom_call.1
= control target key start
LH: loop header
LB: loop body
LE: loop exit
PB: predicated region body
PF: predicated region fallthrough
CT: control target
= control target key end

     0   :  { %s9560_s29 = smov 0   ;;  %s13161_s0 = inlined_call_operand.vmem [shape: f32[2,64,32], index: 0, kind: input, shape index: {}]   ;;  %s13162_s1 = inlined_call_operand.vmem [shape: f32[1,32], index: 1, kind: input, shape index: {}]   ;;  %s13163_s2 = inlined_call_operand.vmem [shape: f32[1,32], index: 2, kind: input, shape index: {}]   ;;  %s13164_s3 = inlined_call_operand.vmem [shape: f32[32,32], index: 3, kind: input, shape index: {}]   ;;  %s13165_s4 = inlined_call_operand.vmem [shape: f32[32,32], index: 4, kind: input, shape index: {}]   ;;  %s13166_s5 = inlined_call_operand.vmem [shape: f32[32,32], index: 5, kind: input, shape index: {}]   ;;  %s13167_s6 = inlined_call_operand.vmem [shape: f32[32,32], index: 6, kind: input, shape index: {}]   ;;  %s13168_s7 = inlined_call_operand.vmem [shape: f32[1,32], index: 7, kind: input, shape index: {}]   ;;  %s13169_s8 = inlined_call_operand.vmem [shape: f32[1,32], index: 8, kind: input, shape index: {}]   ;;  %s13170_s9 = inlined_call_operand.vmem [shape: f32[1,32], index: 9, kind: input, shape index: {}]   ;;  %s13171_s10 = inlined_call_operand.vmem [shape: f32[32,128], index: 10, kind: input, shape index: {}]   ;;  %s13172_s11 = inlined_call_operand.vmem [shape: f32[1,128], index: 11, kind: input, shape index: {}]   ;;  %s13173_s12 = inlined_call_operand.vmem [shape: f32[128,32], index: 12, kind: input, shape index: {}]   ;;  %s13174_s13 = inlined_call_operand.vmem [shape: f32[1,32], index: 13, kind: input, shape index: {}]   ;;  %s13175_s14 = inlined_call_operand.vmem [shape: f32[2,64,32], index: 14, kind: output, shape index: {}]  }
   0x1 LB: > { %s7993_s30 = sadd.s32 4294967295, %s9463_s29   ;;  %p7997_p0 = scmp.ge.s32.totalorder %s9463_s29, 1  ;;  %s9463_s29 = sphi %s9560_s29, %s24_s29  }
   0x2   : > { %p412_p1 = scmp.lt.s32.totalorder %s9463_s29, 3 }
   0x4   : > { %p413_p2 = pnand %p7997_p0, %p412_p1 }
   0x6   : > { %416 = sbr.rel (%p413_p2) target bundleno = 3683 (0xe63), region = 76 }
   0xd   : > { %p458_p3 = scmp.lt.s32.totalorder %s7993_s30, 1  ;;  %vm478_vm0 = vcmask 261120   ;;  %v612_v56 = vld [vmem:[%s13164_s3] sm:$0xff]  ;;  %v613_v57 = vld [vmem:[%s13164_s3 + $0x8] sm:$0xff]  ;;  %v614_v59 = vld [vmem:[%s13164_s3 + $0x10] sm:$0xff]  ;;  %vm1691_vm1 = vcmask 31744  }
   0xe   : > { %v8897_v58 = vpack.c.bf16 %v613_v57, %v612_v56  ;;  %v615_v60 = vld [vmem:[%s13164_s3 + $0x18] sm:$0xff]  ;;  %v745_v62 = vld [vmem:[%s13165_s4] sm:$0xff]  ;;  %v746_v63 = vld [vmem:[%s13165_s4 + $0x8] sm:$0xff]  ;;  %s9465_s23 = smov 120   ;;  %s9466_s24 = smov 124   ;;  %vm1708_vm2 = vcmask 1043456  }
   0xf   : > { %s13610_s30 = smov (!%p458_p3, %s7993_s30), 1  ;;  %v8901_v61 = vpack.c.bf16 %v615_v60, %v614_v59  ;;  %s9467_s25 = smov 108   ;;  %vm2685_vm3 = vcmask 523264   ;;  %vm9473_vm5 = vmmov 0   ;;  %vm7086_vm6 = vcmask 64512  }
  0x10   : > { %s13258_s15 = sshll.u32 %s13610_s30, 6  ;;  %8898 = vmatprep.subr.bf16.mxu0 %v8897_v58  ;;  %s9468_s26 = smov 116   ;;  %vm10941_vm4 = vmpackc.low %vm2685_vm3, %vm2685_vm3  ;;  %vm7095_vm7 = vcmask 97280   ;;  %vm7104_vm8 = vcmask 130048   ;;  %vm7113_vm9 = vcmask 162816   ;;  %vm7122_vm10 = vcmask 195584  }
  0x11   : > { %s9576_s18 = scalar_lea.vmem %s13161_s0, %s13258_s15  ;;  %8900 = vmatpush3.bf16.msra.mxu0 %v8897_v58  ;;  %s9469_s27 = smov 104   ;;  %vm7131_vm11 = vcmask 228352  }
  0x12   : > { %v468_v0 = vld [vmem:[%s9576_s18] sm:$0xff]  ;;  %v470_v1 = vld [vmem:[%s9576_s18 + $0x10] sm:$0xff]  ;;  %v469_v2 = vld [vmem:[%s9576_s18 + $0x8] sm:$0xff]  ;;  %8902 = vmatprep.subr.bf16.mxu0 %v8901_v61  ;;  %s9470_s28 = smov 112   ;;  %s9471_s16 = smov 100  }
  0x13   : > { %v479_v3 = vsel %vm478_vm0, %v468_v0, 0.0  ;;  %v485_v4 = vsel %vm478_vm0, %v470_v1, 0.0  ;;  %v471_v5 = vld [vmem:[%s9576_s18 + $0x18] sm:$0xff]  ;;  %v482_v6 = vsel %vm478_vm0, %v469_v2, 0.0  ;;  %v472_v8 = vld [vmem:[%s9576_s18 + $0x20] sm:$0xff]  ;;  %v473_v9 = vld [vmem:[%s9576_s18 + $0x28] sm:$0xff] }
  0x14   : > { %480 = vadd.xlane.f32.xlu0 %v479_v3  ;;  %486 = vadd.xlane.f32.xlu1 %v485_v4  ;;  %v488_v7 = vsel %vm478_vm0, %v471_v5, 0.0  ;;  %v491_v10 = vsel %vm478_vm0, %v472_v8, 0.0  ;;  %v494_v11 = vsel %vm478_vm0, %v473_v9, 0.0  ;;  %v474_v12 = vld [vmem:[%s9576_s18 + $0x30] sm:$0xff]  ;;  %v475_v13 = vld [vmem:[%s9576_s18 + $0x38] sm:$0xff]  ;;  %s9477_s17 = smov 4  }
  0x15   : > { %v497_v14 = vsel %vm478_vm0, %v474_v12, 0.0  ;;  %v500_v15 = vsel %vm478_vm0, %v475_v13, 0.0  ;;  %8904 = vmatpush3.bf16.msra.mxu0 %v8901_v61  ;;  %s9478_s19 = smov 12   ;;  %s9479_s20 = smov 8  }
  0x16   : > { %s9480_s21 = smov 20   ;;  %s9481_s22 = smov 16  }
  0x18   : > { %483 = vadd.xlane.f32.xlu0 %v482_v6  ;;  %489 = vadd.xlane.f32.xlu1 %v488_v7 }
  0x1c   : > { %492 = vadd.xlane.f32.xlu0 %v491_v10  ;;  %495 = vadd.xlane.f32.xlu1 %v494_v11 }
  0x20   : > { %498 = vadd.xlane.f32.xlu0 %v497_v14  ;;  %501 = vadd.xlane.f32.xlu1 %v500_v15 }
  0xa1   : > { %v481_v16 = vpop.xlane.xlu0 %480  ;;  %v487_v17 = vpop.xlane.xlu1 %486 }
  0xa2   : > { %v504_v18 = vmul.f32 0.03125, %v481_v16  ;;  %v506_v19 = vmul.f32 0.03125, %v487_v17 }
  0xa4   : > { %v9594_v20 = vsub.f32 %v468_v0, %v504_v18  ;;  %v9596_v21 = vsub.f32 %v470_v1, %v506_v19  ;;  %v9652_v0 = vpack.c.bf16 %v746_v63, %v745_v62  ;;  %v747_v1 = vld [vmem:[%s13165_s4 + $0x10] sm:$0xff] }
  0xa5   : > { %v484_v22 = vpop.xlane.xlu0 %483  ;;  %v490_v23 = vpop.xlane.xlu1 %489 }
  0xa6   : > { %v505_v24 = vmul.f32 0.03125, %v484_v22  ;;  %v507_v25 = vmul.f32 0.03125, %v490_v23  ;;  %v520_v26 = vmul.f32 %v9594_v20, %v9594_v20  ;;  %v522_v27 = vmul.f32 %v9596_v21, %v9596_v21  ;;  %9097 = vmatprep.subr.bf16.mxu1 %v9652_v0  ;;  %8906 = vmatprep.subr.bf16.mxu0 %v9652_v0 }
  0xa7   : > { %9099 = vmatpush3.bf16.msra.mxu1 %v9652_v0 }
  0xa8   : > { %v9602_v28 = vsub.f32 %v469_v2, %v505_v24  ;;  %v9604_v29 = vsub.f32 %v471_v5, %v507_v25  ;;  %v528_v30 = vsel %vm478_vm0, %v520_v26, 0.0  ;;  %v534_v33 = vsel %vm478_vm0, %v522_v27, 0.0  ;;  %v748_v2 = vld [vmem:[%s13165_s4 + $0x18] sm:$0xff] }
  0xa9   : > { %529 = vadd.xlane.f32.xlu0 %v528_v30  ;;  %v493_v31 = vpop.xlane.xlu0 %492  ;;  %v496_v32 = vpop.xlane.xlu1 %495  ;;  %v9663_v3 = vpack.c.bf16 %v748_v2, %v747_v1  ;;  %v8002_v30 = vld [vmem:[%s13162_s1] ss:$0 sm:$0xff]  ;;  %v856_v2 = vld [vmem:[%s13166_s5 + $0x10] sm:$0xff] }
  0xaa   : > { %v508_v34 = vmul.f32 0.03125, %v493_v31  ;;  %v509_v35 = vmul.f32 0.03125, %v496_v32  ;;  %v521_v36 = vmul.f32 %v9602_v28, %v9602_v28  ;;  %v523_v37 = vmul.f32 %v9604_v29, %v9604_v29 }
  0xab   : > { %9098 = vmatprep.subr.bf16.mxu1 %v9663_v3 }
  0xac   : > { %v9612_v38 = vsub.f32 %v472_v8, %v508_v34  ;;  %v9614_v39 = vsub.f32 %v473_v9, %v509_v35  ;;  %v531_v40 = vsel %vm478_vm0, %v521_v36, 0.0  ;;  %v537_v43 = vsel %vm478_vm0, %v523_v37, 0.0  ;;  %9100 = vmatpush3.bf16.msra.mxu1 %v9663_v3  ;;  %v8003_v34 = vld [vmem:[%s13163_s2] ss:$0 sm:$0xff] }
  0xad   : > { %535 = vadd.xlane.f32.xlu0 %v534_v33  ;;  %532 = vadd.xlane.f32.xlu1 %v531_v40  ;;  %v499_v41 = vpop.xlane.xlu0 %498  ;;  %v502_v42 = vpop.xlane.xlu1 %501 }
  0xae   : > { %v510_v44 = vmul.f32 0.03125, %v499_v41  ;;  %v511_v45 = vmul.f32 0.03125, %v502_v42  ;;  %v524_v46 = vmul.f32 %v9612_v38, %v9612_v38  ;;  %v525_v47 = vmul.f32 %v9614_v39, %v9614_v39 }
  0xb0   : > { %v9622_v48 = vsub.f32 %v474_v12, %v510_v44  ;;  %v9624_v49 = vsub.f32 %v475_v13, %v511_v45  ;;  %v540_v50 = vsel %vm478_vm0, %v524_v46, 0.0  ;;  %v543_v51 = vsel %vm478_vm0, %v525_v47, 0.0 }
  0xb1   : > { %538 = vadd.xlane.f32.xlu1 %v537_v43  ;;  %541 = vadd.xlane.f32.xlu0 %v540_v50 }
  0xb2   : > { %v526_v52 = vmul.f32 %v9622_v48, %v9622_v48  ;;  %v527_v53 = vmul.f32 %v9624_v49, %v9624_v49 }
  0xb4   : > { %v546_v54 = vsel %vm478_vm0, %v526_v52, 0.0  ;;  %v549_v55 = vsel %vm478_vm0, %v527_v53, 0.0 }
  0xb5   : > { %544 = vadd.xlane.f32.xlu1 %v543_v51  ;;  %547 = vadd.xlane.f32.xlu0 %v546_v54 }
  0xb9   : > { %550 = vadd.xlane.f32.xlu1 %v549_v55 }
 0x136   : > { %v530_v4 = vpop.xlane.xlu0 %529 }
 0x137   : > { %v552_v5 = vmul.f32 0.03125, %v530_v4 }
 0x139   : > { %v560_v6 = vadd.f32 1e-05, %v552_v5 }
 0x13a   : > { %v533_v7 = vpop.xlane.xlu1 %532  ;;  %v536_v8 = vpop.xlane.xlu0 %535 }
 0x13b   : > { %9129 = vrsqrt.f32 %v560_v6  ;;  %v553_v9 = vmul.f32 0.03125, %v533_v7  ;;  %v554_v10 = vmul.f32 0.03125, %v536_v8 }
 0x13d   : > { %v561_v11 = vadd.f32 1e-05, %v553_v9  ;;  %v562_v12 = vadd.f32 1e-05, %v554_v10 }
 0x13e   : > { %v539_v13 = vpop.xlane.xlu1 %538  ;;  %v542_v14 = vpop.xlane.xlu0 %541 }
 0x13f   : > { %9131 = vrsqrt.f32 %v561_v11  ;;  %v555_v15 = vmul.f32 0.03125, %v539_v13  ;;  %v556_v16 = vmul.f32 0.03125, %v542_v14 }
 0x140   : > { %9133 = vrsqrt.f32 %v562_v12 }
 0x141   : > { %v563_v17 = vadd.f32 1e-05, %v555_v15  ;;  %v564_v18 = vadd.f32 1e-05, %v556_v16 }
 0x142   : > { %v545_v19 = vpop.xlane.xlu1 %544  ;;  %v548_v22 = vpop.xlane.xlu0 %547 }
 0x143   : > { %9135 = vrsqrt.f32 %v563_v17  ;;  %v557_v23 = vmul.f32 0.03125, %v545_v19  ;;  %v558_v24 = vmul.f32 0.03125, %v548_v22 }
 0x144   : > { %9137 = vrsqrt.f32 %v564_v18 }
 0x145   : > { %v9130_v25 = vpop.eup %9129  ;;  %v565_v26 = vadd.f32 1e-05, %v557_v23  ;;  %v566_v27 = vadd.f32 1e-05, %v558_v24 }
 0x146   : > { %v551_v31 = vpop.xlane.xlu1 %550  ;;  %v576_v32 = vmul.f32 %v9130_v25, %v9594_v20 }
 0x147   : > { %9139 = vrsqrt.f32 %v565_v26  ;;  %v559_v33 = vmul.f32 0.03125, %v551_v31 }
 0x148   : > { %9141 = vrsqrt.f32 %v566_v27  ;;  %v590_v35 = vmul.f32 %v8002_v30, %v576_v32 }
 0x149   : > { %v9132_v36 = vpop.eup %9131  ;;  %v567_v37 = vadd.f32 1e-05, %v559_v33 }
 0x14a   : > { %v9134_v40 = vpop.eup %9133  ;;  %v604_v41 = vadd.f32 %v8003_v34, %v590_v35  ;;  %v577_v42 = vmul.f32 %v9132_v36, %v9602_v28  ;;  %v854_v28 = vld [vmem:[%s13166_s5] sm:$0xff] }
 0x14b   : > { %9143 = vrsqrt.f32 %v567_v37  ;;  %v578_v43 = vmul.f32 %v9134_v40, %v9596_v21  ;;  %v855_v21 = vld [vmem:[%s13166_s5 + $0x8] sm:$0xff] }
 0x14c   : > { %8497 = vmatprep.mubr.msk.f32.mxu0 %vm478_vm0, %v604_v41  ;;  %v591_v20 = vmul.f32 %v8002_v30, %v577_v42  ;;  %v8913_v59 = vpack.c.bf16 %v855_v21, %v854_v28 }
 0x14d   : > { %v9136_v44 = vpop.eup %9135  ;;  %v592_v45 = vmul.f32 %v8002_v30, %v578_v43 }
 0x14e   : > { %v9138_v46 = vpop.eup %9137  ;;  %v605_v47 = vadd.f32 %v8003_v34, %v591_v20  ;;  %v579_v50 = vmul.f32 %v9136_v44, %v9604_v29 }
 0x14f   : > { %v606_v51 = vadd.f32 %v8003_v34, %v592_v45  ;;  %v580_v52 = vmul.f32 %v9138_v46, %v9612_v38 }
 0x150   : > { %8498 = vmatmul.mubr.msk.f32.vlgmr.msra.gmra.mrb[0].mxu0 %vm478_vm0, %v605_v47  ;;  %v593_v53 = vmul.f32 %v8002_v30, %v579_v50 }
 0x151   : > { %v9140_v54 = vpop.eup %9139  ;;  %8500 = vmatprep.mubr.msk.f32.mxu0 %vm478_vm0, %v606_v51  ;;  %v594_v55 = vmul.f32 %v8002_v30, %v580_v52  ;;  %8908 = vmatpush3.bf16.msra.mxu0 %v9652_v0 }
 0x152   : > { %v9142_v29 = vpop.eup %9141  ;;  %v607_v56 = vadd.f32 %v8003_v34, %v593_v53  ;;  %v581_v38 = vmul.f32 %v9140_v54, %v9614_v39  ;;  %8910 = vmatprep.subr.bf16.mxu0 %v9663_v3 }
 0x153   : > { %v608_v57 = vadd.f32 %v8003_v34, %v594_v55  ;;  %v582_v58 = vmul.f32 %v9142_v29, %v9622_v48 }
 0x154   : > { %8501 = vmatmul.mubr.msk.f32.gmra.mrb[2].mxu0 %vm478_vm0, %v607_v56  ;;  %v595_v60 = vmul.f32 %v8002_v30, %v581_v38 }
 0x155   : > { %v9144_v61 = vpop.eup %9143  ;;  %8523 = vmatprep.mubr.msk.f32.mxu1 %vm478_vm0, %v608_v57  ;;  %8503 = vmatprep.mubr.msk.f32.mxu0 %vm478_vm0, %v608_v57  ;;  %v596_v62 = vmul.f32 %v8002_v30, %v582_v58 }
 0x156   : > { %v609_v63 = vadd.f32 %v8003_v34, %v595_v60  ;;  %v583_v0 = vmul.f32 %v9144_v61, %v9624_v49  ;;  %8912 = vmatpush3.bf16.msra.mxu0 %v9663_v3  ;;  %v857_v49 = vld [vmem:[%s13166_s5 + $0x18] sm:$0xff] }
 0x157   : > { %v610_v39 = vadd.f32 %v8003_v34, %v596_v62  ;;  %8914 = vmatprep.subr.bf16.mxu0 %v8913_v59  ;;  %v8917_v3 = vpack.c.bf16 %v857_v49, %v856_v2 }
 0x158   : > { %8504 = vmatmul.mubr.msk.f32.gmra.mrb[4].mxu0 %vm478_vm0, %v609_v63  ;;  %8524 = vmatmul.mubr.msk.f32.vlgmr.msra.gmra.mrb[0].mxu1 %vm478_vm0, %v609_v63  ;;  %v597_v48 = vmul.f32 %v8002_v30, %v583_v0 }
 0x159   : > { %8506 = vmatprep.mubr.msk.f32.mxu0 %vm478_vm0, %v610_v39  ;;  %8526 = vmatprep.mubr.msk.f32.mxu1 %vm478_vm0, %v610_v39 }
 0x15a   : > { %v611_v1 = vadd.f32 %v8003_v34, %v597_v48 }
 0x15c   : > { %8507 = vmatmul.mubr.msk.f32.gmra.mrb[6].mxu0 %vm478_vm0, %v611_v1  ;;  %8527 = vmatmul.mubr.msk.f32.gmra.mrb[2].mxu1 %vm478_vm0, %v611_v1 }
 0x15d   : > { %8517 = vmatprep.mubr.msk.f32.mxu0 %vm478_vm0, %v604_v41 }
 0x160   : > { %8518 = vmatmul.mubr.msk.f32.vlgmr.msra.gmra.mrb[8].mxu0 %vm478_vm0, %v605_v47 }
 0x161   : > { %8520 = vmatprep.mubr.msk.f32.mxu0 %vm478_vm0, %v606_v51  ;;  %8916 = vmatpush3.bf16.msra.mxu0 %v8913_v59 }
 0x162   : > { %8918 = vmatprep.subr.bf16.mxu0 %v8917_v3 }
 0x164   : > { %8521 = vmatmul.mubr.msk.f32.gmra.mrb[10].mxu0 %vm478_vm0, %v607_v56 }
 0x165   : > { %8920 = vmatpush3.bf16.msra.mxu0 %v8917_v3  ;;  %8537 = vmatprep.mubr.msk.f32.mxu0 %vm478_vm0, %v604_v41 }
 0x168   : > { %8538 = vmatmul.mubr.msk.f32.vlgmr.msra.gmra.mrb[12].mxu0 %vm478_vm0, %v605_v47 }
 0x169   : > { %8540 = vmatprep.mubr.msk.f32.mxu0 %vm478_vm0, %v606_v51 }
 0x16c   : > { %8541 = vmatmul.mubr.msk.f32.gmra.mrb[14].mxu0 %vm478_vm0, %v607_v56 }
 0x16d   : > { %8543 = vmatprep.mubr.msk.f32.mxu0 %vm478_vm0, %v608_v57 }
 0x170   : > { %8544 = vmatmul.mubr.msk.f32.gmra.mrb[16].mxu0 %vm478_vm0, %v609_v63 }
 0x171   : > { %8546 = vmatprep.mubr.msk.f32.mxu0 %vm478_vm0, %v610_v39 }
 0x174   : > { %8547 = vmatmul.mubr.msk.f32.gmra.mrb[18].mxu0 %vm478_vm0, %v611_v1 }
 0x223   : > { %v9720_v4 = vpop.f32.mrb[0].mxu0 }
 0x224   : > { %v706_v5 = vpop.f32.mrb[1].mxu0 }
 0x225   : > { %8551 = vmatprep.mubr.msk.f32.mxu1 %vm1691_vm1, %v706_v5 }
 0x227   : > { %v9723_v6 = vpop.f32.mrb[2].mxu0 }
 0x228   : > { %v9725_v7 = vpop.f32.mrb[3].mxu0 }
 0x22b   : > { %v9727_v8 = vpop.f32.mrb[4].mxu0  ;;  %v9729_v9 = vpop.f32.mrb[0].mxu1 }
 0x22c   : > { %1125 = vrot.lane.b32.xlu0 %v9729_v9, %s9465_s23  ;;  %1101 = vrot.lane.b32.xlu1 %v9729_v9, %s9466_s24  ;;  %v9735_v10 = vpop.f32.mrb[5].mxu0  ;;  %v9737_v11 = vpop.f32.mrb[1].mxu1 }
 0x22f   : > { %v9739_v12 = vpop.f32.mrb[6].mxu0  ;;  %v9741_v13 = vpop.f32.mrb[2].mxu1 }
 0x230   : > { %1197 = vrot.lane.b32.xlu0 %v9729_v9, %s9467_s25  ;;  %1149 = vrot.lane.b32.xlu1 %v9729_v9, %s9468_s26  ;;  %v9747_v14 = vpop.f32.mrb[7].mxu0  ;;  %v9749_v15 = vpop.f32.mrb[3].mxu1 }
 0x233   : > { %v9751_v16 = vpop.f32.mrb[8].mxu0 }
 0x234   : > { %989 = vrot.lane.b32.xlu0 %v9720_v4, %s9465_s23  ;;  %973 = vrot.lane.b32.xlu1 %v9720_v4, %s9466_s24  ;;  %v9757_v17 = vpop.f32.mrb[9].mxu0 }
 0x237   : > { %v9759_v18 = vpop.f32.mrb[10].mxu0 }
 0x238   : > { %1221 = vrot.lane.b32.xlu0 %v9729_v9, %s9469_s27  ;;  %1173 = vrot.lane.b32.xlu1 %v9729_v9, %s9470_s28  ;;  %v9765_v19 = vpop.f32.mrb[11].mxu0 }
 0x23b   : > { %v9767_v22 = vpop.f32.mrb[12].mxu0 }
 0x23c   : > { %13259 = vst [vmem:[#allocation2_spill] sm:$0xff] %v9767_v22  ;;  %1021 = vrot.lane.b32.xlu0 %v9720_v4, %s9470_s28  ;;  %1005 = vrot.lane.b32.xlu1 %v9720_v4, %s9468_s26  ;;  %v9773_v23 = vpop.f32.mrb[13].mxu0 }
 0x23d   : > { %13260 = vst [vmem:[#allocation3_spill] sm:$0xff] %v9773_v23 }
 0x23f   : > { %v9775_v24 = vpop.f32.mrb[14].mxu0 }
 0x240   : > { %13261 = vst [vmem:[#allocation4_spill] sm:$0xff] %v9775_v24  ;;  %1053 = vrot.lane.b32.xlu0 %v9720_v4, %s9469_s27  ;;  %1245 = vrot.lane.b32.xlu1 %v9729_v9, %s9471_s16  ;;  %v9781_v25 = vpop.f32.mrb[15].mxu0 }
 0x241   : > { %13262 = vst [vmem:[#allocation5_spill] sm:$0xff] %v9781_v25 }
 0x243   : > { %v9783_v26 = vpop.f32.mrb[16].mxu0 }
 0x244   : > { %13263 = vst [vmem:[#allocation6_spill] sm:$0xff] %v9783_v26  ;;  %1037 = vrot.lane.b32.xlu1 %v9720_v4, %s9467_s25  ;;  %1099 = vrot.lane.b32.xlu0 %v9737_v11, %s9466_s24  ;;  %v9789_v27 = vpop.f32.mrb[17].mxu0 }
 0x245   : > { %13264 = vst [vmem:[#allocation7_spill] sm:$0xff] %v9789_v27 }
 0x247   : > { %v9791_v30 = vpop.f32.mrb[18].mxu0 }
 0x248   : > { %13265 = vst [vmem:[#allocation8_spill] sm:$0xff] %v9791_v30  ;;  %1069 = vrot.lane.b32.xlu1 %v9720_v4, %s9471_s16  ;;  %1123 = vrot.lane.b32.xlu0 %v9737_v11, %s9465_s23  ;;  %v9797_v31 = vpop.f32.mrb[19].mxu0 }
 0x249   : > { %13266 = vst [vmem:[#allocation9_spill] sm:$0xff] %v9797_v31 }
 0x24c   : > { %1147 = vrot.lane.b32.xlu1 %v9737_v11, %s9468_s26  ;;  %971 = vrot.lane.b32.xlu0 %v706_v5, %s9466_s24 }
 0x250   : > { %1195 = vrot.lane.b32.xlu1 %v9737_v11, %s9467_s25  ;;  %1171 = vrot.lane.b32.xlu0 %v9737_v11, %s9470_s28 }
 0x254   : > { %1003 = vrot.lane.b32.xlu1 %v706_v5, %s9468_s26  ;;  %987 = vrot.lane.b32.xlu0 %v706_v5, %s9465_s23 }
 0x258   : > { %1243 = vrot.lane.b32.xlu1 %v9737_v11, %s9471_s16  ;;  %1219 = vrot.lane.b32.xlu0 %v9737_v11, %s9469_s27 }
 0x25c   : > { %1035 = vrot.lane.b32.xlu1 %v706_v5, %s9467_s25  ;;  %1019 = vrot.lane.b32.xlu0 %v706_v5, %s9470_s28 }
 0x260   : > { %1067 = vrot.lane.b32.xlu1 %v706_v5, %s9471_s16  ;;  %1051 = vrot.lane.b32.xlu0 %v706_v5, %s9469_s27 }
 0x264   : > { %1129 = vrot.lane.b32.xlu0 %v9741_v13, %s9465_s23  ;;  %1105 = vrot.lane.b32.xlu1 %v9741_v13, %s9466_s24 }
 0x268   : > { %1177 = vrot.lane.b32.xlu0 %v9741_v13, %s9470_s28  ;;  %1153 = vrot.lane.b32.xlu1 %v9741_v13, %s9468_s26 }
 0x26c   : > { %993 = vrot.lane.b32.xlu0 %v9723_v6, %s9465_s23  ;;  %977 = vrot.lane.b32.xlu1 %v9723_v6, %s9466_s24 }
 0x270   : > { %1225 = vrot.lane.b32.xlu0 %v9741_v13, %s9469_s27  ;;  %1201 = vrot.lane.b32.xlu1 %v9741_v13, %s9467_s25 }
 0x274   : > { %1025 = vrot.lane.b32.xlu0 %v9723_v6, %s9470_s28  ;;  %1009 = vrot.lane.b32.xlu1 %v9723_v6, %s9468_s26 }
 0x278   : > { %1057 = vrot.lane.b32.xlu0 %v9723_v6, %s9469_s27  ;;  %1249 = vrot.lane.b32.xlu1 %v9741_v13, %s9471_s16 }
 0x27c   : > { %1041 = vrot.lane.b32.xlu1 %v9723_v6, %s9467_s25  ;;  %1103 = vrot.lane.b32.xlu0 %v9749_v15, %s9466_s24 }
 0x280   : > { %1073 = vrot.lane.b32.xlu1 %v9723_v6, %s9471_s16  ;;  %1127 = vrot.lane.b32.xlu0 %v9749_v15, %s9465_s23 }
 0x284   : > { %1151 = vrot.lane.b32.xlu1 %v9749_v15, %s9468_s26  ;;  %975 = vrot.lane.b32.xlu0 %v9725_v7, %s9466_s24 }
 0x288   : > { %1199 = vrot.lane.b32.xlu1 %v9749_v15, %s9467_s25  ;;  %1175 = vrot.lane.b32.xlu0 %v9749_v15, %s9470_s28 }
 0x28c   : > { %1007 = vrot.lane.b32.xlu1 %v9725_v7, %s9468_s26  ;;  %991 = vrot.lane.b32.xlu0 %v9725_v7, %s9465_s23 }
 0x290   : > { %1247 = vrot.lane.b32.xlu1 %v9749_v15, %s9471_s16  ;;  %1223 = vrot.lane.b32.xlu0 %v9749_v15, %s9469_s27 }
 0x294   : > { %1039 = vrot.lane.b32.xlu1 %v9725_v7, %s9467_s25  ;;  %1023 = vrot.lane.b32.xlu0 %v9725_v7, %s9470_s28 }
 0x298   : > { %1071 = vrot.lane.b32.xlu1 %v9725_v7, %s9471_s16  ;;  %1055 = vrot.lane.b32.xlu0 %v9725_v7, %s9469_s27 }
 0x29c   : > { %981 = vrot.lane.b32.xlu1 %v9727_v8, %s9466_s24  ;;  %997 = vrot.lane.b32.xlu0 %v9727_v8, %s9465_s23 }
 0x29e   : > { %v9876_v32 = vpop.permute.xlu1 %1101  ;;  %v9878_v33 = vpop.permute.xlu0 %1125 }
 0x2a0   : > { %1013 = vrot.lane.b32.xlu1 %v9727_v8, %s9468_s26  ;;  %1029 = vrot.lane.b32.xlu0 %v9727_v8, %s9470_s28 }
 0x2a2   : > { %v9884_v34 = vpop.permute.xlu1 %1149  ;;  %v9886_v35 = vpop.permute.xlu0 %1197 }
 0x2a4   : > { %1045 = vrot.lane.b32.xlu1 %v9727_v8, %s9467_s25  ;;  %1061 = vrot.lane.b32.xlu0 %v9727_v8, %s9469_s27 }
 0x2a6   : > { %v9892_v36 = vpop.permute.xlu1 %973  ;;  %v9894_v37 = vpop.permute.xlu0 %989 }
 0x2a8   : > { %1077 = vrot.lane.b32.xlu1 %v9727_v8, %s9471_s16  ;;  %979 = vrot.lane.b32.xlu0 %v9735_v10, %s9466_s24 }
 0x2aa   : > { %v9900_v40 = vpop.permute.xlu1 %1173  ;;  %v9902_v41 = vpop.permute.xlu0 %1221 }
 0x2ac   : > { %1011 = vrot.lane.b32.xlu1 %v9735_v10, %s9468_s26  ;;  %995 = vrot.lane.b32.xlu0 %v9735_v10, %s9465_s23 }
 0x2ae   : > { %v9908_v42 = vpop.permute.xlu1 %1005  ;;  %v9910_v43 = vpop.permute.xlu0 %1021 }
 0x2af   : > { %13267 = vst [vmem:[#allocation10_spill] sm:$0xff] %v9908_v42  ;;  %13268 = vst [vmem:[#allocation11_spill] sm:$0xff] %v9910_v43 }
 0x2b0   : > { %1043 = vrot.lane.b32.xlu1 %v9735_v10, %s9467_s25  ;;  %1027 = vrot.lane.b32.xlu0 %v9735_v10, %s9470_s28 }
 0x2b2   : > { %v9916_v20 = vpop.permute.xlu1 %1245  ;;  %v9918_v44 = vpop.permute.xlu0 %1053 }
 0x2b3   : > { %13269 = vst [vmem:[#allocation12_spill] sm:$0xff] %v9918_v44 }
 0x2b4   : > { %1075 = vrot.lane.b32.xlu1 %v9735_v10, %s9471_s16  ;;  %1059 = vrot.lane.b32.xlu0 %v9735_v10, %s9469_s27 }
 0x2b6   : > { %v9924_v45 = vpop.permute.xlu1 %1037  ;;  %v9926_v46 = vpop.permute.xlu0 %1099 }
 0x2b7   : > { %13270 = vst [vmem:[#allocation13_spill] sm:$0xff] %v9924_v45 }
 0x2b8   : > { %1001 = vrot.lane.b32.xlu0 %v9739_v12, %s9465_s23  ;;  %985 = vrot.lane.b32.xlu1 %v9739_v12, %s9466_s24 }
 0x2ba   : > { %v9932_v47 = vpop.permute.xlu1 %1069  ;;  %v9934_v50 = vpop.permute.xlu0 %1123 }
 0x2bb   : > { %13271 = vst [vmem:[#allocation14_spill] sm:$0xff] %v9932_v47 }
 0x2bc   : > { %1033 = vrot.lane.b32.xlu0 %v9739_v12, %s9470_s28  ;;  %1017 = vrot.lane.b32.xlu1 %v9739_v12, %s9468_s26 }
 0x2be   : > { %v9940_v51 = vpop.permute.xlu1 %1147  ;;  %v972_v52 = vpop.permute.xlu0 %971 }
 0x2bf   : > { %8565 = vmatprep.mubr.msk.f32.mxu0 %vm1691_vm1, %v972_v52 }
 0x2c0   : > { %1065 = vrot.lane.b32.xlu0 %v9739_v12, %s9469_s27  ;;  %1049 = vrot.lane.b32.xlu1 %v9739_v12, %s9467_s25 }
 0x2c2   : > { %v9947_v53 = vpop.permute.xlu1 %1195  ;;  %v9949_v28 = vpop.permute.xlu0 %1171 }
 0x2c4   : > { %1081 = vrot.lane.b32.xlu1 %v9739_v12, %s9471_s16  ;;  %983 = vrot.lane.b32.xlu0 %v9747_v14, %s9466_s24 }
 0x2c6   : > { %v9955_v21 = vpop.permute.xlu1 %1003  ;;  %v9957_v54 = vpop.permute.xlu0 %987 }
 0x2c7   : > { %13272 = vst [vmem:[#allocation15_spill] sm:$0xff] %v9955_v21 }
 0x2c8   : > { %1015 = vrot.lane.b32.xlu1 %v9747_v14, %s9468_s26  ;;  %999 = vrot.lane.b32.xlu0 %v9747_v14, %s9465_s23 }
 0x2ca   : > { %v9963_v55 = vpop.permute.xlu1 %1243  ;;  %v9965_v29 = vpop.permute.xlu0 %1219 }
 0x2cc   : > { %1047 = vrot.lane.b32.xlu1 %v9747_v14, %s9467_s25  ;;  %1031 = vrot.lane.b32.xlu0 %v9747_v14, %s9470_s28 }
 0x2ce   : > { %v9971_v56 = vpop.permute.xlu1 %1035  ;;  %v9973_v38 = vpop.permute.xlu0 %1019 }
 0x2cf   : > { %13273 = vst [vmem:[#allocation16_spill] sm:$0xff] %v9971_v56  ;;  %13274 = vst [vmem:[#allocation17_spill] sm:$0xff] %v9973_v38 }
 0x2d0   : > { %1079 = vrot.lane.b32.xlu1 %v9747_v14, %s9471_s16  ;;  %1063 = vrot.lane.b32.xlu0 %v9747_v14, %s9469_s27 }
 0x2d2   : > { %v9979_v57 = vpop.permute.xlu1 %1067  ;;  %v9981_v58 = vpop.permute.xlu0 %1051 }
 0x2d3   : > { %13275 = vst [vmem:[#allocation18_spill] sm:$0xff] %v9979_v57  ;;  %13276 = vst [vmem:[#allocation19_spill] sm:$0xff] %v9981_v58 }
 0x2d4   : > { %1117 = vrot.lane.b32.xlu0 %v9751_v16, %s9465_s23  ;;  %1093 = vrot.lane.b32.xlu1 %v9751_v16, %s9466_s24 }
 0x2d6   : > { %v9987_v59 = vpop.permute.xlu1 %1105  ;;  %v9989_v60 = vpop.permute.xlu0 %1129 }
 0x2d8   : > { %1189 = vrot.lane.b32.xlu0 %v9751_v16, %s9467_s25  ;;  %1141 = vrot.lane.b32.xlu1 %v9751_v16, %s9468_s26 }
 0x2da   : > { %v9995_v61 = vpop.permute.xlu1 %1153  ;;  %v9997_v62 = vpop.permute.xlu0 %1177 }
 0x2dc   : > { %1213 = vrot.lane.b32.xlu0 %v9751_v16, %s9469_s27  ;;  %1165 = vrot.lane.b32.xlu1 %v9751_v16, %s9470_s28 }
 0x2de   : > { %v10003_v63 = vpop.permute.xlu1 %977  ;;  %v10005_v0 = vpop.permute.xlu0 %993 }
 0x2df   : > { %13277 = vst [vmem:[#allocation20_spill] sm:$0xff] %v10003_v63 }
 0x2e0   : > { %1237 = vrot.lane.b32.xlu1 %v9751_v16, %s9471_s16  ;;  %1091 = vrot.lane.b32.xlu0 %v9757_v17, %s9466_s24 }
 0x2e2   : > { %v10011_v39 = vpop.permute.xlu1 %1201  ;;  %v10013_v48 = vpop.permute.xlu0 %1225 }
 0x2e4   : > { %1139 = vrot.lane.b32.xlu1 %v9757_v17, %s9468_s26  ;;  %1115 = vrot.lane.b32.xlu0 %v9757_v17, %s9465_s23 }
 0x2e6   : > { %v10019_v1 = vpop.permute.xlu1 %1009  ;;  %v10021_v2 = vpop.permute.xlu0 %1025 }
 0x2e7   : > { %13278 = vst [vmem:[#allocation21_spill] sm:$0xff] %v10019_v1  ;;  %13279 = vst [vmem:[#allocation22_spill] sm:$0xff] %v10021_v2 }
 0x2e8   : > { %1187 = vrot.lane.b32.xlu1 %v9757_v17, %s9467_s25  ;;  %1163 = vrot.lane.b32.xlu0 %v9757_v17, %s9470_s28 }
 0x2ea   : > { %v10027_v49 = vpop.permute.xlu1 %1249  ;;  %v10029_v3 = vpop.permute.xlu0 %1057 }
 0x2eb   : > { %13280 = vst [vmem:[#allocation23_spill] sm:$0xff] %v10029_v3 }
 0x2ec   : > { %1235 = vrot.lane.b32.xlu1 %v9757_v17, %s9471_s16  ;;  %1211 = vrot.lane.b32.xlu0 %v9757_v17, %s9469_s27 }
 0x2ee   : > { %v10035_v5 = vpop.permute.xlu1 %1041  ;;  %v10037_v52 = vpop.permute.xlu0 %1103 }
 0x2ef   : > { %13281 = vst [vmem:[#allocation24_spill] sm:$0xff] %v10035_v5 }
 0x2f0   : > { %1097 = vrot.lane.b32.xlu1 %v9759_v18, %s9466_s24  ;;  %1121 = vrot.lane.b32.xlu0 %v9759_v18, %s9465_s23 }
 0x2f2   : > { %v10043_v47 = vpop.permute.xlu1 %1073  ;;  %v10045_v57 = vpop.permute.xlu0 %1127 }
 0x2f3   : > { %13282 = vst [vmem:[#allocation25_spill] sm:$0xff] %v10043_v47 }
 0x2f4   : > { %1145 = vrot.lane.b32.xlu1 %v9759_v18, %s9468_s26  ;;  %1169 = vrot.lane.b32.xlu0 %v9759_v18, %s9470_s28 }
 0x2f6   : > { %v10051_v3 = vpop.permute.xlu1 %1151  ;;  %v10053_v5 = vpop.permute.xlu0 %975 }
 0x2f8   : > { %1193 = vrot.lane.b32.xlu1 %v9759_v18, %s9467_s25  ;;  %1217 = vrot.lane.b32.xlu0 %v9759_v18, %s9469_s27 }
 0x2fa   : > { %v10059_v45 = vpop.permute.xlu1 %1199  ;;  %v10061_v47 = vpop.permute.xlu0 %1175 }
 0x2fc   : > { %1241 = vrot.lane.b32.xlu1 %v9759_v18, %s9471_s16  ;;  %1119 = vrot.lane.b32.xlu0 %v9765_v19, %s9465_s23 }
 0x2fe   : > { %v10067_v44 = vpop.permute.xlu1 %1007  ;;  %v10069_v56 = vpop.permute.xlu0 %991 }
 0x2ff   : > { %13283 = vst [vmem:[#allocation26_spill] sm:$0xff] %v10067_v44 }
 0x300   : > { %1095 = vrot.lane.b32.xlu1 %v9765_v19, %s9466_s24  ;;  %1167 = vrot.lane.b32.xlu0 %v9765_v19, %s9470_s28 }
 0x302   : > { %v10075_v58 = vpop.permute.xlu1 %1247  ;;  %v10077_v1 = vpop.permute.xlu0 %1223 }
 0x304   : > { %1143 = vrot.lane.b32.xlu1 %v9765_v19, %s9468_s26  ;;  %1215 = vrot.lane.b32.xlu0 %v9765_v19, %s9469_s27 }
 0x306   : > { %v10083_v2 = vpop.permute.xlu1 %1039  ;;  %v10085_v44 = vpop.permute.xlu0 %1023 }
 0x307   : > { %13284 = vst [vmem:[#allocation27_spill] sm:$0xff] %v10083_v2  ;;  %13285 = vst [vmem:[#allocation28_spill] sm:$0xff] %v10085_v44 }
 0x308   : > { %1191 = vrot.lane.b32.xlu1 %v9765_v19, %s9467_s25  ;;  %1267 = vrot.lane.b32.xlu0 %v9773_v23, %s9466_s24 }
 0x30a   : > { %v10091_v42 = vpop.permute.xlu1 %1071  ;;  %v10093_v43 = vpop.permute.xlu0 %1055 }
 0x30b   : > { %13286 = vst [vmem:[#allocation29_spill] sm:$0xff] %v10091_v42  ;;  %13287 = vst [vmem:[#allocation30_spill] sm:$0xff] %v10093_v43 }
 0x30c   : > { %1239 = vrot.lane.b32.xlu1 %v9765_v19, %s9471_s16  ;;  %1275 = vrot.lane.b32.xlu0 %v9789_v27, %s9466_s24 }
 0x30e   : > { %v10099_v30 = vpop.permute.xlu1 %981  ;;  %v10101_v2 = vpop.permute.xlu0 %997 }
 0x30f   : > { %13288 = vst [vmem:[#allocation31_spill] sm:$0xff] %v10099_v30  ;;  %13289 = vst [vmem:[#allocation32_spill] sm:$0xff] %v10101_v2 }
 0x310   : > { %1269 = vrot.lane.b32.xlu1 %v9767_v22, %s9466_s24 }
 0x312   : > { %v10105_v44 = vpop.permute.xlu1 %1013  ;;  %v10107_v31 = vpop.permute.xlu0 %1029 }
 0x313   : > { %13290 = vst [vmem:[#allocation33_spill] sm:$0xff] %v10105_v44  ;;  %13291 = vst [vmem:[#allocation34_spill] sm:$0xff] %v10107_v31 }
 0x314   : > { %1273 = vrot.lane.b32.xlu1 %v9775_v24, %s9466_s24 }
 0x316   : > { %v10111_v42 = vpop.permute.xlu1 %1045  ;;  %v10113_v43 = vpop.permute.xlu0 %1061 }
 0x317   : > { %13292 = vst [vmem:[#allocation35_spill] sm:$0xff] %v10111_v42  ;;  %13293 = vst [vmem:[#allocation36_spill] sm:$0xff] %v10113_v43 }
 0x318   : > { %1271 = vrot.lane.b32.xlu1 %v9781_v25, %s9466_s24 }
 0x31a   : > { %v10117_v27 = vpop.permute.xlu1 %1077  ;;  %v10119_v21 = vpop.permute.xlu0 %979 }
 0x31b   : > { %13294 = vst [vmem:[#allocation37_spill] sm:$0xff] %v10117_v27  ;;  %13295 = vst [vmem:[#allocation38_spill] sm:$0xff] %v10119_v21 }
 0x31c   : > { %1277 = vrot.lane.b32.xlu1 %v9783_v26, %s9466_s24 }
 0x31e   : > { %v10123_v44 = vpop.permute.xlu1 %1011  ;;  %v10125_v31 = vpop.permute.xlu0 %995 }
 0x31f   : > { %13296 = vst [vmem:[#allocation39_spill] sm:$0xff] %v10123_v44  ;;  %13297 = vst [vmem:[#allocation40_spill] sm:$0xff] %v10125_v31 }
 0x322   : > { %v10127_v38 = vpop.permute.xlu1 %1043  ;;  %v10129_v24 = vpop.permute.xlu0 %1027 }
 0x323   : > { %13298 = vst [vmem:[#allocation41_spill] sm:$0xff] %v10127_v38  ;;  %13299 = vst [vmem:[#allocation42_spill] sm:$0xff] %v10129_v24 }
 0x326   : > { %v10131_v42 = vpop.permute.xlu1 %1075  ;;  %v10133_v43 = vpop.permute.xlu0 %1059 }
 0x327   : > { %13300 = vst [vmem:[#allocation43_spill] sm:$0xff] %v10131_v42  ;;  %13301 = vst [vmem:[#allocation44_spill] sm:$0xff] %v10133_v43 }
 0x32a   : > { %v10135_v30 = vpop.permute.xlu1 %985  ;;  %1435 = vxpose.xlu0.b32.start [1/8] (short) (narrow) %v9757_v17, 8  ;;  %v10138_v27 = vpop.permute.xlu0 %1001 }
 0x32b   : > { %13302 = vst [vmem:[#allocation45_spill] sm:$0xff] %v10135_v30  ;;  %13303 = vst [vmem:[#allocation46_spill] sm:$0xff] %v10138_v27 }
 0x32e   : > { %v10140_v25 = vpop.permute.xlu1 %1017  ;;  %1436 = vxpose.xlu0.b32.cont [2/8] (short) (narrow) %v9751_v16, 8  ;;  %v10143_v44 = vpop.permute.xlu0 %1033 }
 0x32f   : > { %13304 = vst [vmem:[#allocation47_spill] sm:$0xff] %v10140_v25  ;;  %13305 = vst [vmem:[#allocation48_spill] sm:$0xff] %v10143_v44 }
 0x332   : > { %v10145_v26 = vpop.permute.xlu1 %1049  ;;  %1437 = vxpose.xlu0.b32.cont [3/8] (short) (narrow) %v9765_v19, 8  ;;  %v10148_v38 = vpop.permute.xlu0 %1065 }
 0x333   : > { %13306 = vst [vmem:[#allocation49_spill] sm:$0xff] %v10145_v26  ;;  %13307 = vst [vmem:[#allocation50_spill] sm:$0xff] %v10148_v38 }
 0x336   : > { %v10150_v42 = vpop.permute.xlu1 %1081  ;;  %1438 = vxpose.xlu0.b32.cont [4/8] (short) (narrow) %v9759_v18, 8  ;;  %v10153_v43 = vpop.permute.xlu0 %983 }
 0x337   : > { %13308 = vst [vmem:[#allocation51_spill] sm:$0xff] %v10150_v42  ;;  %13309 = vst [vmem:[#allocation52_spill] sm:$0xff] %v10153_v43 }
 0x33a   : > { %v10155_v17 = vpop.permute.xlu1 %1015  ;;  %1439 = vxpose.xlu0.b32.cont [5/8] (short) (narrow) %v9737_v11, 8  ;;  %v10158_v25 = vpop.permute.xlu0 %999 }
 0x33b   : > { %13310 = vst [vmem:[#allocation53_spill] sm:$0xff] %v10155_v17  ;;  %13311 = vst [vmem:[#allocation54_spill] sm:$0xff] %v10158_v25 }
 0x33e   : > { %v10160_v16 = vpop.permute.xlu1 %1047  ;;  %1440 = vxpose.xlu0.b32.cont [6/8] (short) (narrow) %v9729_v9, 8  ;;  %v10163_v26 = vpop.permute.xlu0 %1031 }
 0x33f   : > { %13312 = vst [vmem:[#allocation55_spill] sm:$0xff] %v10160_v16  ;;  %13313 = vst [vmem:[#allocation56_spill] sm:$0xff] %v10163_v26 }
 0x342   : > { %v10165_v19 = vpop.permute.xlu1 %1079  ;;  %1441 = vxpose.xlu0.b32.cont [7/8] (short) (narrow) %v9749_v15, 8  ;;  %v10168_v42 = vpop.permute.xlu0 %1063 }
 0x343   : > { %13314 = vst [vmem:[#allocation57_spill] sm:$0xff] %v10165_v19  ;;  %13315 = vst [vmem:[#allocation58_spill] sm:$0xff] %v10168_v42 }
 0x346   : > { %v1094_v18 = vpop.permute.xlu1 %1093  ;;  %1442 = vxpose.xlu0.b32.end [8/8] (short) (narrow) %v9741_v13, 8  ;;  %v1118_v38 = vpop.permute.xlu0 %1117 }
 0x34a   : > { %v1142_v17 = vpop.permute.xlu1 %1141  ;;  %v10171_v11 = vpop.permute.xlu0 %1189 }
 0x34e   : > { %v1166_v44 = vpop.permute.xlu1 %1165  ;;  %v1214_v24 = vpop.permute.xlu0 %1213 }
 0x352   : > { %v10173_v16 = vpop.permute.xlu1 %1237  ;;  %v1092_v9 = vpop.permute.xlu0 %1091 }
 0x353   : > { %1467 = vxpose.xlu1.b32.start [1/8] (short) (narrow) %v1092_v9, 8 }
 0x356   : > { %v1140_v26 = vpop.permute.xlu1 %1139  ;;  %v1116_v30 = vpop.permute.xlu0 %1115 }
 0x357   : > { %1468 = vxpose.xlu1.b32.cont [2/8] (short) (narrow) %v1094_v18, 8  ;;  %1499 = vxpose.xlu0.b32.start [1/8] (short) (narrow) %v1116_v30, 8  ;;  %v13362_v18 = vld [vmem:[#allocation24_spill] sm:$0xff] }
 0x35a   : > { %v1188_v15 = vpop.permute.xlu1 %1187  ;;  %v1164_v19 = vpop.permute.xlu0 %1163 }
 0x35b   : > { %1500 = vxpose.xlu0.b32.cont [2/8] (short) (narrow) %v1118_v38, 8  ;;  %v13344_v38 = vld [vmem:[#allocation42_spill] sm:$0xff] }
 0x35e   : > { %v10175_v42 = vpop.permute.xlu1 %1235  ;;  %v1212_v13 = vpop.permute.xlu0 %1211 }
 0x362   : > { %v1098_v43 = vpop.permute.xlu1 %1097  ;;  %v1122_v27 = vpop.permute.xlu0 %1121 }
 0x366   : > { %v1146_v25 = vpop.permute.xlu1 %1145  ;;  %v1170_v21 = vpop.permute.xlu0 %1169 }
 0x36a   : > { %v1194_v2 = vpop.permute.xlu1 %1193  ;;  %v1218_v63 = vpop.permute.xlu0 %1217 }
 0x36e   : > { %v10177_v22 = vpop.permute.xlu1 %1241  ;;  %v1120_v31 = vpop.permute.xlu0 %1119 }
 0x36f   : > { %1501 = vxpose.xlu0.b32.cont [3/8] (short) (narrow) %v1120_v31, 8 }
 0x372   : > { %v1096_v9 = vpop.permute.xlu1 %1095 }
 0x373   : > { %1469 = vxpose.xlu1.b32.cont [3/8] (short) (narrow) %v1096_v9, 8  ;;  %1502 = vxpose.xlu0.b32.cont [4/8] (short) (narrow) %v1122_v27, 8  ;;  %v1168_v27 = vpop.permute.xlu0 %1167  ;;  %v13366_v9 = vld [vmem:[#allocation35_spill] sm:$0xff] }
 0x376   : > { %v1144_v30 = vpop.permute.xlu1 %1143 }
 0x377   : > { %1470 = vxpose.xlu1.b32.cont [4/8] (short) (narrow) %v1098_v43, 8  ;;  %1503 = vxpose.xlu0.b32.cont [5/8] (short) (narrow) %v9934_v50, 8  ;;  %v1216_v31 = vpop.permute.xlu0 %1215  ;;  %v13331_v43 = vld [vmem:[#allocation52_spill] sm:$0xff]  ;;  %v13337_v50 = vld [vmem:[#allocation9_spill] sm:$0xff] }
 0x37b   : > { %1471 = vxpose.xlu1.b32.cont [5/8] (short) (narrow) %v9926_v46, 8  ;;  %1504 = vxpose.xlu0.b32.cont [6/8] (short) (narrow) %v9878_v33, 8  ;;  %v1192_v33 = vpop.permute.xlu1 %1191  ;;  %v13335_v46 = vld [vmem:[#allocation15_spill] sm:$0xff] }
 0x37f   : > { %1472 = vxpose.xlu1.b32.cont [6/8] (short) (narrow) %v9876_v32, 8  ;;  %1505 = vxpose.xlu0.b32.cont [7/8] (short) (narrow) %v10045_v57, 8  ;;  %v13345_v57 = vld [vmem:[#allocation21_spill] sm:$0xff] }
 0x383   : > { %1473 = vxpose.xlu1.b32.cont [7/8] (short) (narrow) %v10037_v52, 8  ;;  %1506 = vxpose.xlu0.b32.end [8/8] (short) (narrow) %v9989_v60, 8  ;;  %v13348_v60 = vld [vmem:[#allocation56_spill] sm:$0xff]  ;;  %v13358_v52 = vld [vmem:[#allocation13_spill] sm:$0xff] }
 0x387   : > { %1474 = vxpose.xlu1.b32.end [8/8] (short) (narrow) %v9987_v59, 8  ;;  %1563 = vxpose.xlu0.b32.start [1/8] (short) (narrow) %v1164_v19, 8  ;;  %v13347_v59 = vld [vmem:[#allocation39_spill] sm:$0xff]  ;;  %v13361_v19 = vld [vmem:[#allocation44_spill] sm:$0xff] }
 0x38b   : > { %1531 = vxpose.xlu1.b32.start [1/8] (short) (narrow) %v1140_v26, 8  ;;  %1564 = vxpose.xlu0.b32.cont [2/8] (short) (narrow) %v1166_v44, 8  ;;  %v10192_v26 = vpop.permute.xlu0 %1267  ;;  %v13333_v44 = vld [vmem:[#allocation4_spill] sm:$0xff] }
 0x38c   : > { %13316 = vst [vmem:[#allocation59_spill] sm:$0xff] %v10192_v26 }
 0x38f   : > { %1532 = vxpose.xlu1.b32.cont [2/8] (short) (narrow) %v1142_v17, 8  ;;  %1565 = vxpose.xlu0.b32.cont [3/8] (short) (narrow) %v1168_v27, 8  ;;  %v10196_v32 = vpop.permute.xlu0 %1275  ;;  %v13359_v17 = vld [vmem:[#allocation23_spill] sm:$0xff]  ;;  %v13367_v27 = vld [vmem:[#allocation50_spill] sm:$0xff] }
 0x390   : > { %13317 = vst [vmem:[#allocation60_spill] sm:$0xff] %v10196_v32 }
 0x393   : > { %1533 = vxpose.xlu1.b32.cont [3/8] (short) (narrow) %v1144_v30, 8  ;;  %1566 = vxpose.xlu0.b32.cont [4/8] (short) (narrow) %v1170_v21, 8  ;;  %v13368_v30 = vld [vmem:[#allocation55_spill] sm:$0xff] }
 0x397   : > { %1534 = vxpose.xlu1.b32.cont [4/8] (short) (narrow) %v1146_v25, 8  ;;  %1567 = vxpose.xlu0.b32.cont [5/8] (short) (narrow) %v9949_v28, 8  ;;  %v13339_v28 = vld [vmem:[#allocation11_spill] sm:$0xff] }
 0x39b   : > { %1535 = vxpose.xlu1.b32.cont [5/8] (short) (narrow) %v9940_v51, 8  ;;  %1568 = vxpose.xlu0.b32.cont [6/8] (short) (narrow) %v9900_v40, 8  ;;  %v13328_v40 = vld [vmem:[#allocation5_spill] sm:$0xff]  ;;  %v13338_v51 = vld [vmem:[#allocation8_spill] sm:$0xff] }
 0x39f   : > { %1536 = vxpose.xlu1.b32.cont [6/8] (short) (narrow) %v9884_v34, 8  ;;  %1569 = vxpose.xlu0.b32.cont [7/8] (short) (narrow) %v10061_v47, 8  ;;  %v13324_v34 = vld [vmem:[#allocation20_spill] sm:$0xff]  ;;  %v13336_v47 = vld [vmem:[#allocation6_spill] sm:$0xff] }
 0x3a3   : > { %1537 = vxpose.xlu1.b32.cont [7/8] (short) (narrow) %v10051_v3, 8  ;;  %1570 = vxpose.xlu0.b32.end [8/8] (short) (narrow) %v9997_v62, 8  ;;  %v13350_v62 = vld [vmem:[#allocation48_spill] sm:$0xff] }
 0x3a7   : > { %1538 = vxpose.xlu1.b32.end [8/8] (short) (narrow) %v9995_v61, 8  ;;  %1627 = vxpose.xlu0.b32.start [1/8] (short) (narrow) %v1212_v13, 8  ;;  %v13349_v61 = vld [vmem:[#allocation33_spill] sm:$0xff]  ;;  %v13365_v13 = vld [vmem:[#allocation58_spill] sm:$0xff] }
 0x3aa   : > { %v1451_v25 = vpop.trf.xlu0 }
 0x3ab   : > { %1595 = vxpose.xlu1.b32.start [1/8] (short) (narrow) %v1188_v15, 8  ;;  %1628 = vxpose.xlu0.b32.cont [2/8] (short) (narrow) %v1214_v24, 8  ;;  %v13323_v24 = vld [vmem:[#allocation2_spill] sm:$0xff]  ;;  %v13364_v15 = vld [vmem:[#allocation41_spill] sm:$0xff] }
 0x3ac   : > { %8549 = vmatprep.subr.msk.mxu1 %vm1708_vm2, %v1451_v25 }
 0x3ad   : > { %8550 = vmatpush3.msk.msra.mxu1 %vm1708_vm2, %v1451_v25  ;;  %v13370_v25 = vld [vmem:[#allocation18_spill] sm:$0xff] }
 0x3ae   : > { %8552 = vmatmul.mubr.msk.f32.vlgmr.msra.gmra.mrb[4].mxu1 %vm1691_vm1, %v9720_v4  ;;  %v1240_v4 = vpop.permute.xlu1 %1239 }
 0x3af   : > { %8554 = vmatprep.mubr.msk.f32.mxu1 %vm1691_vm1, %v9725_v7  ;;  %1596 = vxpose.xlu1.b32.cont [2/8] (short) (narrow) %v10171_v11, 8  ;;  %v13363_v11 = vld [vmem:[#allocation36_spill] sm:$0xff] }
 0x3b0   : > { %1629 = vxpose.xlu0.b32.cont [3/8] (short) (narrow) %v1216_v31, 8  ;;  %v13369_v31 = vld [vmem:[#allocation49_spill] sm:$0xff] }
 0x3b2   : > { %8555 = vmatmul.mubr.msk.f32.gmra.mrb[6].mxu1 %vm1691_vm1, %v9723_v6  ;;  %v10228_v6 = vpop.permute.xlu1 %1269 }
 0x3b3   : > { %8557 = vmatprep.mubr.msk.f32.mxu1 %vm1691_vm1, %v9735_v10  ;;  %1597 = vxpose.xlu1.b32.cont [3/8] (short) (narrow) %v1192_v33, 8  ;;  %13318 = vst [vmem:[#allocation61_spill] sm:$0xff] %v10228_v6 }
 0x3b4   : > { %1630 = vxpose.xlu0.b32.cont [4/8] (short) (narrow) %v1218_v63, 8  ;;  %v13351_v63 = vld [vmem:[#allocation53_spill] sm:$0xff] }
 0x3b6   : > { %8558 = vmatmul.mubr.msk.f32.gmra.mrb[8].mxu1 %vm1691_vm1, %v9727_v8  ;;  %v10231_v7 = vpop.permute.xlu1 %1273 }
 0x3b7   : > { %8560 = vmatprep.mubr.msk.f32.mxu1 %vm1691_vm1, %v9747_v14  ;;  %1598 = vxpose.xlu1.b32.cont [4/8] (short) (narrow) %v1194_v2, 8  ;;  %13319 = vst [vmem:[#allocation62_spill] sm:$0xff] %v10231_v7 }
 0x3b8   : > { %1631 = vxpose.xlu0.b32.cont [5/8] (short) (narrow) %v9965_v29, 8  ;;  %v13342_v29 = vld [vmem:[#allocation22_spill] sm:$0xff] }
 0x3ba   : > { %8561 = vmatmul.mubr.msk.f32.gmra.mrb[10].mxu1 %vm1691_vm1, %v9739_v12  ;;  %v10235_v8 = vpop.permute.xlu1 %1271 }
 0x3bb   : > { %8579 = vmatprep.mubr.msk.f32.mxu1 %vm1691_vm1, %v9957_v54  ;;  %1599 = vxpose.xlu1.b32.cont [5/8] (short) (narrow) %v9947_v53, 8  ;;  %13320 = vst [vmem:[#allocation63_spill] sm:$0xff] %v10235_v8  ;;  %v13340_v54 = vld [vmem:[#allocation28_spill] sm:$0xff] }
 0x3bc   : > { %1632 = vxpose.xlu0.b32.cont [6/8] (short) (narrow) %v9902_v41, 8  ;;  %v13329_v41 = vld [vmem:[#allocation31_spill] sm:$0xff] }
 0x3be   : > { %v10238_v10 = vpop.permute.xlu1 %1277 }
 0x3bf   : > { %1600 = vxpose.xlu1.b32.cont [6/8] (short) (narrow) %v9886_v35, 8  ;;  %13321 = vst [vmem:[#allocation64_spill] sm:$0xff] %v10238_v10  ;;  %v13325_v35 = vld [vmem:[#allocation32_spill] sm:$0xff] }
 0x3c0   : > { %1633 = vxpose.xlu0.b32.cont [7/8] (short) (narrow) %v10077_v1, 8  ;;  %v13355_v1 = vld [vmem:[#allocation7_spill] sm:$0xff] }
 0x3c3   : > { %1601 = vxpose.xlu1.b32.cont [7/8] (short) (narrow) %v10059_v45, 8  ;;  %v13334_v45 = vld [vmem:[#allocation45_spill] sm:$0xff] }
 0x3c4   : > { %1634 = vxpose.xlu0.b32.end [8/8] (short) (narrow) %v10013_v48, 8  ;;  %v13354_v48 = vld [vmem:[#allocation16_spill] sm:$0xff] }
 0x3c7   : > { %1602 = vxpose.xlu1.b32.end [8/8] (short) (narrow) %v10011_v39, 8  ;;  %v13353_v39 = vld [vmem:[#allocation47_spill] sm:$0xff] }
 0x3cb   : > { %1659 = vxpose.xlu1.b32.start [1/8] (short) (narrow) %v10175_v42, 8  ;;  %v13330_v42 = vld [vmem:[#allocation46_spill] sm:$0xff] }
 0x3cf   : > { %1660 = vxpose.xlu1.b32.cont [2/8] (short) (narrow) %v10173_v16, 8  ;;  %v13360_v16 = vld [vmem:[#allocation27_spill] sm:$0xff] }
 0x3d3   : > { %1661 = vxpose.xlu1.b32.cont [3/8] (short) (narrow) %v1240_v4, 8  ;;  %v13371_v4 = vld [vmem:[#allocation14_spill] sm:$0xff] }
 0x3d7   : > { %1662 = vxpose.xlu1.b32.cont [4/8] (short) (narrow) %v10177_v22, 8  ;;  %v13322_v22 = vld [vmem:[#allocation40_spill] sm:$0xff] }
 0x3db   : > { %1663 = vxpose.xlu1.b32.cont [5/8] (short) (narrow) %v9963_v55, 8  ;;  %v13341_v55 = vld [vmem:[#allocation10_spill] sm:$0xff] }
 0x3df   : > { %1664 = vxpose.xlu1.b32.cont [6/8] (short) (narrow) %v9916_v20, 8  ;;  %v13332_v20 = vld [vmem:[#allocation17_spill] sm:$0xff] }
 0x3e3   : > { %1665 = vxpose.xlu1.b32.cont [7/8] (short) (narrow) %v10075_v58, 8  ;;  %v13346_v58 = vld [vmem:[#allocation34_spill] sm:$0xff] }
 0x3e7   : > { %1666 = vxpose.xlu1.b32.end [8/8] (short) (narrow) %v10027_v49, 8  ;;  %v1515_v12 = vpop.trf.xlu0  ;;  %v13356_v49 = vld [vmem:[#allocation12_spill] sm:$0xff] }
 0x3e8   : > { %8577 = vmatprep.subr.msk.mxu1 %vm1708_vm2, %v1515_v12 }
 0x3e9   : > { %8578 = vmatpush3.msk.msra.mxu1 %vm1708_vm2, %v1515_v12  ;;  %v13372_v12 = vld [vmem:[#allocation29_spill] sm:$0xff] }
 0x3ea   : > { %8580 = vmatmul.mubr.msk.f32.vlgmr.msra.gmra.mrb[12].mxu1 %vm1691_vm1, %v9894_v37  ;;  %v13326_v37 = vld [vmem:[#allocation38_spill] sm:$0xff] }
 0x3eb   : > { %v1483_v14 = vpop.trf.xlu1  ;;  %8582 = vmatprep.mubr.msk.f32.mxu1 %vm1691_vm1, %v10069_v56  ;;  %v13343_v56 = vld [vmem:[#allocation26_spill] sm:$0xff] }
 0x3ec   : > { %8563 = vmatprep.subr.msk.mxu0 %vm1708_vm2, %v1483_v14 }
 0x3ed   : > { %1291 = vrot.lane.b32.xlu0 %v9773_v23, %s9465_s23  ;;  %8564 = vmatpush3.msk.msra.mxu0 %vm1708_vm2, %v1483_v14  ;;  %v13373_v14 = vld [vmem:[#allocation25_spill] sm:$0xff] }
 0x3ee   : > { %8566 = vmatmul.mubr.msk.f32.vlgmr.msra.gmra.mrb[20].mxu0 %vm1691_vm1, %v9892_v36  ;;  %8583 = vmatmul.mubr.msk.f32.gmra.mrb[14].mxu1 %vm1691_vm1, %v10005_v0  ;;  %v13327_v36 = vld [vmem:[#allocation54_spill] sm:$0xff]  ;;  %v13352_v0 = vld [vmem:[#allocation19_spill] sm:$0xff] }
 0x3ef   : > { %8568 = vmatprep.mubr.msk.f32.mxu0 %vm1691_vm1, %v10053_v5  ;;  %8585 = vmatprep.mubr.msk.f32.mxu1 %vm1691_vm1, %v13322_v22  ;;  %v13357_v5 = vld [vmem:[#allocation30_spill] sm:$0xff]  ;;  %v13374_v22 = vld [vmem:[#allocation43_spill] sm:$0xff] }
 0x3f1   : > { %1293 = vrot.lane.b32.xlu0 %v13323_v24, %s9465_s23 }
 0x3f2   : > { %8569 = vmatmul.mubr.msk.f32.gmra.mrb[22].mxu0 %vm1691_vm1, %v13324_v34  ;;  %8586 = vmatmul.mubr.msk.f32.gmra.mrb[16].mxu1 %vm1691_vm1, %v13325_v35  ;;  %v13375_v34 = vld [vmem:[#allocation37_spill] sm:$0xff] }
 0x3f3   : > { %8571 = vmatprep.mubr.msk.f32.mxu0 %vm1691_vm1, %v13326_v37  ;;  %8588 = vmatprep.mubr.msk.f32.mxu1 %vm1691_vm1, %v13327_v36  ;;  %v13376_v35 = vld [vmem:[#allocation57_spill] sm:$0xff]  ;;  %v13377_v37 = vld [vmem:[#allocation51_spill] sm:$0xff] }
 0x3f5   : > { %1295 = vrot.lane.b32.xlu0 %v13328_v40, %s9465_s23 }
 0x3f6   : > { %8572 = vmatmul.mubr.msk.f32.gmra.mrb[24].mxu0 %vm1691_vm1, %v13329_v41  ;;  %8589 = vmatmul.mubr.msk.f32.gmra.mrb[18].mxu1 %vm1691_vm1, %v13330_v42 }
 0x3f7   : > { %8574 = vmatprep.mubr.msk.f32.mxu0 %vm1691_vm1, %v13331_v43  ;;  %8607 = vmatprep.mubr.msk.f32.mxu1 %vm1691_vm1, %v13332_v20 }
 0x3f9   : > { %1321 = vrot.lane.b32.xlu0 %v13333_v44, %s9468_s26 }
 0x3fa   : > { %8575 = vmatmul.mubr.msk.f32.gmra.mrb[26].mxu0 %vm1691_vm1, %v13334_v45 }
 0x3fb   : > { %8593 = vmatprep.mubr.msk.f32.mxu0 %vm1691_vm1, %v13335_v46 }
 0x3fd   : > { %1301 = vrot.lane.b32.xlu0 %v13336_v47, %s9465_s23 }
 0x401   : > { %1303 = vrot.lane.b32.xlu0 %v13337_v50, %s9465_s23 }
 0x405   : > { %1329 = vrot.lane.b32.xlu0 %v13338_v51, %s9468_s26  ;;  %1279 = vrot.lane.b32.xlu1 %v13337_v50, %s9466_s24 }
 0x407   : > { %v1579_v53 = vpop.trf.xlu0 }
 0x408   : > { %8605 = vmatprep.subr.msk.mxu1 %vm1708_vm2, %v1579_v53 }
 0x409   : > { %1281 = vrot.lane.b32.xlu1 %v13338_v51, %s9466_s24  ;;  %8606 = vmatpush3.msk.msra.mxu1 %vm1708_vm2, %v1579_v53  ;;  %s9483_s24 = smov 28  }
 0x40a   : > { %8608 = vmatmul.mubr.msk.f32.vlgmr.msra.gmra.mrb[20].mxu1 %vm1691_vm1, %v13339_v28 }
 0x40b   : > { %v1547_v21 = vpop.trf.xlu1  ;;  %8610 = vmatprep.mubr.msk.f32.mxu1 %vm1691_vm1, %v13340_v54 }
 0x40c   : > { %8591 = vmatprep.subr.msk.mxu0 %vm1708_vm2, %v1547_v21 }
 0x40d   : > { %1315 = vrot.lane.b32.xlu1 %v9773_v23, %s9468_s26  ;;  %8592 = vmatpush3.msk.msra.mxu0 %vm1708_vm2, %v1547_v21 }
 0x40e   : > { %8594 = vmatmul.mubr.msk.f32.vlgmr.msra.gmra.mrb[28].mxu0 %vm1691_vm1, %v13341_v55  ;;  %8611 = vmatmul.mubr.msk.f32.gmra.mrb[22].mxu1 %vm1691_vm1, %v13342_v29 }
 0x40f   : > { %8596 = vmatprep.mubr.msk.f32.mxu0 %vm1691_vm1, %v13343_v56  ;;  %8613 = vmatprep.mubr.msk.f32.mxu1 %vm1691_vm1, %v13344_v38 }
 0x411   : > { %1317 = vrot.lane.b32.xlu1 %v13323_v24, %s9468_s26 }
 0x412   : > { %8597 = vmatmul.mubr.msk.f32.gmra.mrb[30].mxu0 %vm1691_vm1, %v13345_v57  ;;  %8614 = vmatmul.mubr.msk.f32.gmra.mrb[24].mxu1 %vm1691_vm1, %v13346_v58 }
 0x413   : > { %8599 = vmatprep.mubr.msk.f32.mxu0 %vm1691_vm1, %v13347_v59  ;;  %8616 = vmatprep.mubr.msk.f32.mxu1 %vm1691_vm1, %v13348_v60 }
 0x415   : > { %1319 = vrot.lane.b32.xlu1 %v13328_v40, %s9468_s26 }
 0x416   : > { %8600 = vmatmul.mubr.msk.f32.gmra.mrb[32].mxu0 %vm1691_vm1, %v13349_v61  ;;  %8617 = vmatmul.mubr.msk.f32.gmra.mrb[26].mxu1 %vm1691_vm1, %v13350_v62 }
 0x417   : > { %8602 = vmatprep.mubr.msk.f32.mxu0 %vm1691_vm1, %v13351_v63  ;;  %8635 = vmatprep.mubr.msk.f32.mxu1 %vm1691_vm1, %v13352_v0 }
 0x419   : > { %1297 = vrot.lane.b32.xlu1 %v13333_v44, %s9465_s23 }
 0x41a   : > { %8603 = vmatmul.mubr.msk.f32.gmra.mrb[34].mxu0 %vm1691_vm1, %v13353_v39 }
 0x41b   : > { %8621 = vmatprep.mubr.msk.f32.mxu0 %vm1691_vm1, %v13354_v48 }
 0x41d   : > { %1299 = vrot.lane.b32.xlu1 %v13355_v1, %s9465_s23 }
 0x421   : > { %1323 = vrot.lane.b32.xlu1 %v13355_v1, %s9468_s26 }
 0x425   : > { %1325 = vrot.lane.b32.xlu1 %v13336_v47, %s9468_s26 }
 0x428   : > { %v1643_v2 = vpop.trf.xlu0 }
 0x429   : > { %8633 = vmatprep.subr.msk.mxu1 %vm1708_vm2, %v1643_v2  ;;  %1327 = vrot.lane.b32.xlu1 %v13337_v50, %s9468_s26 }
 0x42a   : > { %8634 = vmatpush3.msk.msra.mxu1 %vm1708_vm2, %v1643_v2 }
 0x42b   : > { %8636 = vmatmul.mubr.msk.f32.vlgmr.msra.gmra.mrb[28].mxu1 %vm1691_vm1, %v13356_v49  ;;  %v1611_v3 = vpop.trf.xlu1 }
 0x42c   : > { %8638 = vmatprep.mubr.msk.f32.mxu1 %vm1691_vm1, %v13357_v5  ;;  %8619 = vmatprep.subr.msk.mxu0 %vm1708_vm2, %v1611_v3 }
 0x42d   : > { %1305 = vrot.lane.b32.xlu1 %v13338_v51, %s9465_s23  ;;  %8620 = vmatpush3.msk.msra.mxu0 %vm1708_vm2, %v1611_v3  ;;  %s9482_s23 = smov 24  }
 0x42e   : > { %8622 = vmatmul.mubr.msk.f32.vlgmr.msra.gmra.mrb[36].mxu0 %vm1691_vm1, %v13358_v52 }
 0x42f   : > { %8639 = vmatmul.mubr.msk.f32.gmra.mrb[30].mxu1 %vm1691_vm1, %v13359_v17  ;;  %8624 = vmatprep.mubr.msk.f32.mxu0 %vm1691_vm1, %v13360_v16 }
 0x430   : > { %8641 = vmatprep.mubr.msk.f32.mxu1 %vm1691_vm1, %v13361_v19 }
 0x432   : > { %8625 = vmatmul.mubr.msk.f32.gmra.mrb[38].mxu0 %vm1691_vm1, %v13362_v18 }
 0x433   : > { %8642 = vmatmul.mubr.msk.f32.gmra.mrb[32].mxu1 %vm1691_vm1, %v13363_v11  ;;  %8627 = vmatprep.mubr.msk.f32.mxu0 %vm1691_vm1, %v13364_v15 }
 0x434   : > { %8644 = vmatprep.mubr.msk.f32.mxu1 %vm1691_vm1, %v13365_v13 }
 0x436   : > { %8628 = vmatmul.mubr.msk.f32.gmra.mrb[40].mxu0 %vm1691_vm1, %v13366_v9 }
 0x437   : > { %8645 = vmatmul.mubr.msk.f32.gmra.mrb[34].mxu1 %vm1691_vm1, %v13367_v27  ;;  %8630 = vmatprep.mubr.msk.f32.mxu0 %vm1691_vm1, %v13368_v30 }
 0x43a   : > { %8631 = vmatmul.mubr.msk.f32.gmra.mrb[42].mxu0 %vm1691_vm1, %v13369_v31 }
 0x43b   : > { %8649 = vmatprep.mubr.msk.f32.mxu0 %vm1691_vm1, %v13370_v25 }
 0x44b   : > { %v1675_v33 = vpop.trf.xlu1 }
 0x44c   : > { %8647 = vmatprep.subr.msk.mxu0 %vm1708_vm2, %v1675_v33 }
 0x44d   : > { %8648 = vmatpush3.msk.msra.mxu0 %vm1708_vm2, %v1675_v33 }
 0x44e   : > { %8650 = vmatmul.mubr.msk.f32.vlgmr.msra.gmra.mrb[44].mxu0 %vm1691_vm1, %v13371_v4 }
 0x44f   : > { %8652 = vmatprep.mubr.msk.f32.mxu0 %vm1691_vm1, %v13372_v12 }
 0x452   : > { %8653 = vmatmul.mubr.msk.f32.gmra.mrb[46].mxu0 %vm1691_vm1, %v13373_v14 }
 0x453   : > { %8655 = vmatprep.mubr.msk.f32.mxu0 %vm1691_vm1, %v13374_v22 }
 0x456   : > { %8656 = vmatmul.mubr.msk.f32.gmra.mrb[48].mxu0 %vm1691_vm1, %v13375_v34 }
 0x457   : > { %8658 = vmatprep.mubr.msk.f32.mxu0 %vm1691_vm1, %v13376_v35 }
 0x45a   : > { %8659 = vmatmul.mubr.msk.f32.gmra.mrb[50].mxu0 %vm1691_vm1, %v13377_v37 }
 0x477   : > { %v10473_v9 = vpop.permute.xlu1 %1279 }
 0x478   : > { %13378 = vst [vmem:[#allocation40_spill] sm:$0xff] %v10473_v9 }
 0x47b   : > { %v10485_v4 = vpop.permute.xlu1 %1281 }
 0x47c   : > { %13379 = vst [vmem:[#allocation20_spill] sm:$0xff] %v10485_v4 }
 0x47f   : > { %v10491_v22 = vpop.permute.xlu1 %1315 }
 0x480   : > { %13380 = vst [vmem:[#allocation32_spill] sm:$0xff] %v10491_v22 }
 0x481   : > { %v10399_v36 = vpop.f32.mrb[4].mxu1 }
 0x482   : > { %v10401_v41 = vpop.f32.mrb[5].mxu1  ;;  %v2689_v42 = vsel %vm2685_vm3, %v10399_v36, -inf }
 0x483   : > { %2690 = vmax.xlane.f32.xlu1 %v2689_v42  ;;  %v2686_v43 = vsel %vm2685_vm3, %v10401_v41, -inf }
 0x484   : > { %2687 = vmax.xlane.f32.xlu0 %v2686_v43 }
 0x485   : > { %v10407_v20 = vpop.f32.mrb[6].mxu1 }
 0x486   : > { %v10409_v45 = vpop.f32.mrb[7].mxu1  ;;  %v2695_v46 = vsel %vm2685_vm3, %v10407_v20, -inf }
 0x487   : > { %2696 = vmax.xlane.f32.xlu1 %v2695_v46  ;;  %v2692_v53 = vsel %vm2685_vm3, %v10409_v45, -inf  ;;  %v10503_v46 = vpop.permute.xlu1 %1317 }
 0x488   : > { %2693 = vmax.xlane.f32.xlu0 %v2692_v53  ;;  %13381 = vst [vmem:[#allocation38_spill] sm:$0xff] %v10503_v46 }
 0x489   : > { %v10415_v28 = vpop.f32.mrb[8].mxu1 }
 0x48a   : > { %v10417_v21 = vpop.f32.mrb[9].mxu1  ;;  %v2701_v54 = vsel %vm2685_vm3, %v10415_v28, -inf }
 0x48b   : > { %2702 = vmax.xlane.f32.xlu1 %v2701_v54  ;;  %v2698_v55 = vsel %vm2685_vm3, %v10417_v21, -inf }
 0x48c   : > { %2699 = vmax.xlane.f32.xlu0 %v2698_v55 }
 0x48d   : > { %v10423_v29 = vpop.f32.mrb[10].mxu1 }
 0x48e   : > { %v10425_v56 = vpop.f32.mrb[11].mxu1  ;;  %v2707_v38 = vsel %vm2685_vm3, %v10423_v29, -inf }
 0x48f   : > { %2708 = vmax.xlane.f32.xlu1 %v2707_v38  ;;  %v2704_v57 = vsel %vm2685_vm3, %v10425_v56, -inf }
 0x490   : > { %2705 = vmax.xlane.f32.xlu0 %v2704_v57 }
 0x4bd   : > { %v10431_v58 = vpop.f32.mrb[12].mxu1 }
 0x4be   : > { %v10433_v59 = vpop.f32.mrb[13].mxu1  ;;  %v2737_v60 = vsel %vm2685_vm3, %v10431_v58, -inf }
 0x4bf   : > { %2738 = vmax.xlane.f32.xlu1 %v2737_v60  ;;  %v2734_v11 = vsel %vm2685_vm3, %v10433_v59, -inf }
 0x4c1   : > { %v10437_v61 = vpop.f32.mrb[20].mxu0  ;;  %v10439_v62 = vpop.f32.mrb[14].mxu1 }
 0x4c2   : > { %v10441_v63 = vpop.f32.mrb[21].mxu0  ;;  %v10443_v0 = vpop.f32.mrb[15].mxu1  ;;  %v2713_v39 = vsel %vm2685_vm3, %v10437_v61, -inf  ;;  %v2743_v15 = vsel %vm2685_vm3, %v10439_v62, -inf }
 0x4c3   : > { %2714 = vmax.xlane.f32.xlu0 %v2713_v39  ;;  %v2710_v5 = vsel %vm2685_vm3, %v10441_v63, -inf  ;;  %v2740_v25 = vsel %vm2685_vm3, %v10443_v0, -inf }
 0x4c5   : > { %v10447_v48 = vpop.f32.mrb[22].mxu0  ;;  %v10449_v2 = vpop.f32.mrb[16].mxu1 }
 0x4c6   : > { %v10451_v49 = vpop.f32.mrb[23].mxu0  ;;  %v10453_v3 = vpop.f32.mrb[17].mxu1  ;;  %v2719_v52 = vsel %vm2685_vm3, %v10447_v48, -inf  ;;  %v2749_v33 = vsel %vm2685_vm3, %v10449_v2, -inf }
 0x4c7   : > { %2711 = vmax.xlane.f32.xlu0 %v2710_v5  ;;  %2720 = vmax.xlane.f32.xlu1 %v2719_v52  ;;  %v2716_v30 = vsel %vm2685_vm3, %v10451_v49, -inf  ;;  %v2746_v34 = vsel %vm2685_vm3, %v10453_v3, -inf }
 0x4c9   : > { %v10459_v17 = vpop.f32.mrb[24].mxu0  ;;  %v10461_v16 = vpop.f32.mrb[18].mxu1 }
 0x4ca   : > { %v10463_v19 = vpop.f32.mrb[25].mxu0  ;;  %v10465_v18 = vpop.f32.mrb[19].mxu1  ;;  %v2725_v31 = vsel %vm2685_vm3, %v10459_v17, -inf  ;;  %v2755_v35 = vsel %vm2685_vm3, %v10461_v16, -inf }
 0x4cb   : > { %2735 = vmax.xlane.f32.xlu0 %v2734_v11  ;;  %2744 = vmax.xlane.f32.xlu1 %v2743_v15  ;;  %v2722_v12 = vsel %vm2685_vm3, %v10463_v19, -inf  ;;  %v2752_v60 = vsel %vm2685_vm3, %v10465_v18, -inf }
 0x4cd   : > { %v10471_v13 = vpop.f32.mrb[26].mxu0 }
 0x4ce   : > { %v10475_v27 = vpop.f32.mrb[27].mxu0  ;;  %v2731_v14 = vsel %vm2685_vm3, %v10471_v13, -inf }
 0x4cf   : > { %2717 = vmax.xlane.f32.xlu0 %v2716_v30  ;;  %2726 = vmax.xlane.f32.xlu1 %v2725_v31  ;;  %v2728_v43 = vsel %vm2685_vm3, %v10475_v27, -inf  ;;  %v10529_v31 = vpop.permute.xlu1 %1319 }
 0x4d0   : > { %13383 = vst [vmem:[#allocation5_spill] sm:$0xff] %v10529_v31 }
 0x4d3   : > { %2741 = vmax.xlane.f32.xlu0 %v2740_v25  ;;  %2750 = vmax.xlane.f32.xlu1 %v2749_v33  ;;  %v10531_v25 = vpop.permute.xlu0 %1291 }
 0x4d4   : > { %13384 = vst [vmem:[#allocation31_spill] sm:$0xff] %v10531_v25 }
 0x4d7   : > { %2723 = vmax.xlane.f32.xlu0 %v2722_v12  ;;  %2732 = vmax.xlane.f32.xlu1 %v2731_v14  ;;  %v10555_v46 = vpop.permute.xlu0 %1293 }
 0x4d8   : > { %13388 = vst [vmem:[#allocation45_spill] sm:$0xff] %v10555_v46 }
 0x4db   : > { %2747 = vmax.xlane.f32.xlu0 %v2746_v34  ;;  %2756 = vmax.xlane.f32.xlu1 %v2755_v35  ;;  %v10563_v22 = vpop.permute.xlu0 %1295 }
 0x4dc   : > { %13390 = vst [vmem:[#allocation11_spill] sm:$0xff] %v10563_v22 }
 0x4dd   : > { %v10497_v37 = vpop.f32.mrb[20].mxu1 }
 0x4de   : > { %v10499_v42 = vpop.f32.mrb[21].mxu1  ;;  %v2785_v30 = vsel %vm2685_vm3, %v10497_v37, -inf }
 0x4df   : > { %2729 = vmax.xlane.f32.xlu0 %v2728_v43  ;;  %v2782_v43 = vsel %vm2685_vm3, %v10499_v42, -inf }
 0x4e1   : > { %v10505_v53 = vpop.f32.mrb[28].mxu0  ;;  %v10507_v54 = vpop.f32.mrb[22].mxu1 }
 0x4e2   : > { %v10509_v55 = vpop.f32.mrb[29].mxu0  ;;  %v10511_v38 = vpop.f32.mrb[23].mxu1  ;;  %v2761_v57 = vsel %vm2685_vm3, %v10505_v53, -inf  ;;  %v2791_v31 = vsel %vm2685_vm3, %v10507_v54, -inf }
 0x4e3   : > { %2762 = vmax.xlane.f32.xlu1 %v2761_v57  ;;  %2753 = vmax.xlane.f32.xlu0 %v2752_v60  ;;  %v2758_v15 = vsel %vm2685_vm3, %v10509_v55, -inf  ;;  %v10545_v57 = vpop.permute.xlu1 %1297 }
 0x4e4   : > { %13387 = vst [vmem:[#allocation17_spill] sm:$0xff] %v10545_v57 }
 0x4e5   : > { %v10517_v39 = vpop.f32.mrb[30].mxu0  ;;  %v10519_v5 = vpop.f32.mrb[24].mxu1 }
 0x4e6   : > { %13382 = vst [vmem:[#allocation54_spill] sm:$0xff] %v10519_v5  ;;  %v10521_v52 = vpop.f32.mrb[31].mxu0  ;;  %v10523_v11 = vpop.f32.mrb[25].mxu1  ;;  %v2767_v35 = vsel %vm2685_vm3, %v10517_v39, -inf  ;;  %v2797_v46 = vsel %vm2685_vm3, %v10519_v5, -inf }
 0x4e7   : > { %2759 = vmax.xlane.f32.xlu0 %v2758_v15  ;;  %2786 = vmax.xlane.f32.xlu1 %v2785_v30  ;;  %v2764_v30 = vsel %vm2685_vm3, %v10521_v52, -inf  ;;  %v10561_v57 = vpop.permute.xlu1 %1299 }
 0x4e8   : > { %13389 = vst [vmem:[#allocation15_spill] sm:$0xff] %v10561_v57  ;;  %v2794_v57 = vsel %vm2685_vm3, %v10523_v11, -inf }
 0x4e9   : > { %v10533_v33 = vpop.f32.mrb[32].mxu0  ;;  %v10535_v12 = vpop.f32.mrb[26].mxu1 }
 0x4ea   : > { %13385 = vst [vmem:[#allocation46_spill] sm:$0xff] %v10535_v12  ;;  %v10537_v14 = vpop.f32.mrb[33].mxu0  ;;  %v10539_v34 = vpop.f32.mrb[27].mxu1 }
 0x4eb   : > { %13386 = vst [vmem:[#allocation52_spill] sm:$0xff] %v10539_v34  ;;  %2768 = vmax.xlane.f32.xlu1 %v2767_v35  ;;  %2783 = vmax.xlane.f32.xlu0 %v2782_v43  ;;  %v2773_v35 = vsel %vm2685_vm3, %v10533_v33, -inf  ;;  %v2788_v43 = vsel %vm2685_vm3, %v10511_v38, -inf  ;;  %v2770_v4 = vsel %vm2685_vm3, %v10537_v14, -inf  ;;  %v2800_v10 = vsel %vm2685_vm3, %v10539_v34, -inf }
 0x4ed   : > { %v10547_v60 = vpop.f32.mrb[34].mxu0 }
 0x4ee   : > { %v10549_v15 = vpop.f32.mrb[35].mxu0 }
 0x4ef   : > { %2765 = vmax.xlane.f32.xlu0 %v2764_v30  ;;  %2792 = vmax.xlane.f32.xlu1 %v2791_v31  ;;  %v10569_v31 = vpop.permute.xlu1 %1323  ;;  %v2779_v30 = vsel %vm2685_vm3, %v10547_v60, -inf  ;;  %v2776_v22 = vsel %vm2685_vm3, %v10549_v15, -inf }
 0x4f0   : > { %13391 = vst [vmem:[#allocation28_spill] sm:$0xff] %v10569_v31 }
 0x4f3   : > { %2774 = vmax.xlane.f32.xlu1 %v2773_v35  ;;  %2789 = vmax.xlane.f32.xlu0 %v2788_v43  ;;  %v10575_v35 = vpop.permute.xlu0 %1321 }
 0x4f4   : > { %13392 = vst [vmem:[#allocation10_spill] sm:$0xff] %v10575_v35 }
 0x4f7   : > { %2771 = vmax.xlane.f32.xlu0 %v2770_v4  ;;  %2798 = vmax.xlane.f32.xlu1 %v2797_v46  ;;  %v2803_v4 = vsel %vm2685_vm3, %v10535_v12, -inf  ;;  %v10583_v46 = vpop.permute.xlu1 %1325  ;;  %v10587_v25 = vpop.permute.xlu0 %1301 }
 0x4f8   : > { %13394 = vst [vmem:[#allocation26_spill] sm:$0xff] %v10583_v46  ;;  %13396 = vst [vmem:[#allocation21_spill] sm:$0xff] %v10587_v25 }
 0x4fb   : > { %2780 = vmax.xlane.f32.xlu1 %v2779_v30  ;;  %2795 = vmax.xlane.f32.xlu0 %v2794_v57  ;;  %v10613_v6 = vpop.permute.xlu0 %1303 }
 0x4fc   : > { %13401 = vst [vmem:[#allocation48_spill] sm:$0xff] %v10613_v6 }
 0x4fe   : > { %v10577_v43 = vpop.f32.mrb[28].mxu1 }
 0x4ff   : > { %13393 = vst [vmem:[#allocation22_spill] sm:$0xff] %v10577_v43  ;;  %v10585_v31 = vpop.f32.mrb[29].mxu1  ;;  %2777 = vmax.xlane.f32.xlu0 %v2776_v22  ;;  %2804 = vmax.xlane.f32.xlu1 %v2803_v4  ;;  %v10601_v22 = vpop.permute.xlu1 %1327  ;;  %v2833_v8 = vsel %vm2685_vm3, %v10577_v43, -inf }
 0x500   : > { %13395 = vst [vmem:[#allocation42_spill] sm:$0xff] %v10585_v31  ;;  %13399 = vst [vmem:[#allocation56_spill] sm:$0xff] %v10601_v22  ;;  %v2830_v12 = vsel %vm2685_vm3, %v10585_v31, -inf }
 0x501   : > { %v10589_v9 = vpop.f32.mrb[36].mxu0 }
 0x502   : > { %v10591_v30 = vpop.f32.mrb[30].mxu1  ;;  %v10593_v57 = vpop.f32.mrb[37].mxu0  ;;  %v2809_v35 = vsel %vm2685_vm3, %v10589_v9, -inf }
 0x503   : > { %13397 = vst [vmem:[#allocation34_spill] sm:$0xff] %v10591_v30  ;;  %v10599_v32 = vpop.f32.mrb[31].mxu1  ;;  %2810 = vmax.xlane.f32.xlu1 %v2809_v35  ;;  %2801 = vmax.xlane.f32.xlu0 %v2800_v10  ;;  %v2806_v7 = vsel %vm2685_vm3, %v10593_v57, -inf  ;;  %v10629_v6 = vpop.permute.xlu1 %1305  ;;  %v2839_v50 = vsel %vm2685_vm3, %v10591_v30, -inf }
 0x504   : > { %13398 = vst [vmem:[#allocation39_spill] sm:$0xff] %v10599_v32  ;;  %13405 = vst [vmem:[#allocation16_spill] sm:$0xff] %v10629_v6  ;;  %v2836_v47 = vsel %vm2685_vm3, %v10599_v32, -inf }
 0x505   : > { %v10603_v4 = vpop.f32.mrb[38].mxu0 }
 0x506   : > { %v10605_v46 = vpop.f32.mrb[32].mxu1  ;;  %v10607_v25 = vpop.f32.mrb[39].mxu0  ;;  %v2815_v51 = vsel %vm2685_vm3, %v10603_v4, -inf }
 0x507   : > { %13400 = vst [vmem:[#allocation33_spill] sm:$0xff] %v10605_v46  ;;  %v10615_v26 = vpop.f32.mrb[33].mxu1  ;;  %2807 = vmax.xlane.f32.xlu0 %v2806_v7  ;;  %2834 = vmax.xlane.f32.xlu1 %v2833_v8  ;;  %v10631_v7 = vpop.permute.xlu0 %1329 }
 0x508   : > { %13402 = vst [vmem:[#allocation53_spill] sm:$0xff] %v10615_v26  ;;  %13406 = vst [vmem:[#allocation12_spill] sm:$0xff] %v10631_v7  ;;  %v2812_v7 = vsel %vm2685_vm3, %v10607_v25, -inf }
 0x509   : > { %v10617_v10 = vpop.f32.mrb[40].mxu0 }
 0x50a   : > { %v10619_v35 = vpop.f32.mrb[34].mxu1  ;;  %v10621_v22 = vpop.f32.mrb[41].mxu0  ;;  %v2821_v1 = vsel %vm2685_vm3, %v10617_v10, -inf }
 0x50b   : > { %13403 = vst [vmem:[#allocation19_spill] sm:$0xff] %v10619_v35  ;;  %v10627_v34 = vpop.f32.mrb[35].mxu1  ;;  %2816 = vmax.xlane.f32.xlu1 %v2815_v51  ;;  %2831 = vmax.xlane.f32.xlu0 %v2830_v12 }
 0x50c   : > { %13404 = vst [vmem:[#allocation47_spill] sm:$0xff] %v10627_v34 }
 0x50d   : > { %v10633_v8 = vpop.f32.mrb[42].mxu0 }
 0x50e   : > { %v10635_v43 = vpop.f32.mrb[43].mxu0 }
 0x50f   : > { %2840 = vmax.xlane.f32.xlu0 %v2839_v50  ;;  %2837 = vmax.xlane.f32.xlu1 %v2836_v47 }
 0x510   : > { %v2691_v31 = vpop.xlane.xlu1 %2690 }
 0x511   : > { %v2879_v51 = vsub.f32 %v10399_v36, %v2691_v31  ;;  %v2688_v12 = vpop.xlane.xlu0 %2687  ;;  %v2845_v36 = vsel %vm2685_vm3, %v10605_v46, -inf }
 0x512   : > { %v2878_v6 = vsub.f32 %v10401_v41, %v2688_v12  ;;  %v2842_v41 = vsel %vm2685_vm3, %v10615_v26, -inf }
 0x513   : > { %v2944_v44 = vmul.f32 1.442695, %v2879_v51  ;;  %2813 = vmax.xlane.f32.xlu0 %v2812_v7  ;;  %2822 = vmax.xlane.f32.xlu1 %v2821_v1  ;;  %v2818_v1 = vsel %vm2685_vm3, %v10621_v22, -inf }
 0x514   : > { %v2942_v30 = vmul.f32 1.442695, %v2878_v6  ;;  %v2697_v5 = vpop.xlane.xlu1 %2696 }
 0x515   : > { %9145 = vpow2.f32 %v2944_v44  ;;  %v2881_v47 = vsub.f32 %v10407_v20, %v2697_v5  ;;  %v2694_v50 = vpop.xlane.xlu0 %2693 }
 0x516   : > { %9147 = vpow2.f32 %v2942_v30  ;;  %v2880_v44 = vsub.f32 %v10409_v45, %v2694_v50 }
 0x517   : > { %v2948_v31 = vmul.f32 1.442695, %v2881_v47  ;;  %2846 = vmax.xlane.f32.xlu0 %v2845_v36  ;;  %2843 = vmax.xlane.f32.xlu1 %v2842_v41 }
 0x518   : > { %v2946_v47 = vmul.f32 1.442695, %v2880_v44  ;;  %v2703_v41 = vpop.xlane.xlu1 %2702  ;;  %v2851_v44 = vsel %vm2685_vm3, %v10619_v35, -inf }
 0x519   : > { %v2700_v12 = vpop.xlane.xlu0 %2699  ;;  %9149 = vpow2.f32 %v2948_v31 }
 0x51a   : > { %v2882_v6 = vsub.f32 %v10417_v21, %v2700_v12  ;;  %v2827_v12 = vsel %vm2685_vm3, %v10633_v8, -inf }
 0x51b   : > { %2819 = vmax.xlane.f32.xlu0 %v2818_v1 }
 0x51c   : > { %v2950_v30 = vmul.f32 1.442695, %v2882_v6 }
 0x51d   : > { %v2706_v20 = vpop.xlane.xlu0 %2705 }
 0x51e   : > { %v2884_v7 = vsub.f32 %v10425_v56, %v2706_v20  ;;  %9151 = vpow2.f32 %v2950_v30  ;;  %v2883_v56 = vsub.f32 %v10415_v28, %v2703_v41 }
 0x51f   : > { %v10656_v5 = vpop.eup %9145  ;;  %9153 = vpow2.f32 %v2946_v47  ;;  %v2824_v47 = vsel %vm2685_vm3, %v10635_v43, -inf }
 0x520   : > { %v10659_v51 = vpop.eup %9147  ;;  %v3073_v36 = vsel %vm2685_vm3, %v10656_v5, 0.0  ;;  %v2954_v50 = vmul.f32 1.442695, %v2884_v7  ;;  %v2952_v30 = vmul.f32 1.442695, %v2883_v56 }
 0x521   : > { %3074 = vadd.xlane.f32.xlu1 %v3073_v36  ;;  %v10663_v31 = vpop.f32.mrb[44].mxu0  ;;  %v3070_v21 = vsel %vm2685_vm3, %v10659_v51, 0.0 }
 0x522   : > { %3071 = vadd.xlane.f32.xlu0 %v3070_v21  ;;  %v10667_v45 = vpop.f32.mrb[45].mxu0  ;;  %9155 = vpow2.f32 %v2954_v50  ;;  %v2857_v41 = vsel %vm2685_vm3, %v10663_v31, -inf  ;;  %v2709_v50 = vpop.xlane.xlu1 %2708 }
 0x523   : > { %v10672_v1 = vpop.eup %9149  ;;  %9157 = vpow2.f32 %v2952_v30 }
 0x524   : > { %v3079_v7 = vsel %vm2685_vm3, %v10672_v1, 0.0 }
 0x525   : > { %2828 = vmax.xlane.f32.xlu1 %v2827_v12  ;;  %v10674_v6 = vpop.f32.mrb[46].mxu0  ;;  %v2848_v12 = vsel %vm2685_vm3, %v10627_v34, -inf }
 0x526   : > { %13407 = vst [vmem:[#allocation30_spill] sm:$0xff] %v10674_v6  ;;  %2852 = vmax.xlane.f32.xlu0 %v2851_v44  ;;  %v10678_v20 = vpop.f32.mrb[47].mxu0 }
 0x527   : > { %13408 = vst [vmem:[#allocation13_spill] sm:$0xff] %v10678_v20 }
 0x528   : > { %v10690_v21 = vpop.eup %9151 }
 0x529   : > { %3080 = vadd.xlane.f32.xlu1 %v3079_v7  ;;  %v10682_v28 = vpop.f32.mrb[48].mxu0  ;;  %v10696_v44 = vpop.eup %9153  ;;  %v3082_v30 = vsel %vm2685_vm3, %v10690_v21, 0.0 }
 0x52a   : > { %13409 = vst [vmem:[#allocation23_spill] sm:$0xff] %v10682_v28  ;;  %2825 = vmax.xlane.f32.xlu0 %v2824_v47  ;;  %v10686_v36 = vpop.f32.mrb[49].mxu0  ;;  %v2885_v47 = vsub.f32 %v10423_v29, %v2709_v50  ;;  %v2863_v50 = vsel %vm2685_vm3, %v10674_v6, -inf }
 0x52b   : > { %13410 = vst [vmem:[#allocation27_spill] sm:$0xff] %v10686_v36 }
 0x52c   : > { %v10703_v35 = vpop.eup %9155  ;;  %v2956_v46 = vmul.f32 1.442695, %v2885_v47  ;;  %v13203_v47 = vmov 0.0|0.0  }
 0x52d   : > { %2858 = vmax.xlane.f32.xlu1 %v2857_v41  ;;  %v10692_v56 = vpop.f32.mrb[50].mxu0  ;;  %v3076_v41 = vsel %vm2685_vm3, %v10696_v44, 0.0  ;;  %v3088_v34 = vsel %vm2685_vm3, %v10703_v35, 0.0  ;;  %v10711_v26 = vpop.eup %9157  ;;  %8921 = vmatprep.subr.bf16.mxu1 %v13203_v47 }
 0x52e   : > { %13411 = vst [vmem:[#allocation44_spill] sm:$0xff] %v10692_v56  ;;  %2849 = vmax.xlane.f32.xlu0 %v2848_v12  ;;  %v10698_v7 = vpop.f32.mrb[51].mxu0  ;;  %v2854_v12 = vsel %vm2685_vm3, %v10667_v45, -inf  ;;  %9159 = vpow2.f32 %v2956_v46  ;;  %v3085_v29 = vsel %vm2685_vm3, %v10711_v26, 0.0  ;;  %8937 = vmatprep.subr.bf16.mxu0 %v13203_v47  ;;  %v2875_v6 = vsel %vm2685_vm3, %v10692_v56, -inf }
 0x52f   : > { %13412 = vst [vmem:[#allocation24_spill] sm:$0xff] %v10698_v7 }
 0x531   : > { %3083 = vadd.xlane.f32.xlu1 %v3082_v30 }
 0x532   : > { %3077 = vadd.xlane.f32.xlu0 %v3076_v41  ;;  %v2869_v41 = vsel %vm2685_vm3, %v10682_v28, -inf }
 0x535   : > { %3089 = vadd.xlane.f32.xlu1 %v3088_v34  ;;  %v2860_v34 = vsel %vm2685_vm3, %v10678_v20, -inf }
 0x536   : > { %2855 = vmax.xlane.f32.xlu0 %v2854_v12 }
 0x538   : > { %v10721_v30 = vpop.eup %9159 }
 0x539   : > { %v3091_v46 = vsel %vm2685_vm3, %v10721_v30, 0.0 }
 0x53a   : > { %3086 = vadd.xlane.f32.xlu0 %v3085_v29 }
 0x53e   : > { %2864 = vmax.xlane.f32.xlu0 %v2863_v50  ;;  %v2866_v50 = vsel %vm2685_vm3, %v10686_v36, -inf }
 0x542   : > { %2861 = vmax.xlane.f32.xlu0 %v2860_v34 }
 0x546   : > { %3092 = vadd.xlane.f32.xlu0 %v3091_v46 }
 0x54a   : > { %2870 = vmax.xlane.f32.xlu0 %v2869_v41 }
 0x54c   : > { %v2739_v12 = vpop.xlane.xlu1 %2738 }
 0x54d   : > { %v2895_v29 = vsub.f32 %v10431_v58, %v2739_v12  ;;  %v2872_v58 = vsel %vm2685_vm3, %v10698_v7, -inf }
 0x54e   : > { %2867 = vmax.xlane.f32.xlu0 %v2866_v50 }
 0x54f   : > { %v2976_v47 = vmul.f32 1.442695, %v2895_v29 }
 0x550   : > { %v2715_v20 = vpop.xlane.xlu0 %2714 }
 0x551   : > { %9161 = vpow2.f32 %v2976_v47  ;;  %v2887_v34 = vsub.f32 %v10437_v61, %v2715_v20 }
 0x552   : > { %2876 = vmax.xlane.f32.xlu0 %v2875_v6 }
 0x553   : > { %v2960_v46 = vmul.f32 1.442695, %v2887_v34 }
 0x554   : > { %v2721_v32 = vpop.xlane.xlu1 %2720  ;;  %v2712_v28 = vpop.xlane.xlu0 %2711 }
 0x555   : > { %9163 = vpow2.f32 %v2960_v46  ;;  %v2886_v41 = vsub.f32 %v10441_v63, %v2712_v28  ;;  %v2889_v29 = vsub.f32 %v10447_v48, %v2721_v32 }
 0x556   : > { %2873 = vmax.xlane.f32.xlu0 %v2872_v58 }
 0x557   : > { %v2958_v12 = vmul.f32 1.442695, %v2886_v41  ;;  %v2964_v56 = vmul.f32 1.442695, %v2889_v29 }
 0x558   : > { %v2745_v47 = vpop.xlane.xlu1 %2744  ;;  %v2736_v50 = vpop.xlane.xlu0 %2735 }
 0x559   : > { %v2897_v61 = vsub.f32 %v10439_v62, %v2745_v47  ;;  %v2894_v20 = vsub.f32 %v10433_v59, %v2736_v50  ;;  %9165 = vpow2.f32 %v2958_v12 }
 0x55b   : > { %v10739_v6 = vpop.eup %9161  ;;  %v2980_v34 = vmul.f32 1.442695, %v2897_v61  ;;  %v2974_v46 = vmul.f32 1.442695, %v2894_v20 }
 0x55c   : > { %13413 = vst [vmem:[#allocation36_spill] sm:$0xff] %v10739_v6  ;;  %v2727_v63 = vpop.xlane.xlu1 %2726  ;;  %v2718_v28 = vpop.xlane.xlu0 %2717  ;;  %v3121_v58 = vsel %vm2685_vm3, %v10739_v6, 0.0 }
 0x55d   : > { %9167 = vpow2.f32 %v2980_v34  ;;  %v2888_v32 = vsub.f32 %v10451_v49, %v2718_v28  ;;  %3122 = vadd.xlane.f32.xlu0 %v3121_v58  ;;  %v2891_v59 = vsub.f32 %v10459_v17, %v2727_v63 }
 0x55e   : > { %9169 = vpow2.f32 %v2974_v46 }
 0x55f   : > { %v10744_v48 = vpop.eup %9163  ;;  %v2962_v62 = vmul.f32 1.442695, %v2888_v32  ;;  %9171 = vpow2.f32 %v2964_v56  ;;  %v2968_v34 = vmul.f32 1.442695, %v2891_v59 }
 0x560   : > { %v2751_v41 = vpop.xlane.xlu1 %2750  ;;  %v2742_v12 = vpop.xlane.xlu0 %2741  ;;  %v3097_v29 = vsel %vm2685_vm3, %v10744_v48, 0.0 }
 0x561   : > { %v2899_v47 = vsub.f32 %v10449_v2, %v2751_v41  ;;  %v2896_v50 = vsub.f32 %v10443_v0, %v2742_v12  ;;  %3098 = vadd.xlane.f32.xlu1 %v3097_v29  ;;  %9173 = vpow2.f32 %v2962_v62 }
 0x563   : > { %v2984_v49 = vmul.f32 1.442695, %v2899_v47  ;;  %v2978_v61 = vmul.f32 1.442695, %v2896_v50  ;;  %v10751_v20 = vpop.eup %9165 }
 0x564   : > { %v2733_v46 = vpop.xlane.xlu1 %2732  ;;  %v2724_v56 = vpop.xlane.xlu0 %2723  ;;  %v3094_v63 = vsel %vm2685_vm3, %v10751_v20, 0.0 }
 0x565   : > { %9175 = vpow2.f32 %v2984_v49  ;;  %v2890_v17 = vsub.f32 %v10463_v19, %v2724_v56  ;;  %3095 = vadd.xlane.f32.xlu0 %v3094_v63  ;;  %v2893_v58 = vsub.f32 %v10471_v13, %v2733_v46 }
 0x566   : > { %9177 = vpow2.f32 %v2978_v61 }
 0x567   : > { %v10756_v2 = vpop.eup %9167  ;;  %v2966_v0 = vmul.f32 1.442695, %v2890_v17  ;;  %9179 = vpow2.f32 %v2968_v34  ;;  %v2972_v49 = vmul.f32 1.442695, %v2893_v58 }
 0x568   : > { %13414 = vst [vmem:[#allocation41_spill] sm:$0xff] %v10756_v2  ;;  %v10758_v28 = vpop.eup %9169  ;;  %v2757_v32 = vpop.xlane.xlu1 %2756  ;;  %v3127_v59 = vsel %vm2685_vm3, %v10756_v2, 0.0 }
 0x569   : > { %13415 = vst [vmem:[#allocation58_spill] sm:$0xff] %v10758_v28  ;;  %v2748_v62 = vpop.xlane.xlu0 %2747  ;;  %v2901_v19 = vsub.f32 %v10461_v16, %v2757_v32  ;;  %v3118_v12 = vsel %vm2685_vm3, %v10758_v28, 0.0  ;;  %v10767_v29 = vpop.eup %9171  ;;  %9181 = vpow2.f32 %v2966_v0  ;;  %3128 = vadd.xlane.f32.xlu0 %v3127_v59 }
 0x56a   : > { %v2898_v41 = vsub.f32 %v10453_v3, %v2748_v62  ;;  %3119 = vadd.xlane.f32.xlu1 %v3118_v12  ;;  %v3103_v3 = vsel %vm2685_vm3, %v10767_v29, 0.0 }
 0x56b   : > { %v2988_v47 = vmul.f32 1.442695, %v2901_v19  ;;  %v10769_v13 = vpop.eup %9173 }
 0x56c   : > { %v2982_v50 = vmul.f32 1.442695, %v2898_v41  ;;  %v3100_v16 = vsel %vm2685_vm3, %v10769_v13, 0.0 }
 0x56d   : > { %v2730_v61 = vpop.xlane.xlu0 %2729  ;;  %9183 = vpow2.f32 %v2988_v47  ;;  %3101 = vadd.xlane.f32.xlu0 %v3100_v16 }
 0x56e   : > { %v2892_v34 = vsub.f32 %v10475_v27, %v2730_v61  ;;  %9185 = vpow2.f32 %v2982_v50  ;;  %3104 = vadd.xlane.f32.xlu1 %v3103_v3 }
 0x56f   : > { %v10776_v46 = vpop.eup %9175  ;;  %9187 = vpow2.f32 %v2972_v49 }
 0x570   : > { %v2970_v56 = vmul.f32 1.442695, %v2892_v34  ;;  %v10778_v17 = vpop.eup %9177  ;;  %v2763_v63 = vpop.xlane.xlu1 %2762  ;;  %v3133_v27 = vsel %vm2685_vm3, %v10776_v46, 0.0 }
 0x571   : > { %13416 = vst [vmem:[#allocation35_spill] sm:$0xff] %v10778_v17  ;;  %v2754_v0 = vpop.xlane.xlu0 %2753  ;;  %v2903_v58 = vsub.f32 %v10505_v53, %v2763_v63  ;;  %v3124_v62 = vsel %vm2685_vm3, %v10778_v17, 0.0  ;;  %v10786_v59 = vpop.eup %9179 }
 0x572   : > { %9189 = vpow2.f32 %v2970_v56  ;;  %v2900_v32 = vsub.f32 %v10465_v18, %v2754_v0  ;;  %3134 = vadd.xlane.f32.xlu1 %v3133_v27  ;;  %3125 = vadd.xlane.f32.xlu0 %v3124_v62  ;;  %v3109_v53 = vsel %vm2685_vm3, %v10786_v59, 0.0 }
 0x573   : > { %v10788_v41 = vpop.eup %9181  ;;  %v2992_v12 = vmul.f32 1.442695, %v2903_v58 }
 0x574   : > { %v2986_v19 = vmul.f32 1.442695, %v2900_v32  ;;  %v10790_v47 = vpop.xlane.xlu1 %2786  ;;  %v3106_v18 = vsel %vm2685_vm3, %v10788_v41, 0.0 }
 0x575   : > { %v2760_v50 = vpop.xlane.xlu0 %2759 }
 0x576   : > { %v2902_v49 = vsub.f32 %v10509_v55, %v2760_v50  ;;  %9191 = vpow2.f32 %v2986_v19  ;;  %3110 = vadd.xlane.f32.xlu0 %v3109_v53  ;;  %3107 = vadd.xlane.f32.xlu1 %v3106_v18 }
 0x577   : > { %v10797_v61 = vpop.eup %9183  ;;  %9193 = vpow2.f32 %v2992_v12 }
 0x578   : > { %v10799_v34 = vpop.eup %9185  ;;  %v2990_v3 = vmul.f32 1.442695, %v2902_v49  ;;  %v2769_v16 = vpop.xlane.xlu1 %2768  ;;  %v3139_v55 = vsel %vm2685_vm3, %v10797_v61, 0.0 }
 0x579   : > { %v2784_v56 = vpop.xlane.xlu0 %2783  ;;  %v2905_v63 = vsub.f32 %v10517_v39, %v2769_v16  ;;  %v3130_v27 = vsel %vm2685_vm3, %v10799_v34, 0.0  ;;  %v10807_v58 = vpop.eup %9187 }
 0x57a   : > { %v2910_v0 = vsub.f32 %v10499_v42, %v2784_v56  ;;  %3140 = vadd.xlane.f32.xlu1 %v3139_v55  ;;  %3131 = vadd.xlane.f32.xlu0 %v3130_v27  ;;  %9195 = vpow2.f32 %v2990_v3  ;;  %v3115_v49 = vsel %vm2685_vm3, %v10807_v58, 0.0 }
 0x57b   : > { %v2996_v19 = vmul.f32 1.442695, %v2905_v63 }
 0x57c   : > { %v10809_v32 = vpop.eup %9189  ;;  %v3006_v62 = vmul.f32 1.442695, %v2910_v0  ;;  %v10811_v12 = vpop.xlane.xlu1 %2792 }
 0x57d   : > { %v2766_v50 = vpop.xlane.xlu0 %2765  ;;  %v3112_v39 = vsel %vm2685_vm3, %v10809_v32, 0.0 }
 0x57e   : > { %v2904_v42 = vsub.f32 %v10521_v52, %v2766_v50  ;;  %9197 = vpow2.f32 %v3006_v62  ;;  %3116 = vadd.xlane.f32.xlu0 %v3115_v49  ;;  %3113 = vadd.xlane.f32.xlu1 %v3112_v39 }
 0x57f   : > { %9199 = vpow2.f32 %v2996_v19 }
 0x580   : > { %v10818_v53 = vpop.eup %9191  ;;  %v2994_v18 = vmul.f32 1.442695, %v2904_v42  ;;  %v2775_v3 = vpop.xlane.xlu1 %2774 }
 0x581   : > { %v2790_v16 = vpop.xlane.xlu0 %2789  ;;  %v2907_v56 = vsub.f32 %v10533_v33, %v2775_v3  ;;  %v3136_v55 = vsel %vm2685_vm3, %v10818_v53, 0.0  ;;  %v10823_v63 = vpop.eup %9193 }
 0x582   : > { %3137 = vadd.xlane.f32.xlu0 %v3136_v55  ;;  %9201 = vpow2.f32 %v2994_v18  ;;  %v3145_v19 = vsel %vm2685_vm3, %v10823_v63, 0.0 }
 0x583   : > { %v3000_v52 = vmul.f32 1.442695, %v2907_v56 }
 0x584   : > { %v10825_v0 = vpop.xlane.xlu1 %2798  ;;  %v10830_v50 = vpop.eup %9195 }
 0x585   : > { %v2772_v27 = vpop.xlane.xlu0 %2771  ;;  %9203 = vpow2.f32 %v3000_v52  ;;  %v3142_v3 = vsel %vm2685_vm3, %v10830_v50, 0.0 }
 0x586   : > { %v2906_v62 = vsub.f32 %v10537_v14, %v2772_v27  ;;  %3146 = vadd.xlane.f32.xlu0 %v3145_v19 }
 0x588   : > { %v10832_v33 = vpop.eup %9197  ;;  %v2998_v39 = vmul.f32 1.442695, %v2906_v62  ;;  %v2781_v42 = vpop.xlane.xlu1 %2780 }
 0x589   : > { %v10834_v49 = vpop.xlane.xlu0 %2795  ;;  %v2909_v18 = vsub.f32 %v10547_v60, %v2781_v42  ;;  %v3166_v14 = vsel %vm2685_vm3, %v10832_v33, 0.0  ;;  %v10841_v56 = vpop.eup %9199  ;;  %v2911_v42 = vsub.f32 %v10497_v37, %v10790_v47 }
 0x58a   : > { %13417 = vst [vmem:[#allocation50_spill] sm:$0xff] %v10841_v56  ;;  %3143 = vadd.xlane.f32.xlu0 %v3142_v3  ;;  %3167 = vadd.xlane.f32.xlu1 %v3166_v14  ;;  %9205 = vpow2.f32 %v2998_v39  ;;  %v3151_v60 = vsel %vm2685_vm3, %v10841_v56, 0.0 }
 0x58b   : > { %v3004_v55 = vmul.f32 1.442695, %v2909_v18 }
 0x58c   : > { %v10843_v27 = vpop.xlane.xlu1 %2804  ;;  %v10848_v19 = vpop.eup %9201 }
 0x58d   : > { %v2778_v52 = vpop.xlane.xlu0 %2777  ;;  %13418 = vst [vmem:[#allocation55_spill] sm:$0xff] %v10848_v19  ;;  %9207 = vpow2.f32 %v3004_v55  ;;  %v3148_v39 = vsel %vm2685_vm3, %v10848_v19, 0.0 }
 0x58e   : > { %v2908_v62 = vsub.f32 %v10549_v15, %v2778_v52  ;;  %3152 = vadd.xlane.f32.xlu0 %v3151_v60  ;;  %v2912_v15 = vsub.f32 %v10511_v38, %v2790_v16  ;;  %v3008_v52 = vmul.f32 1.442695, %v2911_v42  ;;  %v2913_v38 = vsub.f32 %v10507_v54, %v10811_v12 }
 0x58f   : > { %v10856_v18 = vpop.eup %9203 }
 0x590   : > { %v3002_v2 = vmul.f32 1.442695, %v2908_v62  ;;  %v2811_v3 = vpop.xlane.xlu1 %2810  ;;  %v3157_v55 = vsel %vm2685_vm3, %v10856_v18, 0.0  ;;  %v3010_v19 = vmul.f32 1.442695, %v2912_v15 }
 0x591   : > { %v10852_v14 = vpop.xlane.xlu0 %2801  ;;  %v2919_v60 = vsub.f32 %v10589_v9, %v2811_v3  ;;  %v3012_v3 = vmul.f32 1.442695, %v2913_v38 }
 0x592   : > { %3149 = vadd.xlane.f32.xlu0 %v3148_v39  ;;  %9209 = vpow2.f32 %v3002_v2 }
 0x593   : > { %9211 = vpow2.f32 %v3008_v52  ;;  %v3024_v2 = vmul.f32 1.442695, %v2919_v60 }
 0x594   : > { %v10860_v56 = vpop.xlane.xlu1 %2834  ;;  %v10865_v62 = vpop.eup %9205 }
 0x595   : > { %v2808_v37 = vpop.xlane.xlu0 %2807  ;;  %v3154_v42 = vsel %vm2685_vm3, %v10865_v62, 0.0 }
 0x596   : > { %v2918_v47 = vsub.f32 %v10593_v57, %v2808_v37  ;;  %3158 = vadd.xlane.f32.xlu0 %v3157_v55 }
 0x597   : > { %v10873_v57 = vpop.eup %9207 }
 0x598   : > { %v3022_v17 = vmul.f32 1.442695, %v2918_v47  ;;  %v2817_v16 = vpop.xlane.xlu1 %2816  ;;  %v3163_v54 = vsel %vm2685_vm3, %v10873_v57, 0.0 }
 0x599   : > { %v10869_v9 = vpop.xlane.xlu0 %2831  ;;  %v2921_v39 = vsub.f32 %v10603_v4, %v2817_v16 }
 0x59a   : > { %9213 = vpow2.f32 %v3022_v17  ;;  %3155 = vadd.xlane.f32.xlu0 %v3154_v42 }
 0x59b   : > { %9215 = vpow2.f32 %v3010_v19  ;;  %v3028_v60 = vmul.f32 1.442695, %v2921_v39 }
 0x59c   : > { %9217 = vpow2.f32 %v3024_v2  ;;  %v10880_v12 = vpop.eup %9209  ;;  %v10882_v52 = vpop.xlane.xlu1 %2837 }
 0x59d   : > { %v10876_v15 = vpop.xlane.xlu0 %2840  ;;  %9219 = vpow2.f32 %v3012_v3  ;;  %v3160_v19 = vsel %vm2685_vm3, %v10880_v12, 0.0  ;;  %v10887_v47 = vpop.eup %9211 }
 0x59e   : > { %3164 = vadd.xlane.f32.xlu0 %v3163_v54  ;;  %9221 = vpow2.f32 %v3028_v60  ;;  %v3169_v42 = vsel %vm2685_vm3, %v10887_v47, 0.0 }
 0x5a0   : > { %v10891_v38 = vpop.xlane.xlu1 %2822 }
 0x5a1   : > { %v2814_v37 = vpop.xlane.xlu0 %2813 }
 0x5a2   : > { %v2920_v17 = vsub.f32 %v10607_v25, %v2814_v37  ;;  %3161 = vadd.xlane.f32.xlu0 %v3160_v19 }
 0x5a4   : > { %v3026_v4 = vmul.f32 1.442695, %v2920_v17  ;;  %v10889_v55 = vpop.eup %9213  ;;  %v10909_v37 = vpop.xlane.xlu1 %2843 }
 0x5a5   : > { %v10893_v2 = vpop.eup %9215  ;;  %v10895_v16 = vpop.xlane.xlu0 %2846  ;;  %v3190_v25 = vsel %vm2685_vm3, %v10889_v55, 0.0  ;;  %13422 = vst [vmem:[#allocation29_spill] sm:$0xff] %v10909_v37 }
 0x5a6   : > { %13419 = vst [vmem:[#allocation49_spill] sm:$0xff] %v10893_v2  ;;  %13420 = vst [vmem:[#allocation18_spill] sm:$0xff] %v10895_v16  ;;  %v10901_v3 = vpop.eup %9217  ;;  %9223 = vpow2.f32 %v3026_v4  ;;  %3170 = vadd.xlane.f32.xlu0 %v3169_v42  ;;  %3191 = vadd.xlane.f32.xlu1 %v3190_v25  ;;  %v3172_v54 = vsel %vm2685_vm3, %v10893_v2, 0.0 }
 0x5a7   : > { %v3193_v39 = vsel %vm2685_vm3, %v10901_v3, 0.0  ;;  %v10907_v60 = vpop.eup %9219 }
 0x5a8   : > { %13421 = vst [vmem:[#allocation14_spill] sm:$0xff] %v10907_v60  ;;  %v3175_v19 = vsel %vm2685_vm3, %v10907_v60, 0.0  ;;  %v10915_v4 = vpop.eup %9221 }
 0x5a9   : > { %v10911_v17 = vpop.xlane.xlu0 %2819  ;;  %v3199_v2 = vsel %vm2685_vm3, %v10915_v4, 0.0 }
 0x5aa   : > { %3194 = vadd.xlane.f32.xlu0 %v3193_v39  ;;  %3173 = vadd.xlane.f32.xlu1 %v3172_v54 }
 0x5ae   : > { %v3075_v42 = vpop.xlane.xlu1 %3074  ;;  %3176 = vadd.xlane.f32.xlu0 %v3175_v19 }
 0x5af   : > { %9225 = vrcp.f32 %v3075_v42  ;;  %v3072_v25 = vpop.xlane.xlu0 %3071 }
 0x5b0   : > { %v10917_v6 = vpop.eup %9223  ;;  %9227 = vrcp.f32 %v3072_v25 }
 0x5b1   : > { %v3196_v39 = vsel %vm2685_vm3, %v10917_v6, 0.0 }
 0x5b2   : > { %v10923_v54 = vpop.xlane.xlu1 %2828  ;;  %3200 = vadd.xlane.f32.xlu0 %v3199_v2  ;;  %3197 = vadd.xlane.f32.xlu1 %v3196_v39 }
 0x5b3   : > { %v10927_v28 = vpop.xlane.xlu0 %2852 }
 0x5b4   : > { %13423 = vst [vmem:[#allocation25_spill] sm:$0xff] %v10927_v28 }
 0x5b6   : > { %v3081_v19 = vpop.xlane.xlu1 %3080 }
 0x5b7   : > { %v10929_v42 = vpop.xlane.xlu0 %2825  ;;  %9229 = vrcp.f32 %v3081_v19 }
 0x5b9   : > { %v9226_v7 = vpop.eup %9225 }
 0x5ba   : > { %v9228_v25 = vpop.eup %9227  ;;  %v3265_v16 = vmul.f32 %v9226_v7, %v10656_v5  ;;  %v10932_v36 = vpop.xlane.xlu1 %2858  ;;  %v13427_v7 = vmov 0.0|0.0  }
 0x5bb   : > { %v3263_v37 = vmul.f32 %v9228_v25, %v10659_v51  ;;  %v10937_v39 = vpop.xlane.xlu0 %2849 }
 0x5bc   : > { %13424 = vst [vmem:[#allocation43_spill] sm:$0xff] %v10937_v39 }
 0x5bd   : > { %v8922_v28 = vpack.c.bf16 %v3265_v16, %v3263_v37 }
 0x5be   : > { %v3084_v25 = vpop.xlane.xlu1 %3083 }
 0x5bf   : > { %8924 = vmatpush3.bf16.xpose.msk.msra.mxu1 %vm10941_vm4, %v8922_v28  ;;  %v3078_v5 = vpop.xlane.xlu0 %3077 }
 0x5c0   : > { %8925 = vmatprep.subr.bf16.mxu1 %v13427_v7  ;;  %9231 = vrcp.f32 %v3078_v5 }
 0x5c1   : > { %9233 = vrcp.f32 %v3084_v25  ;;  %v9230_v28 = vpop.eup %9229 }
 0x5c2   : > { %v3269_v19 = vmul.f32 %v9230_v28, %v10672_v1  ;;  %v2914_v28 = vsub.f32 %v10523_v11, %v10834_v49 }
 0x5c3   : > { %1339 = vrot.lane.b32.xlu1 %v9773_v23, %s9470_s28  ;;  %v10950_v51 = vpop.xlane.xlu0 %2855 }
 0x5c7   : > { %1341 = vrot.lane.b32.xlu1 %v13323_v24, %s9470_s28  ;;  %v3087_v2 = vpop.xlane.xlu0 %3086 }
 0x5c8   : > { %1363 = vrot.lane.b32.xlu0 %v9773_v23, %s9467_s25  ;;  %9235 = vrcp.f32 %v3087_v2  ;;  %v3090_v2 = vpop.xlane.xlu1 %3089 }
 0x5c9   : > { %9237 = vrcp.f32 %v3090_v2 }
 0x5ca   : > { %v9232_v37 = vpop.eup %9231 }
 0x5cb   : > { %1365 = vrot.lane.b32.xlu1 %v13323_v24, %s9467_s25  ;;  %v10958_v16 = vpop.xlane.xlu0 %2864  ;;  %v3267_v5 = vmul.f32 %v9232_v37, %v10696_v44  ;;  %v9234_v23 = vpop.eup %9233 }
 0x5cc   : > { %13428 = vst [vmem:[#allocation37_spill] sm:$0xff] %v10958_v16  ;;  %1343 = vrot.lane.b32.xlu0 %v13328_v40, %s9470_s28  ;;  %v3271_v1 = vmul.f32 %v9234_v23, %v10690_v21  ;;  %v13429_v23 = vld [vmem:[#allocation54_spill] sm:$0xff] }
 0x5cd   : > { %v8926_v25 = vpack.c.bf16 %v3269_v19, %v3267_v5  ;;  %v3014_v19 = vmul.f32 1.442695, %v2914_v28  ;;  %v2922_v5 = vsub.f32 %v10621_v22, %v10911_v17  ;;  %v2915_v21 = vsub.f32 %v13429_v23, %v10825_v0 }
 0x5cf   : > { %1367 = vrot.lane.b32.xlu1 %v13328_v40, %s9467_s25  ;;  %v10966_v39 = vpop.xlane.xlu0 %2861  ;;  %8928 = vmatpush3.bf16.xpose.msk.msra.mxu1 %vm10941_vm4, %v8926_v25  ;;  %v3030_v11 = vmul.f32 1.442695, %v2922_v5  ;;  %v3016_v22 = vmul.f32 1.442695, %v2915_v21 }
 0x5d0   : > { %8929 = vmatprep.subr.bf16.mxu1 %v13427_v7 }
 0x5d2   : > { %v9236_v24 = vpop.eup %9235 }
 0x5d3   : > { %v3093_v16 = vpop.xlane.xlu0 %3092  ;;  %v3273_v44 = vmul.f32 %v9236_v24, %v10711_v26  ;;  %v9238_v26 = vpop.eup %9237  ;;  %v2923_v24 = vsub.f32 %v10617_v10, %v10891_v38 }
 0x5d4   : > { %9239 = vrcp.f32 %v3093_v16  ;;  %v3275_v17 = vmul.f32 %v9238_v26, %v10703_v35 }
 0x5d5   : > { %v8930_v37 = vpack.c.bf16 %v3273_v44, %v3271_v1  ;;  %9241 = vpow2.f32 %v3014_v19  ;;  %v3032_v1 = vmul.f32 1.442695, %v2923_v24 }
 0x5d6   : > { %9243 = vpow2.f32 %v3030_v11 }
 0x5d7   : > { %8932 = vmatpush3.bf16.xpose.msk.msra.mxu1 %vm10941_vm4, %v8930_v37  ;;  %v10979_v25 = vpop.xlane.xlu0 %2870  ;;  %9245 = vpow2.f32 %v3016_v22 }
 0x5d8   : > { %8933 = vmatprep.subr.bf16.mxu1 %v13427_v7  ;;  %9247 = vpow2.f32 %v3032_v1 }
 0x5db   : > { %v10986_v16 = vpop.xlane.xlu0 %2867 }
 0x5de   : > { %v9240_v49 = vpop.eup %9239 }
 0x5df   : > { %v3277_v2 = vmul.f32 %v9240_v49, %v10721_v30  ;;  %v10992_v0 = vpop.xlane.xlu0 %2876  ;;  %v10995_v10 = vpop.eup %9241 }
 0x5e0   : > { %v3178_v38 = vsel %vm2685_vm3, %v10995_v10, 0.0  ;;  %v10999_v35 = vpop.eup %9243 }
 0x5e1   : > { %v8934_v44 = vpack.c.bf16 %v3277_v2, %v3275_v17  ;;  %v11003_v28 = vpop.eup %9245  ;;  %v3202_v37 = vsel %vm2685_vm3, %v10999_v35, 0.0 }
 0x5e2   : > { %v11007_v19 = vpop.eup %9247  ;;  %v3181_v21 = vsel %vm2685_vm3, %v11003_v28, 0.0 }
 0x5e3   : > { %8936 = vmatpush3.bf16.xpose.msk.msra.mxu1 %vm10941_vm4, %v8934_v44  ;;  %v11001_v30 = vpop.xlane.xlu0 %2873  ;;  %v3205_v26 = vsel %vm2685_vm3, %v11007_v19, 0.0 }
 0x5e4   : > { %8953 = vmatprep.subr.bf16.mxu1 %v13427_v7 }
 0x5ea   : > { %v11009_v5 = vpop.xlane.xlu0 %3122 }
 0x5eb   : > { %3179 = vadd.xlane.f32.xlu0 %v3178_v38 }
 0x5ee   : > { %v3099_v23 = vpop.xlane.xlu1 %3098 }
 0x5ef   : > { %3203 = vadd.xlane.f32.xlu0 %v3202_v37  ;;  %9249 = vrcp.f32 %v3099_v23 }
 0x5f2   : > { %v3096_v24 = vpop.xlane.xlu0 %3095 }
 0x5f3   : > { %3182 = vadd.xlane.f32.xlu1 %v3181_v21  ;;  %3206 = vadd.xlane.f32.xlu0 %v3205_v26  ;;  %9251 = vrcp.f32 %v3096_v24 }
 0x5f6   : > { %v11017_v49 = vpop.xlane.xlu0 %3128 }
 0x5f7   : > { %v11015_v11 = vpop.xlane.xlu1 %3119  ;;  %13430 = vst [vmem:[#allocation57_spill] sm:$0xff] %v11017_v49  ;;  %v13432_v49 = vld [vmem:[#allocation4_spill] sm:$0xff] }
 0x5f9   : > { %v9250_v2 = vpop.eup %9249 }
 0x5fa   : > { %v3102_v17 = vpop.xlane.xlu0 %3101  ;;  %v3281_v44 = vmul.f32 %v9250_v2, %v10744_v48 }
 0x5fb   : > { %v3105_v22 = vpop.xlane.xlu1 %3104 }
 0x5fc   : > { %9253 = vrcp.f32 %v3105_v22 }
 0x5fd   : > { %9255 = vrcp.f32 %v3102_v17  ;;  %v9252_v1 = vpop.eup %9251 }
 0x5fe   : > { %v3279_v38 = vmul.f32 %v9252_v1, %v10751_v20 }
 0x5ff   : > { %v3135_v37 = vpop.xlane.xlu1 %3134  ;;  %v11021_v23 = vpop.xlane.xlu0 %3125 }
 0x600   : > { %13431 = vst [vmem:[#allocation51_spill] sm:$0xff] %v11021_v23  ;;  %v8938_v21 = vpack.c.bf16 %v3281_v44, %v3279_v38  ;;  %v13433_v44 = vld [vmem:[#allocation7_spill] sm:$0xff] }
 0x602   : > { %8940 = vmatpush3.bf16.xpose.msk.msra.mxu0 %vm10941_vm4, %v8938_v21 }
 0x603   : > { %v3108_v26 = vpop.xlane.xlu1 %3107  ;;  %v3111_v24 = vpop.xlane.xlu0 %3110  ;;  %8941 = vmatprep.subr.bf16.mxu0 %v13427_v7 }
 0x604   : > { %9257 = vrcp.f32 %v3108_v26  ;;  %1345 = vrot.lane.b32.xlu1 %v13432_v49, %s9470_s28 }
 0x605   : > { %9259 = vrcp.f32 %v3111_v24 }
 0x606   : > { %v9254_v22 = vpop.eup %9253  ;;  %9261 = vrcp.f32 %v3135_v37 }
 0x607   : > { %v9256_v48 = vpop.eup %9255  ;;  %v3285_v20 = vmul.f32 %v9254_v22, %v10767_v29  ;;  %v3141_v17 = vpop.xlane.xlu1 %3140  ;;  %v13434_v29 = vld [vmem:[#allocation6_spill] sm:$0xff] }
 0x608   : > { %v3132_v2 = vpop.xlane.xlu0 %3131  ;;  %v3283_v1 = vmul.f32 %v9256_v48, %v10769_v13  ;;  %1347 = vrot.lane.b32.xlu1 %v13433_v44, %s9470_s28 }
 0x609   : > { %9263 = vrcp.f32 %v3132_v2  ;;  %1369 = vrot.lane.b32.xlu0 %v13432_v49, %s9467_s25  ;;  %v13435_v2 = vld [vmem:[#allocation9_spill] sm:$0xff] }
 0x60a   : > { %v8942_v38 = vpack.c.bf16 %v3285_v20, %v3283_v1 }
 0x60b   : > { %v3114_v21 = vpop.xlane.xlu1 %3113 }
 0x60c   : > { %v3117_v26 = vpop.xlane.xlu0 %3116  ;;  %9265 = vrcp.f32 %v3114_v21  ;;  %8944 = vmatpush3.bf16.xpose.msk.msra.mxu0 %vm10941_vm4, %v8942_v38  ;;  %1371 = vrot.lane.b32.xlu1 %v13433_v44, %s9467_s25 }
 0x60d   : > { %9267 = vrcp.f32 %v3117_v26  ;;  %1349 = vrot.lane.b32.xlu0 %v13434_v29, %s9470_s28  ;;  %8945 = vmatprep.subr.bf16.mxu0 %v13427_v7 }
 0x60e   : > { %v9258_v13 = vpop.eup %9257  ;;  %9269 = vrcp.f32 %v3141_v17 }
 0x60f   : > { %v9260_v37 = vpop.eup %9259  ;;  %v3287_v24 = vmul.f32 %v9258_v13, %v10788_v41 }
 0x610   : > { %v3138_v22 = vpop.xlane.xlu0 %3137  ;;  %v3289_v48 = vmul.f32 %v9260_v37, %v10786_v59  ;;  %1373 = vrot.lane.b32.xlu1 %v13434_v29, %s9467_s25  ;;  %v9262_v20 = vpop.eup %9261 }
 0x611   : > { %9271 = vrcp.f32 %v3138_v22  ;;  %1351 = vrot.lane.b32.xlu0 %v13435_v2, %s9470_s28  ;;  %v11048_v26 = vmul.f32 %v9262_v20, %v10776_v46 }
 0x612   : > { %v8946_v1 = vpack.c.bf16 %v3289_v48, %v3287_v24  ;;  %v13436_v48 = vld [vmem:[#allocation52_spill] sm:$0xff] }
 0x613   : > { %v9264_v38 = vpop.eup %9263  ;;  %v2916_v20 = vsub.f32 %v13436_v48, %v10852_v14 }
 0x614   : > { %v3147_v21 = vpop.xlane.xlu0 %3146  ;;  %v11051_v17 = vmul.f32 %v9264_v38, %v10799_v34  ;;  %8948 = vmatpush3.bf16.xpose.msk.msra.mxu0 %vm10941_vm4, %v8946_v1  ;;  %1375 = vrot.lane.b32.xlu1 %v13435_v2, %s9467_s25 }
 0x615   : > { %8949 = vmatprep.subr.bf16.mxu0 %v13427_v7  ;;  %9273 = vrcp.f32 %v3147_v21  ;;  %v3018_v14 = vmul.f32 1.442695, %v2916_v20 }
 0x616   : > { %v9266_v59 = vpop.eup %9265 }
 0x617   : > { %v9268_v13 = vpop.eup %9267  ;;  %v3291_v37 = vmul.f32 %v9266_v59, %v10809_v32 }
 0x618   : > { %v3144_v46 = vpop.xlane.xlu0 %3143  ;;  %v9270_v24 = vpop.eup %9269  ;;  %v3293_v34 = vmul.f32 %v9268_v13, %v10807_v58  ;;  %v2924_v58 = vsub.f32 %v10635_v43, %v10929_v42 }
 0x619   : > { %9275 = vrcp.f32 %v3144_v46  ;;  %v11065_v38 = vmul.f32 %v9270_v24, %v10797_v61 }
 0x61a   : > { %v8950_v1 = vpack.c.bf16 %v3293_v34, %v3291_v37  ;;  %v3034_v13 = vmul.f32 1.442695, %v2924_v58  ;;  %9277 = vpow2.f32 %v3018_v14  ;;  %v13438_v34 = vsub.f32 %v10633_v8, %v10923_v54  ;;  %v3168_v54 = vpop.xlane.xlu1 %3167 }
 0x61b   : > { %v9272_v22 = vpop.eup %9271 }
 0x61c   : > { %v11068_v23 = vmul.f32 %v9272_v22, %v10818_v53  ;;  %v11070_v41 = vpop.xlane.xlu0 %3152  ;;  %8952 = vmatpush3.bf16.xpose.msk.msra.mxu0 %vm10941_vm4, %v8950_v1  ;;  %v13437_v53 = vld [vmem:[#allocation46_spill] sm:$0xff]  ;;  %9279 = vpow2.f32 %v3034_v13  ;;  %v3036_v22 = vmul.f32 1.442695, %v13438_v34 }
 0x61d   : > { %8969 = vmatprep.subr.bf16.mxu0 %v13427_v7  ;;  %v2917_v59 = vsub.f32 %v13437_v53, %v10843_v27 }
 0x61f   : > { %v9274_v61 = vpop.eup %9273  ;;  %v3020_v42 = vmul.f32 1.442695, %v2917_v59 }
 0x620   : > { %v11079_v21 = vpop.xlane.xlu0 %3149  ;;  %v11084_v24 = vmul.f32 %v9274_v61, %v10823_v63 }
 0x623   : > { %v9276_v37 = vpop.eup %9275 }
 0x624   : > { %v3159_v46 = vpop.xlane.xlu0 %3158  ;;  %v11087_v43 = vmul.f32 %v9276_v37, %v10830_v50  ;;  %v11094_v63 = vpop.eup %9277 }
 0x625   : > { %9281 = vrcp.f32 %v3159_v46  ;;  %v3184_v58 = vsel %vm2685_vm3, %v11094_v63, 0.0 }
 0x626   : > { %v11096_v50 = vpop.eup %9279 }
 0x627   : > { %v3208_v37 = vsel %vm2685_vm3, %v11096_v50, 0.0 }
 0x628   : > { %v3156_v48 = vpop.xlane.xlu0 %3155 }
 0x629   : > { %9283 = vrcp.f32 %v3156_v48 }
 0x62a   : > { %9285 = vpow2.f32 %v3020_v42 }
 0x62b   : > { %9287 = vpow2.f32 %v3036_v22 }
 0x62c   : > { %v3165_v20 = vpop.xlane.xlu0 %3164 }
 0x62d   : > { %9289 = vrcp.f32 %v3165_v20 }
 0x62f   : > { %v9282_v8 = vpop.eup %9281 }
 0x630   : > { %v3162_v1 = vpop.xlane.xlu0 %3161  ;;  %3185 = vadd.xlane.f32.xlu0 %v3184_v58  ;;  %v11103_v53 = vmul.f32 %v9282_v8, %v10856_v18 }
 0x631   : > { %9291 = vrcp.f32 %v3162_v1 }
 0x632   : > { %9293 = vrcp.f32 %v3168_v54 }
 0x633   : > { %v9284_v14 = vpop.eup %9283  ;;  %v3192_v42 = vpop.xlane.xlu1 %3191 }
 0x634   : > { %v11100_v61 = vpop.eup %9285  ;;  %v11106_v59 = vmul.f32 %v9284_v14, %v10865_v62  ;;  %v3171_v13 = vpop.xlane.xlu0 %3170  ;;  %3209 = vadd.xlane.f32.xlu0 %v3208_v37 }
 0x635   : > { %v11110_v46 = vpop.eup %9287  ;;  %9295 = vrcp.f32 %v3171_v13  ;;  %v3187_v18 = vsel %vm2685_vm3, %v11100_v61, 0.0 }
 0x636   : > { %9297 = vrcp.f32 %v3192_v42  ;;  %v3211_v62 = vsel %vm2685_vm3, %v11110_v46, 0.0 }
 0x637   : > { %v9290_v48 = vpop.eup %9289  ;;  %v11124_v8 = vpop.xlane.xlu1 %3173 }
 0x638   : > { %v3195_v22 = vpop.xlane.xlu0 %3194  ;;  %3188 = vadd.xlane.f32.xlu1 %v3187_v18  ;;  %3212 = vadd.xlane.f32.xlu0 %v3211_v62  ;;  %v11119_v1 = vmul.f32 %v9290_v48, %v10873_v57 }
 0x639   : > { %9299 = vrcp.f32 %v3195_v22 }
 0x63b   : > { %v9292_v20 = vpop.eup %9291 }
 0x63c   : > { %v11122_v58 = vmul.f32 %v9292_v20, %v10880_v12  ;;  %v11126_v54 = vpop.xlane.xlu0 %3176  ;;  %v9294_v14 = vpop.eup %9293 }
 0x63d   : > { %v11131_v22 = vmul.f32 %v9294_v14, %v10832_v33  ;;  %v13440_v14 = vld [vmem:[#allocation8_spill] sm:$0xff] }
 0x63f   : > { %v9296_v37 = vpop.eup %9295  ;;  %v3198_v42 = vpop.xlane.xlu1 %3197 }
 0x640   : > { %v3201_v18 = vpop.xlane.xlu0 %3200  ;;  %v11134_v57 = vmul.f32 %v9296_v37, %v10887_v47  ;;  %9301 = vrcp.f32 %v3198_v42  ;;  %v9298_v12 = vpop.eup %9297 }
 0x641   : > { %9303 = vrcp.f32 %v3201_v18  ;;  %v11139_v20 = vmul.f32 %v9298_v12, %v10889_v55  ;;  %v13447_v55 = vld [vmem:[#allocation34_spill] sm:$0xff] }
 0x643   : > { %v9300_v48 = vpop.eup %9299  ;;  %13439 = vst [vmem:[#allocation54_spill] sm:$0xff] %v11139_v20 }
 0x644   : > { %v11142_v13 = vmul.f32 %v9300_v48, %v10901_v3  ;;  %v13443_v3 = vld [vmem:[#allocation22_spill] sm:$0xff] }
 0x645   : > { %v2927_v12 = vsub.f32 %v13443_v3, %v10860_v56  ;;  %v13444_v48 = vld [vmem:[#allocation42_spill] sm:$0xff]  ;;  %v2929_v56 = vsub.f32 %v13447_v55, %v10876_v15  ;;  %v11179_v15 = vpop.permute.xlu1 %1339  ;;  %v11189_v55 = vpop.permute.xlu0 %1363 }
 0x646   : > { %v2926_v33 = vsub.f32 %v13444_v48, %v10869_v9  ;;  %v13448_v9 = vld [vmem:[#allocation37_spill] sm:$0xff] }
 0x647   : > { %v3040_v62 = vmul.f32 1.442695, %v2927_v12  ;;  %v3044_v48 = vmul.f32 1.442695, %v2929_v56 }
 0x648   : > { %v3038_v32 = vmul.f32 1.442695, %v2926_v33  ;;  %v13449_v33 = vld [vmem:[#allocation30_spill] sm:$0xff] }
 0x649   : > { %1353 = vrot.lane.b32.xlu1 %v13440_v14, %s9470_s28  ;;  %9305 = vpow2.f32 %v3040_v62  ;;  %v2937_v12 = vsub.f32 %v13449_v33, %v13448_v9  ;;  %v11203_v9 = vpop.permute.xlu0 %1343 }
 0x64a   : > { %v9302_v47 = vpop.eup %9301  ;;  %9307 = vpow2.f32 %v3038_v32 }
 0x64b   : > { %v9304_v37 = vpop.eup %9303  ;;  %v11149_v42 = vmul.f32 %v9302_v47, %v10917_v6  ;;  %v2934_v6 = vsub.f32 %v10667_v45, %v10950_v51  ;;  %v13450_v45 = vld [vmem:[#allocation13_spill] sm:$0xff] }
 0x64c   : > { %v11152_v18 = vmul.f32 %v9304_v37, %v10915_v4  ;;  %v13445_v4 = vld [vmem:[#allocation39_spill] sm:$0xff]  ;;  %v13446_v37 = vsub.f32 %v10663_v31, %v10932_v36  ;;  %v2936_v51 = vsub.f32 %v13450_v45, %v10966_v39 }
 0x64d   : > { %13441 = vst [vmem:[#allocation4_spill] sm:$0xff] %v11149_v42  ;;  %v2928_v47 = vsub.f32 %v13445_v4, %v10882_v52  ;;  %v3054_v3 = vmul.f32 1.442695, %v2934_v6  ;;  %v3060_v52 = vmul.f32 1.442695, %v2937_v12  ;;  %v11193_v4 = vpop.permute.xlu1 %1341 }
 0x64e   : > { %13442 = vst [vmem:[#allocation7_spill] sm:$0xff] %v11152_v18  ;;  %1377 = vrot.lane.b32.xlu0 %v13440_v14, %s9467_s25  ;;  %v3056_v34 = vmul.f32 1.442695, %v13446_v37  ;;  %v3058_v31 = vmul.f32 1.442695, %v2936_v51 }
 0x64f   : > { %v3042_v27 = vmul.f32 1.442695, %v2928_v47 }
 0x650   : > { %9309 = vpow2.f32 %v3056_v34 }
 0x651   : > { %9311 = vpow2.f32 %v3054_v3  ;;  %v11211_v45 = vpop.permute.xlu1 %1365 }
 0x652   : > { %9313 = vpow2.f32 %v3042_v27 }
 0x653   : > { %9315 = vpow2.f32 %v3044_v48  ;;  %v11175_v36 = vpop.eup %9305 }
 0x654   : > { %v11177_v32 = vpop.eup %9307  ;;  %9317 = vpow2.f32 %v3060_v52  ;;  %v3217_v39 = vsel %vm2685_vm3, %v11175_v36, 0.0 }
 0x655   : > { %9319 = vpow2.f32 %v3058_v31  ;;  %v3214_v62 = vsel %vm2685_vm3, %v11177_v32, 0.0 }
 0x65a   : > { %v11181_v34 = vpop.eup %9309 }
 0x65b   : > { %v11187_v27 = vpop.eup %9311  ;;  %v3241_v47 = vsel %vm2685_vm3, %v11181_v34, 0.0 }
 0x65c   : > { %v11191_v6 = vpop.eup %9313  ;;  %v3238_v37 = vsel %vm2685_vm3, %v11187_v27, 0.0 }
 0x65d   : > { %13451 = vst [vmem:[#allocation6_spill] sm:$0xff] %v11191_v6  ;;  %v11199_v56 = vpop.eup %9315  ;;  %v3220_v12 = vsel %vm2685_vm3, %v11191_v6, 0.0 }
 0x65e   : > { %13452 = vst [vmem:[#allocation9_spill] sm:$0xff] %v11199_v56  ;;  %v11201_v3 = vpop.eup %9317  ;;  %v3223_v33 = vsel %vm2685_vm3, %v11199_v56, 0.0  ;;  %v13455_v56 = vld [vmem:[#allocation3_spill] sm:$0xff] }
 0x65f   : > { %13453 = vst [vmem:[#allocation52_spill] sm:$0xff] %v11201_v3  ;;  %v11209_v48 = vpop.eup %9319  ;;  %v3247_v52 = vsel %vm2685_vm3, %v11201_v3, 0.0 }
 0x660   : > { %13454 = vst [vmem:[#allocation46_spill] sm:$0xff] %v11209_v48  ;;  %v3244_v31 = vsel %vm2685_vm3, %v11209_v48, 0.0 }
 0x66d   : > { %3215 = vadd.xlane.f32.xlu1 %v3214_v62  ;;  %3218 = vadd.xlane.f32.xlu0 %v3217_v39  ;;  %v11217_v62 = vpop.permute.xlu1 %1367 }
 0x671   : > { %3242 = vadd.xlane.f32.xlu0 %v3241_v47  ;;  %3239 = vadd.xlane.f32.xlu1 %v3238_v37 }
 0x675   : > { %3224 = vadd.xlane.f32.xlu0 %v3223_v33  ;;  %3221 = vadd.xlane.f32.xlu1 %v3220_v12 }
 0x678   : > { %v3180_v51 = vpop.xlane.xlu0 %3179 }
 0x679   : > { %3248 = vadd.xlane.f32.xlu0 %v3247_v52  ;;  %3245 = vadd.xlane.f32.xlu1 %v3244_v31  ;;  %9321 = vrcp.f32 %v3180_v51 }
 0x67c   : > { %v3204_v39 = vpop.xlane.xlu0 %3203 }
 0x67d   : > { %9323 = vrcp.f32 %v3204_v39  ;;  %v13460_v39 = vld [vmem:[#allocation2_spill] sm:$0xff] }
 0x680   : > { %v3183_v47 = vpop.xlane.xlu1 %3182  ;;  %v3207_v37 = vpop.xlane.xlu0 %3206 }
 0x681   : > { %9325 = vrcp.f32 %v3183_v47 }
 0x682   : > { %9327 = vrcp.f32 %v3207_v37 }
 0x683   : > { %v9322_v33 = vpop.eup %9321 }
 0x684   : > { %v11222_v48 = vmul.f32 %v9322_v33, %v10995_v10  ;;  %v13464_v33 = vld [vmem:[#allocation18_spill] sm:$0xff]  ;;  %v13466_v10 = vld [vmem:[#allocation23_spill] sm:$0xff]  ;;  %v11255_v42 = vpop.permute.xlu1 %1345 }
 0x686   : > { %13456 = vst [vmem:[#allocation8_spill] sm:$0xff] %v11222_v48 }
 0x687   : > { %v9324_v12 = vpop.eup %9323 }
 0x688   : > { %v11228_v51 = vmul.f32 %v9324_v12, %v10999_v35  ;;  %v13461_v35 = vld [vmem:[#allocation29_spill] sm:$0xff] }
 0x689   : > { %v13465_v12 = vld [vmem:[#allocation33_spill] sm:$0xff] }
 0x68a   : > { %1387 = vrot.lane.b32.xlu1 %v13455_v56, %s9469_s27  ;;  %13458 = vst [vmem:[#allocation42_spill] sm:$0xff] %v11228_v51  ;;  %v2931_v47 = vsub.f32 %v13465_v12, %v13464_v33  ;;  %v2939_v51 = vsub.f32 %v13466_v10, %v10979_v25 }
 0x68b   : > { %v9326_v3 = vpop.eup %9325 }
 0x68c   : > { %v9328_v6 = vpop.eup %9327  ;;  %v11225_v52 = vmul.f32 %v9326_v3, %v11003_v28  ;;  %v13462_v28 = vld [vmem:[#allocation53_spill] sm:$0xff]  ;;  %v13463_v3 = vld [vmem:[#allocation27_spill] sm:$0xff]  ;;  %v3048_v48 = vmul.f32 1.442695, %v2931_v47 }
 0x68d   : > { %v11231_v31 = vmul.f32 %v9328_v6, %v11007_v19  ;;  %v2930_v19 = vsub.f32 %v13462_v28, %v13461_v35  ;;  %v2938_v37 = vsub.f32 %v13463_v3, %v10986_v16  ;;  %v11257_v35 = vpop.permute.xlu0 %1369  ;;  %v11261_v16 = vpop.permute.xlu1 %1347 }
 0x68e   : > { %13457 = vst [vmem:[#allocation22_spill] sm:$0xff] %v11225_v52  ;;  %1389 = vrot.lane.b32.xlu1 %v13460_v39, %s9469_s27  ;;  %v3064_v52 = vmul.f32 1.442695, %v2939_v51 }
 0x68f   : > { %13459 = vst [vmem:[#allocation39_spill] sm:$0xff] %v11231_v31  ;;  %1411 = vrot.lane.b32.xlu0 %v13455_v56, %s9471_s16  ;;  %v3046_v6 = vmul.f32 1.442695, %v2930_v19  ;;  %v3062_v31 = vmul.f32 1.442695, %v2938_v37 }
 0x691   : > { %9329 = vpow2.f32 %v3046_v6  ;;  %v11267_v25 = vpop.permute.xlu0 %1349 }
 0x692   : > { %1413 = vrot.lane.b32.xlu1 %v13460_v39, %s9471_s16  ;;  %9331 = vpow2.f32 %v3062_v31  ;;  %v11271_v31 = vpop.permute.xlu1 %1371 }
 0x693   : > { %1391 = vrot.lane.b32.xlu0 %v13328_v40, %s9469_s27  ;;  %9333 = vpow2.f32 %v3048_v48 }
 0x694   : > { %9335 = vpow2.f32 %v3064_v52 }
 0x695   : > { %v11277_v47 = vpop.permute.xlu0 %1351 }
 0x696   : > { %1415 = vrot.lane.b32.xlu1 %v13328_v40, %s9471_s16  ;;  %v11283_v37 = vpop.permute.xlu1 %1373 }
 0x69a   : > { %v11285_v12 = vpop.permute.xlu1 %1375 }
 0x69b   : > { %v11259_v28 = vpop.eup %9329 }
 0x69c   : > { %13467 = vst [vmem:[#allocation34_spill] sm:$0xff] %v11259_v28  ;;  %v3226_v19 = vsel %vm2685_vm3, %v11259_v28, 0.0  ;;  %v11265_v6 = vpop.eup %9331 }
 0x69d   : > { %13468 = vst [vmem:[#allocation37_spill] sm:$0xff] %v11265_v6  ;;  %v11269_v51 = vpop.eup %9333  ;;  %v3250_v48 = vsel %vm2685_vm3, %v11265_v6, 0.0 }
 0x69e   : > { %13469 = vst [vmem:[#allocation30_spill] sm:$0xff] %v11269_v51  ;;  %v11275_v52 = vpop.eup %9335  ;;  %v3229_v10 = vsel %vm2685_vm3, %v11269_v51, 0.0 }
 0x69f   : > { %13470 = vst [vmem:[#allocation13_spill] sm:$0xff] %v11275_v52  ;;  %v3253_v3 = vsel %vm2685_vm3, %v11275_v52, 0.0  ;;  %v13479_v52 = vld [vmem:[#allocation19_spill] sm:$0xff] }
 0x6b2   : > { %3227 = vadd.xlane.f32.xlu0 %v3226_v19 }
 0x6b6   : > { %3251 = vadd.xlane.f32.xlu0 %v3250_v48 }
 0x6ba   : > { %3230 = vadd.xlane.f32.xlu1 %v3229_v10  ;;  %3254 = vadd.xlane.f32.xlu0 %v3253_v3 }
 0x6bd   : > { %v3186_v33 = vpop.xlane.xlu0 %3185 }
 0x6be   : > { %9337 = vrcp.f32 %v3186_v33 }
 0x6c1   : > { %v3210_v19 = vpop.xlane.xlu0 %3209 }
 0x6c2   : > { %9339 = vrcp.f32 %v3210_v19 }
 0x6c5   : > { %v3189_v6 = vpop.xlane.xlu1 %3188  ;;  %v3213_v48 = vpop.xlane.xlu0 %3212 }
 0x6c6   : > { %9341 = vrcp.f32 %v3189_v6 }
 0x6c7   : > { %9343 = vrcp.f32 %v3213_v48 }
 0x6c8   : > { %v9338_v28 = vpop.eup %9337 }
 0x6c9   : > { %v11294_v33 = vmul.f32 %v9338_v28, %v11094_v63  ;;  %v13480_v63 = vld [vmem:[#allocation44_spill] sm:$0xff] }
 0x6cb   : > { %1393 = vrot.lane.b32.xlu1 %v13432_v49, %s9469_s27  ;;  %13471 = vst [vmem:[#allocation3_spill] sm:$0xff] %v11294_v33 }
 0x6cc   : > { %v9340_v51 = vpop.eup %9339 }
 0x6cd   : > { %v11300_v6 = vmul.f32 %v9340_v51, %v11096_v50  ;;  %v13475_v50 = vld [vmem:[#allocation43_spill] sm:$0xff]  ;;  %v13477_v51 = vld [vmem:[#allocation24_spill] sm:$0xff] }
 0x6cf   : > { %1395 = vrot.lane.b32.xlu1 %v13433_v44, %s9469_s27  ;;  %13473 = vst [vmem:[#allocation29_spill] sm:$0xff] %v11300_v6  ;;  %v2941_v6 = vsub.f32 %v13480_v63, %v10992_v0 }
 0x6d0   : > { %v9342_v10 = vpop.eup %9341  ;;  %1417 = vrot.lane.b32.xlu0 %v13432_v49, %s9471_s16 }
 0x6d1   : > { %v9344_v3 = vpop.eup %9343  ;;  %v11297_v19 = vmul.f32 %v9342_v10, %v11100_v61  ;;  %v13476_v61 = vld [vmem:[#allocation47_spill] sm:$0xff]  ;;  %v2940_v10 = vsub.f32 %v13477_v51, %v11001_v30  ;;  %v3068_v18 = vmul.f32 1.442695, %v2941_v6 }
 0x6d2   : > { %v11303_v48 = vmul.f32 %v9344_v3, %v11110_v46  ;;  %v2932_v46 = vsub.f32 %v13476_v61, %v13475_v50  ;;  %v13478_v3 = vld [vmem:[#allocation25_spill] sm:$0xff]  ;;  %v11329_v50 = vpop.permute.xlu1 %1353  ;;  %v11331_v61 = vpop.permute.xlu0 %1377 }
 0x6d3   : > { %13472 = vst [vmem:[#allocation2_spill] sm:$0xff] %v11297_v19  ;;  %1419 = vrot.lane.b32.xlu1 %v13433_v44, %s9471_s16  ;;  %v2933_v33 = vsub.f32 %v13479_v52, %v13478_v3 }
 0x6d4   : > { %13474 = vst [vmem:[#allocation53_spill] sm:$0xff] %v11303_v48  ;;  %1397 = vrot.lane.b32.xlu0 %v13434_v29, %s9469_s27  ;;  %v3050_v28 = vmul.f32 1.442695, %v2932_v46  ;;  %v3066_v48 = vmul.f32 1.442695, %v2940_v10 }
 0x6d5   : > { %v3052_v19 = vmul.f32 1.442695, %v2933_v33 }
 0x6d6   : > { %9345 = vpow2.f32 %v3050_v28 }
 0x6d7   : > { %1421 = vrot.lane.b32.xlu1 %v13434_v29, %s9471_s16  ;;  %9347 = vpow2.f32 %v3066_v48 }
 0x6d8   : > { %1399 = vrot.lane.b32.xlu0 %v13435_v2, %s9469_s27  ;;  %9349 = vpow2.f32 %v3052_v19 }
 0x6d9   : > { %9351 = vpow2.f32 %v3068_v18 }
 0x6db   : > { %1423 = vrot.lane.b32.xlu1 %v13435_v2, %s9471_s16 }
 0x6e0   : > { %v11327_v20 = vpop.eup %9345 }
 0x6e1   : > { %v3232_v30 = vsel %vm2685_vm3, %v11327_v20, 0.0  ;;  %v11335_v52 = vpop.eup %9347 }
 0x6e2   : > { %13481 = vst [vmem:[#allocation27_spill] sm:$0xff] %v11335_v52  ;;  %v11337_v46 = vpop.eup %9349  ;;  %v3256_v19 = vsel %vm2685_vm3, %v11335_v52, 0.0 }
 0x6e3   : > { %v11341_v18 = vpop.eup %9351  ;;  %v3235_v63 = vsel %vm2685_vm3, %v11337_v46, 0.0 }
 0x6e4   : > { %v3259_v28 = vsel %vm2685_vm3, %v11341_v18, 0.0 }
 0x6f7   : > { %3233 = vadd.xlane.f32.xlu0 %v3232_v30 }
 0x6fa   : > { %v3216_v0 = vpop.xlane.xlu1 %3215  ;;  %v3219_v33 = vpop.xlane.xlu0 %3218 }
 0x6fb   : > { %9353 = vrcp.f32 %v3216_v0  ;;  %3257 = vadd.xlane.f32.xlu0 %v3256_v19 }
 0x6fc   : > { %9355 = vrcp.f32 %v3219_v33 }
 0x6fe   : > { %v3240_v6 = vpop.xlane.xlu1 %3239  ;;  %v3243_v48 = vpop.xlane.xlu0 %3242 }
 0x6ff   : > { %9357 = vrcp.f32 %v3240_v6  ;;  %3236 = vadd.xlane.f32.xlu1 %v3235_v63  ;;  %3260 = vadd.xlane.f32.xlu0 %v3259_v28  ;;  %v13485_v63 = vld [vmem:[#allocation62_spill] sm:$0xff]  ;;  %v13486_v28 = vld [vmem:[#allocation60_spill] sm:$0xff] }
 0x700   : > { %9359 = vrcp.f32 %v3243_v48 }
 0x701   : > { %9361 = vrcp.f32 %v11015_v11 }
 0x702   : > { %9363 = vrcp.f32 %v11009_v5 }
 0x705   : > { %v9354_v51 = vpop.eup %9353 }
 0x706   : > { %v9356_v10 = vpop.eup %9355  ;;  %v11348_v3 = vmul.f32 %v9354_v51, %v11177_v32  ;;  %v13482_v32 = vld [vmem:[#allocation59_spill] sm:$0xff]  ;;  %v13491_v51 = vld [vmem:[#allocation45_spill] sm:$0xff] }
 0x707   : > { %v11351_v30 = vmul.f32 %v9356_v10, %v11175_v36  ;;  %v9474_v36 = vmov 0.0   ;;  %v13493_v10 = vld [vmem:[#allocation11_spill] sm:$0xff] }
 0x708   : > { %8677 = vmatprep.mubr.msk.f32.mxu1 %vm9473_vm5, %v9474_v36  ;;  %8696 = vmatprep.mubr.msk.f32.mxu0 %vm9473_vm5, %v9474_v36 }
 0x709   : > { %v9358_v0 = vpop.eup %9357  ;;  %v9018_v33 = vpack.c.bf16 %v11351_v30, %v11348_v3  ;;  %v13542_v3 = vld [vmem:[#allocation52_spill] sm:$0xff] }
 0x70a   : > { %v9360_v19 = vpop.eup %9359  ;;  %v11356_v52 = vmul.f32 %v9358_v0, %v11187_v27  ;;  %v13484_v27 = vld [vmem:[#allocation63_spill] sm:$0xff]  ;;  %v13495_v0 = vld [vmem:[#allocation17_spill] sm:$0xff] }
 0x70b   : > { %v11359_v6 = vmul.f32 %v9360_v19, %v11181_v34  ;;  %v13483_v34 = vld [vmem:[#allocation61_spill] sm:$0xff]  ;;  %v13497_v19 = vld [vmem:[#allocation15_spill] sm:$0xff] }
 0x70d   : > { %v9034_v48 = vpack.c.bf16 %v11359_v6, %v11356_v52 }
 0x710   : > { %1401 = vrot.lane.b32.xlu1 %v13440_v14, %s9469_s27 }
 0x715   : > { %1425 = vrot.lane.b32.xlu0 %v13440_v14, %s9471_s16 }
 0x733   : > { %3390 = vxpose.xlu0.b32.start [1/8] (short) (narrow) %v13455_v56, 8  ;;  %v13487_v56 = vld [vmem:[#allocation64_spill] sm:$0xff] }
 0x737   : > { %3391 = vxpose.xlu0.b32.cont [2/8] (short) (narrow) %v13460_v39, 8  ;;  %v13489_v39 = vld [vmem:[#allocation31_spill] sm:$0xff] }
 0x739   : > { %3422 = vxpose.xlu1.b32.start [1/8] (short) (narrow) %v13482_v32, 8  ;;  %v11397_v32 = vpop.xlane.xlu0 %3224 }
 0x73b   : > { %3392 = vxpose.xlu0.b32.cont [3/8] (short) (narrow) %v13328_v40, 8  ;;  %v13488_v40 = vld [vmem:[#allocation40_spill] sm:$0xff] }
 0x73d   : > { %3423 = vxpose.xlu1.b32.cont [2/8] (short) (narrow) %v13483_v34, 8  ;;  %v13498_v34 = vld [vmem:[#allocation10_spill] sm:$0xff] }
 0x73f   : > { %3393 = vxpose.xlu0.b32.cont [4/8] (short) (narrow) %v13432_v49, 8  ;;  %v13490_v49 = vld [vmem:[#allocation20_spill] sm:$0xff] }
 0x741   : > { %3424 = vxpose.xlu1.b32.cont [3/8] (short) (narrow) %v13484_v27, 8  ;;  %v13499_v27 = vld [vmem:[#allocation21_spill] sm:$0xff] }
 0x743   : > { %3394 = vxpose.xlu0.b32.cont [5/8] (short) (narrow) %v13433_v44, 8  ;;  %v13492_v44 = vld [vmem:[#allocation32_spill] sm:$0xff] }
 0x745   : > { %3425 = vxpose.xlu1.b32.cont [4/8] (short) (narrow) %v13485_v63, 8  ;;  %v13500_v63 = vld [vmem:[#allocation28_spill] sm:$0xff] }
 0x747   : > { %3395 = vxpose.xlu0.b32.cont [6/8] (short) (narrow) %v13434_v29, 8  ;;  %v13494_v29 = vld [vmem:[#allocation38_spill] sm:$0xff] }
 0x749   : > { %3426 = vxpose.xlu1.b32.cont [5/8] (short) (narrow) %v13486_v28, 8 }
 0x74b   : > { %3396 = vxpose.xlu0.b32.cont [7/8] (short) (narrow) %v13435_v2, 8  ;;  %v13496_v2 = vld [vmem:[#allocation5_spill] sm:$0xff] }
 0x74d   : > { %3427 = vxpose.xlu1.b32.cont [6/8] (short) (narrow) %v13487_v56, 8  ;;  %v11404_v56 = vpop.xlane.xlu0 %3248 }
 0x74f   : > { %3397 = vxpose.xlu0.b32.end [8/8] (short) (narrow) %v13440_v14, 8  ;;  %v11395_v14 = vpop.xlane.xlu1 %3221 }
 0x751   : > { %3428 = vxpose.xlu1.b32.cont [7/8] (short) (narrow) %v13488_v40, 8  ;;  %v13501_v40 = vld [vmem:[#allocation48_spill] sm:$0xff] }
 0x753   : > { %3454 = vxpose.xlu0.b32.start [1/8] (short) (narrow) %v13489_v39, 8  ;;  %v11402_v28 = vpop.xlane.xlu1 %3245  ;;  %v13502_v39 = vld [vmem:[#allocation26_spill] sm:$0xff] }
 0x755   : > { %3429 = vxpose.xlu1.b32.end [8/8] (short) (narrow) %v13490_v49, 8  ;;  %v13503_v49 = vld [vmem:[#allocation16_spill] sm:$0xff] }
 0x757   : > { %3455 = vxpose.xlu0.b32.cont [2/8] (short) (narrow) %v13491_v51, 8  ;;  %v1388_v51 = vpop.permute.xlu1 %1387 }
 0x759   : > { %3486 = vxpose.xlu1.b32.start [1/8] (short) (narrow) %v13492_v44, 8  ;;  %v1412_v44 = vpop.permute.xlu0 %1411 }
 0x75b   : > { %3456 = vxpose.xlu0.b32.cont [3/8] (short) (narrow) %v13493_v10, 8  ;;  %v13504_v10 = vld [vmem:[#allocation56_spill] sm:$0xff] }
 0x75d   : > { %3487 = vxpose.xlu1.b32.cont [2/8] (short) (narrow) %v13494_v29, 8  ;;  %v13505_v29 = vld [vmem:[#allocation12_spill] sm:$0xff] }
 0x75f   : > { %3457 = vxpose.xlu0.b32.cont [4/8] (short) (narrow) %v13495_v0, 8  ;;  %v1390_v0 = vpop.permute.xlu1 %1389 }
 0x761   : > { %3488 = vxpose.xlu1.b32.cont [3/8] (short) (narrow) %v13496_v2, 8  ;;  %v1392_v2 = vpop.permute.xlu0 %1391 }
 0x763   : > { %3458 = vxpose.xlu0.b32.cont [5/8] (short) (narrow) %v13497_v19, 8 }
 0x765   : > { %3489 = vxpose.xlu1.b32.cont [4/8] (short) (narrow) %v13498_v34, 8  ;;  %v11414_v19 = vpop.xlane.xlu0 %3227  ;;  %v1414_v34 = vpop.permute.xlu1 %1413 }
 0x767   : > { %3459 = vxpose.xlu0.b32.cont [6/8] (short) (narrow) %v13499_v27, 8 }
 0x769   : > { %3490 = vxpose.xlu1.b32.cont [5/8] (short) (narrow) %v13500_v63, 8  ;;  %v11419_v27 = vpop.xlane.xlu0 %3251  ;;  %v9362_v63 = vpop.eup %9361 }
 0x76a   : > { %v9364_v11 = vpop.eup %9363 }
 0x76b   : > { %3460 = vxpose.xlu0.b32.cont [7/8] (short) (narrow) %v13501_v40, 8  ;;  %v13507_v40 = vld [vmem:[#allocation57_spill] sm:$0xff] }
 0x76d   : > { %3491 = vxpose.xlu1.b32.cont [6/8] (short) (narrow) %v13502_v39, 8 }
 0x76f   : > { %3461 = vxpose.xlu0.b32.end [8/8] (short) (narrow) %v13503_v49, 8  ;;  %v13508_v49 = vld [vmem:[#allocation58_spill] sm:$0xff] }
 0x771   : > { %3492 = vxpose.xlu1.b32.cont [7/8] (short) (narrow) %v13504_v10, 8 }
 0x773   : > { %3550 = vxpose.xlu0.b32.start [1/8] (short) (narrow) %v11189_v55, 8  ;;  %v1416_v55 = vpop.permute.xlu1 %1415 }
 0x775   : > { %3493 = vxpose.xlu1.b32.end [8/8] (short) (narrow) %v13505_v29, 8 }
 0x777   : > { %3551 = vxpose.xlu0.b32.cont [2/8] (short) (narrow) %v11211_v45, 8  ;;  %v11424_v45 = vpop.xlane.xlu1 %3230 }
 0x779   : > { %3518 = vxpose.xlu1.b32.start [1/8] (short) (narrow) %v11179_v15, 8  ;;  %v11426_v15 = vpop.xlane.xlu0 %3254 }
 0x77b   : > { %3552 = vxpose.xlu0.b32.cont [3/8] (short) (narrow) %v11217_v62, 8 }
 0x77d   : > { %3519 = vxpose.xlu1.b32.cont [2/8] (short) (narrow) %v11193_v4, 8  ;;  %v1394_v4 = vpop.permute.xlu1 %1393  ;;  %v1418_v62 = vpop.permute.xlu0 %1417 }
 0x77f   : > { %3553 = vxpose.xlu0.b32.cont [4/8] (short) (narrow) %v11257_v35, 8 }
 0x781   : > { %3520 = vxpose.xlu1.b32.cont [3/8] (short) (narrow) %v11203_v9, 8  ;;  %v1396_v9 = vpop.permute.xlu1 %1395 }
 0x783   : > { %3554 = vxpose.xlu0.b32.cont [5/8] (short) (narrow) %v11271_v31, 8 }
 0x785   : > { %3521 = vxpose.xlu1.b32.cont [4/8] (short) (narrow) %v11255_v42, 8  ;;  %v1398_v42 = vpop.permute.xlu0 %1397  ;;  %v1420_v35 = vpop.permute.xlu1 %1419 }
 0x787   : > { %3555 = vxpose.xlu0.b32.cont [6/8] (short) (narrow) %v11283_v37, 8 }
 0x789   : > { %3522 = vxpose.xlu1.b32.cont [5/8] (short) (narrow) %v11261_v16, 8  ;;  %v1400_v31 = vpop.permute.xlu0 %1399  ;;  %v1422_v37 = vpop.permute.xlu1 %1421 }
 0x78b   : > { %3556 = vxpose.xlu0.b32.cont [7/8] (short) (narrow) %v11285_v12, 8 }
 0x78d   : > { %3523 = vxpose.xlu1.b32.cont [6/8] (short) (narrow) %v11267_v25, 8  ;;  %v11435_v16 = vpop.xlane.xlu0 %3233 }
 0x78f   : > { %3557 = vxpose.xlu0.b32.end [8/8] (short) (narrow) %v11331_v61, 8  ;;  %v13506_v61 = vld [vmem:[#allocation51_spill] sm:$0xff] }
 0x790   : > { %9365 = vrcp.f32 %v13506_v61  ;;  %v13514_v61 = vld [vmem:[#allocation50_spill] sm:$0xff] }
 0x791   : > { %3524 = vxpose.xlu1.b32.cont [7/8] (short) (narrow) %v11277_v47, 8  ;;  %v11438_v25 = vpop.xlane.xlu0 %3257  ;;  %v1424_v47 = vpop.permute.xlu1 %1423  ;;  %9367 = vrcp.f32 %v13507_v40  ;;  %v13516_v40 = vpack.c.bf16 %v11103_v53, %v11106_v59 }
 0x792   : > { %9369 = vrcp.f32 %v11079_v21  ;;  %v13510_v21 = vld [vmem:[#allocation35_spill] sm:$0xff] }
 0x793   : > { %3582 = vxpose.xlu0.b32.start [1/8] (short) (narrow) %v1388_v51, 8  ;;  %v3295_v51 = vmul.f32 %v9362_v63, %v13508_v49  ;;  %9371 = vrcp.f32 %v11070_v41 }
 0x794   : > { %9373 = vrcp.f32 %v11126_v54 }
 0x795   : > { %3525 = vxpose.xlu1.b32.end [8/8] (short) (narrow) %v11329_v50, 8  ;;  %v11441_v12 = vpop.xlane.xlu1 %3236  ;;  %v11443_v50 = vpop.xlane.xlu0 %3260  ;;  %9375 = vrcp.f32 %v11124_v8  ;;  %v13521_v8 = vld [vmem:[#allocation49_spill] sm:$0xff] }
 0x796   : > { %9377 = vrcp.f32 %v11395_v14 }
 0x797   : > { %3583 = vxpose.xlu0.b32.cont [2/8] (short) (narrow) %v1390_v0, 8  ;;  %9379 = vrcp.f32 %v11397_v32 }
 0x798   : > { %9381 = vrcp.f32 %v11402_v28 }
 0x799   : > { %3614 = vxpose.xlu1.b32.start [1/8] (short) (narrow) %v1412_v44, 8  ;;  %v1402_v39 = vpop.permute.xlu1 %1401  ;;  %v1426_v5 = vpop.permute.xlu0 %1425  ;;  %v13509_v44 = vld [vmem:[#allocation36_spill] sm:$0xff]  ;;  %9383 = vrcp.f32 %v11404_v56 }
 0x79a   : > { %v3297_v10 = vmul.f32 %v9364_v11, %v13509_v44  ;;  %v13528_v44 = vld [vmem:[#allocation8_spill] sm:$0xff]  ;;  %9385 = vrcp.f32 %v11424_v45 }
 0x79b   : > { %3584 = vxpose.xlu0.b32.cont [3/8] (short) (narrow) %v1392_v2, 8  ;;  %v9366_v2 = vpop.eup %9365  ;;  %9387 = vrcp.f32 %v11426_v15 }
 0x79c   : > { %v8954_v0 = vpack.c.bf16 %v3297_v10, %v3295_v51  ;;  %v13525_v51 = vld [vmem:[#allocation4_spill] sm:$0xff]  ;;  %9389 = vrcp.f32 %v11414_v19  ;;  %v13539_v19 = vld [vmem:[#allocation6_spill] sm:$0xff] }
 0x79d   : > { %3615 = vxpose.xlu1.b32.cont [2/8] (short) (narrow) %v1414_v34, 8  ;;  %v9368_v34 = vpop.eup %9367  ;;  %9391 = vrcp.f32 %v11419_v27  ;;  %v13540_v27 = vld [vmem:[#allocation9_spill] sm:$0xff] }
 0x79e   : > { %9393 = vrcp.f32 %v11441_v12  ;;  %v13543_v12 = vld [vmem:[#allocation30_spill] sm:$0xff] }
 0x79f   : > { %3585 = vxpose.xlu0.b32.cont [4/8] (short) (narrow) %v1394_v4, 8  ;;  %v13511_v4 = vld [vmem:[#allocation41_spill] sm:$0xff]  ;;  %9395 = vrcp.f32 %v11443_v50 }
 0x7a0   : > { %9397 = vrcp.f32 %v11435_v16  ;;  %v13544_v16 = vld [vmem:[#allocation13_spill] sm:$0xff] }
 0x7a1   : > { %3616 = vxpose.xlu1.b32.cont [3/8] (short) (narrow) %v1416_v55, 8  ;;  %v3299_v55 = vmul.f32 %v9366_v2, %v13510_v21  ;;  %v13534_v21 = vld [vmem:[#allocation3_spill] sm:$0xff]  ;;  %9399 = vrcp.f32 %v11438_v25 }
 0x7a3   : > { %3586 = vxpose.xlu0.b32.cont [5/8] (short) (narrow) %v1396_v9, 8  ;;  %v9370_v9 = vpop.eup %9369 }
 0x7a5   : > { %3617 = vxpose.xlu1.b32.cont [4/8] (short) (narrow) %v1418_v62, 8  ;;  %v3301_v62 = vmul.f32 %v9368_v34, %v13511_v4  ;;  %v13533_v34 = vld [vmem:[#allocation2_spill] sm:$0xff]  ;;  %v13536_v4 = vld [vmem:[#allocation53_spill] sm:$0xff] }
 0x7a7   : > { %3587 = vxpose.xlu0.b32.cont [6/8] (short) (narrow) %v1398_v42, 8  ;;  %v13512_v42 = vpack.c.bf16 %v11084_v24, %v11087_v43  ;;  %v13515_v43 = vpack.c.bf16 %v11048_v26, %v11051_v17  ;;  %v13517_v26 = vpack.c.bf16 %v11065_v38, %v11068_v23  ;;  %v13518_v17 = vpack.c.bf16 %v11119_v1, %v11122_v58  ;;  %v13520_v1 = vld [vmem:[#allocation14_spill] sm:$0xff] }
 0x7a8   : > { %v13519_v23 = vpack.c.bf16 %v11134_v57, %v11131_v22  ;;  %v13524_v57 = vld [vmem:[#allocation7_spill] sm:$0xff] }
 0x7a9   : > { %3618 = vxpose.xlu1.b32.cont [5/8] (short) (narrow) %v1420_v35, 8  ;;  %v8958_v35 = vpack.c.bf16 %v3301_v62, %v3299_v55  ;;  %v13535_v55 = vpack.c.bf16 %v13533_v34, %v13534_v21  ;;  %v13537_v62 = vld [vmem:[#allocation29_spill] sm:$0xff] }
 0x7ab   : > { %3588 = vxpose.xlu0.b32.cont [7/8] (short) (narrow) %v1400_v31, 8  ;;  %v9372_v31 = vpop.eup %9371 }
 0x7ac   : > { %v3317_v63 = vmul.f32 %v9372_v31, %v13514_v61  ;;  %v9374_v59 = vpop.eup %9373  ;;  %v13545_v61 = vld [vmem:[#allocation34_spill] sm:$0xff] }
 0x7ad   : > { %3619 = vxpose.xlu1.b32.cont [6/8] (short) (narrow) %v1422_v37, 8  ;;  %v13513_v37 = vld [vmem:[#allocation55_spill] sm:$0xff]  ;;  %v9376_v38 = vpop.eup %9375  ;;  %v3333_v58 = vmul.f32 %v9374_v59, %v13520_v1 }
 0x7ae   : > { %v3331_v54 = vmul.f32 %v9376_v38, %v13521_v8  ;;  %v9378_v14 = vpop.eup %9377 }
 0x7af   : > { %3589 = vxpose.xlu0.b32.end [8/8] (short) (narrow) %v1402_v39, 8  ;;  %v13522_v39 = vld [vmem:[#allocation54_spill] sm:$0xff]  ;;  %v3363_v45 = vmul.f32 %v9378_v14, %v13539_v19 }
 0x7b0   : > { %v13523_v49 = vpack.c.bf16 %v11142_v13, %v13522_v39  ;;  %v8990_v22 = vpack.c.bf16 %v3333_v58, %v3331_v54  ;;  %v13527_v13 = vld [vmem:[#allocation22_spill] sm:$0xff]  ;;  %v13547_v58 = vld [vmem:[#allocation27_spill] sm:$0xff] }
 0x7b1   : > { %3620 = vxpose.xlu1.b32.cont [7/8] (short) (narrow) %v1424_v47, 8  ;;  %v3315_v47 = vmul.f32 %v9370_v9, %v13513_v37  ;;  %v13529_v10 = vpack.c.bf16 %v13527_v13, %v13528_v44 }
 0x7b3   : > { %v3406_v29 = vpop.trf.xlu0  ;;  %v8974_v24 = vpack.c.bf16 %v3317_v63, %v3315_v47 }
 0x7b4   : > { %8678 = vmatmul.mubr.msk.f32.vlgmr.msra.gmra.mrb[36].mxu1 %vm2685_vm3, %v3406_v29  ;;  %v13530_v29 = vld [vmem:[#allocation39_spill] sm:$0xff] }
 0x7b5   : > { %8956 = vmatpush3.bf16.xpose.msk.msra.mxu1 %vm10941_vm4, %v8954_v0  ;;  %3621 = vxpose.xlu1.b32.end [8/8] (short) (narrow) %v1426_v5, 8  ;;  %v13526_v5 = vpack.c.bf16 %v13524_v57, %v13525_v51  ;;  %v13531_v0 = vld [vmem:[#allocation42_spill] sm:$0xff] }
 0x7b6   : > { %8957 = vmatprep.subr.bf16.mxu1 %v13427_v7  ;;  %8715 = vmatprep.mubr.msk.f32.mxu1 %vm9473_vm5, %v9474_v36  ;;  %v13532_v2 = vpack.c.bf16 %v13530_v29, %v13531_v0 }
 0x7b9   : > { %v3438_v41 = vpop.trf.xlu1 }
 0x7ba   : > { %8697 = vmatmul.mubr.msk.f32.vlgmr.msra.gmra.mrb[52].mxu0 %vm2685_vm3, %v3438_v41  ;;  %v13538_v41 = vpack.c.bf16 %v13536_v4, %v13537_v62 }
 0x7bb   : > { %8972 = vmatpush3.bf16.xpose.msk.msra.mxu0 %vm10941_vm4, %v13512_v42  ;;  %8734 = vmatprep.mubr.msk.f32.mxu0 %vm9473_vm5, %v9474_v36  ;;  %v9380_v42 = vpop.eup %9379 }
 0x7bc   : > { %8973 = vmatprep.subr.bf16.mxu0 %v13427_v7  ;;  %v9382_v32 = vpop.eup %9381  ;;  %v3365_v15 = vmul.f32 %v9380_v42, %v13540_v27 }
 0x7bd   : > { %8960 = vmatpush3.bf16.xpose.msk.msra.mxu1 %vm10941_vm4, %v8958_v35  ;;  %v9384_v56 = vpop.eup %9383  ;;  %v13541_v35 = vld [vmem:[#allocation46_spill] sm:$0xff] }
 0x7be   : > { %8961 = vmatprep.subr.bf16.mxu1 %v13427_v7  ;;  %v3379_v31 = vmul.f32 %v9382_v32, %v13541_v35  ;;  %v3381_v30 = vmul.f32 %v9384_v56, %v13542_v3  ;;  %v9386_v52 = vpop.eup %9385 }
 0x7bf   : > { %v3369_v50 = vmul.f32 %v9386_v52, %v13543_v12 }
 0x7c0   : > { %v9038_v6 = vpack.c.bf16 %v3381_v30, %v3379_v31  ;;  %v9475_v31 = vmov 1983009808   ;;  %v4683_v30 = vlaneseq }
 0x7c1   : > { %v4681_v3 = vunpack.c.l.s4 %v9475_v31 }
 0x7c3   : > { %8976 = vmatpush3.bf16.xpose.msk.msra.mxu0 %vm10941_vm4, %v8974_v24  ;;  %v13546_v24 = vld [vmem:[#allocation37_spill] sm:$0xff] }
 0x7c4   : > { %8977 = vmatprep.subr.bf16.mxu0 %v13427_v7 }
 0x7c5   : > { %8964 = vmatpush3.bf16.xpose.msk.msra.mxu1 %vm10941_vm4, %v13515_v43 }
 0x7c6   : > { %8965 = vmatprep.subr.bf16.mxu1 %v13427_v7 }
 0x7cb   : > { %8980 = vmatpush3.bf16.xpose.msk.msra.mxu0 %vm10941_vm4, %v13516_v40 }
 0x7cc   : > { %8981 = vmatprep.subr.bf16.mxu0 %v13427_v7 }
 0x7cd   : > { %8968 = vmatpush3.bf16.xpose.msk.msra.mxu1 %vm10941_vm4, %v13517_v26 }
 0x7ce   : > { %8985 = vmatprep.subr.bf16.mxu1 %v13427_v7 }
 0x7d3   : > { %8984 = vmatpush3.bf16.xpose.msk.msra.mxu0 %vm10941_vm4, %v13518_v17  ;;  %v3470_v53 = vpop.trf.xlu0 }
 0x7d4   : > { %8716 = vmatmul.mubr.msk.f32.vlgmr.msra.gmra.mrb[38].mxu1 %vm2685_vm3, %v3470_v53  ;;  %9001 = vmatprep.subr.bf16.mxu0 %v13427_v7 }
 0x7d5   : > { %8988 = vmatpush3.bf16.xpose.msk.msra.mxu1 %vm10941_vm4, %v13519_v23  ;;  %8753 = vmatprep.mubr.msk.f32.mxu1 %vm9473_vm5, %v9474_v36 }
 0x7d6   : > { %8989 = vmatprep.subr.bf16.mxu1 %v13427_v7 }
 0x7d9   : > { %v3502_v11 = vpop.trf.xlu1 }
 0x7da   : > { %8735 = vmatmul.mubr.msk.f32.vlgmr.msra.gmra.mrb[54].mxu0 %vm2685_vm3, %v3502_v11 }
 0x7db   : > { %9004 = vmatpush3.bf16.xpose.msk.msra.mxu0 %vm10941_vm4, %v13523_v49  ;;  %8772 = vmatprep.mubr.msk.f32.mxu0 %vm9473_vm5, %v9474_v36 }
 0x7dc   : > { %9005 = vmatprep.subr.bf16.mxu0 %v13427_v7 }
 0x7dd   : > { %8992 = vmatpush3.bf16.xpose.msk.msra.mxu1 %vm10941_vm4, %v8990_v22 }
 0x7de   : > { %8993 = vmatprep.subr.bf16.mxu1 %v13427_v7 }
 0x7e3   : > { %9008 = vmatpush3.bf16.xpose.msk.msra.mxu0 %vm10941_vm4, %v13526_v5 }
 0x7e4   : > { %9009 = vmatprep.subr.bf16.mxu0 %v13427_v7 }
 0x7e5   : > { %8996 = vmatpush3.bf16.xpose.msk.msra.mxu1 %vm10941_vm4, %v13529_v10 }
 0x7e6   : > { %8997 = vmatprep.subr.bf16.mxu1 %v13427_v7 }
 0x7eb   : > { %9012 = vmatpush3.bf16.xpose.msk.msra.mxu0 %vm10941_vm4, %v13532_v2 }
 0x7ec   : > { %9013 = vmatprep.subr.bf16.mxu0 %v13427_v7 }
 0x7ed   : > { %9000 = vmatpush3.bf16.xpose.msk.msra.mxu1 %vm10941_vm4, %v13535_v55 }
 0x7ee   : > { %9017 = vmatprep.subr.bf16.mxu1 %v13427_v7 }
 0x7f3   : > { %9016 = vmatpush3.bf16.xpose.msk.msra.mxu0 %vm10941_vm4, %v13538_v41  ;;  %v3566_v9 = vpop.trf.xlu0 }
 0x7f4   : > { %9033 = vmatprep.subr.bf16.mxu0 %v13427_v7 }
 0x7f9   : > { %v3534_v28 = vpop.trf.xlu1 }
 0x7fa   : > { %8754 = vmatmul.mubr.msk.f32.vlgmr.msra.gmra.mrb[40].mxu1 %vm2685_vm3, %v3534_v28  ;;  %8773 = vmatmul.mubr.msk.f32.vlgmr.msra.gmra.mrb[56].mxu0 %vm2685_vm3, %v3566_v9 }
 0x7fb   : > { %9020 = vmatpush3.bf16.xpose.msk.msra.mxu1 %vm10941_vm4, %v9018_v33  ;;  %9036 = vmatpush3.bf16.xpose.msk.msra.mxu0 %vm10941_vm4, %v9034_v48  ;;  %v9022_v33 = vpack.c.bf16 %v3365_v15, %v3363_v45  ;;  %v9388_v48 = vpop.eup %9387 }
 0x7fc   : > { %9021 = vmatprep.subr.bf16.mxu1 %v13427_v7  ;;  %9037 = vmatprep.subr.bf16.mxu0 %v13427_v7  ;;  %v9390_v37 = vpop.eup %9389  ;;  %v3385_v47 = vmul.f32 %v9388_v48, %v13544_v16  ;;  %v4684_v48 = vshrl.u32 %v4683_v30, 7 }
 0x7fd   : > { %8791 = vmatprep.mubr.msk.f32.mxu1 %vm9473_vm5, %v9474_v36  ;;  %8810 = vmatprep.mubr.msk.f32.mxu0 %vm9473_vm5, %v9474_v36  ;;  %v9392_v36 = vpop.eup %9391  ;;  %v3367_v63 = vmul.f32 %v9390_v37, %v13545_v61 }
 0x7fe   : > { %v3383_v25 = vmul.f32 %v9392_v36, %v13546_v24  ;;  %v9394_v43 = vpop.eup %9393  ;;  %v9476_v36 = vmov 1934713408  }
 0x7ff   : > { %v9026_v40 = vpack.c.bf16 %v3369_v50, %v3367_v63  ;;  %v9396_v17 = vpop.eup %9395  ;;  %v3373_v23 = vmul.f32 %v9394_v43, %v11337_v46  ;;  %v4745_v12 = vunpack.c.l.s4 %v9476_v36 }
 0x800   : > { %v9042_v26 = vpack.c.bf16 %v3385_v47, %v3383_v25  ;;  %v9398_v53 = vpop.eup %9397  ;;  %v3389_v38 = vmul.f32 %v9396_v17, %v11341_v18 }
 0x801   : > { %v9400_v59 = vpop.eup %9399  ;;  %v3371_v1 = vmul.f32 %v9398_v53, %v11327_v20  ;;  %v4746_v25 = vunpack.c.0.s8 %v4745_v12 }
 0x802   : > { %v3387_v8 = vmul.f32 %v9400_v59, %v13547_v58 }
 0x803   : > { %9024 = vmatpush3.bf16.xpose.msk.msra.mxu1 %vm10941_vm4, %v9022_v33  ;;  %9040 = vmatpush3.bf16.xpose.msk.msra.mxu0 %vm10941_vm4, %v9038_v6  ;;  %v9030_v54 = vpack.c.bf16 %v3373_v23, %v3371_v1  ;;  %v4682_v6 = vunpack.c.0.s8 %v4681_v3  ;;  %v11642_v58 = vsub.s32 %v4746_v25, %v4684_v48 }
 0x804   : > { %9025 = vmatprep.subr.bf16.mxu1 %v13427_v7  ;;  %9041 = vmatprep.subr.bf16.mxu0 %v13427_v7  ;;  %v9046_v11 = vpack.c.bf16 %v3389_v38, %v3387_v8 }
 0x805   : > { %v11637_v47 = vsub.s32 %v4682_v6, %v4684_v48 }
 0x80b   : > { %9028 = vmatpush3.bf16.xpose.msk.msra.mxu1 %vm10941_vm4, %v9026_v40  ;;  %9044 = vmatpush3.bf16.xpose.msk.msra.mxu0 %vm10941_vm4, %v9042_v26 }
 0x80c   : > { %9029 = vmatprep.subr.bf16.mxu1 %v13427_v7  ;;  %9045 = vmatprep.subr.bf16.mxu0 %v13427_v7 }
 0x813   : > { %9032 = vmatpush3.bf16.xpose.msk.msra.mxu1 %vm10941_vm4, %v9030_v54  ;;  %9048 = vmatpush3.bf16.xpose.msk.msra.mxu0 %vm10941_vm4, %v9046_v11  ;;  %v3598_v39 = vpop.trf.xlu0 }
 0x819   : > { %v3630_v49 = vpop.trf.xlu1 }
 0x81a   : > { %8792 = vmatmul.mubr.msk.f32.vlgmr.msra.gmra.mrb[42].mxu1 %vm2685_vm3, %v3598_v39  ;;  %8811 = vmatmul.mubr.msk.f32.vlgmr.msra.gmra.mrb[58].mxu0 %vm2685_vm3, %v3630_v49 }
 0x887   : > { %v3739_v7 = vpop.f32.mrb[36].mxu1 }
 0x888   : > { %4422 = vxpose.xlu0.b32.start.end [1/1] (short) (narrow) %v3739_v7, 64  ;;  %v8679_v46 = vpop.f32.mrb[37].mxu1 }
 0x88d   : > { %v3836_v20 = vpop.f32.mrb[52].mxu0 }
 0x88e   : > { %4454 = vxpose.xlu1.b32.start.end [1/1] (short) (narrow) %v3836_v20, 64  ;;  %v8698_v18 = vpop.f32.mrb[53].mxu0 }
 0x8a7   : > { %v3933_v22 = vpop.f32.mrb[38].mxu1 }
 0x8a8   : > { %4486 = vxpose.xlu0.b32.start.end [1/1] (short) (narrow) %v3933_v22, 64  ;;  %v8717_v57 = vpop.f32.mrb[39].mxu1 }
 0x8ad   : > { %v4030_v51 = vpop.f32.mrb[54].mxu0 }
 0x8ae   : > { %4518 = vxpose.xlu1.b32.start.end [1/1] (short) (narrow) %v4030_v51, 64  ;;  %v8736_v5 = vpop.f32.mrb[55].mxu0 }
 0x8cd   : > { %v4127_v60 = vpop.f32.mrb[40].mxu1  ;;  %v4224_v13 = vpop.f32.mrb[56].mxu0 }
 0x8ce   : > { %4550 = vxpose.xlu0.b32.start.end [1/1] (short) (narrow) %v4127_v60, 64  ;;  %4582 = vxpose.xlu1.b32.start.end [1/1] (short) (narrow) %v4224_v13, 64  ;;  %v8755_v44 = vpop.f32.mrb[41].mxu1  ;;  %v8774_v10 = vpop.f32.mrb[57].mxu0 }
 0x8ed   : > { %v4321_v29 = vpop.f32.mrb[42].mxu1  ;;  %v4418_v0 = vpop.f32.mrb[58].mxu0 }
 0x8ee   : > { %4646 = vxpose.xlu1.b32.start.end [1/1] (short) (narrow) %v4418_v0, 64  ;;  %4614 = vxpose.xlu0.b32.start.end [1/1] (short) (narrow) %v4321_v29, 64  ;;  %v8793_v2 = vpop.f32.mrb[43].mxu1  ;;  %v8812_v34 = vpop.f32.mrb[59].mxu0 }
 0x908   : > { %v4438_v21 = vpop.trf.xlu0 }
 0x90c   : > { %v4439_v55 = vpop.trf.xlu0 }
 0x90e   : > { %v4470_v4 = vpop.trf.xlu1 }
 0x910   : > { %v11615_v62 = vpop.trf.xlu0 }
 0x912   : > { %v4471_v41 = vpop.trf.xlu1 }
 0x914   : > { %v11617_v14 = vpop.trf.xlu0 }
 0x916   : > { %v4472_v9 = vpop.trf.xlu1 }
 0x918   : > { %v11619_v42 = vpop.trf.xlu0 }
 0x91a   : > { %v11621_v32 = vpop.trf.xlu1 }
 0x91c   : > { %v11623_v28 = vpop.trf.xlu0 }
 0x91e   : > { %v11625_v56 = vpop.trf.xlu1 }
 0x920   : > { %v11627_v19 = vpop.trf.xlu0 }
 0x922   : > { %v11629_v45 = vpop.trf.xlu1 }
 0x924   : > { %v11631_v27 = vpop.trf.xlu0 }
 0x926   : > { %v11633_v15 = vpop.trf.xlu1 }
 0x928   : > { %v4502_v35 = vpop.trf.xlu0 }
 0x929   : > { %v4678_v61 = vcombine.low %v4438_v21, %v4502_v35  ;;  %v4679_v40 = vcombine.high %v4438_v21, %v4502_v35 }
 0x92a   : > { %v11635_v52 = vpop.trf.xlu1 }
 0x92b   : > { %v4686_v59 = vrot.slane %v4678_v61, %v11637_v47  ;;  %v4693_v39 = vrot.slane %v4679_v40, %v11637_v47 }
 0x92c   : > { %v4503_v33 = vpop.trf.xlu0 }
 0x92d   : > { %v4814_v26 = vcombine.low %v4439_v55, %v4503_v33  ;;  %v4815_v49 = vcombine.high %v4439_v55, %v4503_v33 }
 0x92e   : > { %v4534_v37 = vpop.trf.xlu1 }
 0x92f   : > { %v4694_v50 = vcombine.low %v4470_v4, %v4534_v37  ;;  %v4695_v63 = vcombine.high %v4470_v4, %v4534_v37  ;;  %v4822_v7 = vrot.slane %v4814_v26, %v11637_v47  ;;  %v4829_v0 = vrot.slane %v4815_v49, %v11637_v47 }
 0x930   : > { %v4504_v16 = vpop.trf.xlu0 }
 0x931   : > { %v4702_v43 = vrot.slane %v4694_v50, %v11637_v47  ;;  %v4709_v23 = vrot.slane %v4695_v63, %v11637_v47  ;;  %v4950_v20 = vcombine.low %v11615_v62, %v4504_v16  ;;  %v4951_v18 = vcombine.high %v11615_v62, %v4504_v16 }
 0x932   : > { %v4535_v24 = vpop.trf.xlu1 }
 0x933   : > { %v4830_v17 = vcombine.low %v4471_v41, %v4535_v24  ;;  %v4831_v38 = vcombine.high %v4471_v41, %v4535_v24  ;;  %v4742_v8 = vcombine.low %v4686_v59, %v4702_v43  ;;  %v4743_v54 = vcombine.high %v4686_v59, %v4702_v43 }
 0x934   : > { %v4505_v53 = vpop.trf.xlu0  ;;  %v4758_v51 = vcombine.low %v4693_v39, %v4709_v23  ;;  %v4759_v5 = vcombine.high %v4693_v39, %v4709_v23  ;;  %v4958_v21 = vrot.slane %v4950_v20, %v11637_v47  ;;  %v4965_v55 = vrot.slane %v4951_v18, %v11637_v47 }
 0x935   : > { %v4838_v11 = vrot.slane %v4830_v17, %v11637_v47  ;;  %v4845_v60 = vrot.slane %v4831_v38, %v11637_v47  ;;  %v4750_v44 = vrot.slane %v4742_v8, %v11642_v58  ;;  %v4757_v10 = vrot.slane %v4743_v54, %v11642_v58 }
 0x936   : > { %v4536_v1 = vpop.trf.xlu1  ;;  %v4766_v62 = vrot.slane %v4758_v51, %v11642_v58  ;;  %v4773_v41 = vrot.slane %v4759_v5, %v11642_v58  ;;  %v5086_v6 = vcombine.low %v11617_v14, %v4505_v53  ;;  %v5087_v48 = vcombine.high %v11617_v14, %v4505_v53 }
 0x937   : > { %v4966_v22 = vcombine.low %v4472_v9, %v4536_v1  ;;  %v4967_v57 = vcombine.high %v4472_v9, %v4536_v1  ;;  %v4878_v29 = vcombine.low %v4822_v7, %v4838_v11  ;;  %v4879_v2 = vcombine.high %v4822_v7, %v4838_v11 }
 0x938   : > { %v4506_v46 = vpop.trf.xlu0  ;;  %v4894_v9 = vcombine.low %v4829_v0, %v4845_v60  ;;  %v4895_v35 = vcombine.high %v4829_v0, %v4845_v60  ;;  %v8172_v30 = vcombine.low %v4750_v44, %v4757_v10  ;;  %v8174_v16 = vcombine.high %v4750_v44, %v4757_v10 }
 0x939   : > { %v4974_v34 = vrot.slane %v4966_v22, %v11637_v47  ;;  %v4981_v4 = vrot.slane %v4967_v57, %v11637_v47  ;;  %v11660_v33 = vrot.slane %v4878_v29, %v11642_v58  ;;  %v11665_v37 = vrot.slane %v4879_v2, %v11642_v58 }
 0x93a   : > { %v4537_v13 = vpop.trf.xlu1  ;;  %v8176_v25 = vcombine.low %v4766_v62, %v4773_v41  ;;  %v11670_v43 = vrot.slane %v4894_v9, %v11642_v58  ;;  %v11673_v40 = vrot.slane %v4895_v35, %v11642_v58  ;;  %v5222_v14 = vcombine.low %v11619_v42, %v4506_v46 }
 0x93b   : > { %v5014_v36 = vcombine.low %v4958_v21, %v4974_v34  ;;  %v5015_v12 = vcombine.high %v4958_v21, %v4974_v34  ;;  %v5102_v50 = vcombine.low %v11621_v32, %v4537_v13  ;;  %v5030_v61 = vcombine.low %v4965_v55, %v4981_v4 }
 0x93c   : > { %v4507_v31 = vpop.trf.xlu0  ;;  %v5031_v63 = vcombine.high %v4965_v55, %v4981_v4  ;;  %v5103_v24 = vcombine.high %v11621_v32, %v4537_v13  ;;  %v8178_v17 = vcombine.high %v4766_v62, %v4773_v41  ;;  %v5094_v53 = vrot.slane %v5086_v6, %v11637_v47 }
 0x93d   : > { %v5101_v59 = vrot.slane %v5087_v48, %v11637_v47  ;;  %v5223_v23 = vcombine.high %v11619_v42, %v4506_v46  ;;  %v8180_v32 = vcombine.low %v11660_v33, %v11665_v37  ;;  %v11684_v38 = vrot.slane %v5014_v36, %v11642_v58 }
 0x93e   : > { %v4538_v3 = vpop.trf.xlu1  ;;  %v11687_v1 = vrot.slane %v5015_v12, %v11642_v58  ;;  %v5110_v8 = vrot.slane %v5102_v50, %v11637_v47  ;;  %v8182_v11 = vcombine.high %v11660_v33, %v11665_v37  ;;  %v11695_v39 = vrot.slane %v5030_v61, %v11642_v58 }
 0x93f   : > { %v11698_v42 = vrot.slane %v5031_v63, %v11642_v58  ;;  %v5117_v49 = vrot.slane %v5103_v24, %v11637_v47  ;;  %v8184_v7 = vcombine.low %v11670_v43, %v11673_v40  ;;  %v8186_v46 = vcombine.high %v11670_v43, %v11673_v40 }
 0x940   : > { %v11690_v54 = vpop.trf.xlu0  ;;  %v5230_v20 = vrot.slane %v5222_v14, %v11637_v47  ;;  %v5238_v18 = vcombine.low %v11625_v56, %v4538_v3  ;;  %v11710_v57 = vrot.slane %v5223_v23, %v11637_v47  ;;  %v5358_v51 = vcombine.low %v11623_v28, %v4507_v31 }
 0x941   : > { %v5359_v5 = vcombine.high %v11623_v28, %v4507_v31  ;;  %v5239_v60 = vcombine.high %v11625_v56, %v4538_v3  ;;  %v8188_v13 = vcombine.low %v11684_v38, %v11687_v1  ;;  %v5150_v44 = vcombine.low %v5094_v53, %v5110_v8 }
 0x942   : > { %v11676_v26 = vpop.trf.xlu1  ;;  %v5774_v10 = vrot.slane %v8172_v30, %v11637_v47  ;;  %v5790_v29 = vrot.slane %v8174_v16, %v11637_v47  ;;  %v8190_v0 = vcombine.high %v11684_v38, %v11687_v1  ;;  %v8192_v2 = vcombine.low %v11695_v39, %v11698_v42 }
 0x943   : > { %v5151_v34 = vcombine.high %v5094_v53, %v5110_v8  ;;  %v5166_v21 = vcombine.low %v5101_v59, %v5117_v49  ;;  %v5246_v28 = vrot.slane %v5238_v18, %v11637_v47  ;;  %v5806_v56 = vrot.slane %v8176_v25, %v11637_v47 }
 0x944   : > { %v5822_v55 = vrot.slane %v8178_v17, %v11637_v47  ;;  %v5830_v4 = vcombine.low %v5774_v10, %v5790_v29  ;;  %v11726_v62 = vpop.trf.xlu0  ;;  %v8194_v9 = vcombine.high %v11695_v39, %v11698_v42  ;;  %v5167_v35 = vcombine.high %v5101_v59, %v5117_v49 }
 0x945   : > { %v11733_v31 = vrot.slane %v5358_v51, %v11637_v47  ;;  %v5253_v3 = vrot.slane %v5239_v60, %v11637_v47  ;;  %v11737_v30 = vrot.slane %v5150_v44, %v11642_v58  ;;  %v11740_v33 = vrot.slane %v5359_v5, %v11637_v47 }
 0x946   : > { %v11707_v22 = vpop.trf.xlu1  ;;  %v11743_v6 = vrot.slane %v5830_v4, %v11642_v58  ;;  %v5862_v48 = vcombine.low %v5806_v56, %v5822_v55  ;;  %v11746_v37 = vrot.slane %v5151_v34, %v11642_v58  ;;  %v11749_v36 = vrot.slane %v5166_v21, %v11642_v58 }
 0x947   : > { %v5831_v12 = vcombine.high %v5774_v10, %v5790_v29  ;;  %v5863_v50 = vcombine.high %v5806_v56, %v5822_v55  ;;  %v5286_v16 = vcombine.low %v5230_v20, %v5246_v28  ;;  %v5287_v61 = vcombine.high %v5230_v20, %v5246_v28 }
 0x948   : > { %13548 = vst [vmem:[#allocation18_spill] sm:$0xff] %v11743_v6  ;;  %v11752_v63 = vrot.slane %v5862_v48, %v11642_v58  ;;  %v5374_v24 = vcombine.low %v11629_v45, %v11676_v26  ;;  %v11761_v40 = vrot.slane %v5167_v35, %v11642_v58  ;;  %v5302_v14 = vcombine.low %v11710_v57, %v5253_v3 }
 0x949   : > { %v5494_v17 = vcombine.low %v11627_v19, %v11690_v54  ;;  %v5375_v53 = vcombine.high %v11629_v45, %v11676_v26  ;;  %v5303_v59 = vcombine.high %v11710_v57, %v5253_v3  ;;  %v11772_v8 = vrot.slane %v5831_v12, %v11642_v58 }
 0x94a   : > { %v11728_v41 = vpop.trf.xlu1  ;;  %13549 = vst [vmem:[#allocation33_spill] sm:$0xff] %v11752_v63  ;;  %v5895_v23 = vcombine.high %v11743_v6, %v11752_v63  ;;  %v11775_v49 = vrot.slane %v5863_v50, %v11642_v58  ;;  %v8196_v20 = vcombine.low %v11737_v30, %v11746_v37  ;;  %v5495_v18 = vcombine.high %v11627_v19, %v11690_v54 }
 0x94b   : > { %v5910_v51 = vrot.slane %v8180_v32, %v11637_v47  ;;  %v5926_v45 = vrot.slane %v8182_v11, %v11637_v47  ;;  %v11784_v26 = vrot.slane %v5286_v16, %v11642_v58  ;;  %v11787_v57 = vrot.slane %v5287_v61, %v11642_v58 }
 0x94c   : > { %6862 = vrot.lane.b32.xlu0 %v5895_v23, %s9477_s17  ;;  %v5382_v5 = vrot.slane %v5374_v24, %v11637_v47  ;;  %v5942_v60 = vrot.slane %v8184_v7, %v11637_v47  ;;  %v8198_v32 = vcombine.high %v11737_v30, %v11746_v37  ;;  %v5389_v54 = vrot.slane %v5375_v53, %v11637_v47 }
 0x94d   : > { %v5958_v11 = vrot.slane %v8186_v46, %v11637_v47  ;;  %v5966_v10 = vcombine.low %v5910_v51, %v5926_v45  ;;  %v8200_v29 = vcombine.low %v11749_v36, %v11761_v40  ;;  %v11803_v34 = vrot.slane %v5302_v14, %v11642_v58 }
 0x94e   : > { %v11756_v25 = vpop.trf.xlu1  ;;  %v11758_v43 = vpop.trf.xlu0  ;;  %v11806_v7 = vrot.slane %v5303_v59, %v11642_v58  ;;  %v5897_v21 = vcombine.high %v11772_v8, %v11775_v49  ;;  %v8202_v28 = vcombine.high %v11749_v36, %v11761_v40  ;;  %v5510_v55 = vcombine.low %v11633_v15, %v11707_v22 }
 0x94f   : > { %v11813_v56 = vrot.slane %v5966_v10, %v11642_v58  ;;  %v5998_v46 = vcombine.low %v5942_v60, %v5958_v11  ;;  %v8204_v4 = vcombine.low %v11784_v26, %v11787_v57  ;;  %v5502_v35 = vrot.slane %v5494_v17, %v11637_v47 }
 0x950   : > { %v11821_v3 = vrot.slane %v5495_v18, %v11637_v47  ;;  %v5422_v48 = vcombine.low %v11733_v31, %v5382_v5  ;;  %6926 = vrot.lane.b32.xlu0 %v5897_v21, %s9478_s19  ;;  %v5423_v16 = vcombine.high %v11733_v31, %v5382_v5  ;;  %v5438_v61 = vcombine.low %v11740_v33, %v5389_v54 }
 0x951   : > { %13550 = vst [vmem:[#allocation23_spill] sm:$0xff] %v11813_v56  ;;  %v11832_v24 = vrot.slane %v5998_v46, %v11642_v58  ;;  %v5511_v14 = vcombine.high %v11633_v15, %v11707_v22  ;;  %v8206_v17 = vcombine.high %v11784_v26, %v11787_v57  ;;  %v8208_v53 = vcombine.low %v11803_v34, %v11806_v7 }
 0x952   : > { %v11792_v44 = vpop.trf.xlu1  ;;  %v11794_v19 = vpop.trf.xlu0  ;;  %v5439_v59 = vcombine.high %v11740_v33, %v5389_v54  ;;  %v5646_v23 = vcombine.low %v11635_v52, %v11728_v41  ;;  %v5518_v18 = vrot.slane %v5510_v55, %v11637_v47  ;;  %v5647_v5 = vcombine.high %v11635_v52, %v11728_v41 }
 0x953   : > { %13551 = vst [vmem:[#allocation43_spill] sm:$0xff] %v11832_v24  ;;  %v6031_v31 = vcombine.high %v11813_v56, %v11832_v24  ;;  %v5967_v15 = vcombine.high %v5910_v51, %v5926_v45  ;;  %v8210_v22 = vcombine.high %v11803_v34, %v11806_v7  ;;  %v5630_v10 = vcombine.low %v11631_v27, %v11726_v62 }
 0x954   : > { %v5631_v33 = vcombine.high %v11631_v27, %v11726_v62  ;;  %v5999_v54 = vcombine.high %v5942_v60, %v5958_v11  ;;  %v11859_v55 = vrot.slane %v5422_v48, %v11642_v58  ;;  %v11862_v52 = vrot.slane %v5423_v16, %v11642_v58 }
 0x955   : > { %v11865_v41 = vrot.slane %v5438_v61, %v11642_v58  ;;  %6864 = vrot.lane.b32.xlu1 %v6031_v31, %s9477_s17  ;;  %v5525_v51 = vrot.slane %v5511_v14, %v11637_v47  ;;  %v11870_v27 = vrot.slane %v5439_v59, %v11642_v58  ;;  %v5896_v62 = vcombine.low %v11772_v8, %v11775_v49 }
 0x956   : > { %v11825_v12 = vpop.trf.xlu1  ;;  %v11827_v50 = vpop.trf.xlu0  ;;  %v5654_v45 = vrot.slane %v5646_v23, %v11637_v47  ;;  %v11879_v60 = vrot.slane %v8188_v13, %v11637_v47  ;;  %v5558_v11 = vcombine.low %v5502_v35, %v5518_v18  ;;  %v5559_v48 = vcombine.high %v5502_v35, %v5518_v18 }
 0x957   : > { %v5661_v16 = vrot.slane %v5647_v5, %v11637_v47  ;;  %v5981_v61 = vrot.slane %v5967_v15, %v11642_v58  ;;  %v6013_v14 = vrot.slane %v5999_v54, %v11642_v58  ;;  %v11888_v8 = vrot.slane %v8190_v0, %v11637_v47 }
 0x958   : > { %v11894_v13 = vrot.slane %v8192_v2, %v11637_v47  ;;  %v11900_v49 = vrot.slane %v8194_v9, %v11637_v47  ;;  %v5638_v38 = vrot.slane %v5630_v10, %v11637_v47  ;;  %v5645_v1 = vrot.slane %v5631_v33, %v11637_v47 }
 0x959   : > { %v5574_v0 = vcombine.low %v11821_v3, %v5525_v51  ;;  %v5575_v23 = vcombine.high %v11821_v3, %v5525_v51  ;;  %6894 = vrot.lane.b32.xlu1 %v5896_v62, %s9479_s20  ;;  %v8212_v39 = vcombine.low %v11859_v55, %v11862_v52  ;;  %v6102_v2 = vcombine.low %v11879_v60, %v11888_v8 }
 0x95a   : > { %v11854_v21 = vpop.trf.xlu1  ;;  %v11856_v46 = vpop.trf.xlu0  ;;  %v6134_v9 = vcombine.low %v11894_v13, %v11900_v49  ;;  %v5694_v18 = vcombine.low %v5638_v38, %v5654_v45  ;;  %v5695_v3 = vcombine.high %v5638_v38, %v5654_v45  ;;  %v6032_v5 = vcombine.low %v5981_v61, %v6013_v14 }
 0x95b   : > { %v11922_v15 = vrot.slane %v5558_v11, %v11642_v58  ;;  %v11925_v10 = vrot.slane %v5559_v48, %v11642_v58  ;;  %v5710_v33 = vcombine.low %v5645_v1, %v5661_v16  ;;  %v5711_v54 = vcombine.high %v5645_v1, %v5661_v16 }
 0x95c   : > { %v11932_v42 = vrot.slane %v5574_v0, %v11642_v58  ;;  %v11935_v31 = vrot.slane %v5575_v23, %v11642_v58  ;;  %v6182_v45 = vrot.slane %v8196_v20, %v11637_v47  ;;  %v6198_v11 = vrot.slane %v8198_v32, %v11637_v47 }
 0x95d   : > { %6896 = vrot.lane.b32.xlu1 %v6032_v5, %s9479_s20  ;;  %v11947_v48 = vrot.slane %v6102_v2, %v11642_v58  ;;  %v11950_v16 = vrot.slane %v6134_v9, %v11642_v58  ;;  %v6214_v38 = vrot.slane %v8200_v29, %v11637_v47  ;;  %v6230_v20 = vrot.slane %v8202_v28, %v11637_v47 }
 0x95e   : > { %v11902_v35 = vpop.trf.xlu1  ;;  %v11904_v59 = vpop.trf.xlu0  ;;  %v8218_v30 = vcombine.high %v11865_v41, %v11870_v27  ;;  %v11963_v37 = vrot.slane %v5694_v18, %v11642_v58  ;;  %v11966_v32 = vrot.slane %v5695_v3, %v11642_v58  ;;  %v6033_v1 = vcombine.high %v5981_v61, %v6013_v14 }
 0x95f   : > { %13552 = vst [vmem:[#allocation47_spill] sm:$0xff] %v11947_v48  ;;  %13553 = vst [vmem:[#allocation24_spill] sm:$0xff] %v11950_v16  ;;  %v11973_v23 = vrot.slane %v5710_v33, %v11642_v58  ;;  %v11976_v36 = vrot.slane %v5711_v54, %v11642_v58  ;;  %v6103_v61 = vcombine.high %v11879_v60, %v11888_v8 }
 0x960   : > { %13554 = vst [vmem:[#allocation25_spill] sm:$0xff] %v11963_v37  ;;  %13555 = vst [vmem:[#allocation19_spill] sm:$0xff] %v11966_v32  ;;  %v6135_v14 = vcombine.high %v11894_v13, %v11900_v49  ;;  %v6238_v9 = vcombine.low %v6182_v45, %v6198_v11  ;;  %v6167_v18 = vcombine.high %v11947_v48, %v11950_v16 }
 0x961   : > { %13556 = vst [vmem:[#allocation44_spill] sm:$0xff] %v11973_v23  ;;  %13557 = vst [vmem:[#allocation59_spill] sm:$0xff] %v11976_v36  ;;  %6928 = vrot.lane.b32.xlu1 %v6033_v1, %s9478_s19  ;;  %v6270_v3 = vcombine.low %v6214_v38, %v6230_v20  ;;  %v6239_v5 = vcombine.high %v6182_v45, %v6198_v11  ;;  %v6271_v33 = vcombine.high %v6214_v38, %v6230_v20 }
 0x962   : > { %v11927_v51 = vpop.trf.xlu1  ;;  %v11929_v62 = vpop.trf.xlu0  ;;  %v6318_v54 = vrot.slane %v8204_v4, %v11637_v47  ;;  %v6334_v60 = vrot.slane %v8206_v17, %v11637_v47  ;;  %v12003_v8 = vrot.slane %v8208_v53, %v11637_v47  ;;  %v12009_v13 = vrot.slane %v8210_v22, %v11637_v47 }
 0x963   : > { %v12027_v7 = vrot.slane %v6103_v61, %v11642_v58  ;;  %v12030_v22 = vrot.slane %v6135_v14, %v11642_v58  ;;  %v12033_v45 = vrot.slane %v6238_v9, %v11642_v58  ;;  %v12036_v11 = vrot.slane %v6270_v3, %v11642_v58 }
 0x964   : > { %v12039_v38 = vrot.slane %v6239_v5, %v11642_v58  ;;  %v12042_v20 = vrot.slane %v6271_v33, %v11642_v58  ;;  %v6374_v61 = vcombine.low %v6318_v54, %v6334_v60  ;;  %v6406_v14 = vcombine.low %v12003_v8, %v12009_v13 }
 0x965   : > { %6866 = vrot.lane.b32.xlu1 %v6167_v18, %s9477_s17  ;;  %v6454_v9 = vrot.slane %v8212_v39, %v11637_v47  ;;  %v13558_v18 = vcombine.high %v11859_v55, %v11862_v52  ;;  %v6375_v34 = vcombine.high %v6318_v54, %v6334_v60  ;;  %v13559_v1 = vcombine.low %v11865_v41, %v11870_v27 }
 0x966   : > { %v11978_v40 = vpop.trf.xlu1  ;;  %v11980_v28 = vpop.trf.xlu0  ;;  %v12063_v26 = vrot.slane %v8218_v30, %v11637_v47  ;;  %v6407_v41 = vcombine.high %v12003_v8, %v12009_v13  ;;  %v12088_v30 = vrot.slane %v6374_v61, %v11642_v58 }
 0x967   : > { %v6470_v3 = vrot.slane %v13558_v18, %v11637_v47  ;;  %v12060_v57 = vrot.slane %v13559_v1, %v11637_v47 }
 0x969   : > { %v6510_v27 = vcombine.low %v6454_v9, %v6470_v3  ;;  %v6511_v60 = vcombine.high %v6454_v9, %v6470_v3 }
 0x96a   : > { %v12019_v17 = vpop.trf.xlu1  ;;  %v12021_v53 = vpop.trf.xlu0 }
 0x96e   : > { %v4662_v5 = vpop.trf.xlu1  ;;  %v4630_v33 = vpop.trf.xlu0 }
 0x96f   : > { %v4726_v49 = vcombine.low %v11756_v25, %v4662_v5  ;;  %v4727_v55 = vcombine.high %v11756_v25, %v4662_v5  ;;  %v4710_v52 = vcombine.low %v11758_v43, %v4630_v33  ;;  %v4711_v54 = vcombine.high %v11758_v43, %v4630_v33 }
 0x971   : > { %v4734_v1 = vrot.slane %v4726_v49, %v11637_v47  ;;  %v4741_v25 = vrot.slane %v4727_v55, %v11637_v47  ;;  %v4718_v18 = vrot.slane %v4710_v52, %v11637_v47  ;;  %v4725_v43 = vrot.slane %v4711_v54, %v11637_v47 }
 0x972   : > { %v4663_v5 = vpop.trf.xlu1  ;;  %v4631_v33 = vpop.trf.xlu0  ;;  %v12091_v49 = vrot.slane %v6406_v14, %v11642_v58  ;;  %v12094_v55 = vrot.slane %v6375_v34, %v11642_v58  ;;  %v6542_v52 = vcombine.low %v12060_v57, %v12063_v26 }
 0x973   : > { %v4862_v54 = vcombine.low %v11792_v44, %v4663_v5  ;;  %v4863_v39 = vcombine.high %v11792_v44, %v4663_v5  ;;  %v4846_v8 = vcombine.low %v11794_v19, %v4631_v33  ;;  %v4847_v13 = vcombine.high %v11794_v19, %v4631_v33 }
 0x974   : > { %v4774_v9 = vcombine.low %v4718_v18, %v4734_v1  ;;  %v4775_v61 = vcombine.high %v4718_v18, %v4734_v1  ;;  %v4790_v3 = vcombine.low %v4725_v43, %v4741_v25  ;;  %v4791_v4 = vcombine.high %v4725_v43, %v4741_v25 }
 0x975   : > { %v4870_v14 = vrot.slane %v4862_v54, %v11637_v47  ;;  %v4877_v34 = vrot.slane %v4863_v39, %v11637_v47  ;;  %v4854_v2 = vrot.slane %v4846_v8, %v11637_v47  ;;  %v4861_v29 = vrot.slane %v4847_v13, %v11637_v47 }
 0x976   : > { %v4664_v0 = vpop.trf.xlu1  ;;  %v4632_v48 = vpop.trf.xlu0  ;;  %v12107_v44 = vrot.slane %v6407_v41, %v11642_v58  ;;  %v12110_v5 = vrot.slane %v6510_v27, %v11642_v58  ;;  %v12113_v19 = vrot.slane %v6511_v60, %v11642_v58  ;;  %v12118_v33 = vrot.slane %v6542_v52, %v11642_v58 }
 0x977   : > { %v4910_v25 = vcombine.low %v4854_v2, %v4870_v14  ;;  %v4911_v39 = vcombine.high %v4854_v2, %v4870_v14  ;;  %v4926_v18 = vcombine.low %v4861_v29, %v4877_v34  ;;  %v4927_v43 = vcombine.high %v4861_v29, %v4877_v34 }
 0x978   : > { %13560 = vst [vmem:[#allocation61_spill] sm:$0xff] %v12113_v19  ;;  %v13561_v41 = vcombine.low %v11922_v15, %v11925_v10  ;;  %v13562_v60 = vcombine.high %v11922_v15, %v11925_v10  ;;  %v13563_v2 = vcombine.low %v11932_v42, %v11935_v31  ;;  %v4782_v52 = vrot.slane %v4774_v9, %v11642_v58 }
 0x979   : > { %v4789_v8 = vrot.slane %v4775_v61, %v11642_v58  ;;  %v4798_v13 = vrot.slane %v4790_v3, %v11642_v58  ;;  %v4805_v14 = vrot.slane %v4791_v4, %v11642_v58  ;;  %v4998_v34 = vcombine.low %v11825_v12, %v4664_v0 }
 0x97a   : > { %v12124_v54 = vrot.slane %v13561_v41, %v11637_v47  ;;  %v12130_v27 = vrot.slane %v13562_v60, %v11637_v47  ;;  %v12136_v29 = vrot.slane %v13563_v2, %v11637_v47  ;;  %v4999_v15 = vcombine.high %v11825_v12, %v4664_v0  ;;  %v4665_v0 = vpop.trf.xlu1  ;;  %v4633_v16 = vpop.trf.xlu0 }
 0x97b   : > { %v4982_v10 = vcombine.low %v11827_v50, %v4632_v48  ;;  %v4983_v41 = vcombine.high %v11827_v50, %v4632_v48  ;;  %v4918_v60 = vrot.slane %v4910_v25, %v11642_v58  ;;  %v4925_v2 = vrot.slane %v4911_v39, %v11642_v58 }
 0x97c   : > { %v4934_v9 = vrot.slane %v4926_v18, %v11642_v58  ;;  %v4941_v61 = vrot.slane %v4927_v43, %v11642_v58  ;;  %v5006_v3 = vrot.slane %v4998_v34, %v11637_v47  ;;  %v5013_v4 = vrot.slane %v4999_v15, %v11637_v47 }
 0x97d   : > { %v4990_v1 = vrot.slane %v4982_v10, %v11637_v47  ;;  %v4997_v12 = vrot.slane %v4983_v41, %v11637_v47  ;;  %v8173_v24 = vcombine.low %v4782_v52, %v4789_v8  ;;  %v8175_v50 = vcombine.high %v4782_v52, %v4789_v8 }
 0x97e   : > { %v13564_v48 = vcombine.high %v11932_v42, %v11935_v31  ;;  %v8177_v18 = vcombine.low %v4798_v13, %v4805_v14  ;;  %v8179_v43 = vcombine.high %v4798_v13, %v4805_v14  ;;  %v5134_v41 = vcombine.low %v11854_v21, %v4665_v0 }
 0x97f   : > { %v5046_v34 = vcombine.low %v4990_v1, %v5006_v3  ;;  %v5047_v15 = vcombine.high %v4990_v1, %v5006_v3  ;;  %v5062_v10 = vcombine.low %v4997_v12, %v5013_v4  ;;  %v5063_v56 = vcombine.high %v4997_v12, %v5013_v4 }
 0x980   : > { %v12158_v25 = vrot.slane %v13564_v48, %v11637_v47  ;;  %v5118_v63 = vcombine.low %v11856_v46, %v4633_v16  ;;  %v8181_v52 = vcombine.low %v4918_v60, %v4925_v2  ;;  %v8183_v8 = vcombine.high %v4918_v60, %v4925_v2  ;;  %v4666_v2 = vpop.trf.xlu1 }
 0x981   : > { %v8185_v6 = vcombine.low %v4934_v9, %v4941_v61  ;;  %v8187_v19 = vcombine.high %v4934_v9, %v4941_v61  ;;  %v5054_v42 = vrot.slane %v5046_v34, %v11642_v58  ;;  %v5061_v31 = vrot.slane %v5047_v15, %v11642_v58 }
 0x982   : > { %v5135_v48 = vcombine.high %v11854_v21, %v4665_v0  ;;  %v5119_v13 = vcombine.high %v11856_v46, %v4633_v16  ;;  %v12169_v1 = vrot.slane %v8173_v24, %v11637_v47  ;;  %v12172_v14 = vrot.slane %v8175_v50, %v11637_v47  ;;  %v4634_v24 = vpop.trf.xlu0 }
 0x983   : > { %v12175_v3 = vrot.slane %v8177_v18, %v11637_v47  ;;  %v12178_v60 = vrot.slane %v8179_v43, %v11637_v47  ;;  %v5070_v9 = vrot.slane %v5062_v10, %v11642_v58  ;;  %v5077_v61 = vrot.slane %v5063_v56, %v11642_v58 }
 0x984   : > { %v5142_v21 = vrot.slane %v5134_v41, %v11637_v47  ;;  %v5126_v46 = vrot.slane %v5118_v63, %v11637_v47  ;;  %v12185_v16 = vrot.slane %v8181_v52, %v11637_v47  ;;  %v12188_v4 = vrot.slane %v8183_v8, %v11637_v47 }
 0x985   : > { %v12191_v12 = vrot.slane %v8185_v6, %v11637_v47  ;;  %v12194_v0 = vrot.slane %v8187_v19, %v11637_v47  ;;  %v8189_v50 = vcombine.low %v5054_v42, %v5061_v31  ;;  %v8191_v18 = vcombine.high %v5054_v42, %v5061_v31 }
 0x986   : > { %v12197_v56 = vrot.slane %v5135_v48, %v11637_v47  ;;  %v12200_v63 = vrot.slane %v5119_v13, %v11637_v47  ;;  %v5270_v43 = vcombine.low %v11902_v35, %v4666_v2  ;;  %v5271_v34 = vcombine.high %v11902_v35, %v4666_v2  ;;  %v4667_v13 = vpop.trf.xlu1 }
 0x987   : > { %v5254_v15 = vcombine.low %v11904_v59, %v4634_v24  ;;  %v5255_v6 = vcombine.high %v11904_v59, %v4634_v24  ;;  %v8193_v10 = vcombine.low %v5070_v9, %v5077_v61  ;;  %v8195_v41 = vcombine.high %v5070_v9, %v5077_v61  ;;  %v4635_v9 = vpop.trf.xlu0 }
 0x988   : > { %v5182_v19 = vcombine.low %v5126_v46, %v5142_v21  ;;  %v5183_v52 = vcombine.high %v5126_v46, %v5142_v21  ;;  %v5278_v8 = vrot.slane %v5270_v43, %v11637_v47  ;;  %v5285_v42 = vrot.slane %v5271_v34, %v11637_v47 }
 0x989   : > { %v5262_v31 = vrot.slane %v5254_v15, %v11637_v47  ;;  %v5269_v48 = vrot.slane %v5255_v6, %v11637_v47  ;;  %v12211_v39 = vrot.slane %v8189_v50, %v11637_v47  ;;  %v12214_v35 = vrot.slane %v8191_v18, %v11637_v47 }
 0x98a   : > { %v5846_v43 = vcombine.low %v12169_v1, %v12172_v14  ;;  %v5878_v50 = vcombine.low %v12175_v3, %v12178_v60  ;;  %v5406_v18 = vcombine.low %v11927_v51, %v4667_v13  ;;  %v5407_v34 = vcombine.high %v11927_v51, %v4667_v13  ;;  %v4668_v59 = vpop.trf.xlu1 }
 0x98b   : > { %v5318_v61 = vcombine.low %v5262_v31, %v5278_v8  ;;  %v5319_v21 = vcombine.high %v5262_v31, %v5278_v8  ;;  %v5334_v46 = vcombine.low %v5269_v48, %v5285_v42  ;;  %v5335_v24 = vcombine.high %v5269_v48, %v5285_v42 }
 0x98c   : > { %v5854_v31 = vrot.slane %v5846_v43, %v11642_v58  ;;  %v5886_v48 = vrot.slane %v5878_v50, %v11642_v58  ;;  %v5414_v2 = vrot.slane %v5406_v18, %v11637_v47  ;;  %v5421_v51 = vrot.slane %v5407_v34, %v11637_v47  ;;  %v4636_v34 = vpop.trf.xlu0 }
 0x98d   : > { %v12227_v15 = vrot.slane %v5318_v61, %v11642_v58  ;;  %v12230_v6 = vrot.slane %v5319_v21, %v11642_v58  ;;  %v12233_v8 = vrot.slane %v5334_v46, %v11642_v58  ;;  %v12236_v42 = vrot.slane %v5335_v24, %v11642_v58 }
 0x98e   : > { %v5899_v24 = vcombine.high %v5854_v31, %v5886_v48  ;;  %v5898_v43 = vcombine.low %v5854_v31, %v5886_v48  ;;  %v5390_v50 = vcombine.low %v11929_v62, %v4635_v9  ;;  %v5391_v18 = vcombine.high %v11929_v62, %v4635_v9 }
 0x98f   : > { %v12253_v36 = vrot.slane %v8193_v10, %v11637_v47  ;;  %v12256_v13 = vrot.slane %v8195_v41, %v11637_v47  ;;  %v12259_v61 = vrot.slane %v5182_v19, %v11642_v58  ;;  %v12262_v21 = vrot.slane %v5183_v52, %v11642_v58 }
 0x990   : > { %6990 = vrot.lane.b32.xlu1 %v5899_v24, %s9480_s21  ;;  %6958 = vrot.lane.b32.xlu0 %v5898_v43, %s9481_s22  ;;  %v5398_v62 = vrot.slane %v5390_v50, %v11637_v47  ;;  %v5405_v10 = vrot.slane %v5391_v18, %v11637_v47  ;;  %v5982_v41 = vcombine.low %v12185_v16, %v12188_v4 }
 0x991   : > { %v6014_v19 = vcombine.low %v12191_v12, %v12194_v0  ;;  %v5542_v9 = vcombine.low %v11978_v40, %v4668_v59  ;;  %v5543_v52 = vcombine.high %v11978_v40, %v4668_v59  ;;  %v5526_v31 = vcombine.low %v11980_v28, %v4636_v34 }
 0x992   : > { %v5454_v48 = vcombine.low %v5398_v62, %v5414_v2  ;;  %v5455_v24 = vcombine.high %v5398_v62, %v5414_v2  ;;  %v5470_v46 = vcombine.low %v5405_v10, %v5421_v51  ;;  %v5471_v43 = vcombine.high %v5405_v10, %v5421_v51 }
 0x993   : > { %v12276_v50 = vrot.slane %v5982_v41, %v11642_v58  ;;  %v12279_v18 = vrot.slane %v6014_v19, %v11642_v58  ;;  %v5550_v23 = vrot.slane %v5542_v9, %v11637_v47  ;;  %v5557_v32 = vrot.slane %v5543_v52, %v11637_v47 }
 0x994   : > { %v12284_v37 = vrot.slane %v5454_v48, %v11642_v58  ;;  %v12287_v40 = vrot.slane %v5455_v24, %v11642_v58  ;;  %v12290_v59 = vrot.slane %v5470_v46, %v11642_v58  ;;  %v12293_v2 = vrot.slane %v5471_v43, %v11642_v58  ;;  %v4669_v24 = vpop.trf.xlu1  ;;  %v4637_v43 = vpop.trf.xlu0 }
 0x995   : > { %v13565_v51 = vcombine.low %v12027_v7, %v12030_v22  ;;  %v6034_v62 = vcombine.low %v12276_v50, %v12279_v18  ;;  %v5527_v10 = vcombine.high %v11980_v28, %v4636_v34  ;;  %v5534_v41 = vrot.slane %v5526_v31, %v11637_v47 }
 0x996   : > { %v5847_v19 = vcombine.high %v12169_v1, %v12172_v14  ;;  %v8213_v46 = vcombine.low %v12284_v37, %v12287_v40  ;;  %v13566_v28 = vcombine.low %v12200_v63, %v12197_v56  ;;  %v8197_v48 = vcombine.low %v12259_v61, %v12262_v21 }
 0x997   : > { %6898 = vrot.lane.b32.xlu1 %v13565_v51, %s9479_s20  ;;  %6960 = vrot.lane.b32.xlu0 %v6034_v62, %s9481_s22  ;;  %v5541_v1 = vrot.slane %v5527_v10, %v11637_v47  ;;  %v5590_v14 = vcombine.low %v5534_v41, %v5550_v23  ;;  %v5591_v31 = vcombine.high %v5534_v41, %v5550_v23 }
 0x998   : > { %v12317_v34 = vrot.slane %v13566_v28, %v11642_v58  ;;  %v13567_v51 = vcombine.high %v12200_v63, %v12197_v56  ;;  %v8199_v28 = vcombine.high %v12259_v61, %v12262_v21  ;;  %v12330_v9 = vrot.slane %v5847_v19, %v11642_v58 }
 0x999   : > { %v12333_v62 = vrot.slane %v5590_v14, %v11642_v58  ;;  %v12336_v23 = vrot.slane %v5591_v31, %v11642_v58  ;;  %v5606_v10 = vcombine.low %v5541_v1, %v5557_v32  ;;  %v5607_v41 = vcombine.high %v5541_v1, %v5557_v32 }
 0x99a   : > { %v5213_v52 = vrot.slane %v13567_v51, %v11642_v58  ;;  %v5879_v56 = vcombine.high %v12175_v3, %v12178_v60  ;;  %v5678_v63 = vcombine.low %v12019_v17, %v4669_v24  ;;  %v5679_v51 = vcombine.high %v12019_v17, %v4669_v24 }
 0x99b   : > { %v5662_v61 = vcombine.low %v12021_v53, %v4637_v43  ;;  %v12344_v21 = vrot.slane %v5606_v10, %v11642_v58  ;;  %v12347_v19 = vrot.slane %v5607_v41, %v11642_v58  ;;  %v13568_v3 = vcombine.high %v12033_v45, %v12036_v11 }
 0x99c   : > { %v5893_v17 = vrot.slane %v5879_v56, %v11642_v58  ;;  %v5686_v60 = vrot.slane %v5678_v63, %v11637_v47  ;;  %v5693_v1 = vrot.slane %v5679_v51, %v11637_v47  ;;  %v5663_v31 = vcombine.high %v12021_v53, %v4637_v43 }
 0x99d   : > { %6868 = vrot.lane.b32.xlu0 %v13568_v3, %s9477_s17  ;;  %v8201_v24 = vcombine.low %v12317_v34, %v5213_v52  ;;  %v8203_v10 = vcombine.high %v12317_v34, %v5213_v52  ;;  %v12368_v3 = vrot.slane %v8197_v48, %v11637_v47  ;;  %v5670_v63 = vrot.slane %v5662_v61, %v11637_v47 }
 0x99e   : > { %v5900_v56 = vcombine.low %v12330_v9, %v5893_v17  ;;  %v5677_v51 = vrot.slane %v5663_v31, %v11637_v47  ;;  %v12374_v53 = vrot.slane %v8199_v28, %v11637_v47  ;;  %v13569_v52 = vcombine.low %v12227_v15, %v12230_v6 }
 0x99f   : > { %v6035_v43 = vcombine.high %v12276_v50, %v12279_v18  ;;  %v5983_v48 = vcombine.high %v12185_v16, %v12188_v4  ;;  %v5726_v61 = vcombine.low %v5670_v63, %v5686_v60  ;;  %v5727_v31 = vcombine.high %v5670_v63, %v5686_v60 }
 0x9a0   : > { %v12380_v34 = vrot.slane %v13569_v52, %v11637_v47  ;;  %7022 = vrot.lane.b32.xlu1 %v5900_v56, %s9482_s23  ;;  %v5742_v32 = vcombine.low %v5677_v51, %v5693_v1  ;;  %v5743_v28 = vcombine.high %v5677_v51, %v5693_v1  ;;  %v13570_v41 = vcombine.high %v12227_v15, %v12230_v6 }
 0x9a1   : > { %6992 = vrot.lane.b32.xlu0 %v6035_v43, %s9480_s21  ;;  %v6015_v50 = vcombine.high %v12191_v12, %v12194_v0  ;;  %v6118_v16 = vcombine.low %v12211_v39, %v12214_v35  ;;  %v6150_v4 = vcombine.low %v12253_v36, %v12256_v13  ;;  %v5734_v18 = vrot.slane %v5726_v61, %v11642_v58 }
 0x9a2   : > { %v12391_v14 = vrot.slane %v13570_v41, %v11637_v47  ;;  %v5741_v60 = vrot.slane %v5727_v31, %v11642_v58  ;;  %v5750_v1 = vrot.slane %v5742_v32, %v11642_v58  ;;  %v5757_v15 = vrot.slane %v5743_v28, %v11642_v58 }
 0x9a3   : > { %v13571_v6 = vcombine.low %v12233_v8, %v12236_v42  ;;  %v13572_v12 = vcombine.high %v12233_v8, %v12236_v42  ;;  %v5997_v56 = vrot.slane %v5983_v48, %v11642_v58  ;;  %v6029_v63 = vrot.slane %v6015_v50, %v11642_v58 }
 0x9a4   : > { %v8229_v51 = vcombine.low %v5734_v18, %v5741_v60  ;;  %v8231_v32 = vcombine.high %v5734_v18, %v5741_v60  ;;  %v8233_v52 = vcombine.low %v5750_v1, %v5757_v15  ;;  %v8235_v43 = vcombine.high %v5750_v1, %v5757_v15 }
 0x9a5   : > { %v12408_v41 = vrot.slane %v13571_v6, %v11637_v47  ;;  %v12414_v0 = vrot.slane %v13572_v12, %v11637_v47  ;;  %v13573_v61 = vcombine.high %v12027_v7, %v12030_v22  ;;  %v12423_v31 = vrot.slane %v8201_v24, %v11637_v47 }
 0x9a6   : > { %v12426_v8 = vrot.slane %v8203_v10, %v11637_v47  ;;  %v13574_v42 = vcombine.low %v12039_v38, %v12042_v20  ;;  %v6439_v48 = vcombine.high %v12088_v30, %v12091_v49  ;;  %v6440_v28 = vcombine.low %v12094_v55, %v12107_v44 }
 0x9a7   : > { %6930 = vrot.lane.b32.xlu1 %v13573_v61, %s9478_s19  ;;  %v5901_v7 = vcombine.high %v12330_v9, %v5893_v17  ;;  %v6126_v22 = vrot.slane %v6118_v16, %v11642_v58  ;;  %v6158_v24 = vrot.slane %v6150_v4, %v11642_v58  ;;  %v13575_v10 = vcombine.high %v12060_v57, %v12063_v26 }
 0x9a8   : > { %6900 = vrot.lane.b32.xlu0 %v13574_v42, %s9479_s20  ;;  %v6036_v18 = vcombine.low %v5997_v56, %v6029_v63  ;;  %v6575_v60 = vcombine.high %v12110_v5, %v12118_v33  ;;  %v13576_v1 = vcombine.low %v12124_v54, %v12130_v27  ;;  %v6678_v9 = vcombine.low %v12136_v29, %v12158_v25 }
 0x9a9   : > { %v12443_v50 = vrot.slane %v13575_v10, %v11642_v58  ;;  %v12459_v26 = vrot.slane %v8213_v46, %v11637_v47  ;;  %v6254_v57 = vcombine.low %v12368_v3, %v12374_v53  ;;  %v6390_v17 = vcombine.low %v12380_v34, %v12391_v14 }
 0x9aa   : > { %v12451_v15 = vrot.slane %v13576_v1, %v11642_v58  ;;  %v6422_v16 = vcombine.low %v12408_v41, %v12414_v0  ;;  %v13577_v4 = vcombine.high %v12284_v37, %v12287_v40  ;;  %v13578_v46 = vcombine.low %v12290_v59, %v12293_v2 }
 0x9ab   : > { %7054 = vrot.lane.b32.xlu1 %v5901_v7, %s9483_s24  ;;  %v13579_v61 = vcombine.high %v12290_v59, %v12293_v2  ;;  %v6286_v7 = vcombine.low %v12423_v31, %v12426_v8  ;;  %v13580_v37 = vcombine.low %v12333_v62, %v12336_v23  ;;  %v6170_v10 = vcombine.low %v6126_v22, %v6158_v24 }
 0x9ac   : > { %v6477_v6 = vrot.slane %v13577_v4, %v11637_v47  ;;  %v6493_v12 = vrot.slane %v13578_v46, %v11637_v47  ;;  %7024 = vrot.lane.b32.xlu0 %v6036_v18, %s9482_s23  ;;  %v12490_v1 = vrot.slane %v6390_v17, %v11642_v58  ;;  %v12493_v4 = vrot.slane %v6422_v16, %v11642_v58 }
 0x9ad   : > { %v6509_v42 = vrot.slane %v13579_v61, %v11637_v47  ;;  %v12487_v40 = vrot.slane %v13580_v37, %v11637_v47  ;;  %v13581_v59 = vcombine.high %v12333_v62, %v12336_v23  ;;  %v13582_v18 = vcombine.low %v12344_v21, %v12347_v19 }
 0x9ae   : > { %v13583_v17 = vcombine.high %v12344_v21, %v12347_v19  ;;  %v6037_v16 = vcombine.high %v5997_v56, %v6029_v63  ;;  %v6171_v37 = vcombine.high %v6126_v22, %v6158_v24  ;;  %v12515_v62 = vrot.slane %v6254_v57, %v11642_v58 }
 0x9af   : > { %v12499_v2 = vrot.slane %v13581_v59, %v11637_v47  ;;  %v12505_v46 = vrot.slane %v13582_v18, %v11637_v47  ;;  %6962 = vrot.lane.b32.xlu1 %v6170_v10, %s9481_s22  ;;  %v6119_v23 = vcombine.high %v12211_v39, %v12214_v35  ;;  %v6442_v59 = vcombine.low %v12490_v1, %v12493_v4  ;;  %v13586_v10 = vld [vmem:[#allocation19_spill] sm:$0xff] }
 0x9b0   : > { %v12511_v61 = vrot.slane %v13583_v17, %v11637_v47  ;;  %v13584_v18 = vcombine.high %v12039_v38, %v12042_v20  ;;  %v12526_v21 = vrot.slane %v6286_v7, %v11642_v58  ;;  %v6151_v19 = vcombine.high %v12253_v36, %v12256_v13  ;;  %v13585_v7 = vld [vmem:[#allocation25_spill] sm:$0xff] }
 0x9b1   : > { %v6443_v56 = vcombine.high %v12490_v1, %v12493_v4  ;;  %v6526_v63 = vcombine.low %v12459_v26, %v6477_v6  ;;  %v6733_v39 = vrot.slane %v8229_v51, %v11637_v47  ;;  %v6558_v35 = vcombine.low %v6493_v12, %v6509_v42 }
 0x9b2   : > { %6932 = vrot.lane.b32.xlu0 %v13584_v18, %s9478_s19  ;;  %v6391_v22 = vcombine.high %v12380_v34, %v12391_v14  ;;  %v6423_v38 = vcombine.high %v12408_v41, %v12414_v0  ;;  %v6749_v20 = vrot.slane %v8231_v32, %v11637_v47  ;;  %v6765_v24 = vrot.slane %v8233_v52, %v11637_v47 }
 0x9b3   : > { %v6781_v36 = vrot.slane %v8235_v43, %v11637_v47  ;;  %v12542_v13 = vrot.slane %v6526_v63, %v11642_v58  ;;  %6870 = vrot.lane.b32.xlu1 %v6439_v48, %s9477_s17  ;;  %v6255_v51 = vcombine.high %v12368_v3, %v12374_v53  ;;  %v12548_v57 = vrot.slane %v6558_v35, %v11642_v58 }
 0x9b4   : > { %v12551_v14 = vrot.slane %v6391_v22, %v11642_v58  ;;  %v12554_v34 = vrot.slane %v6423_v38, %v11642_v58  ;;  %v6306_v41 = vcombine.low %v12515_v62, %v12526_v21  ;;  %v12560_v0 = vrot.slane %v6119_v23, %v11642_v58 }
 0x9b5   : > { %v12563_v32 = vrot.slane %v6151_v19, %v11642_v58  ;;  %v6287_v52 = vcombine.high %v12423_v31, %v12426_v8  ;;  %v6578_v43 = vcombine.low %v12542_v13, %v12548_v57  ;;  %v13587_v17 = vcombine.low %v13585_v7, %v13586_v10  ;;  %v13589_v8 = vld [vmem:[#allocation44_spill] sm:$0xff]  ;;  %v13590_v19 = vld [vmem:[#allocation59_spill] sm:$0xff] }
 0x9b6   : > { %7056 = vrot.lane.b32.xlu0 %v6037_v16, %s9483_s24  ;;  %v6444_v48 = vcombine.low %v12551_v14, %v12554_v34  ;;  %v6579_v23 = vcombine.high %v12542_v13, %v12548_v57  ;;  %v13588_v18 = vcombine.high %v13585_v7, %v13586_v10  ;;  %v13591_v63 = vcombine.low %v13589_v8, %v13590_v19 }
 0x9b7   : > { %v12575_v16 = vrot.slane %v13587_v17, %v11637_v47  ;;  %v13592_v22 = vcombine.high %v13589_v8, %v13590_v19  ;;  %v6445_v17 = vcombine.high %v12551_v14, %v12554_v34  ;;  %6994 = vrot.lane.b32.xlu1 %v6171_v37, %s9480_s21  ;;  %v12601_v7 = vrot.slane %v6678_v9, %v11642_v58 }
 0x9b8   : > { %v12583_v31 = vrot.slane %v13588_v18, %v11637_v47  ;;  %v12589_v35 = vrot.slane %v13591_v63, %v11637_v47  ;;  %v6527_v10 = vcombine.high %v12459_v26, %v6477_v6  ;;  %v6559_v18 = vcombine.high %v6493_v12, %v6509_v42 }
 0x9b9   : > { %v12595_v38 = vrot.slane %v13592_v22, %v11637_v47  ;;  %v6662_v63 = vcombine.low %v12487_v40, %v12499_v2  ;;  %v6172_v47 = vcombine.low %v12560_v0, %v12563_v32  ;;  %v6694_v8 = vcombine.low %v12505_v46, %v12511_v61 }
 0x9ba   : > { %6964 = vrot.lane.b32.xlu0 %v6306_v41, %s9481_s22  ;;  %v6798_v19 = vcombine.low %v6733_v39, %v6749_v20  ;;  %v6830_v22 = vcombine.low %v6765_v24, %v6781_v36  ;;  %v6307_v9 = vcombine.high %v12515_v62, %v12526_v21  ;;  %v12614_v37 = vrot.slane %v6527_v10, %v11642_v58 }
 0x9bb   : > { %v12617_v26 = vrot.slane %v6559_v18, %v11642_v58  ;;  %v12620_v6 = vrot.slane %v6662_v63, %v11642_v58  ;;  %v6782_v12 = vcombine.low %v12575_v16, %v12583_v31  ;;  %v6814_v42 = vcombine.low %v12589_v35, %v12595_v38  ;;  %6902 = vrot.lane.b32.xlu1 %v6440_v28, %s9479_s20  ;;  %v7140_v28 = vld [vmem:[%s13167_s6] sm:$0xff]  ;;  %v13593_v18 = vld [vmem:[#allocation61_spill] sm:$0xff] }
 0x9bc   : > { %v12627_v41 = vrot.slane %v6694_v8, %v11642_v58  ;;  %v12630_v62 = vrot.slane %v6798_v19, %v11642_v58  ;;  %v12639_v10 = vrot.slane %v6830_v22, %v11642_v58  ;;  %v6799_v63 = vcombine.high %v6733_v39, %v6749_v20 }
 0x9bd   : > { %v6831_v19 = vcombine.high %v6765_v24, %v6781_v36  ;;  %v6663_v22 = vcombine.high %v12487_v40, %v12499_v2  ;;  %v7141_v40 = vld [vmem:[%s13167_s6 + $0x8] sm:$0xff]  ;;  %v12669_v2 = vrot.slane %v6782_v12, %v11642_v58  ;;  %v12672_v24 = vrot.slane %v6814_v42, %v11642_v58 }
 0x9be   : > { %6872 = vrot.lane.b32.xlu0 %v6575_v60, %s9477_s17  ;;  %v12658_v20 = vrot.slane %v6799_v63, %v11642_v58  ;;  %v6695_v60 = vcombine.high %v12505_v46, %v12511_v61  ;;  %v7142_v46 = vld [vmem:[%s13167_s6 + $0x10] sm:$0xff]  ;;  %v7143_v61 = vld [vmem:[%s13167_s6 + $0x18] sm:$0xff]  ;;  %v6441_v42 = vcombine.high %v12094_v55, %v12107_v44  ;;  %v9049_v39 = vpack.c.bf16 %v7141_v40, %v7140_v28 }
 0x9bf   : > { %v12675_v36 = vrot.slane %v6831_v19, %v11642_v58  ;;  %v12678_v63 = vrot.slane %v6663_v22, %v11642_v58  ;;  %7026 = vrot.lane.b32.xlu1 %v6172_v47, %s9482_s23  ;;  %v6576_v21 = vcombine.low %v13593_v18, %v12443_v50  ;;  %v9053_v8 = vpack.c.bf16 %v7143_v61, %v7142_v46 }
 0x9c0   : > { %v12688_v12 = vrot.slane %v6695_v60, %v11642_v58  ;;  %v6269_v55 = vrot.slane %v6255_v51, %v11642_v58  ;;  %v6301_v44 = vrot.slane %v6287_v52, %v11642_v58  ;;  %9050 = vmatprep.subr.bf16.mxu1 %v9049_v39  ;;  %v6846_v28 = vcombine.low %v12669_v2, %v12672_v24 }
 0x9c1   : > { %v6852_v19 = vcombine.low %v12658_v20, %v12675_v36  ;;  %v6853_v22 = vcombine.high %v12658_v20, %v12675_v36  ;;  %9052 = vmatpush3.bf16.msra.mxu1 %v9049_v39  ;;  %v6173_v20 = vcombine.high %v12560_v0, %v12563_v32  ;;  %v6577_v53 = vcombine.high %v13593_v18, %v12443_v50 }
 0x9c2   : > { %6996 = vrot.lane.b32.xlu0 %v6307_v9, %s9480_s21  ;;  %v6716_v47 = vcombine.low %v12678_v63, %v12688_v12  ;;  %v6717_v60 = vcombine.high %v12678_v63, %v12688_v12  ;;  %v6710_v9 = vcombine.low %v12451_v15, %v12601_v7  ;;  %9054 = vmatprep.subr.bf16.mxu1 %v9053_v8 }
 0x9c3   : > { %6934 = vrot.lane.b32.xlu1 %v6441_v42, %s9478_s19  ;;  %v6308_v3 = vcombine.low %v6269_v55, %v6301_v44  ;;  %v6711_v51 = vcombine.high %v12451_v15, %v12601_v7  ;;  %v6647_v0 = vcombine.high %v12124_v54, %v12130_v27  ;;  %v6679_v32 = vcombine.high %v12136_v29, %v12158_v25 }
 0x9c4   : > { %v6309_v52 = vcombine.high %v6269_v55, %v6301_v44  ;;  %v6847_v27 = vcombine.high %v12669_v2, %v12672_v24  ;;  %v6783_v29 = vcombine.high %v12575_v16, %v12583_v31  ;;  %v6815_v25 = vcombine.high %v12589_v35, %v12595_v38  ;;  %v6863_v38 = vpop.permute.xlu0 %6862 }
 0x9c5   : > { %9056 = vmatpush3.bf16.msra.mxu1 %v9053_v8  ;;  %v6661_v50 = vrot.slane %v6647_v0, %v11642_v58  ;;  %v13595_v13 = vcombine.low %v12620_v6, %v12627_v41  ;;  %v13596_v57 = vcombine.low %v12630_v62, %v12639_v10  ;;  %v13597_v14 = vcombine.high %v12614_v37, %v12617_v26  ;;  %v13601_v8 = vld [vmem:[#allocation33_spill] sm:$0xff] }
 0x9c6   : > { %6904 = vrot.lane.b32.xlu0 %v6576_v21, %s9479_s20  ;;  %v6797_v1 = vrot.slane %v6783_v29, %v11642_v58  ;;  %v6829_v4 = vrot.slane %v6815_v25, %v11642_v58  ;;  %v13598_v16 = vcombine.high %v12630_v62, %v12639_v10 }
 0x9c7   : > { %7058 = vrot.lane.b32.xlu1 %v6173_v20, %s9483_s24  ;;  %v6865_v34 = vpop.permute.xlu1 %6864  ;;  %v13603_v20 = vld [vmem:[#allocation23_spill] sm:$0xff] }
 0x9ca   : > { %7028 = vrot.lane.b32.xlu0 %v6308_v3, %s9482_s23  ;;  %v13604_v3 = vld [vmem:[#allocation43_spill] sm:$0xff] }
 0x9cb   : > { %6966 = vrot.lane.b32.xlu1 %v6442_v59, %s9481_s22  ;;  %v6693_v59 = vrot.slane %v6679_v32, %v11642_v58  ;;  %v13594_v58 = vcombine.low %v12614_v37, %v12617_v26  ;;  %v6895_v31 = vpop.permute.xlu1 %6894  ;;  %v6927_v37 = vpop.permute.xlu0 %6926 }
 0x9cd   : > { %v6712_v54 = vcombine.low %v6661_v50, %v6693_v59 }
 0x9ce   : > { %6936 = vrot.lane.b32.xlu0 %v6577_v53, %s9478_s19  ;;  %v13605_v53 = vcombine.low %v13603_v20, %v13604_v3 }
 0x9cf   : > { %6874 = vrot.lane.b32.xlu1 %v6711_v51, %s9477_s17  ;;  %v6897_v35 = vpop.permute.xlu1 %6896 }
 0x9d0   : > { %v7079_v51 = vsel %vm1691_vm1, %v13605_v53, %v6865_v34 }
 0x9d1   : > { %v7088_v32 = vsel %vm7086_vm6, %v7079_v51, %v6897_v35 }
 0x9d2   : > { %7060 = vrot.lane.b32.xlu0 %v6309_v52, %s9483_s24 }
 0x9d3   : > { %6998 = vrot.lane.b32.xlu1 %v6443_v56, %s9480_s21  ;;  %v6713_v56 = vcombine.high %v6661_v50, %v6693_v59 }
 0x9d6   : > { %6968 = vrot.lane.b32.xlu0 %v6578_v43, %s9481_s22  ;;  %v6848_v43 = vcombine.low %v6797_v1, %v6829_v4 }
 0x9d7   : > { %6906 = vrot.lane.b32.xlu1 %v6712_v54, %s9479_s20 }
 0x9da   : > { %6876 = vrot.lane.b32.xlu0 %v6847_v27, %s9477_s17 }
 0x9db   : > { %7030 = vrot.lane.b32.xlu1 %v6444_v48, %s9482_s23  ;;  %v6849_v48 = vcombine.high %v6797_v1, %v6829_v4 }
 0x9de   : > { %7000 = vrot.lane.b32.xlu0 %v6579_v23, %s9480_s21  ;;  %v13599_v23 = vcombine.high %v12620_v6, %v12627_v41  ;;  %v13600_v41 = vld [vmem:[#allocation18_spill] sm:$0xff] }
 0x9df   : > { %6938 = vrot.lane.b32.xlu1 %v6713_v56, %s9478_s19  ;;  %v13602_v39 = vcombine.low %v13600_v41, %v13601_v8  ;;  %v6302_v8 = vcombine.low %v12033_v45, %v12036_v11 }
 0x9e1   : > { %v7078_v40 = vsel %vm1691_vm1, %v13602_v39, %v6863_v38 }
 0x9e2   : > { %6908 = vrot.lane.b32.xlu0 %v6848_v43, %s9479_s20  ;;  %v7087_v36 = vsel %vm7086_vm6, %v7078_v40, %v6895_v31 }
 0x9e3   : > { %7062 = vrot.lane.b32.xlu1 %v6445_v17, %s9483_s24  ;;  %v6929_v17 = vpop.permute.xlu1 %6928  ;;  %v7096_v61 = vsel %vm7095_vm7, %v7087_v36, %v6927_v37 }
 0x9e4   : > { %v7097_v50 = vsel %vm7095_vm7, %v7088_v32, %v6929_v17 }
 0x9e6   : > { %7032 = vrot.lane.b32.xlu0 %v13594_v58, %s9482_s23 }
 0x9e7   : > { %6970 = vrot.lane.b32.xlu1 %v13595_v13, %s9481_s22  ;;  %v6867_v26 = vpop.permute.xlu1 %6866  ;;  %v13606_v13 = vld [vmem:[#allocation24_spill] sm:$0xff] }
 0x9ea   : > { %6940 = vrot.lane.b32.xlu0 %v6849_v48, %s9478_s19 }
 0x9eb   : > { %6972 = vrot.lane.b32.xlu1 %v13596_v57, %s9481_s22  ;;  %v13607_v57 = vld [vmem:[#allocation47_spill] sm:$0xff] }
 0x9ee   : > { %7064 = vrot.lane.b32.xlu0 %v13597_v14, %s9483_s24  ;;  %v6166_v14 = vcombine.low %v13607_v57, %v13606_v13 }
 0x9ef   : > { %7004 = vrot.lane.b32.xlu1 %v13598_v16, %s9480_s21 }
 0x9f0   : > { %v7080_v16 = vsel %vm1691_vm1, %v6166_v14, %v6867_v26 }
 0x9f2   : > { %7002 = vrot.lane.b32.xlu0 %v13599_v23, %s9480_s21 }
 0x9f3   : > { %7036 = vrot.lane.b32.xlu1 %v6852_v19, %s9482_s23 }
 0x9f6   : > { %7034 = vrot.lane.b32.xlu0 %v6716_v47, %s9482_s23 }
 0x9f7   : > { %7068 = vrot.lane.b32.xlu1 %v6853_v22, %s9483_s24 }
 0x9fa   : > { %7066 = vrot.lane.b32.xlu0 %v6717_v60, %s9483_s24  ;;  %s13608_s24 = sshll.u32 %s13610_s30, 6 }
 0x9fb   : > { %s467_s16 = scalar_lea.vmem %s13175_s14, %s13608_s24 }
 0xa02   : > { %v6959_v62 = vpop.permute.xlu0 %6958  ;;  %v6991_v21 = vpop.permute.xlu1 %6990 }
 0xa03   : > { %v7105_v12 = vsel %vm7104_vm8, %v7096_v61, %v6959_v62 }
 0xa04   : > { %v7114_v22 = vsel %vm7113_vm9, %v7105_v12, %v6991_v21 }
 0xa09   : > { %v6961_v10 = vpop.permute.xlu0 %6960  ;;  %v6899_v18 = vpop.permute.xlu1 %6898 }
 0xa0a   : > { %v7106_v59 = vsel %vm7104_vm8, %v7097_v50, %v6961_v10  ;;  %v7089_v23 = vsel %vm7086_vm6, %v7080_v16, %v6899_v18 }
 0xa0f   : > { %v6869_v6 = vpop.permute.xlu0 %6868 }
 0xa10   : > { %v7081_v26 = vsel %vm1691_vm1, %v6302_v8, %v6869_v6  ;;  %v9449_v8 = vld [vmem:[%s9576_s18 + $0x8] sm:$0xff] }
 0xa12   : > { %v7023_v63 = vpop.permute.xlu1 %7022 }
 0xa13   : > { %v6993_v46 = vpop.permute.xlu0 %6992  ;;  %v7123_v47 = vsel %vm7122_vm10, %v7114_v22, %v7023_v63 }
 0xa14   : > { %v7115_v54 = vsel %vm7113_vm9, %v7106_v59, %v6993_v46 }
 0xa19   : > { %v6931_v42 = vpop.permute.xlu1 %6930 }
 0xa1a   : > { %v6901_v19 = vpop.permute.xlu0 %6900  ;;  %v7098_v35 = vsel %vm7095_vm7, %v7089_v23, %v6931_v42 }
 0xa1b   : > { %v7090_v39 = vsel %vm7086_vm6, %v7081_v26, %v6901_v19 }
 0xa1d   : > { %v7055_v60 = vpop.permute.xlu1 %7054 }
 0xa1e   : > { %v7132_v55 = vsel %vm7131_vm11, %v7123_v47, %v7055_v60  ;;  %v7025_v44 = vpop.permute.xlu0 %7024  ;;  %v6438_v60 = vcombine.low %v12088_v30, %v12091_v49  ;;  %v6574_v30 = vcombine.low %v12110_v5, %v12118_v33 }
 0xa1f   : > { %8821 = vmatprep.mubr.msk.f32.mxu1 %vm478_vm0, %v7132_v55  ;;  %v7124_v29 = vsel %vm7122_vm10, %v7115_v54, %v7025_v44 }
 0xa21   : > { %v6963_v0 = vpop.permute.xlu1 %6962 }
 0xa22   : > { %v7107_v17 = vsel %vm7104_vm8, %v7098_v35, %v6963_v0 }
 0xa24   : > { %v6933_v52 = vpop.permute.xlu0 %6932 }
 0xa25   : > { %v6871_v27 = vpop.permute.xlu1 %6870  ;;  %v7099_v36 = vsel %vm7095_vm7, %v7090_v39, %v6933_v52  ;;  %v9450_v39 = vld [vmem:[%s9576_s18] sm:$0xff] }
 0xa26   : > { %v7082_v44 = vsel %vm1691_vm1, %v6438_v60, %v6871_v27 }
 0xa28   : > { %v7057_v25 = vpop.permute.xlu0 %7056 }
 0xa29   : > { %v7133_v1 = vsel %vm7131_vm11, %v7124_v29, %v7057_v25  ;;  %v6995_v4 = vpop.permute.xlu1 %6994 }
 0xa2a   : > { %8822 = vmatmul.mubr.msk.f32.vlgmr.msra.gmra.mrb[44].mxu1 %vm478_vm0, %v7133_v1  ;;  %v7116_v37 = vsel %vm7113_vm9, %v7107_v17, %v6995_v4 }
 0xa2c   : > { %v6965_v56 = vpop.permute.xlu0 %6964 }
 0xa2d   : > { %v6903_v43 = vpop.permute.xlu1 %6902  ;;  %v7108_v63 = vsel %vm7104_vm8, %v7099_v36, %v6965_v56 }
 0xa2e   : > { %v7091_v20 = vsel %vm7086_vm6, %v7082_v44, %v6903_v43 }
 0xa30   : > { %v6873_v58 = vpop.permute.xlu0 %6872 }
 0xa31   : > { %v7027_v48 = vpop.permute.xlu1 %7026  ;;  %v7083_v49 = vsel %vm1691_vm1, %v6574_v30, %v6873_v58  ;;  %v9455_v30 = vld [vmem:[%s9576_s18 + $0x38] sm:$0xff] }
 0xa32   : > { %v7125_v62 = vsel %vm7122_vm10, %v7116_v37, %v7027_v48 }
 0xa34   : > { %v6997_v34 = vpop.permute.xlu0 %6996 }
 0xa35   : > { %v6935_v31 = vpop.permute.xlu1 %6934  ;;  %v7117_v46 = vsel %vm7113_vm9, %v7108_v63, %v6997_v34 }
 0xa36   : > { %v7100_v53 = vsel %vm7095_vm7, %v7091_v20, %v6935_v31  ;;  %v9453_v20 = vld [vmem:[%s9576_s18 + $0x28] sm:$0xff] }
 0xa38   : > { %v6905_v38 = vpop.permute.xlu0 %6904 }
 0xa39   : > { %v7059_v21 = vpop.permute.xlu1 %7058  ;;  %v7092_v29 = vsel %vm7086_vm6, %v7083_v49, %v6905_v38 }
 0xa3a   : > { %v7134_v10 = vsel %vm7131_vm11, %v7125_v62, %v7059_v21 }
 0xa3b   : > { %8824 = vmatprep.mubr.msk.f32.mxu1 %vm478_vm0, %v7134_v10 }
 0xa3c   : > { %v7029_v41 = vpop.permute.xlu0 %7028 }
 0xa3d   : > { %v6967_v18 = vpop.permute.xlu1 %6966  ;;  %v7126_v12 = vsel %vm7122_vm10, %v7117_v46, %v7029_v41  ;;  %v8244_v41 = vld [vmem:[%s13168_s7] ss:$0 sm:$0xff] }
 0xa3e   : > { %v7109_v0 = vsel %vm7104_vm8, %v7100_v53, %v6967_v18 }
 0xa40   : > { %v6937_v40 = vpop.permute.xlu0 %6936 }
 0xa41   : > { %v6875_v61 = vpop.permute.xlu1 %6874  ;;  %v7101_v1 = vsel %vm7095_vm7, %v7092_v29, %v6937_v40  ;;  %v9456_v29 = vld [vmem:[%s9576_s18 + $0x30] sm:$0xff] }
 0xa42   : > { %v7084_v14 = vsel %vm1691_vm1, %v6710_v9, %v6875_v61 }
 0xa44   : > { %v7061_v42 = vpop.permute.xlu0 %7060 }
 0xa45   : > { %v7135_v45 = vsel %vm7131_vm11, %v7126_v12, %v7061_v42  ;;  %v6999_v11 = vpop.permute.xlu1 %6998 }
 0xa46   : > { %8825 = vmatmul.mubr.msk.f32.gmra.mrb[46].mxu1 %vm478_vm0, %v7135_v45  ;;  %v7118_v32 = vsel %vm7113_vm9, %v7109_v0, %v6999_v11  ;;  %v9451_v45 = vld [vmem:[%s9576_s18 + $0x18] sm:$0xff] }
 0xa48   : > { %v6969_v6 = vpop.permute.xlu0 %6968 }
 0xa49   : > { %v6907_v22 = vpop.permute.xlu1 %6906  ;;  %v7110_v4 = vsel %vm7104_vm8, %v7101_v1, %v6969_v6  ;;  %v9452_v6 = vld [vmem:[%s9576_s18 + $0x10] sm:$0xff] }
 0xa4a   : > { %v7093_v23 = vsel %vm7086_vm6, %v7084_v14, %v6907_v22 }
 0xa4c   : > { %v6877_v47 = vpop.permute.xlu0 %6876 }
 0xa4d   : > { %v7031_v19 = vpop.permute.xlu1 %7030  ;;  %v7085_v57 = vsel %vm1691_vm1, %v6846_v28, %v6877_v47 }
 0xa4e   : > { %v7127_v52 = vsel %vm7122_vm10, %v7118_v32, %v7031_v19 }
 0xa50   : > { %v7001_v55 = vpop.permute.xlu0 %7000 }
 0xa51   : > { %v6939_v3 = vpop.permute.xlu1 %6938  ;;  %v7119_v56 = vsel %vm7113_vm9, %v7110_v4, %v7001_v55 }
 0xa52   : > { %v7102_v38 = vsel %vm7095_vm7, %v7093_v23, %v6939_v3 }
 0xa54   : > { %v6909_v51 = vpop.permute.xlu0 %6908 }
 0xa55   : > { %v7063_v50 = vpop.permute.xlu1 %7062  ;;  %v7094_v34 = vsel %vm7086_vm6, %v7085_v57, %v6909_v51  ;;  %v9454_v51 = vld [vmem:[%s9576_s18 + $0x20] sm:$0xff] }
 0xa56   : > { %v7136_v59 = vsel %vm7131_vm11, %v7127_v52, %v7063_v50 }
 0xa57   : > { %8827 = vmatprep.mubr.msk.f32.mxu1 %vm478_vm0, %v7136_v59 }
 0xa58   : > { %v7033_v54 = vpop.permute.xlu0 %7032 }
 0xa59   : > { %v6971_v27 = vpop.permute.xlu1 %6970  ;;  %v7128_v48 = vsel %vm7122_vm10, %v7119_v56, %v7033_v54 }
 0xa5a   : > { %v7111_v2 = vsel %vm7104_vm8, %v7102_v38, %v6971_v27 }
 0xa5c   : > { %v6941_v25 = vpop.permute.xlu0 %6940 }
 0xa5d   : > { %v6973_v43 = vpop.permute.xlu1 %6972  ;;  %v7103_v31 = vsel %vm7095_vm7, %v7094_v34, %v6941_v25 }
 0xa5e   : > { %v7112_v24 = vsel %vm7104_vm8, %v7103_v31, %v6973_v43 }
 0xa60   : > { %v7065_v13 = vpop.permute.xlu0 %7064 }
 0xa61   : > { %v7137_v5 = vsel %vm7131_vm11, %v7128_v48, %v7065_v13  ;;  %v7005_v33 = vpop.permute.xlu1 %7004 }
 0xa62   : > { %8828 = vmatmul.mubr.msk.f32.gmra.mrb[48].mxu1 %vm478_vm0, %v7137_v5  ;;  %v7121_v9 = vsel %vm7113_vm9, %v7112_v24, %v7005_v33 }
 0xa64   : > { %v7003_v58 = vpop.permute.xlu0 %7002 }
 0xa65   : > { %v7037_v16 = vpop.permute.xlu1 %7036  ;;  %v7120_v15 = vsel %vm7113_vm9, %v7111_v2, %v7003_v58 }
 0xa66   : > { %v7130_v37 = vsel %vm7122_vm10, %v7121_v9, %v7037_v16 }
 0xa68   : > { %v7035_v35 = vpop.permute.xlu0 %7034 }
 0xa69   : > { %v7069_v7 = vpop.permute.xlu1 %7068  ;;  %v7129_v28 = vsel %vm7122_vm10, %v7120_v15, %v7035_v35 }
 0xa6a   : > { %v7139_v21 = vsel %vm7131_vm11, %v7130_v37, %v7069_v7  ;;  %v7432_v37 = vld [vmem:[%s13171_s10 + $0x10] sm:$0xff] }
 0xa6c   : > { %v7067_v17 = vpop.permute.xlu0 %7066 }
 0xa6d   : > { %v7138_v62 = vsel %vm7131_vm11, %v7129_v28, %v7067_v17  ;;  %v7430_v28 = vld [vmem:[%s13171_s10] sm:$0xff]  ;;  %v7431_v17 = vld [vmem:[%s13171_s10 + $0x8] sm:$0xff] }
 0xa6e   : > { %8830 = vmatprep.mubr.msk.f32.mxu1 %vm478_vm0, %v7138_v62 }
 0xa6f   : > { %8831 = vmatmul.mubr.msk.f32.gmra.mrb[50].mxu1 %vm478_vm0, %v7139_v21  ;;  %v9057_v21 = vpack.c.bf16 %v7431_v17, %v7430_v28 }
 0xa71   : > { %9058 = vmatprep.subr.bf16.mxu0 %v9057_v21 }
 0xa72   : > { %9060 = vmatpush3.bf16.msra.mxu0 %v9057_v21 }
 0xafd   : > { %v8823_v10 = vpop.f32.mrb[44].mxu1 }
 0xafe   : > { %v7274_v26 = vadd.f32 %v9449_v8, %v8823_v10  ;;  %v7234_v18 = vpop.f32.mrb[45].mxu1  ;;  %v7433_v10 = vld [vmem:[%s13171_s10 + $0x18] sm:$0xff] }
 0xaff   : > { %v7273_v40 = vadd.f32 %v9450_v39, %v7234_v18 }
 0xb00   : > { %v12885_v36 = vadd.f32 %v8244_v41, %v7274_v26 }
 0xb01   : > { %v12887_v63 = vadd.f32 %v8244_v41, %v7273_v40 }
 0xb02   : > { %v7301_v46 = vsel %vm478_vm0, %v12885_v36, 0.0 }
 0xb03   : > { %7302 = vadd.xlane.f32.xlu1 %v7301_v46  ;;  %v7298_v61 = vsel %vm478_vm0, %v12887_v63, 0.0 }
 0xb04   : > { %7299 = vadd.xlane.f32.xlu0 %v7298_v61 }
 0xb19   : > { %v8826_v12 = vpop.f32.mrb[46].mxu1 }
 0xb1a   : > { %v7244_v42 = vpop.f32.mrb[47].mxu1  ;;  %v7276_v11 = vadd.f32 %v9451_v45, %v8826_v12 }
 0xb1b   : > { %v7275_v22 = vadd.f32 %v9452_v6, %v7244_v42 }
 0xb1c   : > { %v12897_v19 = vadd.f32 %v8244_v41, %v7276_v11 }
 0xb1d   : > { %v12895_v47 = vadd.f32 %v8244_v41, %v7275_v22 }
 0xb1e   : > { %v7307_v55 = vsel %vm478_vm0, %v12897_v19, 0.0 }
 0xb1f   : > { %v7304_v60 = vsel %vm478_vm0, %v12895_v47, 0.0 }
 0xb20   : > { %7305 = vadd.xlane.f32.xlu0 %v7304_v60 }
 0xb24   : > { %7308 = vadd.xlane.f32.xlu0 %v7307_v55 }
 0xb35   : > { %v8829_v44 = vpop.f32.mrb[48].mxu1 }
 0xb36   : > { %v7278_v3 = vadd.f32 %v9453_v20, %v8829_v44  ;;  %v7254_v53 = vpop.f32.mrb[49].mxu1 }
 0xb37   : > { %v7277_v0 = vadd.f32 %v9454_v51, %v7254_v53 }
 0xb38   : > { %v12905_v32 = vadd.f32 %v8244_v41, %v7278_v3 }
 0xb39   : > { %v12907_v52 = vadd.f32 %v8244_v41, %v7277_v0 }
 0xb3a   : > { %v7313_v50 = vsel %vm478_vm0, %v12905_v32, 0.0 }
 0xb3b   : > { %7314 = vadd.xlane.f32.xlu0 %v7313_v50  ;;  %v7310_v59 = vsel %vm478_vm0, %v12907_v52, 0.0 }
 0xb3c   : > { %7311 = vadd.xlane.f32.xlu1 %v7310_v59 }
 0xb42   : > { %v8832_v54 = vpop.f32.mrb[50].mxu1 }
 0xb43   : > { %v7280_v49 = vadd.f32 %v9455_v30, %v8832_v54  ;;  %v7264_v27 = vpop.f32.mrb[51].mxu1 }
 0xb44   : > { %v7279_v25 = vadd.f32 %v9456_v29, %v7264_v27 }
 0xb45   : > { %v12915_v1 = vadd.f32 %v8244_v41, %v7280_v49 }
 0xb46   : > { %v12917_v4 = vadd.f32 %v8244_v41, %v7279_v25  ;;  %v9061_v41 = vpack.c.bf16 %v7433_v10, %v7432_v37  ;;  %v8245_v25 = vld [vmem:[%s13169_s8] ss:$0 sm:$0xff] }
 0xb47   : > { %v7319_v56 = vsel %vm478_vm0, %v12915_v1, 0.0 }
 0xb48   : > { %7320 = vadd.xlane.f32.xlu0 %v7319_v56  ;;  %v7316_v43 = vsel %vm478_vm0, %v12917_v4, 0.0  ;;  %9062 = vmatprep.subr.bf16.mxu0 %v9061_v41 }
 0xb49   : > { %7317 = vadd.xlane.f32.xlu1 %v7316_v43  ;;  %9064 = vmatpush3.bf16.msra.mxu0 %v9061_v41 }
 0xb90   : > { %v7303_v48 = vpop.xlane.xlu1 %7302 }
 0xb91   : > { %v7323_v13 = vmul.f32 0.03125, %v7303_v48  ;;  %v7300_v5 = vpop.xlane.xlu0 %7299 }
 0xb92   : > { %v7322_v33 = vmul.f32 0.03125, %v7300_v5 }
 0xb93   : > { %v12924_v58 = vsub.f32 %v12885_v36, %v7323_v13  ;;  %v8246_v13 = vld [vmem:[%s13170_s9] ss:$0 sm:$0xff] }
 0xb94   : > { %v12927_v57 = vsub.f32 %v12887_v63, %v7322_v33 }
 0xb95   : > { %v7339_v14 = vmul.f32 %v12924_v58, %v12924_v58 }
 0xb96   : > { %v7338_v34 = vmul.f32 %v12927_v57, %v12927_v57 }
 0xb97   : > { %v7349_v16 = vsel %vm478_vm0, %v7339_v14, 0.0 }
 0xb98   : > { %7350 = vadd.xlane.f32.xlu0 %v7349_v16  ;;  %v7346_v23 = vsel %vm478_vm0, %v7338_v34, 0.0 }
 0xb99   : > { %7347 = vadd.xlane.f32.xlu1 %v7346_v23 }
 0xbad   : > { %v7306_v31 = vpop.xlane.xlu0 %7305 }
 0xbae   : > { %v7324_v35 = vmul.f32 0.03125, %v7306_v31 }
 0xbb0   : > { %v12936_v38 = vsub.f32 %v12895_v47, %v7324_v35 }
 0xbb1   : > { %v7309_v2 = vpop.xlane.xlu0 %7308 }
 0xbb2   : > { %v7325_v24 = vmul.f32 0.03125, %v7309_v2  ;;  %v7340_v15 = vmul.f32 %v12936_v38, %v12936_v38 }
 0xbb4   : > { %v12941_v7 = vsub.f32 %v12897_v19, %v7325_v24  ;;  %v7352_v9 = vsel %vm478_vm0, %v7340_v15, 0.0 }
 0xbb5   : > { %7353 = vadd.xlane.f32.xlu1 %v7352_v9 }
 0xbb6   : > { %v7341_v62 = vmul.f32 %v12941_v7, %v12941_v7 }
 0xbb8   : > { %v7355_v8 = vsel %vm478_vm0, %v7341_v62, 0.0 }
 0xbb9   : > { %7356 = vadd.xlane.f32.xlu0 %v7355_v8 }
 0xbc8   : > { %v7315_v26 = vpop.xlane.xlu0 %7314 }
 0xbc9   : > { %v7327_v18 = vmul.f32 0.03125, %v7315_v26  ;;  %v7312_v39 = vpop.xlane.xlu1 %7311 }
 0xbca   : > { %v7326_v40 = vmul.f32 0.03125, %v7312_v39 }
 0xbcb   : > { %v12960_v46 = vsub.f32 %v12905_v32, %v7327_v18 }
 0xbcc   : > { %v12963_v61 = vsub.f32 %v12907_v52, %v7326_v40 }
 0xbcd   : > { %v7343_v12 = vmul.f32 %v12960_v46, %v12960_v46 }
 0xbce   : > { %v7342_v42 = vmul.f32 %v12963_v61, %v12963_v61 }
 0xbcf   : > { %v7361_v45 = vsel %vm478_vm0, %v7343_v12, 0.0 }
 0xbd0   : > { %7362 = vadd.xlane.f32.xlu0 %v7361_v45  ;;  %v7358_v11 = vsel %vm478_vm0, %v7342_v42, 0.0 }
 0xbd1   : > { %7359 = vadd.xlane.f32.xlu1 %v7358_v11 }
 0xbd5   : > { %v7321_v6 = vpop.xlane.xlu0 %7320 }
 0xbd6   : > { %v7329_v22 = vmul.f32 0.03125, %v7321_v6  ;;  %v7318_v60 = vpop.xlane.xlu1 %7317 }
 0xbd7   : > { %v7328_v55 = vmul.f32 0.03125, %v7318_v60 }
 0xbd8   : > { %v12972_v44 = vsub.f32 %v12915_v1, %v7329_v22 }
 0xbd9   : > { %v12975_v20 = vsub.f32 %v12917_v4, %v7328_v55 }
 0xbda   : > { %v7345_v3 = vmul.f32 %v12972_v44, %v12972_v44 }
 0xbdb   : > { %v7344_v53 = vmul.f32 %v12975_v20, %v12975_v20 }
 0xbdc   : > { %v7367_v51 = vsel %vm478_vm0, %v7345_v3, 0.0 }
 0xbdd   : > { %7368 = vadd.xlane.f32.xlu0 %v7367_v51  ;;  %v7364_v0 = vsel %vm478_vm0, %v7344_v53, 0.0 }
 0xbde   : > { %7365 = vadd.xlane.f32.xlu1 %v7364_v0 }
 0xc25   : > { %v7351_v50 = vpop.xlane.xlu0 %7350 }
 0xc26   : > { %v7371_v59 = vmul.f32 0.03125, %v7351_v50  ;;  %v7348_v54 = vpop.xlane.xlu1 %7347 }
 0xc27   : > { %v7370_v30 = vmul.f32 0.03125, %v7348_v54 }
 0xc28   : > { %v7379_v49 = vadd.f32 1e-05, %v7371_v59 }
 0xc29   : > { %v7378_v27 = vadd.f32 1e-05, %v7370_v30 }
 0xc2a   : > { %9401 = vrsqrt.f32 %v7379_v49  ;;  %v7786_v49 = vld [vmem:[%s13173_s12] sm:$0xff] }
 0xc2b   : > { %9403 = vrsqrt.f32 %v7378_v27  ;;  %v7787_v27 = vld [vmem:[%s13173_s12 + $0x8] sm:$0xff] }
 0xc34   : > { %v9402_v29 = vpop.eup %9401 }
 0xc35   : > { %v9404_v56 = vpop.eup %9403  ;;  %v7395_v43 = vmul.f32 %v9402_v29, %v12924_v58  ;;  %v7789_v29 = vld [vmem:[%s13173_s12 + $0x18] sm:$0xff] }
 0xc36   : > { %v7394_v48 = vmul.f32 %v9404_v56, %v12927_v57  ;;  %v7790_v56 = vld [vmem:[%s13173_s12 + $0x20] sm:$0xff] }
 0xc37   : > { %v7409_v5 = vmul.f32 %v8245_v25, %v7395_v43  ;;  %v7791_v43 = vld [vmem:[%s13173_s12 + $0x28] sm:$0xff] }
 0xc38   : > { %v7408_v33 = vmul.f32 %v8245_v25, %v7394_v48  ;;  %v9073_v48 = vpack.c.bf16 %v7791_v43, %v7790_v56 }
 0xc39   : > { %v7423_v34 = vadd.f32 %v8246_v13, %v7409_v5  ;;  %v7793_v5 = vld [vmem:[%s13173_s12 + $0x38] sm:$0xff] }
 0xc3a   : > { %v7422_v14 = vadd.f32 %v8246_v13, %v7408_v33 }
 0xc3c   : > { %8841 = vmatprep.mubr.msk.f32.mxu0 %vm478_vm0, %v7422_v14  ;;  %v7794_v14 = vld [vmem:[%s13173_s12 + $0x40] sm:$0xff] }
 0xc3d   : > { %8842 = vmatmul.mubr.msk.f32.vlgmr.msra.gmra.mrb[60].mxu0 %vm478_vm0, %v7423_v34  ;;  %v7795_v34 = vld [vmem:[%s13173_s12 + $0x48] sm:$0xff] }
 0xc42   : > { %v7354_v16 = vpop.xlane.xlu1 %7353 }
 0xc43   : > { %v7372_v23 = vmul.f32 0.03125, %v7354_v16  ;;  %v9081_v16 = vpack.c.bf16 %v7795_v34, %v7794_v14 }
 0xc45   : > { %v7380_v31 = vadd.f32 1e-05, %v7372_v23  ;;  %v7796_v23 = vld [vmem:[%s13173_s12 + $0x50] sm:$0xff] }
 0xc46   : > { %v7357_v35 = vpop.xlane.xlu0 %7356 }
 0xc47   : > { %9405 = vrsqrt.f32 %v7380_v31  ;;  %v7373_v58 = vmul.f32 0.03125, %v7357_v35  ;;  %v7797_v31 = vld [vmem:[%s13173_s12 + $0x58] sm:$0xff] }
 0xc48   : > { %v9085_v35 = vpack.c.bf16 %v7797_v31, %v7796_v23 }
 0xc49   : > { %v7381_v2 = vadd.f32 1e-05, %v7373_v58  ;;  %v7798_v58 = vld [vmem:[%s13173_s12 + $0x60] sm:$0xff] }
 0xc4b   : > { %9407 = vrsqrt.f32 %v7381_v2  ;;  %v7799_v2 = vld [vmem:[%s13173_s12 + $0x68] sm:$0xff] }
 0xc51   : > { %v9406_v57 = vpop.eup %9405 }
 0xc52   : > { %v7396_v24 = vmul.f32 %v9406_v57, %v12936_v38  ;;  %v9089_v57 = vpack.c.bf16 %v7799_v2, %v7798_v58 }
 0xc54   : > { %v7410_v15 = vmul.f32 %v8245_v25, %v7396_v24  ;;  %v7800_v24 = vld [vmem:[%s13173_s12 + $0x70] sm:$0xff] }
 0xc55   : > { %v9408_v9 = vpop.eup %9407 }
 0xc56   : > { %v7424_v28 = vadd.f32 %v8246_v13, %v7410_v15  ;;  %v7397_v17 = vmul.f32 %v9408_v9, %v12941_v7  ;;  %v7801_v15 = vld [vmem:[%s13173_s12 + $0x78] sm:$0xff] }
 0xc57   : > { %v9093_v9 = vpack.c.bf16 %v7801_v15, %v7800_v24 }
 0xc58   : > { %8844 = vmatprep.mubr.msk.f32.mxu0 %vm478_vm0, %v7424_v28  ;;  %v7411_v37 = vmul.f32 %v8245_v25, %v7397_v17  ;;  %v13056_v28 = vld [vmem:[%s13172_s11] ss:$0 sm:$0xff] }
 0xc5a   : > { %v7425_v62 = vadd.f32 %v8246_v13, %v7411_v37 }
 0xc5c   : > { %8845 = vmatmul.mubr.msk.f32.gmra.mrb[62].mxu0 %vm478_vm0, %v7425_v62 }
 0xc5d   : > { %v7363_v21 = vpop.xlane.xlu0 %7362 }
 0xc5e   : > { %v7375_v10 = vmul.f32 0.03125, %v7363_v21  ;;  %v7360_v41 = vpop.xlane.xlu1 %7359 }
 0xc5f   : > { %v7374_v8 = vmul.f32 0.03125, %v7360_v41 }
 0xc60   : > { %v7383_v26 = vadd.f32 1e-05, %v7375_v10 }
 0xc61   : > { %v7382_v18 = vadd.f32 1e-05, %v7374_v8 }
 0xc62   : > { %9409 = vrsqrt.f32 %v7383_v26 }
 0xc63   : > { %9411 = vrsqrt.f32 %v7382_v18 }
 0xc6a   : > { %v7369_v38 = vpop.xlane.xlu0 %7368 }
 0xc6b   : > { %v7377_v39 = vmul.f32 0.03125, %v7369_v38  ;;  %v7366_v40 = vpop.xlane.xlu1 %7365 }
 0xc6c   : > { %v9410_v12 = vpop.eup %9409  ;;  %v7376_v42 = vmul.f32 0.03125, %v7366_v40 }
 0xc6d   : > { %v9412_v7 = vpop.eup %9411  ;;  %v7385_v45 = vadd.f32 1e-05, %v7377_v39  ;;  %v7399_v11 = vmul.f32 %v9410_v12, %v12960_v46 }
 0xc6e   : > { %v7384_v6 = vadd.f32 1e-05, %v7376_v42  ;;  %v7398_v22 = vmul.f32 %v9412_v7, %v12963_v61 }
 0xc6f   : > { %9413 = vrsqrt.f32 %v7385_v45  ;;  %v7413_v60 = vmul.f32 %v8245_v25, %v7399_v11 }
 0xc70   : > { %9415 = vrsqrt.f32 %v7384_v6  ;;  %v7412_v55 = vmul.f32 %v8245_v25, %v7398_v22 }
 0xc71   : > { %v7427_v53 = vadd.f32 %v8246_v13, %v7413_v60 }
 0xc72   : > { %v7426_v3 = vadd.f32 %v8246_v13, %v7412_v55 }
 0xc74   : > { %8847 = vmatprep.mubr.msk.f32.mxu0 %vm478_vm0, %v7426_v3 }
 0xc75   : > { %8848 = vmatmul.mubr.msk.f32.gmra.mrb[64].mxu0 %vm478_vm0, %v7427_v53 }
 0xc79   : > { %v9414_v51 = vpop.eup %9413 }
 0xc7a   : > { %v9416_v0 = vpop.eup %9415  ;;  %v7401_v50 = vmul.f32 %v9414_v51, %v12972_v44  ;;  %v7788_v44 = vld [vmem:[%s13173_s12 + $0x10] sm:$0xff] }
 0xc7b   : > { %v7400_v59 = vmul.f32 %v9416_v0, %v12975_v20  ;;  %v9065_v20 = vpack.c.bf16 %v7787_v27, %v7786_v49 }
 0xc7c   : > { %v7415_v46 = vmul.f32 %v8245_v25, %v7401_v50 }
 0xc7d   : > { %v7414_v54 = vmul.f32 %v8245_v25, %v7400_v59  ;;  %v9069_v25 = vpack.c.bf16 %v7789_v29, %v7788_v44  ;;  %9066 = vmatprep.subr.bf16.mxu1 %v9065_v20 }
 0xc7e   : > { %v7429_v61 = vadd.f32 %v8246_v13, %v7415_v46  ;;  %9068 = vmatpush3.bf16.msra.mxu1 %v9065_v20 }
 0xc7f   : > { %v7428_v30 = vadd.f32 %v8246_v13, %v7414_v54  ;;  %9070 = vmatprep.subr.bf16.mxu1 %v9069_v25  ;;  %v7792_v13 = vld [vmem:[%s13173_s12 + $0x30] sm:$0xff] }
 0xc80   : > { %v9077_v33 = vpack.c.bf16 %v7793_v5, %v7792_v13 }
 0xc81   : > { %8850 = vmatprep.mubr.msk.f32.mxu0 %vm478_vm0, %v7428_v30 }
 0xc82   : > { %8851 = vmatmul.mubr.msk.f32.gmra.mrb[66].mxu0 %vm478_vm0, %v7429_v61  ;;  %9072 = vmatpush3.bf16.msra.mxu1 %v9069_v25 }
 0xc83   : > { %9074 = vmatprep.subr.bf16.mxu1 %v9073_v48 }
 0xc86   : > { %9076 = vmatpush3.bf16.msra.mxu1 %v9073_v48 }
 0xc87   : > { %9078 = vmatprep.subr.bf16.mxu1 %v9077_v33 }
 0xc8a   : > { %9080 = vmatpush3.bf16.msra.mxu1 %v9077_v33 }
 0xc8b   : > { %9082 = vmatprep.subr.bf16.mxu1 %v9081_v16 }
 0xc8e   : > { %9084 = vmatpush3.bf16.msra.mxu1 %v9081_v16 }
 0xc8f   : > { %9086 = vmatprep.subr.bf16.mxu1 %v9085_v35 }
 0xc92   : > { %9088 = vmatpush3.bf16.msra.mxu1 %v9085_v35 }
 0xc93   : > { %9090 = vmatprep.subr.bf16.mxu1 %v9089_v57 }
 0xc96   : > { %9092 = vmatpush3.bf16.msra.mxu1 %v9089_v57 }
 0xc97   : > { %9094 = vmatprep.subr.bf16.mxu1 %v9093_v9 }
 0xc9a   : > { %9096 = vmatpush3.bf16.msra.mxu1 %v9093_v9 }
 0xd10   : > { %v8843_v17 = vpop.f32.mrb[60].mxu0 }
 0xd11   : > { %v13059_v37 = vadd.f32 %v8843_v17, %v13056_v28  ;;  %v7531_v62 = vpop.f32.mrb[61].mxu0  ;;  %v9484_v17 = vmov -1.0  }
 0xd12   : > { %v13062_v21 = vadd.f32 %v13056_v28, %v7531_v62 }
 0xd13   : > { %v7579_v10 = vmul.f32 0.70710677, %v13059_v37 }
 0xd14   : > { %v13066_v41 = vmul.f32 0.70710677, %v13062_v21 }
 0xd15   : > { %v7603_v8 = vand.u32 2147483647, %v7579_v10  ;;  %vm7587_vm12 = vcmp.ge.f32.partialorder %v7579_v10, 0.0  ;;  %v7570_v10 = vmul.f32 0.5, %v13062_v21 }
 0xd16   : > { %v7602_v26 = vand.u32 2147483647, %v13066_v41  ;;  %vm7586_vm13 = vcmp.ge.f32.partialorder %v13066_v41, 0.0  ;;  %v7595_v62 = vsel %vm7587_vm12, 1.0, %v9484_v17 }
 0xd17   : > { %v7611_v18 = vmul.f32 0.3275911, %v7603_v8  ;;  %v7715_v12 = vsub.f32 0.0, %v7603_v8 }
 0xd18   : > { %v7610_v38 = vmul.f32 0.3275911, %v7602_v26  ;;  %v7714_v42 = vsub.f32 0.0, %v7602_v26 }
 0xd19   : > { %v7619_v39 = vadd.f32 1.0, %v7611_v18  ;;  %v7723_v45 = vmul.f32 %v7715_v12, %v7603_v8  ;;  %v7594_v18 = vsel %vm7586_vm13, 1.0, %v9484_v17  ;;  %v7571_v12 = vmul.f32 0.5, %v13059_v37 }
 0xd1a   : > { %v7618_v40 = vadd.f32 1.0, %v7610_v38  ;;  %v7722_v22 = vmul.f32 %v7714_v42, %v7602_v26 }
 0xd1b   : > { %9417 = vrcp.f32 %v7619_v39  ;;  %v7732_v3 = vmul.f32 1.442695, %v7723_v45 }
 0xd1c   : > { %9419 = vrcp.f32 %v7618_v40  ;;  %v7730_v0 = vmul.f32 1.442695, %v7722_v22 }
 0xd1d   : > { %9421 = vpow2.f32 %v7732_v3 }
 0xd1e   : > { %9423 = vpow2.f32 %v7730_v0 }
 0xd25   : > { %v9418_v7 = vpop.eup %9417 }
 0xd26   : > { %v9420_v11 = vpop.eup %9419  ;;  %v7643_v6 = vmul.f32 1.0614054, %v9418_v7 }
 0xd27   : > { %v7642_v60 = vmul.f32 1.0614054, %v9420_v11  ;;  %v9422_v23 = vpop.eup %9421 }
 0xd28   : > { %v7651_v55 = vadd.f32 -1.4531521, %v7643_v6  ;;  %v9424_v58 = vpop.eup %9423 }
 0xd29   : > { %v7650_v53 = vadd.f32 -1.4531521, %v7642_v60 }
 0xd2a   : > { %v7659_v51 = vmul.f32 %v9418_v7, %v7651_v55 }
 0xd2b   : > { %v7658_v50 = vmul.f32 %v9420_v11, %v7650_v53 }
 0xd2c   : > { %v7667_v59 = vadd.f32 1.4214138, %v7659_v51 }
 0xd2d   : > { %v7666_v46 = vadd.f32 1.4214138, %v7658_v50 }
 0xd2e   : > { %v7675_v54 = vmul.f32 %v9418_v7, %v7667_v59 }
 0xd2f   : > { %v8846_v30 = vpop.f32.mrb[62].mxu0  ;;  %v7674_v61 = vmul.f32 %v9420_v11, %v7666_v46 }
 0xd30   : > { %v7683_v49 = vadd.f32 -0.28449672, %v7675_v54  ;;  %v13070_v27 = vadd.f32 %v8846_v30, %v13056_v28  ;;  %v7541_v44 = vpop.f32.mrb[63].mxu0 }
 0xd31   : > { %v13073_v20 = vadd.f32 %v13056_v28, %v7541_v44  ;;  %v7682_v29 = vadd.f32 -0.28449672, %v7674_v61 }
 0xd32   : > { %v7691_v25 = vmul.f32 %v9418_v7, %v7683_v49  ;;  %v13076_v56 = vmul.f32 0.70710677, %v13070_v27 }
 0xd33   : > { %v13079_v43 = vmul.f32 0.70710677, %v13073_v20  ;;  %v7690_v48 = vmul.f32 %v9420_v11, %v7682_v29 }
 0xd34   : > { %v7699_v13 = vadd.f32 0.2548296, %v7691_v25  ;;  %v7605_v5 = vand.u32 2147483647, %v13076_v56  ;;  %vm7589_vm14 = vcmp.ge.f32.partialorder %v13076_v56, 0.0 }
 0xd35   : > { %v7604_v33 = vand.u32 2147483647, %v13079_v43  ;;  %v7698_v14 = vadd.f32 0.2548296, %v7690_v48  ;;  %vm7588_vm15 = vcmp.ge.f32.partialorder %v13079_v43, 0.0 }
 0xd36   : > { %v7707_v34 = vmul.f32 %v9418_v7, %v7699_v13  ;;  %v7613_v16 = vmul.f32 0.3275911, %v7605_v5  ;;  %v7717_v41 = vsub.f32 0.0, %v7605_v5 }
 0xd37   : > { %v7612_v31 = vmul.f32 0.3275911, %v7604_v33  ;;  %v7706_v35 = vmul.f32 %v9420_v11, %v7698_v14  ;;  %v7716_v42 = vsub.f32 0.0, %v7604_v33 }
 0xd38   : > { %v7747_v2 = vmul.f32 %v9422_v23, %v7707_v34  ;;  %v7621_v57 = vadd.f32 1.0, %v7613_v16  ;;  %v7725_v6 = vmul.f32 %v7717_v41, %v7605_v5 }
 0xd39   : > { %v7620_v24 = vadd.f32 1.0, %v7612_v31  ;;  %v7746_v15 = vmul.f32 %v9424_v58, %v7706_v35  ;;  %v7724_v60 = vmul.f32 %v7716_v42, %v7604_v33 }
 0xd3a   : > { %v7755_v9 = vsub.f32 1.0, %v7747_v2  ;;  %9425 = vrcp.f32 %v7621_v57  ;;  %v7736_v51 = vmul.f32 1.442695, %v7725_v6 }
 0xd3b   : > { %9427 = vrcp.f32 %v7620_v24  ;;  %v7754_v8 = vsub.f32 1.0, %v7746_v15  ;;  %v7734_v21 = vmul.f32 1.442695, %v7724_v60 }
 0xd3c   : > { %v7763_v26 = vmul.f32 %v7755_v9, %v7595_v62  ;;  %9429 = vpow2.f32 %v7736_v51 }
 0xd3d   : > { %v7762_v38 = vmul.f32 %v7754_v8, %v7594_v18  ;;  %9431 = vpow2.f32 %v7734_v21 }
 0xd3e   : > { %v7771_v39 = vadd.f32 1.0, %v7763_v26 }
 0xd3f   : > { %v7770_v40 = vadd.f32 1.0, %v7762_v38 }
 0xd40   : > { %v7779_v45 = vmul.f32 %v7771_v39, %v7571_v12 }
 0xd41   : > { %v7778_v7 = vmul.f32 %v7770_v40, %v7570_v10 }
 0xd43   : > { %8885 = vmatprep.mubr.f32.mxu1 %v7778_v7  ;;  %v7597_v7 = vsel %vm7589_vm14, 1.0, %v9484_v17 }
 0xd44   : > { %v9426_v11 = vpop.eup %9425  ;;  %8886 = vmatmul.mubr.f32.vlgmr.msra.gmra.mrb[52].mxu1 %v7779_v45 }
 0xd45   : > { %v9428_v22 = vpop.eup %9427  ;;  %v7645_v55 = vmul.f32 1.0614054, %v9426_v11 }
 0xd46   : > { %v7644_v3 = vmul.f32 1.0614054, %v9428_v22  ;;  %v9430_v9 = vpop.eup %9429 }
 0xd47   : > { %v7653_v53 = vadd.f32 -1.4531521, %v7645_v55  ;;  %v9432_v18 = vpop.eup %9431 }
 0xd48   : > { %v8849_v0 = vpop.f32.mrb[64].mxu0  ;;  %v7652_v50 = vadd.f32 -1.4531521, %v7644_v3  ;;  %v7572_v3 = vmul.f32 0.5, %v13073_v20 }
 0xd49   : > { %v13089_v59 = vadd.f32 %v8849_v0, %v13056_v28  ;;  %v7551_v37 = vpop.f32.mrb[65].mxu0  ;;  %v7661_v46 = vmul.f32 %v9426_v11, %v7653_v53 }
 0xd4a   : > { %v13092_v54 = vadd.f32 %v13056_v28, %v7551_v37  ;;  %v7660_v30 = vmul.f32 %v9428_v22, %v7652_v50 }
 0xd4b   : > { %v13095_v61 = vmul.f32 0.70710677, %v13089_v59  ;;  %v7669_v49 = vadd.f32 1.4214138, %v7661_v46 }
 0xd4c   : > { %v13098_v44 = vmul.f32 0.70710677, %v13092_v54  ;;  %v7668_v29 = vadd.f32 1.4214138, %v7660_v30 }
 0xd4d   : > { %v7607_v25 = vand.u32 2147483647, %v13095_v61  ;;  %v7677_v48 = vmul.f32 %v9426_v11, %v7669_v49  ;;  %v7573_v49 = vmul.f32 0.5, %v13070_v27  ;;  %vm7591_vm1 = vcmp.ge.f32.partialorder %v13095_v61, 0.0 }
 0xd4e   : > { %v7606_v13 = vand.u32 2147483647, %v13098_v44  ;;  %v7676_v5 = vmul.f32 %v9428_v22, %v7668_v29  ;;  %vm7590_vm2 = vcmp.ge.f32.partialorder %v13098_v44, 0.0  ;;  %v7574_v44 = vmul.f32 0.5, %v13092_v54 }
 0xd4f   : > { %v7615_v33 = vmul.f32 0.3275911, %v7607_v25  ;;  %v7685_v14 = vadd.f32 -0.28449672, %v7677_v48  ;;  %v7719_v12 = vsub.f32 0.0, %v7607_v25 }
 0xd50   : > { %v7614_v34 = vmul.f32 0.3275911, %v7606_v13  ;;  %v7684_v16 = vadd.f32 -0.28449672, %v7676_v5  ;;  %v7718_v45 = vsub.f32 0.0, %v7606_v13 }
 0xd51   : > { %v7623_v23 = vadd.f32 1.0, %v7615_v33  ;;  %v7693_v31 = vmul.f32 %v9426_v11, %v7685_v14  ;;  %v7727_v53 = vmul.f32 %v7719_v12, %v7607_v25 }
 0xd52   : > { %v7622_v35 = vadd.f32 1.0, %v7614_v34  ;;  %v7692_v58 = vmul.f32 %v9428_v22, %v7684_v16  ;;  %v7726_v21 = vmul.f32 %v7718_v45, %v7606_v13 }
 0xd53   : > { %9433 = vrcp.f32 %v7623_v23  ;;  %v7701_v2 = vadd.f32 0.2548296, %v7693_v31  ;;  %v7740_v14 = vmul.f32 1.442695, %v7727_v53 }
 0xd54   : > { %9435 = vrcp.f32 %v7622_v35  ;;  %v7700_v57 = vadd.f32 0.2548296, %v7692_v58  ;;  %v7738_v20 = vmul.f32 1.442695, %v7726_v21 }
 0xd55   : > { %v8852_v24 = vpop.f32.mrb[66].mxu0  ;;  %v7709_v15 = vmul.f32 %v9426_v11, %v7701_v2 }
 0xd56   : > { %v13103_v62 = vadd.f32 %v8852_v24, %v13056_v28  ;;  %v7561_v8 = vpop.f32.mrb[67].mxu0  ;;  %v7708_v26 = vmul.f32 %v9428_v22, %v7700_v57 }
 0xd57   : > { %v13107_v38 = vadd.f32 %v13056_v28, %v7561_v8  ;;  %v7749_v39 = vmul.f32 %v9430_v9, %v7709_v15  ;;  %v7596_v28 = vsel %vm7588_vm15, 1.0, %v9484_v17 }
 0xd58   : > { %v13111_v10 = vmul.f32 0.70710677, %v13103_v62  ;;  %v7748_v40 = vmul.f32 %v9432_v18, %v7708_v26 }
 0xd59   : > { %v13114_v41 = vmul.f32 0.70710677, %v13107_v38  ;;  %v7757_v42 = vsub.f32 1.0, %v7749_v39 }
 0xd5a   : > { %v7609_v56 = vand.u32 2147483647, %v13111_v10  ;;  %v7756_v11 = vsub.f32 1.0, %v7748_v40  ;;  %vm7593_vm3 = vcmp.ge.f32.partialorder %v13111_v10, 0.0 }
 0xd5b   : > { %v7608_v6 = vand.u32 2147483647, %v13114_v41  ;;  %v7765_v43 = vmul.f32 %v7757_v42, %v7597_v7  ;;  %vm7592_vm4 = vcmp.ge.f32.partialorder %v13114_v41, 0.0 }
 0xd5c   : > { %v7617_v22 = vmul.f32 0.3275911, %v7609_v56  ;;  %v7764_v60 = vmul.f32 %v7756_v11, %v7596_v28  ;;  %v7721_v35 = vsub.f32 0.0, %v7609_v56 }
 0xd5d   : > { %v9434_v55 = vpop.eup %9433  ;;  %v7616_v51 = vmul.f32 0.3275911, %v7608_v6  ;;  %v7773_v0 = vadd.f32 1.0, %v7765_v43  ;;  %v7720_v58 = vsub.f32 0.0, %v7608_v6 }
 0xd5e   : > { %v9436_v50 = vpop.eup %9435  ;;  %v7625_v37 = vadd.f32 1.0, %v7617_v22  ;;  %v7772_v46 = vadd.f32 1.0, %v7764_v60  ;;  %v7647_v30 = vmul.f32 1.0614054, %v9434_v55  ;;  %v7729_v9 = vmul.f32 %v7721_v35, %v7609_v56 }
 0xd5f   : > { %v7624_v29 = vadd.f32 1.0, %v7616_v51  ;;  %v7646_v48 = vmul.f32 1.0614054, %v9436_v50  ;;  %v7781_v34 = vmul.f32 %v7773_v0, %v7573_v49  ;;  %v7728_v18 = vmul.f32 %v7720_v58, %v7608_v6 }
 0xd60   : > { %9437 = vrcp.f32 %v7625_v37  ;;  %v7780_v5 = vmul.f32 %v7772_v46, %v7572_v3  ;;  %v7655_v33 = vadd.f32 -1.4531521, %v7647_v30  ;;  %v7744_v11 = vmul.f32 1.442695, %v7729_v9 }
 0xd61   : > { %9439 = vrcp.f32 %v7624_v29  ;;  %v7654_v16 = vadd.f32 -1.4531521, %v7646_v48  ;;  %v7742_v60 = vmul.f32 1.442695, %v7728_v18  ;;  %v7599_v30 = vsel %vm7591_vm1, 1.0, %v9484_v17 }
 0xd62   : > { %8888 = vmatprep.mubr.f32.mxu1 %v7780_v5  ;;  %v7663_v25 = vmul.f32 %v9434_v55, %v7655_v33  ;;  %9441 = vpow2.f32 %v7740_v14  ;;  %v7600_v18 = vsel %vm7592_vm4, 1.0, %v9484_v17 }
 0xd63   : > { %8889 = vmatmul.mubr.f32.gmra.mrb[54].mxu1 %v7781_v34  ;;  %v7662_v23 = vmul.f32 %v9436_v50, %v7654_v16  ;;  %9443 = vpow2.f32 %v7738_v20  ;;  %v7575_v20 = vmul.f32 0.5, %v13089_v59  ;;  %v7601_v59 = vsel %vm7593_vm3, 1.0, %v9484_v17 }
 0xd64   : > { %v7671_v13 = vadd.f32 1.4214138, %v7663_v25  ;;  %9445 = vpow2.f32 %v7744_v11 }
 0xd65   : > { %v7670_v31 = vadd.f32 1.4214138, %v7662_v23  ;;  %9447 = vpow2.f32 %v7742_v60 }
 0xd66   : > { %v7679_v27 = vmul.f32 %v9434_v55, %v7671_v13 }
 0xd67   : > { %v7678_v2 = vmul.f32 %v9436_v50, %v7670_v31 }
 0xd68   : > { %v7687_v57 = vadd.f32 -0.28449672, %v7679_v27 }
 0xd69   : > { %v7686_v24 = vadd.f32 -0.28449672, %v7678_v2 }
 0xd6a   : > { %v9438_v15 = vpop.eup %9437  ;;  %v7695_v8 = vmul.f32 %v9434_v55, %v7687_v57 }
 0xd6b   : > { %v9440_v26 = vpop.eup %9439  ;;  %v7694_v39 = vmul.f32 %v9436_v50, %v7686_v24  ;;  %v7649_v40 = vmul.f32 1.0614054, %v9438_v15 }
 0xd6c   : > { %v7703_v12 = vadd.f32 0.2548296, %v7695_v8  ;;  %v7648_v42 = vmul.f32 1.0614054, %v9440_v26  ;;  %v9442_v22 = vpop.eup %9441 }
 0xd6d   : > { %v7702_v7 = vadd.f32 0.2548296, %v7694_v39  ;;  %v7657_v45 = vadd.f32 -1.4531521, %v7649_v40  ;;  %v9444_v51 = vpop.eup %9443 }
 0xd6e   : > { %v7711_v28 = vmul.f32 %v9434_v55, %v7703_v12  ;;  %v7656_v43 = vadd.f32 -1.4531521, %v7648_v42  ;;  %v9446_v58 = vpop.eup %9445  ;;  %v7576_v12 = vmul.f32 0.5, %v13107_v38  ;;  %v7577_v42 = vmul.f32 0.5, %v13103_v62 }
 0xd6f   : > { %v7710_v3 = vmul.f32 %v9436_v50, %v7702_v7  ;;  %v7665_v53 = vmul.f32 %v9438_v15, %v7657_v45  ;;  %v7598_v50 = vsel %vm7590_vm2, 1.0, %v9484_v17  ;;  %v9448_v57 = vpop.eup %9447  ;;  %v8256_v45 = vld [vmem:[%s13174_s13] ss:$0 sm:$0xff] }
 0xd70   : > { %v7751_v56 = vmul.f32 %v9442_v22, %v7711_v28  ;;  %v7664_v0 = vmul.f32 %v9440_v26, %v7656_v43 }
 0xd71   : > { %v7750_v6 = vmul.f32 %v9444_v51, %v7710_v3  ;;  %v7673_v21 = vadd.f32 1.4214138, %v7665_v53 }
 0xd72   : > { %v7759_v37 = vsub.f32 1.0, %v7751_v56  ;;  %v7672_v46 = vadd.f32 1.4214138, %v7664_v0 }
 0xd73   : > { %v7758_v55 = vsub.f32 1.0, %v7750_v6  ;;  %v7681_v49 = vmul.f32 %v9438_v15, %v7673_v21 }
 0xd74   : > { %v7767_v29 = vmul.f32 %v7759_v37, %v7599_v30  ;;  %v7680_v48 = vmul.f32 %v9440_v26, %v7672_v46 }
 0xd75   : > { %v7766_v5 = vmul.f32 %v7758_v55, %v7598_v50  ;;  %v7689_v61 = vadd.f32 -0.28449672, %v7681_v49 }
 0xd76   : > { %v7775_v33 = vadd.f32 1.0, %v7767_v29  ;;  %v7688_v14 = vadd.f32 -0.28449672, %v7680_v48 }
 0xd77   : > { %v7774_v34 = vadd.f32 1.0, %v7766_v5  ;;  %v7697_v16 = vmul.f32 %v9438_v15, %v7689_v61 }
 0xd78   : > { %v7696_v25 = vmul.f32 %v9440_v26, %v7688_v14  ;;  %v7783_v31 = vmul.f32 %v7775_v33, %v7575_v20 }
 0xd79   : > { %v7782_v23 = vmul.f32 %v7774_v34, %v7574_v44  ;;  %v7705_v13 = vadd.f32 0.2548296, %v7697_v16 }
 0xd7a   : > { %v7704_v35 = vadd.f32 0.2548296, %v7696_v25 }
 0xd7b   : > { %8891 = vmatprep.mubr.f32.mxu1 %v7782_v23  ;;  %v7713_v27 = vmul.f32 %v9438_v15, %v7705_v13 }
 0xd7c   : > { %8892 = vmatmul.mubr.f32.gmra.mrb[56].mxu1 %v7783_v31  ;;  %v7712_v2 = vmul.f32 %v9440_v26, %v7704_v35 }
 0xd7d   : > { %v7753_v24 = vmul.f32 %v9446_v58, %v7713_v27 }
 0xd7e   : > { %v7752_v54 = vmul.f32 %v9448_v57, %v7712_v2 }
 0xd7f   : > { %v7761_v9 = vsub.f32 1.0, %v7753_v24 }
 0xd80   : > { %v7760_v8 = vsub.f32 1.0, %v7752_v54 }
 0xd81   : > { %v7769_v39 = vmul.f32 %v7761_v9, %v7601_v59 }
 0xd82   : > { %v7768_v40 = vmul.f32 %v7760_v8, %v7600_v18 }
 0xd83   : > { %v7777_v15 = vadd.f32 1.0, %v7769_v39 }
 0xd84   : > { %v7776_v26 = vadd.f32 1.0, %v7768_v40 }
 0xd85   : > { %v7785_v7 = vmul.f32 %v7777_v15, %v7577_v42 }
 0xd86   : > { %v7784_v10 = vmul.f32 %v7776_v26, %v7576_v12 }
 0xd88   : > { %8894 = vmatprep.mubr.f32.mxu1 %v7784_v10 }
 0xd89   : > { %8895 = vmatmul.mubr.f32.gmra.mrb[58].mxu1 %v7785_v7 }
 0xe17   : > { %v8887_v41 = vpop.f32.mrb[52].mxu1 }
 0xe18   : > { %v7908_v11 = vadd.f32 %v8887_v41, %v12885_v36  ;;  %v7868_v17 = vpop.f32.mrb[53].mxu1 }
 0xe19   : > { %v7907_v38 = vadd.f32 %v7868_v17, %v12887_v63 }
 0xe1a   : > { %v7923_v62 = vadd.f32 %v8256_v45, %v7908_v11 }
 0xe1b   : > { %v7922_v28 = vadd.f32 %v8256_v45, %v7907_v38 }
 0xe1c   : > { %7931 = vst.msk [vmem:[%s467_s16 + $0x8] sm:$0xff] %vm478_vm0, %v7923_v62 }
 0xe1d   : > { %7930 = vst.msk [vmem:[%s467_s16] sm:$0xff] %vm478_vm0, %v7922_v28 }
 0xe36   : > { %v8890_v43 = vpop.f32.mrb[54].mxu1 }
 0xe37   : > { %v7910_v22 = vadd.f32 %v8890_v43, %v12897_v19  ;;  %v7878_v60 = vpop.f32.mrb[55].mxu1 }
 0xe38   : > { %v7909_v36 = vadd.f32 %v7878_v60, %v12895_v47 }
 0xe39   : > { %v7925_v3 = vadd.f32 %v8256_v45, %v7910_v22 }
 0xe3a   : > { %v7924_v53 = vadd.f32 %v8256_v45, %v7909_v36 }
 0xe3b   : > { %7933 = vst.msk [vmem:[%s467_s16 + $0x18] sm:$0xff] %vm478_vm0, %v7925_v3 }
 0xe3c   : > { %7932 = vst.msk [vmem:[%s467_s16 + $0x10] sm:$0xff] %vm478_vm0, %v7924_v53 }
 0xe4f   : > { %v8893_v51 = vpop.f32.mrb[56].mxu1 }
 0xe50   : > { %v7912_v63 = vadd.f32 %v8893_v51, %v12905_v32  ;;  %v7888_v56 = vpop.f32.mrb[57].mxu1 }
 0xe51   : > { %v7911_v0 = vadd.f32 %v7888_v56, %v12907_v52 }
 0xe52   : > { %v7927_v6 = vadd.f32 %v8256_v45, %v7912_v63 }
 0xe53   : > { %v7926_v21 = vadd.f32 %v8256_v45, %v7911_v0 }
 0xe54   : > { %7935 = vst.msk [vmem:[%s467_s16 + $0x28] sm:$0xff] %vm478_vm0, %v7927_v6 }
 0xe55   : > { %7934 = vst.msk [vmem:[%s467_s16 + $0x20] sm:$0xff] %vm478_vm0, %v7926_v21 }
 0xe5c   : > { %v8896_v19 = vpop.f32.mrb[58].mxu1 }
 0xe5d   : > { %v7914_v47 = vadd.f32 %v8896_v19, %v12915_v1  ;;  %v7898_v37 = vpop.f32.mrb[59].mxu1 }
 0xe5e   : > { %v7913_v46 = vadd.f32 %v7898_v37, %v12917_v4 }
 0xe5f   : > { %v7929_v30 = vadd.f32 %v8256_v45, %v7914_v47 }
 0xe60   : > { %v7928_v55 = vadd.f32 %v8256_v45, %v7913_v46 }
 0xe61   : > { %7937 = vst.msk [vmem:[%s467_s16 + $0x38] sm:$0xff] %vm478_vm0, %v7929_v30 }
 0xe62   : > { %7936 = vst.msk [vmem:[%s467_s16 + $0x30] sm:$0xff] %vm478_vm0, %v7928_v55 }
 0xe63 PF: > { %s24_s29 = sadd.s32 1, %s9463_s29  }
 0xe64   : > { %p21_p4 = scmp.ge.s32.totalorder %s24_s29, 4  }
 0xe66   :  { %23 = sbr.rel (!%p21_p4) target bundleno = 1 (0x1), region = 106 }

</bundles_post_ra>
